<compile_context>
chip_gen: v7x
topology: tpu7x:2x2x1
jax: 0.10.0
libtpu: 0.0.40
codegen_flags: <defaults>
</compile_context>

<pallas_src>
import numpy as np
import jax
import jax.numpy as jnp
from jax.experimental import pallas as pl
from jax.experimental.pallas import tpu as pltpu


# ----------------------------- configuration -----------------------------
# Original channels: 64,128,256,256,512,512,512,1024 ; hidden=1000 ; input
# 6x384x1280 -> 20*6*1024 features.  Scaled /8 here:
C1, C2, C3, C4, C6 = 8, 16, 32, 64, 128
HIDDEN = 128
H_IN, W_IN = 128, 192                      # /64 after six stride-2 convs -> 2 x 3
FEAT = (H_IN // 64) * (W_IN // 64) * C6    # flatten size fed to lstm1

CONV_CFG = [
    # (name, cin, cout, k, stride, pad)
    ("conv1",   6,  C1, 7, 2, 3),
    ("conv2",   C1, C2, 5, 2, 2),
    ("conv3",   C2, C3, 5, 2, 2),
    ("conv3_1", C3, C3, 3, 1, 1),
    ("conv4",   C3, C4, 3, 2, 1),
    ("conv4_1", C4, C4, 3, 1, 1),
    ("conv5",   C4, C4, 3, 2, 1),
    # conv5_1 is defined in __init__ but never used in forward(); omitted.
    ("conv6",   C4, C6, 3, 2, 1),
]

VMEM_LIMIT = 64 * 1024 * 1024   # explicit scoped-VMEM budget (<= v7x physical)


# ------------------------------- kernels ---------------------------------
def _conv_kernel(p_ref, w_ref, b_ref, o_ref):
    """One deep MXU dot per (batch, M-tile) grid point.

    p_ref: (1, K, TM)  bf16 im2col slab   (K = KH*KW*Cin, taps folded into K)
    w_ref: (Cout, K)   bf16 flattened weights
    b_ref: (Cout, 1)   f32 bias
    o_ref: (1, Cout, TM) f32 output (lane-dense: last dim is the big M tile)
    """
    o_ref[0] = (jnp.dot(w_ref[...], p_ref[0],
                        preferred_element_type=jnp.float32)
                + b_ref[...])


def _sigmoid(x):
    # exp lowers to the EUP; approximate reciprocal also runs on the EUP,
    # keeping the VALU slots free (matters most on v5e).
    return pl.reciprocal(1.0 + jnp.exp(-x), approx=True)


def _rnn_head_kernel(x_ref, h1_ref, c1_ref, h2_ref, c2_ref,
                     w1ih_ref, w1hh_ref, b1_ref,
                     w2ih_ref, w2hh_ref, b2_ref,
                     wfc_ref, bfc_ref,
                     out_ref, h1o_ref, c1o_ref, h2o_ref, c2o_ref):
    """Fused lstm1 -> lstm2 -> fc (torch.nn.LSTMCell gate order [i, f, g, o])."""
    H = h1_ref.shape[-1]

    def lstm_cell(x_bf, h, c, wih_ref, whh_ref, b_ref):
        gates = (jnp.dot(x_bf, wih_ref[...],
                         preferred_element_type=jnp.float32)
                 + jnp.dot(h.astype(jnp.bfloat16), whh_ref[...],
                           preferred_element_type=jnp.float32)
                 + b_ref[...])
        i = _sigmoid(gates[:, 0 * H:1 * H])
        f = _sigmoid(gates[:, 1 * H:2 * H])
        g = jnp.tanh(gates[:, 2 * H:3 * H])
        o = _sigmoid(gates[:, 3 * H:4 * H])
        c_new = f * c + i * g
        h_new = o * jnp.tanh(c_new)
        return h_new, c_new

    h1, c1 = lstm_cell(x_ref[...], h1_ref[...], c1_ref[...],
                       w1ih_ref, w1hh_ref, b1_ref)
    h2, c2 = lstm_cell(h1.astype(jnp.bfloat16), h2_ref[...], c2_ref[...],
                       w2ih_ref, w2hh_ref, b2_ref)
    out_ref[...] = (jnp.dot(h2.astype(jnp.bfloat16), wfc_ref[...],
                            preferred_element_type=jnp.float32)
                    + bfc_ref[...])
    h1o_ref[...] = h1
    c1o_ref[...] = c1
    h2o_ref[...] = h2
    c2o_ref[...] = c2


# ------------------------------- wrappers --------------------------------
def _vmem_spec():
    return pl.BlockSpec(memory_space=pltpu.MemorySpace.VMEM)


def _pick_tile(m):
    """Largest lane-aligned tile that divides M; fall back to the full extent."""
    for tm in (1024, 512, 256, 128):
        if m % tm == 0:
            return tm
    return m


def conv2d_pallas(x_nchw, w_flat, b, *, k, stride, padding):
    """2D conv, NCHW activations, output in (N, Cout, Ho, Wo).

    w_flat: (Cout, KH*KW*Cin) bf16, with column index (kh*KW + kw)*Cin + cin,
            i.e. w_flat[cout, (kh*KW+kw)*Cin + cin] == torch_weight[cout, cin, kh, kw].
    """
    N, Cin, H, W = x_nchw.shape
    Cout, K = w_flat.shape
    KH = KW = k
    Ho = (H + 2 * padding - KH) // stride + 1
    Wo = (W + 2 * padding - KW) // stride + 1
    M = Ho * Wo

    # im2col with taps folded into the contraction dim, built directly in bf16
    # (halves the slab's HBM footprint and matches the MXU-native input dtype).
    xb = x_nchw.astype(jnp.bfloat16)
    xp = jnp.pad(xb, ((0, 0), (0, 0), (padding, padding), (padding, padding)))
    taps = []
    for kh in range(KH):
        for kw in range(KW):
            sl = xp[:, :, kh:kh + stride * (Ho - 1) + 1:stride,
                          kw:kw + stride * (Wo - 1) + 1:stride]
            taps.append(sl.reshape(N, Cin, M))
    patches = jnp.concatenate(taps, axis=1)          # (N, K, M) bf16

    TM = _pick_tile(M)
    grid = (N, M // TM)

    out = pl.pallas_call(
        _conv_kernel,
        out_shape=jax.ShapeDtypeStruct((N, Cout, M), jnp.float32),
        grid_spec=pltpu.PrefetchScalarGridSpec(
            num_scalar_prefetch=0,
            grid=grid,
            in_specs=[pl.BlockSpec((1, K, TM), lambda n, m: (n, 0, m)),
                      pl.BlockSpec((Cout, K), lambda n, m: (0, 0)),
                      pl.BlockSpec((Cout, 1), lambda n, m: (0, 0))],
            out_specs=pl.BlockSpec((1, Cout, TM), lambda n, m: (n, 0, m)),
        ),
        compiler_params=pltpu.CompilerParams(
            dimension_semantics=("parallel", "parallel"),
            vmem_limit_bytes=VMEM_LIMIT),
    )(patches, w_flat, b)
    return out.reshape(N, Cout, Ho, Wo)


def rnn_head_pallas(x_bf16, hx1, cx1, hx2, cx2, p1, p2, pfc):
    """Fused lstm1 + lstm2 + fc in a single pallas_call."""
    B, H = hx1.shape
    b1 = p1["b_ih"] + p1["b_hh"]
    b2 = p2["b_ih"] + p2["b_hh"]
    out, h1, c1, h2, c2 = pl.pallas_call(
        _rnn_head_kernel,
        out_shape=(jax.ShapeDtypeStruct((B, 6), jnp.float32),
                   jax.ShapeDtypeStruct((B, H), jnp.float32),
                   jax.ShapeDtypeStruct((B, H), jnp.float32),
                   jax.ShapeDtypeStruct((B, H), jnp.float32),
                   jax.ShapeDtypeStruct((B, H), jnp.float32)),
        in_specs=[_vmem_spec() for _ in range(13)],
        out_specs=tuple(_vmem_spec() for _ in range(5)),
        compiler_params=pltpu.CompilerParams(vmem_limit_bytes=VMEM_LIMIT),
    )(x_bf16, hx1, cx1, hx2, cx2,
      p1["w_ih"], p1["w_hh"], b1,
      p2["w_ih"], p2["w_hh"], b2,
      pfc["w"], pfc["b"])
    return out, h1, c1, h2, c2


# ------------------------------ parameters -------------------------------
def _uniform(key, shape, bound):
    return jax.random.uniform(key, shape, jnp.float32, -bound, bound)


def init_params(key):
    params = {}
    for (name, cin, cout, k, _s, _p) in CONV_CFG:
        key, kw_, kb_ = jax.random.split(key, 3)
        bound = 1.0 / np.sqrt(cin * k * k)
        params[name] = {
            # flattened taps-folded layout (Cout, KH*KW*Cin); bf16 for the MXU
            "w": _uniform(kw_, (cout, k * k * cin), bound).astype(jnp.bfloat16),
            "b": _uniform(kb_, (cout, 1), bound),              # f32
        }
    bound = 1.0 / np.sqrt(HIDDEN)
    for name, in_dim in (("lstm1", FEAT), ("lstm2", HIDDEN)):
        key, k1, k2, k3, k4 = jax.random.split(key, 5)
        params[name] = {
            "w_ih": _uniform(k1, (in_dim, 4 * HIDDEN), bound).astype(jnp.bfloat16),
            "w_hh": _uniform(k2, (HIDDEN, 4 * HIDDEN), bound).astype(jnp.bfloat16),
            "b_ih": _uniform(k3, (1, 4 * HIDDEN), bound),      # f32
            "b_hh": _uniform(k4, (1, 4 * HIDDEN), bound),      # f32
        }
    key, k1, k2 = jax.random.split(key, 3)
    params["fc"] = {"w": _uniform(k1, (HIDDEN, 6), bound).astype(jnp.bfloat16),
                    "b": _uniform(k2, (1, 6), bound)}          # f32
    return params


# ------------------------------- forward ---------------------------------
def deepvo_forward(params, x_nchw, hx1, cx1, hx2, cx2):
    x = x_nchw.astype(jnp.float32)

    # Reference forward() has NO activations between convs and skips conv5_1.
    for (name, _cin, _cout, k, stride, pad) in CONV_CFG:
        p = params[name]
        x = conv2d_pallas(x, p["w"], p["b"], k=k, stride=stride, padding=pad)

    # Conv activations are already NCHW, so this matches torch's
    # x.view(N, C*H*W) element ordering exactly.
    feat = x.reshape(x.shape[0], -1)                     # (N, FEAT)

    out, hx1, cx1, hx2, cx2 = rnn_head_pallas(
        feat.astype(jnp.bfloat16), hx1, cx1, hx2, cx2,
        params["lstm1"], params["lstm2"], params["fc"])
    return out, (hx1, cx1, hx2, cx2)


# --------------------------------- main -----------------------------------
if __name__ == "__main__":
    key = jax.random.PRNGKey(0)
    kparams, kx = jax.random.split(key)
    params = init_params(kparams)

    # batch = 1 (reset_hidden_states(size=1) forces batch 1 in the reference)
    x = jax.random.normal(kx, (1, 6, H_IN, W_IN), jnp.float32)  # NCHW input

    hx1 = jnp.zeros((1, HIDDEN), jnp.float32)
    cx1 = jnp.zeros((1, HIDDEN), jnp.float32)
    hx2 = jnp.zeros((1, HIDDEN), jnp.float32)
    cx2 = jnp.zeros((1, HIDDEN), jnp.float32)

    fwd = jax.jit(deepvo_forward)
    out, (hx1, cx1, hx2, cx2) = fwd(params, x, hx1, cx1, hx2, cx2)
    out = jax.block_until_ready(out)

    assert out.shape == (1, 6) and out.dtype == jnp.float32
    assert hx1.shape == (1, HIDDEN) and cx2.shape == (1, HIDDEN)
    assert bool(jnp.all(jnp.isfinite(out)))
    print("KERNEL_OK")
</pallas_src>

<mosaic_0001>
module attributes {stable_mosaic.version = 11 : i64} {
  func.func @_conv_kernel(%arg0: i32, %arg1: i32, %arg2: memref<1x294x1024xbf16, #tpu.memory_space<vmem>>, %arg3: memref<8x294xbf16, #tpu.memory_space<vmem>>, %arg4: memref<8x1xf32, #tpu.memory_space<vmem>>, %arg5: memref<1x8x1024xf32, #tpu.memory_space<vmem>>) attributes {dimension_semantics = [#tpu.dimension_semantics<parallel>, #tpu.dimension_semantics<parallel>], iteration_bounds = array<i64: 1, 6>, scalar_prefetch = 0 : i64, scratch_operands = 0 : i64, tpu.core_type = #tpu.core_type<tc>, window_params = [{transform_indices = @transform_0, window_bounds = array<i64: 1, 294, 1024>}, {pipeline_mode = #tpu.pipeline_mode<synchronous>, transform_indices = @transform_1, window_bounds = array<i64: 8, 294>}, {pipeline_mode = #tpu.pipeline_mode<synchronous>, transform_indices = @transform_2, window_bounds = array<i64: 8, 1>}, {transform_indices = @transform_3, window_bounds = array<i64: 1, 8, 1024>}]} {
    %c0 = arith.constant 0 : index
    %c0_0 = arith.constant 0 : index
    %0 = vector.load %arg3[%c0, %c0_0] : memref<8x294xbf16, #tpu.memory_space<vmem>>, vector<8x294xbf16>
    %c0_1 = arith.constant 0 : index
    %c0_2 = arith.constant 0 : index
    %c0_3 = arith.constant 0 : index
    %1 = vector.load %arg2[%c0_1, %c0_2, %c0_3] : memref<1x294x1024xbf16, #tpu.memory_space<vmem>>, vector<1x294x1024xbf16>
    %2 = vector.shape_cast %1 : vector<1x294x1024xbf16> to vector<294x1024xbf16>
    %cst = arith.constant dense<0.000000e+00> : vector<8x1024xf32>
    %3 = tpu.matmul %0, %2, %cst {dimension_numbers = #tpu.dot_dimension_numbers<[1], [0], [0], [1], [0, 0, 1, 1], [], []>} : vector<8x294xbf16>, vector<294x1024xbf16>, vector<8x1024xf32> -> vector<8x1024xf32>
    %c0_4 = arith.constant 0 : index
    %c0_5 = arith.constant 0 : index
    %4 = vector.load %arg4[%c0_4, %c0_5] : memref<8x1xf32, #tpu.memory_space<vmem>>, vector<8x1xf32>
    %5 = vector.broadcast %4 : vector<8x1xf32> to vector<8x1024xf32>
    %6 = arith.addf %3, %5 : vector<8x1024xf32>
    %c0_6 = arith.constant 0 : index
    %c0_7 = arith.constant 0 : index
    %c0_8 = arith.constant 0 : index
    %7 = vector.load %arg5[%c0_6, %c0_7, %c0_8] : memref<1x8x1024xf32, #tpu.memory_space<vmem>>, vector<1x8x1024xf32>
    %8 = vector.shape_cast %7 : vector<1x8x1024xf32> to vector<8x1024xf32>
    %9 = vector.shape_cast %6 : vector<8x1024xf32> to vector<1x8x1024xf32>
    tpu.vector_store %arg5[%c0_6, %c0_7, %c0_8], %9 {strides = array<i32>} : memref<1x8x1024xf32, #tpu.memory_space<vmem>>, vector<1x8x1024xf32>,
    return
  }
  func.func @transform_0(%arg0: i32, %arg1: i32) -> (i32, i32, i32) {
    %c0_i32 = arith.constant 0 : i32
    %c0_i32_0 = arith.constant 0 : i32
    return %arg0, %c0_i32, %arg1 : i32, i32, i32
  }
  func.func @transform_1(%arg0: i32, %arg1: i32) -> (i32, i32) {
    %c0_i32 = arith.constant 0 : i32
    %c0_i32_0 = arith.constant 0 : i32
    %c0_i32_1 = arith.constant 0 : i32
    return %c0_i32, %c0_i32_0 : i32, i32
  }
  func.func @transform_2(%arg0: i32, %arg1: i32) -> (i32, i32) {
    %c0_i32 = arith.constant 0 : i32
    %c0_i32_0 = arith.constant 0 : i32
    %c0_i32_1 = arith.constant 0 : i32
    return %c0_i32, %c0_i32_0 : i32, i32
  }
  func.func @transform_3(%arg0: i32, %arg1: i32) -> (i32, i32, i32) {
    %c0_i32 = arith.constant 0 : i32
    %c0_i32_0 = arith.constant 0 : i32
    return %arg0, %c0_i32, %arg1 : i32, i32, i32
  }
}

module attributes {stable_mosaic.version = 11 : i64} {
  func.func @_conv_kernel(%arg0: i32, %arg1: i32, %arg2: memref<1x200x512xbf16, #tpu.memory_space<vmem>>, %arg3: memref<16x200xbf16, #tpu.memory_space<vmem>>, %arg4: memref<16x1xf32, #tpu.memory_space<vmem>>, %arg5: memref<1x16x512xf32, #tpu.memory_space<vmem>>) attributes {dimension_semantics = [#tpu.dimension_semantics<parallel>, #tpu.dimension_semantics<parallel>], iteration_bounds = array<i64: 1, 3>, scalar_prefetch = 0 : i64, scratch_operands = 0 : i64, tpu.core_type = #tpu.core_type<tc>, window_params = [{transform_indices = @transform_0, window_bounds = array<i64: 1, 200, 512>}, {pipeline_mode = #tpu.pipeline_mode<synchronous>, transform_indices = @transform_1, window_bounds = array<i64: 16, 200>}, {pipeline_mode = #tpu.pipeline_mode<synchronous>, transform_indices = @transform_2, window_bounds = array<i64: 16, 1>}, {transform_indices = @transform_3, window_bounds = array<i64: 1, 16, 512>}]} {
    %c0 = arith.constant 0 : index
    %c0_0 = arith.constant 0 : index
    %0 = vector.load %arg3[%c0, %c0_0] : memref<16x200xbf16, #tpu.memory_space<vmem>>, vector<16x200xbf16>
    %c0_1 = arith.constant 0 : index
    %c0_2 = arith.constant 0 : index
    %c0_3 = arith.constant 0 : index
    %1 = vector.load %arg2[%c0_1, %c0_2, %c0_3] : memref<1x200x512xbf16, #tpu.memory_space<vmem>>, vector<1x200x512xbf16>
    %2 = vector.shape_cast %1 : vector<1x200x512xbf16> to vector<200x512xbf16>
    %cst = arith.constant dense<0.000000e+00> : vector<16x512xf32>
    %3 = tpu.matmul %0, %2, %cst {dimension_numbers = #tpu.dot_dimension_numbers<[1], [0], [0], [1], [0, 0, 1, 1], [], []>} : vector<16x200xbf16>, vector<200x512xbf16>, vector<16x512xf32> -> vector<16x512xf32>
    %c0_4 = arith.constant 0 : index
    %c0_5 = arith.constant 0 : index
    %4 = vector.load %arg4[%c0_4, %c0_5] : memref<16x1xf32, #tpu.memory_space<vmem>>, vector<16x1xf32>
    %5 = vector.broadcast %4 : vector<16x1xf32> to vector<16x512xf32>
    %6 = arith.addf %3, %5 : vector<16x512xf32>
    %c0_6 = arith.constant 0 : index
    %c0_7 = arith.constant 0 : index
    %c0_8 = arith.constant 0 : index
    %7 = vector.load %arg5[%c0_6, %c0_7, %c0_8] : memref<1x16x512xf32, #tpu.memory_space<vmem>>, vector<1x16x512xf32>
    %8 = vector.shape_cast %7 : vector<1x16x512xf32> to vector<16x512xf32>
    %9 = vector.shape_cast %6 : vector<16x512xf32> to vector<1x16x512xf32>
    tpu.vector_store %arg5[%c0_6, %c0_7, %c0_8], %9 {strides = array<i32>} : memref<1x16x512xf32, #tpu.memory_space<vmem>>, vector<1x16x512xf32>,
    return
  }
  func.func @transform_0(%arg0: i32, %arg1: i32) -> (i32, i32, i32) {
    %c0_i32 = arith.constant 0 : i32
    %c0_i32_0 = arith.constant 0 : i32
    return %arg0, %c0_i32, %arg1 : i32, i32, i32
  }
  func.func @transform_1(%arg0: i32, %arg1: i32) -> (i32, i32) {
    %c0_i32 = arith.constant 0 : i32
    %c0_i32_0 = arith.constant 0 : i32
    %c0_i32_1 = arith.constant 0 : i32
    return %c0_i32, %c0_i32_0 : i32, i32
  }
  func.func @transform_2(%arg0: i32, %arg1: i32) -> (i32, i32) {
    %c0_i32 = arith.constant 0 : i32
    %c0_i32_0 = arith.constant 0 : i32
    %c0_i32_1 = arith.constant 0 : i32
    return %c0_i32, %c0_i32_0 : i32, i32
  }
  func.func @transform_3(%arg0: i32, %arg1: i32) -> (i32, i32, i32) {
    %c0_i32 = arith.constant 0 : i32
    %c0_i32_0 = arith.constant 0 : i32
    return %arg0, %c0_i32, %arg1 : i32, i32, i32
  }
}

module attributes {stable_mosaic.version = 11 : i64} {
  func.func @_conv_kernel(%arg0: i32, %arg1: i32, %arg2: memref<1x400x128xbf16, #tpu.memory_space<vmem>>, %arg3: memref<32x400xbf16, #tpu.memory_space<vmem>>, %arg4: memref<32x1xf32, #tpu.memory_space<vmem>>, %arg5: memref<1x32x128xf32, #tpu.memory_space<vmem>>) attributes {dimension_semantics = [#tpu.dimension_semantics<parallel>, #tpu.dimension_semantics<parallel>], iteration_bounds = array<i64: 1, 3>, scalar_prefetch = 0 : i64, scratch_operands = 0 : i64, tpu.core_type = #tpu.core_type<tc>, window_params = [{transform_indices = @transform_0, window_bounds = array<i64: 1, 400, 128>}, {pipeline_mode = #tpu.pipeline_mode<synchronous>, transform_indices = @transform_1, window_bounds = array<i64: 32, 400>}, {pipeline_mode = #tpu.pipeline_mode<synchronous>, transform_indices = @transform_2, window_bounds = array<i64: 32, 1>}, {transform_indices = @transform_3, window_bounds = array<i64: 1, 32, 128>}]} {
    %c0 = arith.constant 0 : index
    %c0_0 = arith.constant 0 : index
    %0 = vector.load %arg3[%c0, %c0_0] : memref<32x400xbf16, #tpu.memory_space<vmem>>, vector<32x400xbf16>
    %c0_1 = arith.constant 0 : index
    %c0_2 = arith.constant 0 : index
    %c0_3 = arith.constant 0 : index
    %1 = vector.load %arg2[%c0_1, %c0_2, %c0_3] : memref<1x400x128xbf16, #tpu.memory_space<vmem>>, vector<1x400x128xbf16>
    %2 = vector.shape_cast %1 : vector<1x400x128xbf16> to vector<400x128xbf16>
    %cst = arith.constant dense<0.000000e+00> : vector<32x128xf32>
    %3 = tpu.matmul %0, %2, %cst {dimension_numbers = #tpu.dot_dimension_numbers<[1], [0], [0], [1], [0, 0, 1, 1], [], []>} : vector<32x400xbf16>, vector<400x128xbf16>, vector<32x128xf32> -> vector<32x128xf32>
    %c0_4 = arith.constant 0 : index
    %c0_5 = arith.constant 0 : index
    %4 = vector.load %arg4[%c0_4, %c0_5] : memref<32x1xf32, #tpu.memory_space<vmem>>, vector<32x1xf32>
    %5 = vector.broadcast %4 : vector<32x1xf32> to vector<32x128xf32>
    %6 = arith.addf %3, %5 : vector<32x128xf32>
    %c0_6 = arith.constant 0 : index
    %c0_7 = arith.constant 0 : index
    %c0_8 = arith.constant 0 : index
    %7 = vector.load %arg5[%c0_6, %c0_7, %c0_8] : memref<1x32x128xf32, #tpu.memory_space<vmem>>, vector<1x32x128xf32>
    %8 = vector.shape_cast %7 : vector<1x32x128xf32> to vector<32x128xf32>
    %9 = vector.shape_cast %6 : vector<32x128xf32> to vector<1x32x128xf32>
    tpu.vector_store %arg5[%c0_6, %c0_7, %c0_8], %9 {strides = array<i32>} : memref<1x32x128xf32, #tpu.memory_space<vmem>>, vector<1x32x128xf32>,
    return
  }
  func.func @transform_0(%arg0: i32, %arg1: i32) -> (i32, i32, i32) {
    %c0_i32 = arith.constant 0 : i32
    %c0_i32_0 = arith.constant 0 : i32
    return %arg0, %c0_i32, %arg1 : i32, i32, i32
  }
  func.func @transform_1(%arg0: i32, %arg1: i32) -> (i32, i32) {
    %c0_i32 = arith.constant 0 : i32
    %c0_i32_0 = arith.constant 0 : i32
    %c0_i32_1 = arith.constant 0 : i32
    return %c0_i32, %c0_i32_0 : i32, i32
  }
  func.func @transform_2(%arg0: i32, %arg1: i32) -> (i32, i32) {
    %c0_i32 = arith.constant 0 : i32
    %c0_i32_0 = arith.constant 0 : i32
    %c0_i32_1 = arith.constant 0 : i32
    return %c0_i32, %c0_i32_0 : i32, i32
  }
  func.func @transform_3(%arg0: i32, %arg1: i32) -> (i32, i32, i32) {
    %c0_i32 = arith.constant 0 : i32
    %c0_i32_0 = arith.constant 0 : i32
    return %arg0, %c0_i32, %arg1 : i32, i32, i32
  }
}

module attributes {stable_mosaic.version = 11 : i64} {
  func.func @_conv_kernel(%arg0: i32, %arg1: i32, %arg2: memref<1x288x128xbf16, #tpu.memory_space<vmem>>, %arg3: memref<32x288xbf16, #tpu.memory_space<vmem>>, %arg4: memref<32x1xf32, #tpu.memory_space<vmem>>, %arg5: memref<1x32x128xf32, #tpu.memory_space<vmem>>) attributes {dimension_semantics = [#tpu.dimension_semantics<parallel>, #tpu.dimension_semantics<parallel>], iteration_bounds = array<i64: 1, 3>, scalar_prefetch = 0 : i64, scratch_operands = 0 : i64, tpu.core_type = #tpu.core_type<tc>, window_params = [{transform_indices = @transform_0, window_bounds = array<i64: 1, 288, 128>}, {pipeline_mode = #tpu.pipeline_mode<synchronous>, transform_indices = @transform_1, window_bounds = array<i64: 32, 288>}, {pipeline_mode = #tpu.pipeline_mode<synchronous>, transform_indices = @transform_2, window_bounds = array<i64: 32, 1>}, {transform_indices = @transform_3, window_bounds = array<i64: 1, 32, 128>}]} {
    %c0 = arith.constant 0 : index
    %c0_0 = arith.constant 0 : index
    %0 = vector.load %arg3[%c0, %c0_0] : memref<32x288xbf16, #tpu.memory_space<vmem>>, vector<32x288xbf16>
    %c0_1 = arith.constant 0 : index
    %c0_2 = arith.constant 0 : index
    %c0_3 = arith.constant 0 : index
    %1 = vector.load %arg2[%c0_1, %c0_2, %c0_3] : memref<1x288x128xbf16, #tpu.memory_space<vmem>>, vector<1x288x128xbf16>
    %2 = vector.shape_cast %1 : vector<1x288x128xbf16> to vector<288x128xbf16>
    %cst = arith.constant dense<0.000000e+00> : vector<32x128xf32>
    %3 = tpu.matmul %0, %2, %cst {dimension_numbers = #tpu.dot_dimension_numbers<[1], [0], [0], [1], [0, 0, 1, 1], [], []>} : vector<32x288xbf16>, vector<288x128xbf16>, vector<32x128xf32> -> vector<32x128xf32>
    %c0_4 = arith.constant 0 : index
    %c0_5 = arith.constant 0 : index
    %4 = vector.load %arg4[%c0_4, %c0_5] : memref<32x1xf32, #tpu.memory_space<vmem>>, vector<32x1xf32>
    %5 = vector.broadcast %4 : vector<32x1xf32> to vector<32x128xf32>
    %6 = arith.addf %3, %5 : vector<32x128xf32>
    %c0_6 = arith.constant 0 : index
    %c0_7 = arith.constant 0 : index
    %c0_8 = arith.constant 0 : index
    %7 = vector.load %arg5[%c0_6, %c0_7, %c0_8] : memref<1x32x128xf32, #tpu.memory_space<vmem>>, vector<1x32x128xf32>
    %8 = vector.shape_cast %7 : vector<1x32x128xf32> to vector<32x128xf32>
    %9 = vector.shape_cast %6 : vector<32x128xf32> to vector<1x32x128xf32>
    tpu.vector_store %arg5[%c0_6, %c0_7, %c0_8], %9 {strides = array<i32>} : memref<1x32x128xf32, #tpu.memory_space<vmem>>, vector<1x32x128xf32>,
    return
  }
  func.func @transform_0(%arg0: i32, %arg1: i32) -> (i32, i32, i32) {
    %c0_i32 = arith.constant 0 : i32
    %c0_i32_0 = arith.constant 0 : i32
    return %arg0, %c0_i32, %arg1 : i32, i32, i32
  }
  func.func @transform_1(%arg0: i32, %arg1: i32) -> (i32, i32) {
    %c0_i32 = arith.constant 0 : i32
    %c0_i32_0 = arith.constant 0 : i32
    %c0_i32_1 = arith.constant 0 : i32
    return %c0_i32, %c0_i32_0 : i32, i32
  }
  func.func @transform_2(%arg0: i32, %arg1: i32) -> (i32, i32) {
    %c0_i32 = arith.constant 0 : i32
    %c0_i32_0 = arith.constant 0 : i32
    %c0_i32_1 = arith.constant 0 : i32
    return %c0_i32, %c0_i32_0 : i32, i32
  }
  func.func @transform_3(%arg0: i32, %arg1: i32) -> (i32, i32, i32) {
    %c0_i32 = arith.constant 0 : i32
    %c0_i32_0 = arith.constant 0 : i32
    return %arg0, %c0_i32, %arg1 : i32, i32, i32
  }
}

module attributes {stable_mosaic.version = 11 : i64} {
  func.func @_conv_kernel(%arg0: i32, %arg1: i32, %arg2: memref<1x288x96xbf16, #tpu.memory_space<vmem>>, %arg3: memref<64x288xbf16, #tpu.memory_space<vmem>>, %arg4: memref<64x1xf32, #tpu.memory_space<vmem>>, %arg5: memref<1x64x96xf32, #tpu.memory_space<vmem>>) attributes {dimension_semantics = [#tpu.dimension_semantics<parallel>, #tpu.dimension_semantics<parallel>], iteration_bounds = array<i64: 1, 1>, scalar_prefetch = 0 : i64, scratch_operands = 0 : i64, tpu.core_type = #tpu.core_type<tc>, window_params = [{transform_indices = @transform_0, window_bounds = array<i64: 1, 288, 96>}, {pipeline_mode = #tpu.pipeline_mode<synchronous>, transform_indices = @transform_1, window_bounds = array<i64: 64, 288>}, {pipeline_mode = #tpu.pipeline_mode<synchronous>, transform_indices = @transform_2, window_bounds = array<i64: 64, 1>}, {transform_indices = @transform_3, window_bounds = array<i64: 1, 64, 96>}]} {
    %c0 = arith.constant 0 : index
    %c0_0 = arith.constant 0 : index
    %0 = vector.load %arg3[%c0, %c0_0] : memref<64x288xbf16, #tpu.memory_space<vmem>>, vector<64x288xbf16>
    %c0_1 = arith.constant 0 : index
    %c0_2 = arith.constant 0 : index
    %c0_3 = arith.constant 0 : index
    %1 = vector.load %arg2[%c0_1, %c0_2, %c0_3] : memref<1x288x96xbf16, #tpu.memory_space<vmem>>, vector<1x288x96xbf16>
    %2 = vector.shape_cast %1 : vector<1x288x96xbf16> to vector<288x96xbf16>
    %cst = arith.constant dense<0.000000e+00> : vector<64x96xf32>
    %3 = tpu.matmul %0, %2, %cst {dimension_numbers = #tpu.dot_dimension_numbers<[1], [0], [0], [1], [0, 0, 1, 1], [], []>} : vector<64x288xbf16>, vector<288x96xbf16>, vector<64x96xf32> -> vector<64x96xf32>
    %c0_4 = arith.constant 0 : index
    %c0_5 = arith.constant 0 : index
    %4 = vector.load %arg4[%c0_4, %c0_5] : memref<64x1xf32, #tpu.memory_space<vmem>>, vector<64x1xf32>
    %5 = vector.broadcast %4 : vector<64x1xf32> to vector<64x96xf32>
    %6 = arith.addf %3, %5 : vector<64x96xf32>
    %c0_6 = arith.constant 0 : index
    %c0_7 = arith.constant 0 : index
    %c0_8 = arith.constant 0 : index
    %7 = vector.load %arg5[%c0_6, %c0_7, %c0_8] : memref<1x64x96xf32, #tpu.memory_space<vmem>>, vector<1x64x96xf32>
    %8 = vector.shape_cast %7 : vector<1x64x96xf32> to vector<64x96xf32>
    %9 = vector.shape_cast %6 : vector<64x96xf32> to vector<1x64x96xf32>
    tpu.vector_store %arg5[%c0_6, %c0_7, %c0_8], %9 {strides = array<i32>} : memref<1x64x96xf32, #tpu.memory_space<vmem>>, vector<1x64x96xf32>,
    return
  }
  func.func @transform_0(%arg0: i32, %arg1: i32) -> (i32, i32, i32) {
    %c0_i32 = arith.constant 0 : i32
    %c0_i32_0 = arith.constant 0 : i32
    return %arg0, %c0_i32, %arg1 : i32, i32, i32
  }
  func.func @transform_1(%arg0: i32, %arg1: i32) -> (i32, i32) {
    %c0_i32 = arith.constant 0 : i32
    %c0_i32_0 = arith.constant 0 : i32
    %c0_i32_1 = arith.constant 0 : i32
    return %c0_i32, %c0_i32_0 : i32, i32
  }
  func.func @transform_2(%arg0: i32, %arg1: i32) -> (i32, i32) {
    %c0_i32 = arith.constant 0 : i32
    %c0_i32_0 = arith.constant 0 : i32
    %c0_i32_1 = arith.constant 0 : i32
    return %c0_i32, %c0_i32_0 : i32, i32
  }
  func.func @transform_3(%arg0: i32, %arg1: i32) -> (i32, i32, i32) {
    %c0_i32 = arith.constant 0 : i32
    %c0_i32_0 = arith.constant 0 : i32
    return %arg0, %c0_i32, %arg1 : i32, i32, i32
  }
}

module attributes {stable_mosaic.version = 11 : i64} {
  func.func @_conv_kernel(%arg0: i32, %arg1: i32, %arg2: memref<1x576x96xbf16, #tpu.memory_space<vmem>>, %arg3: memref<64x576xbf16, #tpu.memory_space<vmem>>, %arg4: memref<64x1xf32, #tpu.memory_space<vmem>>, %arg5: memref<1x64x96xf32, #tpu.memory_space<vmem>>) attributes {dimension_semantics = [#tpu.dimension_semantics<parallel>, #tpu.dimension_semantics<parallel>], iteration_bounds = array<i64: 1, 1>, scalar_prefetch = 0 : i64, scratch_operands = 0 : i64, tpu.core_type = #tpu.core_type<tc>, window_params = [{transform_indices = @transform_0, window_bounds = array<i64: 1, 576, 96>}, {pipeline_mode = #tpu.pipeline_mode<synchronous>, transform_indices = @transform_1, window_bounds = array<i64: 64, 576>}, {pipeline_mode = #tpu.pipeline_mode<synchronous>, transform_indices = @transform_2, window_bounds = array<i64: 64, 1>}, {transform_indices = @transform_3, window_bounds = array<i64: 1, 64, 96>}]} {
    %c0 = arith.constant 0 : index
    %c0_0 = arith.constant 0 : index
    %0 = vector.load %arg3[%c0, %c0_0] : memref<64x576xbf16, #tpu.memory_space<vmem>>, vector<64x576xbf16>
    %c0_1 = arith.constant 0 : index
    %c0_2 = arith.constant 0 : index
    %c0_3 = arith.constant 0 : index
    %1 = vector.load %arg2[%c0_1, %c0_2, %c0_3] : memref<1x576x96xbf16, #tpu.memory_space<vmem>>, vector<1x576x96xbf16>
    %2 = vector.shape_cast %1 : vector<1x576x96xbf16> to vector<576x96xbf16>
    %cst = arith.constant dense<0.000000e+00> : vector<64x96xf32>
    %3 = tpu.matmul %0, %2, %cst {dimension_numbers = #tpu.dot_dimension_numbers<[1], [0], [0], [1], [0, 0, 1, 1], [], []>} : vector<64x576xbf16>, vector<576x96xbf16>, vector<64x96xf32> -> vector<64x96xf32>
    %c0_4 = arith.constant 0 : index
    %c0_5 = arith.constant 0 : index
    %4 = vector.load %arg4[%c0_4, %c0_5] : memref<64x1xf32, #tpu.memory_space<vmem>>, vector<64x1xf32>
    %5 = vector.broadcast %4 : vector<64x1xf32> to vector<64x96xf32>
    %6 = arith.addf %3, %5 : vector<64x96xf32>
    %c0_6 = arith.constant 0 : index
    %c0_7 = arith.constant 0 : index
    %c0_8 = arith.constant 0 : index
    %7 = vector.load %arg5[%c0_6, %c0_7, %c0_8] : memref<1x64x96xf32, #tpu.memory_space<vmem>>, vector<1x64x96xf32>
    %8 = vector.shape_cast %7 : vector<1x64x96xf32> to vector<64x96xf32>
    %9 = vector.shape_cast %6 : vector<64x96xf32> to vector<1x64x96xf32>
    tpu.vector_store %arg5[%c0_6, %c0_7, %c0_8], %9 {strides = array<i32>} : memref<1x64x96xf32, #tpu.memory_space<vmem>>, vector<1x64x96xf32>,
    return
  }
  func.func @transform_0(%arg0: i32, %arg1: i32) -> (i32, i32, i32) {
    %c0_i32 = arith.constant 0 : i32
    %c0_i32_0 = arith.constant 0 : i32
    return %arg0, %c0_i32, %arg1 : i32, i32, i32
  }
  func.func @transform_1(%arg0: i32, %arg1: i32) -> (i32, i32) {
    %c0_i32 = arith.constant 0 : i32
    %c0_i32_0 = arith.constant 0 : i32
    %c0_i32_1 = arith.constant 0 : i32
    return %c0_i32, %c0_i32_0 : i32, i32
  }
  func.func @transform_2(%arg0: i32, %arg1: i32) -> (i32, i32) {
    %c0_i32 = arith.constant 0 : i32
    %c0_i32_0 = arith.constant 0 : i32
    %c0_i32_1 = arith.constant 0 : i32
    return %c0_i32, %c0_i32_0 : i32, i32
  }
  func.func @transform_3(%arg0: i32, %arg1: i32) -> (i32, i32, i32) {
    %c0_i32 = arith.constant 0 : i32
    %c0_i32_0 = arith.constant 0 : i32
    return %arg0, %c0_i32, %arg1 : i32, i32, i32
  }
}

module attributes {stable_mosaic.version = 11 : i64} {
  func.func @_conv_kernel(%arg0: i32, %arg1: i32, %arg2: memref<1x576x24xbf16, #tpu.memory_space<vmem>>, %arg3: memref<64x576xbf16, #tpu.memory_space<vmem>>, %arg4: memref<64x1xf32, #tpu.memory_space<vmem>>, %arg5: memref<1x64x24xf32, #tpu.memory_space<vmem>>) attributes {dimension_semantics = [#tpu.dimension_semantics<parallel>, #tpu.dimension_semantics<parallel>], iteration_bounds = array<i64: 1, 1>, scalar_prefetch = 0 : i64, scratch_operands = 0 : i64, tpu.core_type = #tpu.core_type<tc>, window_params = [{transform_indices = @transform_0, window_bounds = array<i64: 1, 576, 24>}, {pipeline_mode = #tpu.pipeline_mode<synchronous>, transform_indices = @transform_1, window_bounds = array<i64: 64, 576>}, {pipeline_mode = #tpu.pipeline_mode<synchronous>, transform_indices = @transform_2, window_bounds = array<i64: 64, 1>}, {transform_indices = @transform_3, window_bounds = array<i64: 1, 64, 24>}]} {
    %c0 = arith.constant 0 : index
    %c0_0 = arith.constant 0 : index
    %0 = vector.load %arg3[%c0, %c0_0] : memref<64x576xbf16, #tpu.memory_space<vmem>>, vector<64x576xbf16>
    %c0_1 = arith.constant 0 : index
    %c0_2 = arith.constant 0 : index
    %c0_3 = arith.constant 0 : index
    %1 = vector.load %arg2[%c0_1, %c0_2, %c0_3] : memref<1x576x24xbf16, #tpu.memory_space<vmem>>, vector<1x576x24xbf16>
    %2 = vector.shape_cast %1 : vector<1x576x24xbf16> to vector<576x24xbf16>
    %cst = arith.constant dense<0.000000e+00> : vector<64x24xf32>
    %3 = tpu.matmul %0, %2, %cst {dimension_numbers = #tpu.dot_dimension_numbers<[1], [0], [0], [1], [0, 0, 1, 1], [], []>} : vector<64x576xbf16>, vector<576x24xbf16>, vector<64x24xf32> -> vector<64x24xf32>
    %c0_4 = arith.constant 0 : index
    %c0_5 = arith.constant 0 : index
    %4 = vector.load %arg4[%c0_4, %c0_5] : memref<64x1xf32, #tpu.memory_space<vmem>>, vector<64x1xf32>
    %5 = vector.broadcast %4 : vector<64x1xf32> to vector<64x24xf32>
    %6 = arith.addf %3, %5 : vector<64x24xf32>
    %c0_6 = arith.constant 0 : index
    %c0_7 = arith.constant 0 : index
    %c0_8 = arith.constant 0 : index
    %7 = vector.load %arg5[%c0_6, %c0_7, %c0_8] : memref<1x64x24xf32, #tpu.memory_space<vmem>>, vector<1x64x24xf32>
    %8 = vector.shape_cast %7 : vector<1x64x24xf32> to vector<64x24xf32>
    %9 = vector.shape_cast %6 : vector<64x24xf32> to vector<1x64x24xf32>
    tpu.vector_store %arg5[%c0_6, %c0_7, %c0_8], %9 {strides = array<i32>} : memref<1x64x24xf32, #tpu.memory_space<vmem>>, vector<1x64x24xf32>,
    return
  }
  func.func @transform_0(%arg0: i32, %arg1: i32) -> (i32, i32, i32) {
    %c0_i32 = arith.constant 0 : i32
    %c0_i32_0 = arith.constant 0 : i32
    return %arg0, %c0_i32, %arg1 : i32, i32, i32
  }
  func.func @transform_1(%arg0: i32, %arg1: i32) -> (i32, i32) {
    %c0_i32 = arith.constant 0 : i32
    %c0_i32_0 = arith.constant 0 : i32
    %c0_i32_1 = arith.constant 0 : i32
    return %c0_i32, %c0_i32_0 : i32, i32
  }
  func.func @transform_2(%arg0: i32, %arg1: i32) -> (i32, i32) {
    %c0_i32 = arith.constant 0 : i32
    %c0_i32_0 = arith.constant 0 : i32
    %c0_i32_1 = arith.constant 0 : i32
    return %c0_i32, %c0_i32_0 : i32, i32
  }
  func.func @transform_3(%arg0: i32, %arg1: i32) -> (i32, i32, i32) {
    %c0_i32 = arith.constant 0 : i32
    %c0_i32_0 = arith.constant 0 : i32
    return %arg0, %c0_i32, %arg1 : i32, i32, i32
  }
}

module attributes {stable_mosaic.version = 11 : i64} {
  func.func @_conv_kernel(%arg0: i32, %arg1: i32, %arg2: memref<1x576x6xbf16, #tpu.memory_space<vmem>>, %arg3: memref<128x576xbf16, #tpu.memory_space<vmem>>, %arg4: memref<128x1xf32, #tpu.memory_space<vmem>>, %arg5: memref<1x128x6xf32, #tpu.memory_space<vmem>>) attributes {dimension_semantics = [#tpu.dimension_semantics<parallel>, #tpu.dimension_semantics<parallel>], iteration_bounds = array<i64: 1, 1>, scalar_prefetch = 0 : i64, scratch_operands = 0 : i64, tpu.core_type = #tpu.core_type<tc>, window_params = [{transform_indices = @transform_0, window_bounds = array<i64: 1, 576, 6>}, {pipeline_mode = #tpu.pipeline_mode<synchronous>, transform_indices = @transform_1, window_bounds = array<i64: 128, 576>}, {pipeline_mode = #tpu.pipeline_mode<synchronous>, transform_indices = @transform_2, window_bounds = array<i64: 128, 1>}, {transform_indices = @transform_3, window_bounds = array<i64: 1, 128, 6>}]} {
    %c0 = arith.constant 0 : index
    %c0_0 = arith.constant 0 : index
    %0 = vector.load %arg3[%c0, %c0_0] : memref<128x576xbf16, #tpu.memory_space<vmem>>, vector<128x576xbf16>
    %c0_1 = arith.constant 0 : index
    %c0_2 = arith.constant 0 : index
    %c0_3 = arith.constant 0 : index
    %1 = vector.load %arg2[%c0_1, %c0_2, %c0_3] : memref<1x576x6xbf16, #tpu.memory_space<vmem>>, vector<1x576x6xbf16>
    %2 = vector.shape_cast %1 : vector<1x576x6xbf16> to vector<576x6xbf16>
    %cst = arith.constant dense<0.000000e+00> : vector<128x6xf32>
    %3 = tpu.matmul %0, %2, %cst {dimension_numbers = #tpu.dot_dimension_numbers<[1], [0], [0], [1], [0, 0, 1, 1], [], []>} : vector<128x576xbf16>, vector<576x6xbf16>, vector<128x6xf32> -> vector<128x6xf32>
    %c0_4 = arith.constant 0 : index
    %c0_5 = arith.constant 0 : index
    %4 = vector.load %arg4[%c0_4, %c0_5] : memref<128x1xf32, #tpu.memory_space<vmem>>, vector<128x1xf32>
    %5 = vector.broadcast %4 : vector<128x1xf32> to vector<128x6xf32>
    %6 = arith.addf %3, %5 : vector<128x6xf32>
    %c0_6 = arith.constant 0 : index
    %c0_7 = arith.constant 0 : index
    %c0_8 = arith.constant 0 : index
    %7 = vector.load %arg5[%c0_6, %c0_7, %c0_8] : memref<1x128x6xf32, #tpu.memory_space<vmem>>, vector<1x128x6xf32>
    %8 = vector.shape_cast %7 : vector<1x128x6xf32> to vector<128x6xf32>
    %9 = vector.shape_cast %6 : vector<128x6xf32> to vector<1x128x6xf32>
    tpu.vector_store %arg5[%c0_6, %c0_7, %c0_8], %9 {strides = array<i32>} : memref<1x128x6xf32, #tpu.memory_space<vmem>>, vector<1x128x6xf32>,
    return
  }
  func.func @transform_0(%arg0: i32, %arg1: i32) -> (i32, i32, i32) {
    %c0_i32 = arith.constant 0 : i32
    %c0_i32_0 = arith.constant 0 : i32
    return %arg0, %c0_i32, %arg1 : i32, i32, i32
  }
  func.func @transform_1(%arg0: i32, %arg1: i32) -> (i32, i32) {
    %c0_i32 = arith.constant 0 : i32
    %c0_i32_0 = arith.constant 0 : i32
    %c0_i32_1 = arith.constant 0 : i32
    return %c0_i32, %c0_i32_0 : i32, i32
  }
  func.func @transform_2(%arg0: i32, %arg1: i32) -> (i32, i32) {
    %c0_i32 = arith.constant 0 : i32
    %c0_i32_0 = arith.constant 0 : i32
    %c0_i32_1 = arith.constant 0 : i32
    return %c0_i32, %c0_i32_0 : i32, i32
  }
  func.func @transform_3(%arg0: i32, %arg1: i32) -> (i32, i32, i32) {
    %c0_i32 = arith.constant 0 : i32
    %c0_i32_0 = arith.constant 0 : i32
    return %arg0, %c0_i32, %arg1 : i32, i32, i32
  }
}

module attributes {stable_mosaic.version = 11 : i64} {
  func.func @_rnn_head_kernel(%arg0: memref<1x768xbf16, #tpu.memory_space<vmem>>, %arg1: memref<1x128xf32, #tpu.memory_space<vmem>>, %arg2: memref<1x128xf32, #tpu.memory_space<vmem>>, %arg3: memref<1x128xf32, #tpu.memory_space<vmem>>, %arg4: memref<1x128xf32, #tpu.memory_space<vmem>>, %arg5: memref<768x512xbf16, #tpu.memory_space<vmem>>, %arg6: memref<128x512xbf16, #tpu.memory_space<vmem>>, %arg7: memref<1x512xf32, #tpu.memory_space<vmem>>, %arg8: memref<128x512xbf16, #tpu.memory_space<vmem>>, %arg9: memref<128x512xbf16, #tpu.memory_space<vmem>>, %arg10: memref<1x512xf32, #tpu.memory_space<vmem>>, %arg11: memref<128x6xbf16, #tpu.memory_space<vmem>>, %arg12: memref<1x6xf32, #tpu.memory_space<vmem>>, %arg13: memref<1x6xf32, #tpu.memory_space<vmem>>, %arg14: memref<1x128xf32, #tpu.memory_space<vmem>>, %arg15: memref<1x128xf32, #tpu.memory_space<vmem>>, %arg16: memref<1x128xf32, #tpu.memory_space<vmem>>, %arg17: memref<1x128xf32, #tpu.memory_space<vmem>>) attributes {dimension_semantics = [], scalar_prefetch = 0 : i64, scratch_operands = 0 : i64, tpu.core_type = #tpu.core_type<tc>} {
    %c0 = arith.constant 0 : index
    %c0_0 = arith.constant 0 : index
    %0 = vector.load %arg0[%c0, %c0_0] : memref<1x768xbf16, #tpu.memory_space<vmem>>, vector<1x768xbf16>
    %c0_1 = arith.constant 0 : index
    %c0_2 = arith.constant 0 : index
    %1 = vector.load %arg1[%c0_1, %c0_2] : memref<1x128xf32, #tpu.memory_space<vmem>>, vector<1x128xf32>
    %c0_3 = arith.constant 0 : index
    %c0_4 = arith.constant 0 : index
    %2 = vector.load %arg2[%c0_3, %c0_4] : memref<1x128xf32, #tpu.memory_space<vmem>>, vector<1x128xf32>
    %c0_5 = arith.constant 0 : index
    %c0_6 = arith.constant 0 : index
    %3 = vector.load %arg5[%c0_5, %c0_6] : memref<768x512xbf16, #tpu.memory_space<vmem>>, vector<768x512xbf16>
    %cst = arith.constant dense<0.000000e+00> : vector<1x512xf32>
    %4 = tpu.matmul %0, %3, %cst {dimension_numbers = #tpu.dot_dimension_numbers<[1], [0], [0], [1], [0, 0, 1, 1], [], []>} : vector<1x768xbf16>, vector<768x512xbf16>, vector<1x512xf32> -> vector<1x512xf32>
    %5 = arith.truncf %1 : vector<1x128xf32> to vector<1x128xbf16>
    %c0_7 = arith.constant 0 : index
    %c0_8 = arith.constant 0 : index
    %6 = vector.load %arg6[%c0_7, %c0_8] : memref<128x512xbf16, #tpu.memory_space<vmem>>, vector<128x512xbf16>
    %cst_9 = arith.constant dense<0.000000e+00> : vector<1x512xf32>
    %7 = tpu.matmul %5, %6, %cst_9 {dimension_numbers = #tpu.dot_dimension_numbers<[1], [0], [0], [1], [0, 0, 1, 1], [], []>} : vector<1x128xbf16>, vector<128x512xbf16>, vector<1x512xf32> -> vector<1x512xf32>
    %8 = arith.addf %4, %7 : vector<1x512xf32>
    %c0_10 = arith.constant 0 : index
    %c0_11 = arith.constant 0 : index
    %9 = vector.load %arg7[%c0_10, %c0_11] : memref<1x512xf32, #tpu.memory_space<vmem>>, vector<1x512xf32>
    %10 = arith.addf %8, %9 : vector<1x512xf32>
    %11 = vector.extract_strided_slice %10 {offsets = [0, 0], sizes = [1, 128], strides = [1, 1]} : vector<1x512xf32> to vector<1x128xf32>
    %cst_12 = arith.constant 0.000000e+00 : f32
    %12 = vector.broadcast %cst_12 : f32 to vector<1x128xf32>
    %13 = arith.subf %12, %11 : vector<1x128xf32>
    %14 = math.exp %13 : vector<1x128xf32>
    %cst_13 = arith.constant 1.000000e+00 : f32
    %15 = vector.broadcast %cst_13 : f32 to vector<1x128xf32>
    %16 = arith.addf %15, %14 : vector<1x128xf32>
    %17 = tpu.reciprocal %16 {approx = true} : vector<1x128xf32> -> vector<1x128xf32>
    %18 = vector.extract_strided_slice %10 {offsets = [0, 128], sizes = [1, 128], strides = [1, 1]} : vector<1x512xf32> to vector<1x128xf32>
    %cst_14 = arith.constant 0.000000e+00 : f32
    %19 = vector.broadcast %cst_14 : f32 to vector<1x128xf32>
    %20 = arith.subf %19, %18 : vector<1x128xf32>
    %21 = math.exp %20 : vector<1x128xf32>
    %cst_15 = arith.constant 1.000000e+00 : f32
    %22 = vector.broadcast %cst_15 : f32 to vector<1x128xf32>
    %23 = arith.addf %22, %21 : vector<1x128xf32>
    %24 = tpu.reciprocal %23 {approx = true} : vector<1x128xf32> -> vector<1x128xf32>
    %25 = vector.extract_strided_slice %10 {offsets = [0, 256], sizes = [1, 128], strides = [1, 1]} : vector<1x512xf32> to vector<1x128xf32>
    %26 = math.tanh %25 : vector<1x128xf32>
    %27 = vector.extract_strided_slice %10 {offsets = [0, 384], sizes = [1, 128], strides = [1, 1]} : vector<1x512xf32> to vector<1x128xf32>
    %cst_16 = arith.constant 0.000000e+00 : f32
    %28 = vector.broadcast %cst_16 : f32 to vector<1x128xf32>
    %29 = arith.subf %28, %27 : vector<1x128xf32>
    %30 = math.exp %29 : vector<1x128xf32>
    %cst_17 = arith.constant 1.000000e+00 : f32
    %31 = vector.broadcast %cst_17 : f32 to vector<1x128xf32>
    %32 = arith.addf %31, %30 : vector<1x128xf32>
    %33 = tpu.reciprocal %32 {approx = true} : vector<1x128xf32> -> vector<1x128xf32>
    %34 = arith.mulf %24, %2 : vector<1x128xf32>
    %35 = arith.mulf %17, %26 : vector<1x128xf32>
    %36 = arith.addf %34, %35 : vector<1x128xf32>
    %37 = math.tanh %36 : vector<1x128xf32>
    %38 = arith.mulf %33, %37 : vector<1x128xf32>
    %39 = arith.truncf %38 : vector<1x128xf32> to vector<1x128xbf16>
    %c0_18 = arith.constant 0 : index
    %c0_19 = arith.constant 0 : index
    %40 = vector.load %arg3[%c0_18, %c0_19] : memref<1x128xf32, #tpu.memory_space<vmem>>, vector<1x128xf32>
    %c0_20 = arith.constant 0 : index
    %c0_21 = arith.constant 0 : index
    %41 = vector.load %arg4[%c0_20, %c0_21] : memref<1x128xf32, #tpu.memory_space<vmem>>, vector<1x128xf32>
    %c0_22 = arith.constant 0 : index
    %c0_23 = arith.constant 0 : index
    %42 = vector.load %arg8[%c0_22, %c0_23] : memref<128x512xbf16, #tpu.memory_space<vmem>>, vector<128x512xbf16>
    %cst_24 = arith.constant dense<0.000000e+00> : vector<1x512xf32>
    %43 = tpu.matmul %39, %42, %cst_24 {dimension_numbers = #tpu.dot_dimension_numbers<[1], [0], [0], [1], [0, 0, 1, 1], [], []>} : vector<1x128xbf16>, vector<128x512xbf16>, vector<1x512xf32> -> vector<1x512xf32>
    %44 = arith.truncf %40 : vector<1x128xf32> to vector<1x128xbf16>
    %c0_25 = arith.constant 0 : index
    %c0_26 = arith.constant 0 : index
    %45 = vector.load %arg9[%c0_25, %c0_26] : memref<128x512xbf16, #tpu.memory_space<vmem>>, vector<128x512xbf16>
    %cst_27 = arith.constant dense<0.000000e+00> : vector<1x512xf32>
    %46 = tpu.matmul %44, %45, %cst_27 {dimension_numbers = #tpu.dot_dimension_numbers<[1], [0], [0], [1], [0, 0, 1, 1], [], []>} : vector<1x128xbf16>, vector<128x512xbf16>, vector<1x512xf32> -> vector<1x512xf32>
    %47 = arith.addf %43, %46 : vector<1x512xf32>
    %c0_28 = arith.constant 0 : index
    %c0_29 = arith.constant 0 : index
    %48 = vector.load %arg10[%c0_28, %c0_29] : memref<1x512xf32, #tpu.memory_space<vmem>>, vector<1x512xf32>
    %49 = arith.addf %47, %48 : vector<1x512xf32>
    %50 = vector.extract_strided_slice %49 {offsets = [0, 0], sizes = [1, 128], strides = [1, 1]} : vector<1x512xf32> to vector<1x128xf32>
    %cst_30 = arith.constant 0.000000e+00 : f32
    %51 = vector.broadcast %cst_30 : f32 to vector<1x128xf32>
    %52 = arith.subf %51, %50 : vector<1x128xf32>
    %53 = math.exp %52 : vector<1x128xf32>
    %cst_31 = arith.constant 1.000000e+00 : f32
    %54 = vector.broadcast %cst_31 : f32 to vector<1x128xf32>
    %55 = arith.addf %54, %53 : vector<1x128xf32>
    %56 = tpu.reciprocal %55 {approx = true} : vector<1x128xf32> -> vector<1x128xf32>
    %57 = vector.extract_strided_slice %49 {offsets = [0, 128], sizes = [1, 128], strides = [1, 1]} : vector<1x512xf32> to vector<1x128xf32>
    %cst_32 = arith.constant 0.000000e+00 : f32
    %58 = vector.broadcast %cst_32 : f32 to vector<1x128xf32>
    %59 = arith.subf %58, %57 : vector<1x128xf32>
    %60 = math.exp %59 : vector<1x128xf32>
    %cst_33 = arith.constant 1.000000e+00 : f32
    %61 = vector.broadcast %cst_33 : f32 to vector<1x128xf32>
    %62 = arith.addf %61, %60 : vector<1x128xf32>
    %63 = tpu.reciprocal %62 {approx = true} : vector<1x128xf32> -> vector<1x128xf32>
    %64 = vector.extract_strided_slice %49 {offsets = [0, 256], sizes = [1, 128], strides = [1, 1]} : vector<1x512xf32> to vector<1x128xf32>
    %65 = math.tanh %64 : vector<1x128xf32>
    %66 = vector.extract_strided_slice %49 {offsets = [0, 384], sizes = [1, 128], strides = [1, 1]} : vector<1x512xf32> to vector<1x128xf32>
    %cst_34 = arith.constant 0.000000e+00 : f32
    %67 = vector.broadcast %cst_34 : f32 to vector<1x128xf32>
    %68 = arith.subf %67, %66 : vector<1x128xf32>
    %69 = math.exp %68 : vector<1x128xf32>
    %cst_35 = arith.constant 1.000000e+00 : f32
    %70 = vector.broadcast %cst_35 : f32 to vector<1x128xf32>
    %71 = arith.addf %70, %69 : vector<1x128xf32>
    %72 = tpu.reciprocal %71 {approx = true} : vector<1x128xf32> -> vector<1x128xf32>
    %73 = arith.mulf %63, %41 : vector<1x128xf32>
    %74 = arith.mulf %56, %65 : vector<1x128xf32>
    %75 = arith.addf %73, %74 : vector<1x128xf32>
    %76 = math.tanh %75 : vector<1x128xf32>
    %77 = arith.mulf %72, %76 : vector<1x128xf32>
    %78 = arith.truncf %77 : vector<1x128xf32> to vector<1x128xbf16>
    %c0_36 = arith.constant 0 : index
    %c0_37 = arith.constant 0 : index
    %79 = vector.load %arg11[%c0_36, %c0_37] : memref<128x6xbf16, #tpu.memory_space<vmem>>, vector<128x6xbf16>
    %cst_38 = arith.constant dense<0.000000e+00> : vector<1x6xf32>
    %80 = tpu.matmul %78, %79, %cst_38 {dimension_numbers = #tpu.dot_dimension_numbers<[1], [0], [0], [1], [0, 0, 1, 1], [], []>} : vector<1x128xbf16>, vector<128x6xbf16>, vector<1x6xf32> -> vector<1x6xf32>
    %c0_39 = arith.constant 0 : index
    %c0_40 = arith.constant 0 : index
    %81 = vector.load %arg12[%c0_39, %c0_40] : memref<1x6xf32, #tpu.memory_space<vmem>>, vector<1x6xf32>
    %82 = arith.addf %80, %81 : vector<1x6xf32>
    %c0_41 = arith.constant 0 : index
    %c0_42 = arith.constant 0 : index
    %83 = vector.load %arg13[%c0_41, %c0_42] : memref<1x6xf32, #tpu.memory_space<vmem>>, vector<1x6xf32>
    tpu.vector_store %arg13[%c0_41, %c0_42], %82 {strides = array<i32>} : memref<1x6xf32, #tpu.memory_space<vmem>>, vector<1x6xf32>,
    %c0_43 = arith.constant 0 : index
    %c0_44 = arith.constant 0 : index
    %84 = vector.load %arg14[%c0_43, %c0_44] : memref<1x128xf32, #tpu.memory_space<vmem>>, vector<1x128xf32>
    tpu.vector_store %arg14[%c0_43, %c0_44], %38 {strides = array<i32>} : memref<1x128xf32, #tpu.memory_space<vmem>>, vector<1x128xf32>,
    %c0_45 = arith.constant 0 : index
    %c0_46 = arith.constant 0 : index
    %85 = vector.load %arg15[%c0_45, %c0_46] : memref<1x128xf32, #tpu.memory_space<vmem>>, vector<1x128xf32>
    tpu.vector_store %arg15[%c0_45, %c0_46], %36 {strides = array<i32>} : memref<1x128xf32, #tpu.memory_space<vmem>>, vector<1x128xf32>,
    %c0_47 = arith.constant 0 : index
    %c0_48 = arith.constant 0 : index
    %86 = vector.load %arg16[%c0_47, %c0_48] : memref<1x128xf32, #tpu.memory_space<vmem>>, vector<1x128xf32>
    tpu.vector_store %arg16[%c0_47, %c0_48], %77 {strides = array<i32>} : memref<1x128xf32, #tpu.memory_space<vmem>>, vector<1x128xf32>,
    %c0_49 = arith.constant 0 : index
    %c0_50 = arith.constant 0 : index
    %87 = vector.load %arg17[%c0_49, %c0_50] : memref<1x128xf32, #tpu.memory_space<vmem>>, vector<1x128xf32>
    tpu.vector_store %arg17[%c0_49, %c0_50], %75 {strides = array<i32>} : memref<1x128xf32, #tpu.memory_space<vmem>>, vector<1x128xf32>,
    return
  }
}

</mosaic_0001>

<bundles_post_ra>
// kernel: deepvo_forward.9
= control target key start
LH: loop header
LB: loop body
LE: loop exit
PB: predicated region body
PF: predicated region fallthrough
CT: control target
= control target key end

     0   :  { %8 = vsyncpa [#allocation3], 0  ;;  %s2571_s0 = inlined_call_operand.hbm [shape: bf16[1,294,6144], index: 0, kind: input, shape index: {}]   ;;  %s2572_s1 = inlined_call_operand.hbm [shape: bf16[8,294], index: 1, kind: input, shape index: {}]   ;;  %s2573_s2 = inlined_call_operand.hbm [shape: f32[8,1], index: 2, kind: input, shape index: {}]   ;;  %s2574_s3 = inlined_call_operand.hbm [shape: f32[1,8,6144], index: 3, kind: output, shape index: {}]  }
   0x1   :  { %10 = vsyncpa [#allocation3 + $0x1], 0 }
   0x2   :  { %11 = vsyncpa [#allocation6], 0 }
   0x3   :  { %12 = vsyncpa [#allocation4], 0 }
   0x4   :  { %14 = vsyncpa [#allocation4 + $0x1], 0  ;;  %s2135_s12 = smov 0   ;;  %s2137_s13 = smov 0  }
   0x5   :  { %s2139_s14 = smov 0   ;;  %s2141_s15 = smov 0  }
   0x6   :  { %s2143_s16 = smov 0   ;;  %s2145_s17 = smov 0  }
   0x7 LB: > { %s1626_s18 = sadd.s32 4294967295, %s2105_s17   ;;  %s1627_s19 = sadd.s32 4294967294, %s2105_s17   ;;  %s2105_s17 = sphi %s2145_s17, %s20_s17   ;;  %s2101_s16 = sphi %s2143_s16, %s2599_s16   ;;  %s2097_s15 = sphi %s2141_s15, %s2598_s15   ;;  %s2093_s14 = sphi %s2139_s14, %s2597_s14   ;;  %s2089_s13 = sphi %s2137_s13, %s2596_s13   ;;  %s2085_s12 = sphi %s2135_s12, %s2595_s12  }
   0x8   : > { %s41_s20 = sadd.s32 1, %s2093_s14  ;;  %p48_p0 = scmp.ne.s32.totalorder %s2093_s14, %s2089_s13 }
   0x9   : > { %p49_p1 = scmp.eq.s32.totalorder %s2105_s17, 0  ;;  %p54_p2 = scmp.ne.s32.totalorder %s2089_s13, %s2085_s12 }
   0xa   : > { %p2173_p3 = scmp.eq.s32.totalorder %s1626_s18, 0  ;;  %p122_p4 = scmp.eq.s32.totalorder %s1626_s18, 5 }
   0xb   : > { %p2177_p5 = por %p49_p1, %p48_p0  ;;  %p128_p6 = scmp.eq.s32.totalorder %s1627_s19, 5 }
   0xc   : > { %s2581_s21 = scalar_select %p2173_p3, 1, 0 }
   0xd   : > { %p2183_p7 = por %p2173_p3, %p54_p2  ;;  %p2187_p8 = por %p122_p4, %p48_p0 }
   0xe   : > { %p2191_p9 = por %p128_p6, %p54_p2  ;;  %p1628_p10 = scmp.ge.s32.totalorder %s2105_s17, 1 }
   0xf   : > { %s2583_s23 = scalar_select %p2183_p7, 1, 0 }
  0x10   : > { %s2584_s24 = scalar_select %p2187_p8, 1, 0 }
  0x11   : > { %s2585_s25 = scalar_select %p2191_p9, 1, 0 }
  0x12   : > { %p135_p11 = scmp.lt.s32.totalorder %s2105_s17, 7  ;;  %s2107_s27 = smov [#allocation5]  }
  0x13   : > { %s148_s28 = sshll.u32 %s2107_s27, 4  ;;  %p1863_p13 = scmp.lt.s32.totalorder %s2105_s17, 6  ;;  %s149_s28 = int_to_ptr.vmem [resolvable:$true] %s148_s28 }
  0x14   : > { %p2197_p12 = pnand %p1628_p10, %p135_p11  ;;  %s2108_s30 = smov [#allocation7]  }
  0x15   : > { %p2206_p1 = pnand %p1863_p13, %p2177_p5  ;;  %s159_s4 = sshll.u32 %s2108_s30, 4  ;;  %s2216_s4 = int_to_ptr.vmem [resolvable:$true] %s159_s4 }
  0x16   : > { %s2586_s26 = scalar_select %p2197_p12, 1, 0 }
  0x17   : > { %p1846_p0 = pneg %p2197_p12  ;;  %s1933_s8 = scalar_lea.hbm %s2572_s1, 192 }
  0x18   : > { %s2587_s29 = scalar_select %p2206_p1, 1, 0 }
  0x19   : > { %p2212_p2 = pnand %p1846_p0, %p2173_p3  ;;  %p1934_p4 = scmp.ne.s32.totalorder %s2572_s1, %s1933_s8 }
  0x1a   : > { %p1940_p11 = scmp.lt.u32.totalorder %s1933_s8, %s2572_s1 }
  0x1b   : > { %p1935_p5 = pneg %p2212_p2 }
  0x1d   : > { %p1936_p6 = pnand %p1935_p5, %p1934_p4 }
  0x1f   : > { %p1937_p10 = pneg %p1936_p6 }
  0x21   : > { %p1942_p13 = pnand %p1940_p11, %p1937_p10 }
  0x23   : > { %1945 = shalt.err (!%p1942_p13)
}
  0x24   : > { %s1946_s19 = scalar_lea.vmem %s149_s28, 192  ;;  %p1954_p3 = scmp.lt.s32.totalorder %s149_s28, %s149_s28 }
  0x25   : > { %p1947_p0 = scmp.ne.s32.totalorder %s149_s28, %s1946_s19  ;;  %p1955_p7 = scmp.lt.s32.totalorder %s1946_s19, %s1946_s19 }
  0x27   : > { %p1949_p9 = pnand %p1947_p0, %p1935_p5  ;;  %p1956_p12 = por %p1955_p7, %p1954_p3 }
  0x29   : > { %p1950_p8 = pneg %p1949_p9 }
  0x2b   : > { %p1957_p1 = pnand %p1956_p12, %p1950_p8 }
  0x2d   : > { %1960 = shalt.err (!%p1957_p1)
}
  0x2e   : > { %1849 = dma.hbm_to_vmem [thread:$0]  (!%p2212_p2), %s2572_s1, 192, %s149_s28, [#allocation6]  }
  0x2f   : > { %s1961_s7 = scalar_lea.hbm %s2573_s2, 128 }
  0x30   : > { %p1962_p9 = scmp.ne.s32.totalorder %s2573_s2, %s1961_s7  ;;  %p1968_p8 = scmp.lt.u32.totalorder %s1961_s7, %s2573_s2 }
  0x32   : > { %p1964_p3 = pnand %p1962_p9, %p1935_p5 }
  0x34   : > { %p1965_p7 = pneg %p1964_p3 }
  0x36   : > { %p1970_p12 = pnand %p1968_p8, %p1965_p7 }
  0x38   : > { %1973 = shalt.err (!%p1970_p12)
}
  0x39   : > { %s1974_s28 = scalar_lea.vmem %s2216_s4, 128  ;;  %p1982_p10 = scmp.lt.s32.totalorder %s2216_s4, %s2216_s4 }
  0x3a   : > { %p1975_p1 = scmp.ne.s32.totalorder %s2216_s4, %s1974_s28  ;;  %p1983_p11 = scmp.lt.s32.totalorder %s1974_s28, %s1974_s28 }
  0x3c   : > { %p1977_p4 = pnand %p1975_p1, %p1935_p5  ;;  %p1984_p13 = por %p1983_p11, %p1982_p10 }
  0x3e   : > { %p1978_p6 = pneg %p1977_p4 }
  0x40   : > { %p1985_p0 = pnand %p1984_p13, %p1978_p6 }
  0x42   : > { %1988 = shalt.err (!%p1985_p0)
}
  0x43   : > { %1852 = dma.hbm_to_vmem [thread:$0]  (!%p2212_p2), %s2573_s2, 128, %s2216_s4, [#allocation6]  }
  0x44   : > { %s29_s22 = sadd.s32 1, %s2101_s16  ;;  %s170_s27 = sand.u32 1, %s2093_s14  }
  0x45   : > { %p30_p5 = scmp.ge.s32.totalorder %s29_s22, 6  ;;  %s1832_s30 = smul.u32 1184, %s170_s27 }
  0x46   : > { %s1806_s6 = sshll.u32 %s2101_s16, 9  ;;  %s2284_s28 = scalar_lea.sflag [#allocation3], %s170_s27 }
  0x47   : > { %s2601_s22 = smov (%p30_p5, %s29_s22), 0  ;;  %s2273_s8 = scalar_lea.hbm %s2571_s0, %s1806_s6 }
  0x48   : > { %s37_s9 = ssub.s32 %s2101_s16, %s2601_s22  ;;  %s174_s4 = scalar_lea.vmem [#allocation2], %s1832_s30 }
  0x49   : > { %s183_s10 = sshll.u32 %s174_s4, 4  ;;  %p39_p2 = scmp.eq.s32.totalorder %s37_s9, 0  ;;  %s2277_s10 = int_to_ptr.vmem [resolvable:$true] %s183_s10 }
  0x4a   : > { %s1989_s18 = scalar_lea.hbm %s2273_s8, 18944  ;;  %p2589_p3 = scmp.ne.s32.totalorder %s2587_s29, 0 }
  0x4b   : > { %s2282_s11 = scalar_select %p39_p2, %s2093_s14, %s41_s20  }
  0x4c   : > { %p1990_p9 = scmp.ne.s32.totalorder %s2273_s8, %s1989_s18  ;;  %p1991_p7 = pneg %p2589_p3 }
  0x4d   : > { %s1994_s30 = scalar_lea.hbm %s2571_s0, 113664  ;;  %p1995_p1 = scmp.lt.u32.totalorder %s2273_s8, %s2571_s0 }
  0x4e   : > { %p1992_p8 = pnand %p1991_p7, %p1990_p9  ;;  %p1996_p4 = scmp.lt.u32.totalorder %s1994_s30, %s1989_s18 }
  0x4f   : > { %p1998_p10 = scmp.lt.u32.totalorder %s1989_s18, %s2273_s8 }
  0x50   : > { %p1993_p12 = pneg %p1992_p8  ;;  %p1997_p6 = por %p1996_p4, %p1995_p1 }
  0x52   : > { %p1999_p11 = por %p1998_p10, %p1997_p6 }
  0x54   : > { %p2000_p13 = pnand %p1999_p11, %p1993_p12 }
  0x56   : > { %2003 = shalt.err (!%p2000_p13)
}
  0x57   : > { %s2004_s20 = scalar_lea.vmem %s2277_s10, 18944  ;;  %s2109_s27 = smov [#allocation2]  }
  0x58   : > { %p2005_p0 = scmp.ne.s32.totalorder %s2277_s10, %s2004_s20  ;;  %s2009_s9 = sshll.u32 %s2109_s27, 4  ;;  %s2010_s9 = int_to_ptr.vmem [resolvable:$false] %s2009_s9 }
  0x59   : > { %s2011_s4 = scalar_lea.vmem %s2010_s9, 37888  ;;  %p2012_p9 = scmp.lt.s32.totalorder %s2277_s10, %s2010_s9 }
  0x5a   : > { %p2007_p5 = pnand %p2005_p0, %p1991_p7  ;;  %p2013_p8 = scmp.lt.s32.totalorder %s2011_s4, %s2004_s20 }
  0x5c   : > { %p2008_p2 = pneg %p2007_p5  ;;  %p2014_p1 = por %p2013_p8, %p2012_p9 }
  0x5e   : > { %p2015_p4 = pnand %p2014_p1, %p2008_p2 }
  0x60   : > { %2018 = shalt.err (!%p2015_p4)
}
  0x61   : > { %s2110_s18 = smov 3072   ;;  %s2111_s19 = smov 512  }
  0x62   : > { %s2112_s6 = smov 32   ;;  %p2590_p7 = scmp.ne.s32.totalorder %s2586_s26, 0 }
  0x63   : > { %1856 = dma.hbm_to_vmem [thread:$0]  (!%p2589_p3), %s2273_s8, 18944, %s2277_s10, %s2284_s28, %s2110_s18, %s2111_s19, %s2112_s6  }
  0x64   : > { %195 = sbr.rel (%p2590_p7) target bundleno = 496 (0x1f0), region = 32  ;;  %s2315_s30 = sand.u32 (!%p2590_p7), 1, %s2089_s13  }
  0x65   : > { %s1833_s5 = smul.u32 (!%p2590_p7), 1184, %s2315_s30  ;;  %s198_s7 = scalar_lea.sflag (!%p2590_p7), [#allocation3], %s2315_s30 }
  0x66   : > { %p2591_p12 = scmp.ne.s32.totalorder (!%p2590_p7), %s2583_s23, 0 }
  0x67   : > { %s2319_s20 = scalar_lea.vmem (!%p2590_p7), [#allocation2], %s1833_s5 }
  0x6b   : > { %2072 = dma.done.wait (%p2591_p12), %s198_s7, 18944  }
  0x6c   : > { %2074 = vsyncadd (%p2591_p12), %s198_s7, 4294948352  ;;  %p2592_p3 = scmp.ne.s32.totalorder %s2581_s21, 0 }
  0x6e   : > { %2076 = dma.done.wait (%p2592_p3), [#allocation6], 320  }
  0x6f   : > { %2078 = vsyncadd (%p2592_p3), [#allocation6], 4294966976  ;;  %v2113_v0 = vmov 0   ;;  %v237_v1 = vld [vmem:[%s2319_s20] sm:$0xff]  ;;  %v238_v3 = vld [vmem:[%s2319_s20 + $0x8] sm:$0xff]  ;;  %vm1145_vm0 = vcmask 1042432  }
  0x70   : > { %1921 = vset.pattern.permute.xlu0 %v2113_v0  ;;  %v241_v2 = vld [vmem:[%s2319_s20 + $0x20] sm:$0xff]  ;;  %v242_v5 = vld [vmem:[%s2319_s20 + $0x28] sm:$0xff]  ;;  %vm1141_vm1 = vcmask 310272   ;;  %s1637_s21 = sshll.u32 %s2315_s30, 6  ;;  %s1807_s26 = sshll.u32 %s2097_s15, 10 }
  0x71   : > { %v1642_v4 = vcombine.high %v237_v1, %v241_v2  ;;  %v1641_v6 = vcombine.low %v237_v1, %v241_v2  ;;  %v245_v7 = vld [vmem:[%s2319_s20 + $0x40] sm:$0xff]  ;;  %v1644_v9 = vcombine.high %v238_v3, %v242_v5  ;;  %v1643_v10 = vcombine.low %v238_v3, %v242_v5  ;;  %v246_v12 = vld [vmem:[%s2319_s20 + $0x48] sm:$0xff]  ;;  %s231_s23 = scalar_lea.vmem [#allocation8], %s1637_s21  ;;  %s2523_s28 = scalar_lea.hbm %s2574_s3, %s1807_s26 }
  0x72   : > { %v249_v8 = vld [vmem:[%s2319_s20 + $0x60] sm:$0xff]  ;;  %v250_v13 = vld [vmem:[%s2319_s20 + $0x68] sm:$0xff]  ;;  %s1523_s29 = sshll.u32 %s231_s23, 4  ;;  %s1507_s15 = scalar_lea.sflag [#allocation4], %s2315_s30  ;;  %s2525_s29 = int_to_ptr.vmem [resolvable:$true] %s1523_s29 }
  0x73   : > { %v1650_v11 = vcombine.high %v245_v7, %v249_v8  ;;  %v253_v14 = vld [vmem:[%s2319_s20 + $0x80] sm:$0xff]  ;;  %1170 = vmatprep.subr.bf16.mxu0 %v1642_v4  ;;  %v1652_v15 = vcombine.high %v246_v12, %v250_v13  ;;  %v254_v17 = vld [vmem:[%s2319_s20 + $0x88] sm:$0xff]  ;;  %1252 = vmatprep.subr.bf16.mxu1 %v1644_v9  ;;  %v1649_v19 = vcombine.low %v245_v7, %v249_v8  ;;  %s2019_s27 = scalar_lea.vmem %s2525_s29, 1024  ;;  %p2593_p10 = scmp.ne.s32.totalorder %s2584_s24, 0 }
  0x74   : > { %v257_v16 = vld [vmem:[%s2319_s20 + $0xa0] sm:$0xff]  ;;  %v258_v18 = vld [vmem:[%s2319_s20 + $0xa8] sm:$0xff]  ;;  %1171 = vmatpush1.bf16.msra.mxu0 %v1641_v6  ;;  %1253 = vmatpush1.bf16.msra.mxu1 %v1643_v10  ;;  %v1651_v20 = vcombine.low %v246_v12, %v250_v13  ;;  %p2020_p6 = scmp.ne.s32.totalorder %s2525_s29, %s2019_s27  ;;  %s2114_s9 = smov [#allocation8]  }
  0x75   : > { %1172 = vmatprep.subr.bf16.mxu0 %v1650_v11  ;;  %v1658_v21 = vcombine.high %v253_v14, %v257_v16  ;;  %1254 = vmatprep.subr.bf16.mxu1 %v1652_v15  ;;  %v1660_v22 = vcombine.high %v254_v17, %v258_v18  ;;  %v261_v23 = vld [vmem:[%s2319_s20 + $0xc0] sm:$0xff]  ;;  %v262_v25 = vld [vmem:[%s2319_s20 + $0xc8] sm:$0xff]  ;;  %v1657_v27 = vcombine.low %v253_v14, %v257_v16  ;;  %s2023_s4 = sshll.u32 %s2114_s9, 4  ;;  %s2024_s4 = int_to_ptr.vmem [resolvable:$false] %s2023_s4 }
  0x76   : > { %v265_v24 = vld [vmem:[%s2319_s20 + $0xe0] sm:$0xff]  ;;  %v266_v26 = vld [vmem:[%s2319_s20 + $0xe8] sm:$0xff]  ;;  %v1659_v28 = vcombine.low %v254_v17, %v258_v18  ;;  %p2021_p11 = pnand %p2020_p6, %p2593_p10  ;;  %s2025_s18 = scalar_lea.vmem %s2024_s4, 2048 }
  0x77   : > { %v1666_v29 = vcombine.high %v261_v23, %v265_v24  ;;  %v1668_v30 = vcombine.high %v262_v25, %v266_v26  ;;  %v269_v31 = vld [vmem:[%s2319_s20 + $0x100] sm:$0xff]  ;;  %v270_v33 = vld [vmem:[%s2319_s20 + $0x108] sm:$0xff]  ;;  %v1665_v35 = vcombine.low %v261_v23, %v265_v24  ;;  %v1667_v36 = vcombine.low %v262_v25, %v266_v26  ;;  %p2026_p0 = scmp.lt.s32.totalorder %s2525_s29, %s2024_s4  ;;  %p2027_p5 = scmp.lt.s32.totalorder %s2025_s18, %s2019_s27 }
  0x78   : > { %1173 = vmatpush1.bf16.msra.mxu0 %v1649_v19  ;;  %1255 = vmatpush1.bf16.msra.mxu1 %v1651_v20  ;;  %v273_v32 = vld [vmem:[%s2319_s20 + $0x120] sm:$0xff]  ;;  %v274_v34 = vld [vmem:[%s2319_s20 + $0x128] sm:$0xff]  ;;  %p2022_p13 = pneg %p2021_p11 }
  0x79   : > { %1174 = vmatprep.subr.bf16.mxu0 %v1658_v21  ;;  %1256 = vmatprep.subr.bf16.mxu1 %v1660_v22  ;;  %v1674_v37 = vcombine.high %v269_v31, %v273_v32  ;;  %v1676_v38 = vcombine.high %v270_v33, %v274_v34  ;;  %v277_v39 = vld [vmem:[%s2319_s20 + $0x140] sm:$0xff]  ;;  %v278_v41 = vld [vmem:[%s2319_s20 + $0x148] sm:$0xff]  ;;  %v1673_v43 = vcombine.low %v269_v31, %v273_v32  ;;  %p2028_p2 = por %p2027_p5, %p2026_p0 }
  0x7a   : > { %v281_v40 = vld [vmem:[%s2319_s20 + $0x160] sm:$0xff]  ;;  %v282_v42 = vld [vmem:[%s2319_s20 + $0x168] sm:$0xff]  ;;  %v1675_v44 = vcombine.low %v270_v33, %v274_v34 }
  0x7b   : > { %v1682_v45 = vcombine.high %v277_v39, %v281_v40  ;;  %v1684_v46 = vcombine.high %v278_v41, %v282_v42  ;;  %v285_v47 = vld [vmem:[%s2319_s20 + $0x180] sm:$0xff]  ;;  %v286_v49 = vld [vmem:[%s2319_s20 + $0x188] sm:$0xff]  ;;  %v1681_v51 = vcombine.low %v277_v39, %v281_v40  ;;  %v1683_v52 = vcombine.low %v278_v41, %v282_v42  ;;  %p2029_p9 = pnand %p2028_p2, %p2022_p13 }
  0x7c   : > { %1175 = vmatpush1.bf16.msra.mxu0 %v1657_v27  ;;  %1257 = vmatpush1.bf16.msra.mxu1 %v1659_v28  ;;  %v289_v48 = vld [vmem:[%s2319_s20 + $0x1a0] sm:$0xff]  ;;  %v290_v50 = vld [vmem:[%s2319_s20 + $0x1a8] sm:$0xff] }
  0x7d   : > { %1176 = vmatprep.subr.bf16.mxu0 %v1666_v29  ;;  %1258 = vmatprep.subr.bf16.mxu1 %v1668_v30  ;;  %v1690_v53 = vcombine.high %v285_v47, %v289_v48  ;;  %v2358_v54 = vld [vmem:[#allocation5] sm:$0xff]  ;;  %v1692_v55 = vcombine.high %v286_v49, %v290_v50  ;;  %v294_v59 = vld [vmem:[%s2319_s20 + $0x1c8] sm:$0xff]  ;;  %v1689_v61 = vcombine.low %v285_v47, %v289_v48 }
  0x7e   : > { %v293_v56 = vld [vmem:[%s2319_s20 + $0x1c0] sm:$0xff]  ;;  %v2364_v58 = vcombine.high %v2358_v54, %v2358_v54  ;;  %v298_v60 = vld [vmem:[%s2319_s20 + $0x1e8] sm:$0xff]  ;;  %v1691_v62 = vcombine.low %v286_v49, %v290_v50 }
  0x7f   : > { %v297_v57 = vld [vmem:[%s2319_s20 + $0x1e0] sm:$0xff]  ;;  %v1700_v1 = vcombine.high %v294_v59, %v298_v60  ;;  %v302_v4 = vld [vmem:[%s2319_s20 + $0x208] sm:$0xff]  ;;  %v1699_v7 = vcombine.low %v294_v59, %v298_v60 }
  0x80   : > { %1177 = vmatpush1.bf16.msra.mxu0 %v1665_v35  ;;  %1259 = vmatpush1.bf16.msra.mxu1 %v1667_v36  ;;  %v1698_v63 = vcombine.high %v293_v56, %v297_v57  ;;  %v301_v2 = vld [vmem:[%s2319_s20 + $0x200] sm:$0xff]  ;;  %v306_v5 = vld [vmem:[%s2319_s20 + $0x228] sm:$0xff]  ;;  %v1697_v6 = vcombine.low %v293_v56, %v297_v57 }
  0x81   : > { %1178 = vmatprep.subr.bf16.mxu0 %v1674_v37  ;;  %1260 = vmatprep.subr.bf16.mxu1 %v1676_v38  ;;  %v305_v3 = vld [vmem:[%s2319_s20 + $0x220] sm:$0xff]  ;;  %v1708_v9 = vcombine.high %v302_v4, %v306_v5  ;;  %v310_v12 = vld [vmem:[%s2319_s20 + $0x248] sm:$0xff]  ;;  %v1707_v15 = vcombine.low %v302_v4, %v306_v5 }
  0x82   : > { %1202 = vmatprep.mubr.bf16.mxu0 %v2364_v58  ;;  %1284 = vmatprep.mubr.bf16.mxu1 %v2364_v58  ;;  %v1706_v8 = vcombine.high %v301_v2, %v305_v3  ;;  %v309_v10 = vld [vmem:[%s2319_s20 + $0x240] sm:$0xff]  ;;  %v314_v13 = vld [vmem:[%s2319_s20 + $0x268] sm:$0xff]  ;;  %v1705_v14 = vcombine.low %v301_v2, %v305_v3 }
  0x83   : > { %v313_v11 = vld [vmem:[%s2319_s20 + $0x260] sm:$0xff]  ;;  %v1716_v17 = vcombine.high %v310_v12, %v314_v13  ;;  %v318_v20 = vld [vmem:[%s2319_s20 + $0x288] sm:$0xff]  ;;  %v1715_v23 = vcombine.low %v310_v12, %v314_v13 }
  0x84   : > { %1179 = vmatpush1.bf16.msra.mxu0 %v1673_v43  ;;  %1261 = vmatpush1.bf16.msra.mxu1 %v1675_v44  ;;  %v1714_v16 = vcombine.high %v309_v10, %v313_v11  ;;  %v317_v18 = vld [vmem:[%s2319_s20 + $0x280] sm:$0xff]  ;;  %v322_v21 = vld [vmem:[%s2319_s20 + $0x2a8] sm:$0xff]  ;;  %v1713_v22 = vcombine.low %v309_v10, %v313_v11 }
  0x85   : > { %1180 = vmatprep.subr.bf16.mxu0 %v1682_v45  ;;  %1262 = vmatprep.subr.bf16.mxu1 %v1684_v46  ;;  %v321_v19 = vld [vmem:[%s2319_s20 + $0x2a0] sm:$0xff]  ;;  %v1724_v25 = vcombine.high %v318_v20, %v322_v21  ;;  %v326_v28 = vld [vmem:[%s2319_s20 + $0x2c8] sm:$0xff]  ;;  %v1723_v31 = vcombine.low %v318_v20, %v322_v21 }
  0x86   : > { %v1722_v24 = vcombine.high %v317_v18, %v321_v19  ;;  %v325_v26 = vld [vmem:[%s2319_s20 + $0x2c0] sm:$0xff]  ;;  %v330_v29 = vld [vmem:[%s2319_s20 + $0x2e8] sm:$0xff]  ;;  %v1721_v30 = vcombine.low %v317_v18, %v321_v19 }
  0x87   : > { %v329_v27 = vld [vmem:[%s2319_s20 + $0x2e0] sm:$0xff]  ;;  %v1732_v33 = vcombine.high %v326_v28, %v330_v29  ;;  %v334_v36 = vld [vmem:[%s2319_s20 + $0x308] sm:$0xff]  ;;  %v1731_v39 = vcombine.low %v326_v28, %v330_v29 }
  0x88   : > { %1181 = vmatpush1.bf16.msra.mxu0 %v1681_v51  ;;  %1263 = vmatpush1.bf16.msra.mxu1 %v1683_v52  ;;  %v1730_v32 = vcombine.high %v325_v26, %v329_v27  ;;  %v333_v34 = vld [vmem:[%s2319_s20 + $0x300] sm:$0xff]  ;;  %v338_v37 = vld [vmem:[%s2319_s20 + $0x328] sm:$0xff]  ;;  %v1729_v38 = vcombine.low %v325_v26, %v329_v27 }
  0x89   : > { %1182 = vmatprep.subr.bf16.mxu0 %v1690_v53  ;;  %1264 = vmatprep.subr.bf16.mxu1 %v1692_v55  ;;  %v337_v35 = vld [vmem:[%s2319_s20 + $0x320] sm:$0xff]  ;;  %v1740_v41 = vcombine.high %v334_v36, %v338_v37  ;;  %v342_v44 = vld [vmem:[%s2319_s20 + $0x348] sm:$0xff]  ;;  %v1739_v47 = vcombine.low %v334_v36, %v338_v37 }
  0x8a   : > { %v1738_v40 = vcombine.high %v333_v34, %v337_v35  ;;  %v341_v42 = vld [vmem:[%s2319_s20 + $0x340] sm:$0xff]  ;;  %v346_v45 = vld [vmem:[%s2319_s20 + $0x368] sm:$0xff]  ;;  %v1737_v46 = vcombine.low %v333_v34, %v337_v35 }
  0x8b   : > { %v345_v43 = vld [vmem:[%s2319_s20 + $0x360] sm:$0xff]  ;;  %v1748_v49 = vcombine.high %v342_v44, %v346_v45  ;;  %v385_v52 = vld [vmem:[#allocation7] sm:$0xff]  ;;  %v1747_v57 = vcombine.low %v342_v44, %v346_v45 }
  0x8c   : > { %1183 = vmatpush1.bf16.msra.mxu0 %v1689_v61  ;;  %1265 = vmatpush1.bf16.msra.mxu1 %v1691_v62  ;;  %v1746_v48 = vcombine.high %v341_v42, %v345_v43  ;;  %v349_v50 = vld [vmem:[%s2319_s20 + $0x380] sm:$0xff]  ;;  %v350_v53 = vld [vmem:[%s2319_s20 + $0x388] sm:$0xff]  ;;  %v1745_v56 = vcombine.low %v341_v42, %v345_v43  ;;  %v252_v42 = vld [vmem:[%s2319_s20 + $0x78] sm:$0xff] }
  0x8d   : > { %1184 = vmatprep.subr.bf16.mxu0 %v1698_v63  ;;  %1266 = vmatprep.subr.bf16.mxu1 %v1700_v1  ;;  %v353_v51 = vld [vmem:[%s2319_s20 + $0x3a0] sm:$0xff]  ;;  %v354_v55 = vld [vmem:[%s2319_s20 + $0x3a8] sm:$0xff] }
  0x8e   : > { %388 = vperm.xlu0 %1921, %v385_v52   ;;  %v1754_v59 = vcombine.high %v349_v50, %v353_v51  ;;  %v1756_v60 = vcombine.high %v350_v53, %v354_v55  ;;  %v357_v61 = vld [vmem:[%s2319_s20 + $0x3c0] sm:$0xff]  ;;  %v358_v63 = vld [vmem:[%s2319_s20 + $0x3c8] sm:$0xff]  ;;  %v1753_v2 = vcombine.low %v349_v50, %v353_v51  ;;  %v1755_v3 = vcombine.low %v350_v53, %v354_v55  ;;  %v260_v50 = vld [vmem:[%s2319_s20 + $0xb8] sm:$0xff] }
  0x8f   : > { %v361_v62 = vld [vmem:[%s2319_s20 + $0x3e0] sm:$0xff]  ;;  %v362_v1 = vld [vmem:[%s2319_s20 + $0x3e8] sm:$0xff] }
  0x90   : > { %1185 = vmatpush1.bf16.msra.mxu0 %v1697_v6  ;;  %1267 = vmatpush1.bf16.msra.mxu1 %v1699_v7  ;;  %v1762_v4 = vcombine.high %v357_v61, %v361_v62  ;;  %v1764_v5 = vcombine.high %v358_v63, %v362_v1  ;;  %v365_v6 = vld [vmem:[%s2319_s20 + $0x400] sm:$0xff]  ;;  %v1761_v10 = vcombine.low %v357_v61, %v361_v62  ;;  %v378_v18 = vld [vmem:[%s2319_s20 + $0x468] sm:$0xff] }
  0x91   : > { %1186 = vmatprep.subr.bf16.mxu0 %v1706_v8  ;;  %1268 = vmatprep.subr.bf16.mxu1 %v1708_v9  ;;  %v369_v7 = vld [vmem:[%s2319_s20 + $0x420] sm:$0xff]  ;;  %v366_v8 = vld [vmem:[%s2319_s20 + $0x408] sm:$0xff]  ;;  %v1763_v11 = vcombine.low %v358_v63, %v362_v1 }
  0x92   : > { %v370_v9 = vld [vmem:[%s2319_s20 + $0x428] sm:$0xff]  ;;  %v1770_v12 = vcombine.high %v365_v6, %v369_v7  ;;  %v1769_v19 = vcombine.low %v365_v6, %v369_v7 }
  0x93   : > { %v1772_v13 = vcombine.high %v366_v8, %v370_v9  ;;  %v1771_v20 = vcombine.low %v366_v8, %v370_v9  ;;  %v279_v9 = vld [vmem:[%s2319_s20 + $0x150] sm:$0xff] }
  0x94   : > { %1187 = vmatpush1.bf16.msra.mxu0 %v1705_v14  ;;  %1269 = vmatpush1.bf16.msra.mxu1 %v1707_v15  ;;  %v373_v14 = vld [vmem:[%s2319_s20 + $0x440] sm:$0xff] }
  0x95   : > { %1188 = vmatprep.subr.bf16.mxu0 %v1714_v16  ;;  %1270 = vmatprep.subr.bf16.mxu1 %v1716_v17  ;;  %v377_v15 = vld [vmem:[%s2319_s20 + $0x460] sm:$0xff]  ;;  %v2410_v16 = vcombine.low %v2358_v54, %v2358_v54  ;;  %v374_v17 = vld [vmem:[%s2319_s20 + $0x448] sm:$0xff] }
  0x96   : > { %v1778_v21 = vcombine.high %v373_v14, %v377_v15  ;;  %v1777_v54 = vcombine.low %v373_v14, %v377_v15 }
  0x98   : > { %1189 = vmatpush1.bf16.msra.mxu0 %v1713_v22  ;;  %1271 = vmatpush1.bf16.msra.mxu1 %v1715_v23  ;;  %v1780_v22 = vcombine.high %v374_v17, %v378_v18  ;;  %v381_v23 = vld [vmem:[%s2319_s20 + $0x480] sm:$0x77] }
  0x99   : > { %1190 = vmatprep.subr.bf16.mxu0 %v1722_v24  ;;  %1272 = vmatprep.subr.bf16.mxu1 %v1724_v25  ;;  %v382_v24 = vld [vmem:[%s2319_s20 + $0x488] sm:$0x77]  ;;  %v1779_v25 = vcombine.low %v374_v17, %v378_v18  ;;  %v1786_v26 = vcombine.high %v381_v23, %v381_v23  ;;  %v1785_v27 = vcombine.low %v381_v23, %v381_v23  ;;  %v287_v18 = vld [vmem:[%s2319_s20 + $0x190] sm:$0xff] }
  0x9a   : > { %v1788_v28 = vcombine.high %v382_v24, %v382_v24  ;;  %v1787_v29 = vcombine.low %v382_v24, %v382_v24 }
  0x9b   : > { %v1147_v34 = vsel %vm1145_vm0, %v1785_v27, 0  ;;  %v296_v27 = vld [vmem:[%s2319_s20 + $0x1d8] sm:$0xff] }
  0x9c   : > { %1191 = vmatpush1.bf16.msra.mxu0 %v1721_v30  ;;  %1273 = vmatpush1.bf16.msra.mxu1 %v1723_v31  ;;  %v239_v30 = vld [vmem:[%s2319_s20 + $0x10] sm:$0xff]  ;;  %v1153_v36 = vsel %vm1145_vm0, %v1787_v29, 0 }
  0x9d   : > { %1192 = vmatprep.subr.bf16.mxu0 %v1730_v32  ;;  %1274 = vmatprep.subr.bf16.mxu1 %v1732_v33  ;;  %v243_v31 = vld [vmem:[%s2319_s20 + $0x30] sm:$0xff]  ;;  %v240_v32 = vld [vmem:[%s2319_s20 + $0x18] sm:$0xff] }
  0x9e   : > { %v244_v33 = vld [vmem:[%s2319_s20 + $0x38] sm:$0xff]  ;;  %v1646_v35 = vcombine.high %v239_v30, %v243_v31  ;;  %v1645_v43 = vcombine.low %v239_v30, %v243_v31 }
  0x9f   : > { %v1648_v37 = vcombine.high %v240_v32, %v244_v33  ;;  %v1647_v44 = vcombine.low %v240_v32, %v244_v33  ;;  %v303_v33 = vld [vmem:[%s2319_s20 + $0x210] sm:$0xff] }
  0xa0   : > { %1193 = vmatpush1.bf16.msra.mxu0 %v1729_v38  ;;  %1275 = vmatpush1.bf16.msra.mxu1 %v1731_v39  ;;  %v247_v38 = vld [vmem:[%s2319_s20 + $0x50] sm:$0xff] }
  0xa1   : > { %1194 = vmatprep.subr.bf16.mxu0 %v1738_v40  ;;  %1276 = vmatprep.subr.bf16.mxu1 %v1740_v41  ;;  %v251_v39 = vld [vmem:[%s2319_s20 + $0x70] sm:$0xff]  ;;  %v2430_v40 = vld [vmem:[#allocation5 + $0x8] ss:$0 sps:$4 sm:$0xff]   ;;  %v248_v41 = vld [vmem:[%s2319_s20 + $0x58] sm:$0xff] }
  0xa2   : > { %v1654_v45 = vcombine.high %v247_v38, %v251_v39  ;;  %v1653_v51 = vcombine.low %v247_v38, %v251_v39  ;;  %v1655_v52 = vcombine.low %v248_v41, %v252_v42 }
  0xa4   : > { %1195 = vmatpush1.bf16.msra.mxu0 %v1737_v46  ;;  %1277 = vmatpush1.bf16.msra.mxu1 %v1739_v47  ;;  %v1656_v46 = vcombine.high %v248_v41, %v252_v42  ;;  %v255_v47 = vld [vmem:[%s2319_s20 + $0x90] sm:$0xff] }
  0xa5   : > { %1196 = vmatprep.subr.bf16.mxu0 %v1746_v48  ;;  %1278 = vmatprep.subr.bf16.mxu1 %v1748_v49  ;;  %v259_v48 = vld [vmem:[%s2319_s20 + $0xb0] sm:$0xff]  ;;  %v256_v49 = vld [vmem:[%s2319_s20 + $0x98] sm:$0xff] }
  0xa6   : > { %v1662_v53 = vcombine.high %v255_v47, %v259_v48  ;;  %v1664_v55 = vcombine.high %v256_v49, %v260_v50  ;;  %v1661_v61 = vcombine.low %v255_v47, %v259_v48  ;;  %v1663_v62 = vcombine.low %v256_v49, %v260_v50  ;;  %v311_v42 = vld [vmem:[%s2319_s20 + $0x250] sm:$0xff] }
  0xa7   : > { %v319_v50 = vld [vmem:[%s2319_s20 + $0x290] sm:$0xff] }
  0xa8   : > { %1197 = vmatpush1.bf16.msra.mxu0 %v1745_v56  ;;  %1279 = vmatpush1.bf16.msra.mxu1 %v1747_v57  ;;  %v263_v56 = vld [vmem:[%s2319_s20 + $0xd0] sm:$0xff] }
  0xa9   : > { %1198 = vmatprep.subr.bf16.mxu0 %v1754_v59  ;;  %1280 = vmatprep.subr.bf16.mxu1 %v1756_v60  ;;  %v267_v57 = vld [vmem:[%s2319_s20 + $0xf0] sm:$0xff]  ;;  %v264_v59 = vld [vmem:[%s2319_s20 + $0xd8] sm:$0xff] }
  0xaa   : > { %v268_v60 = vld [vmem:[%s2319_s20 + $0xf8] sm:$0xff]  ;;  %v1670_v63 = vcombine.high %v263_v56, %v267_v57  ;;  %v1669_v6 = vcombine.low %v263_v56, %v267_v57 }
  0xab   : > { %v1672_v1 = vcombine.high %v264_v59, %v268_v60 }
  0xac   : > { %1199 = vmatpush1.bf16.msra.mxu0 %v1753_v2  ;;  %1281 = vmatpush1.bf16.msra.mxu1 %v1755_v3  ;;  %v271_v2 = vld [vmem:[%s2319_s20 + $0x110] sm:$0xff] }
  0xad   : > { %1200 = vmatprep.subr.bf16.mxu0 %v1762_v4  ;;  %1282 = vmatprep.subr.bf16.mxu1 %v1764_v5  ;;  %v275_v3 = vld [vmem:[%s2319_s20 + $0x130] sm:$0xff]  ;;  %v272_v4 = vld [vmem:[%s2319_s20 + $0x118] sm:$0xff] }
  0xae   : > { %v276_v5 = vld [vmem:[%s2319_s20 + $0x138] sm:$0xff]  ;;  %v1678_v7 = vcombine.high %v271_v2, %v275_v3 }
  0xaf   : > { %v1680_v8 = vcombine.high %v272_v4, %v276_v5  ;;  %v1679_v14 = vcombine.low %v272_v4, %v276_v5  ;;  %v335_v5 = vld [vmem:[%s2319_s20 + $0x310] sm:$0xff] }
  0xb0   : > { %1201 = vmatpush1.bf16.msra.mxu0 %v1761_v10  ;;  %1283 = vmatpush1.bf16.msra.mxu1 %v1763_v11  ;;  %v283_v10 = vld [vmem:[%s2319_s20 + $0x170] sm:$0xff]  ;;  %v280_v11 = vld [vmem:[%s2319_s20 + $0x158] sm:$0xff] }
  0xb1   : > { %1211 = vmatprep.subr.bf16.mxu0 %v1770_v12  ;;  %1293 = vmatprep.subr.bf16.mxu1 %v1772_v13  ;;  %v284_v12 = vld [vmem:[%s2319_s20 + $0x178] sm:$0xff]  ;;  %v1677_v13 = vcombine.low %v271_v2, %v275_v3  ;;  %v1686_v15 = vcombine.high %v279_v9, %v283_v10 }
  0xb2   : > { %v1688_v17 = vcombine.high %v280_v11, %v284_v12  ;;  %v1687_v23 = vcombine.low %v280_v11, %v284_v12  ;;  %v343_v12 = vld [vmem:[%s2319_s20 + $0x350] sm:$0xff] }
  0xb3   : > { %1203 = vmatmul.mubr.bf16.vlgmr.msra.gmra.mrb[0].mxu0 %v2410_v16  ;;  %1285 = vmatmul.mubr.bf16.vlgmr.msra.gmra.mrb[0].mxu1 %v2410_v16 }
  0xb4   : > { %1212 = vmatpush1.bf16.msra.mxu0 %v1769_v19  ;;  %1294 = vmatpush1.bf16.msra.mxu1 %v1771_v20  ;;  %v291_v19 = vld [vmem:[%s2319_s20 + $0x1b0] sm:$0xff]  ;;  %v288_v20 = vld [vmem:[%s2319_s20 + $0x198] sm:$0xff] }
  0xb5   : > { %1213 = vmatprep.subr.bf16.mxu0 %v1778_v21  ;;  %1295 = vmatprep.subr.bf16.mxu1 %v1780_v22  ;;  %v292_v21 = vld [vmem:[%s2319_s20 + $0x1b8] sm:$0xff]  ;;  %v1685_v22 = vcombine.low %v279_v9, %v283_v10  ;;  %v1694_v24 = vcombine.high %v287_v18, %v291_v19  ;;  %v1693_v29 = vcombine.low %v287_v18, %v291_v19 }
  0xb6   : > { %1243 = vmatprep.mubr.bf16.mxu0 %v2113_v0  ;;  %1325 = vmatprep.mubr.bf16.mxu1 %v2113_v0  ;;  %v1695_v30 = vcombine.low %v288_v20, %v292_v21 }
  0xb8   : > { %1214 = vmatpush1.bf16.msra.mxu0 %v1777_v54  ;;  %1296 = vmatpush1.bf16.msra.mxu1 %v1779_v25  ;;  %v1696_v54 = vcombine.high %v288_v20, %v292_v21  ;;  %v295_v25 = vld [vmem:[%s2319_s20 + $0x1d0] sm:$0xff] }
  0xb9   : > { %1793 = vmatprep.subr.msk.bf16.mxu0 %vm1145_vm0, %v1786_v26  ;;  %1795 = vmatprep.subr.msk.bf16.mxu1 %vm1145_vm0, %v1788_v28  ;;  %v299_v26 = vld [vmem:[%s2319_s20 + $0x1f0] sm:$0xff]  ;;  %v300_v28 = vld [vmem:[%s2319_s20 + $0x1f8] sm:$0xff] }
  0xba   : > { %v1702_v31 = vcombine.high %v295_v25, %v299_v26  ;;  %v1704_v32 = vcombine.high %v296_v27, %v300_v28  ;;  %v1703_v38 = vcombine.low %v296_v27, %v300_v28  ;;  %v351_v21 = vld [vmem:[%s2319_s20 + $0x390] sm:$0xff] }
  0xbb   : > { %v359_v28 = vld [vmem:[%s2319_s20 + $0x3d0] sm:$0xff] }
  0xbc   : > { %1216 = vmatpush1.bf16.msra.mxu0 %v1147_v34  ;;  %1298 = vmatpush1.bf16.msra.mxu1 %v1153_v36  ;;  %v307_v34 = vld [vmem:[%s2319_s20 + $0x230] sm:$0xff]  ;;  %v308_v36 = vld [vmem:[%s2319_s20 + $0x238] sm:$0xff] }
  0xbd   : > { %1334 = vmatprep.subr.bf16.mxu0 %v1646_v35  ;;  %1416 = vmatprep.subr.bf16.mxu1 %v1648_v37  ;;  %v304_v35 = vld [vmem:[%s2319_s20 + $0x218] sm:$0xff]  ;;  %v1701_v37 = vcombine.low %v295_v25, %v299_v26  ;;  %v1710_v39 = vcombine.high %v303_v33, %v307_v34 }
  0xbe   : > { %v1712_v41 = vcombine.high %v304_v35, %v308_v36  ;;  %v1711_v47 = vcombine.low %v304_v35, %v308_v36  ;;  %v367_v36 = vld [vmem:[%s2319_s20 + $0x410] sm:$0xff] }
  0xbf   : > { %1794 = vmatmul.mubr.msk.bf16.vlgmr.msra.gmra.mrb[0].mxu0 %vm1141_vm1, %v2430_v40  ;;  %1796 = vmatmul.mubr.msk.bf16.vlgmr.msra.gmra.mrb[0].mxu1 %vm1141_vm1, %v2430_v40 }
  0xc0   : > { %1335 = vmatpush1.bf16.msra.mxu0 %v1645_v43  ;;  %1417 = vmatpush1.bf16.msra.mxu1 %v1647_v44  ;;  %v315_v43 = vld [vmem:[%s2319_s20 + $0x270] sm:$0xff]  ;;  %v312_v44 = vld [vmem:[%s2319_s20 + $0x258] sm:$0xff] }
  0xc1   : > { %1336 = vmatprep.subr.bf16.mxu0 %v1654_v45  ;;  %1418 = vmatprep.subr.bf16.mxu1 %v1656_v46  ;;  %v316_v45 = vld [vmem:[%s2319_s20 + $0x278] sm:$0xff]  ;;  %v1709_v46 = vcombine.low %v303_v33, %v307_v34  ;;  %v1718_v48 = vcombine.high %v311_v42, %v315_v43 }
  0xc2   : > { %1366 = vmatprep.mubr.bf16.mxu0 %v2364_v58  ;;  %1448 = vmatprep.mubr.bf16.mxu1 %v2364_v58  ;;  %v1671_v58 = vcombine.low %v264_v59, %v268_v60  ;;  %v1720_v49 = vcombine.high %v312_v44, %v316_v45  ;;  %v1719_v56 = vcombine.low %v312_v44, %v316_v45  ;;  %v327_v60 = vld [vmem:[%s2319_s20 + $0x2d0] sm:$0xff] }
  0xc3   : > { %v375_v45 = vld [vmem:[%s2319_s20 + $0x450] sm:$0xff] }
  0xc4   : > { %1337 = vmatpush1.bf16.msra.mxu0 %v1653_v51  ;;  %1419 = vmatpush1.bf16.msra.mxu1 %v1655_v52  ;;  %v323_v51 = vld [vmem:[%s2319_s20 + $0x2b0] sm:$0xff]  ;;  %v320_v52 = vld [vmem:[%s2319_s20 + $0x298] sm:$0xff] }
  0xc5   : > { %1338 = vmatprep.subr.bf16.mxu0 %v1662_v53  ;;  %1420 = vmatprep.subr.bf16.mxu1 %v1664_v55  ;;  %v324_v53 = vld [vmem:[%s2319_s20 + $0x2b8] sm:$0xff]  ;;  %v1717_v55 = vcombine.low %v311_v42, %v315_v43  ;;  %v1726_v57 = vcombine.high %v319_v50, %v323_v51 }
  0xc6   : > { %v1728_v59 = vcombine.high %v320_v52, %v324_v53  ;;  %v1727_v2 = vcombine.low %v320_v52, %v324_v53  ;;  %v383_v53 = vld [vmem:[%s2319_s20 + $0x490] sm:$0x77] }
  0xc8   : > { %1339 = vmatpush1.bf16.msra.mxu0 %v1661_v61  ;;  %1421 = vmatpush1.bf16.msra.mxu1 %v1663_v62  ;;  %v331_v61 = vld [vmem:[%s2319_s20 + $0x2f0] sm:$0xff]  ;;  %v328_v62 = vld [vmem:[%s2319_s20 + $0x2d8] sm:$0xff] }
  0xc9   : > { %1340 = vmatprep.subr.bf16.mxu0 %v1670_v63  ;;  %1422 = vmatprep.subr.bf16.mxu1 %v1672_v1  ;;  %v332_v63 = vld [vmem:[%s2319_s20 + $0x2f8] sm:$0xff]  ;;  %v1725_v1 = vcombine.low %v319_v50, %v323_v51  ;;  %v1734_v3 = vcombine.high %v327_v60, %v331_v61 }
  0xca   : > { %v1736_v4 = vcombine.high %v328_v62, %v332_v63  ;;  %v1735_v9 = vcombine.low %v328_v62, %v332_v63 }
  0xcc   : > { %1341 = vmatpush1.bf16.msra.mxu0 %v1669_v6  ;;  %1423 = vmatpush1.bf16.msra.mxu1 %v1671_v58  ;;  %v339_v6 = vld [vmem:[%s2319_s20 + $0x330] sm:$0xff]  ;;  %v336_v58 = vld [vmem:[%s2319_s20 + $0x318] sm:$0xff] }
  0xcd   : > { %1342 = vmatprep.subr.bf16.mxu0 %v1678_v7  ;;  %1424 = vmatprep.subr.bf16.mxu1 %v1680_v8  ;;  %v340_v7 = vld [vmem:[%s2319_s20 + $0x338] sm:$0xff]  ;;  %v1733_v8 = vcombine.low %v327_v60, %v331_v61  ;;  %v1742_v10 = vcombine.high %v335_v5, %v339_v6  ;;  %v1789_v60 = vcombine.low %v383_v53, %v383_v53 }
  0xce   : > { %v1744_v11 = vcombine.high %v336_v58, %v340_v7  ;;  %v1743_v18 = vcombine.low %v336_v58, %v340_v7 }
  0xd0   : > { %1343 = vmatpush1.bf16.msra.mxu0 %v1677_v13  ;;  %1425 = vmatpush1.bf16.msra.mxu1 %v1679_v14  ;;  %v347_v13 = vld [vmem:[%s2319_s20 + $0x370] sm:$0xff]  ;;  %v344_v14 = vld [vmem:[%s2319_s20 + $0x358] sm:$0xff] }
  0xd1   : > { %1344 = vmatprep.subr.bf16.mxu0 %v1686_v15  ;;  %1426 = vmatprep.subr.bf16.mxu1 %v1688_v17  ;;  %v348_v15 = vld [vmem:[%s2319_s20 + $0x378] sm:$0xff]  ;;  %v1741_v17 = vcombine.low %v335_v5, %v339_v6  ;;  %v1750_v19 = vcombine.high %v343_v12, %v347_v13 }
  0xd2   : > { %v1752_v20 = vcombine.high %v344_v14, %v348_v15  ;;  %v1751_v25 = vcombine.low %v344_v14, %v348_v15 }
  0xd4   : > { %1345 = vmatpush1.bf16.msra.mxu0 %v1685_v22  ;;  %1427 = vmatpush1.bf16.msra.mxu1 %v1687_v23  ;;  %v355_v22 = vld [vmem:[%s2319_s20 + $0x3b0] sm:$0xff]  ;;  %v352_v23 = vld [vmem:[%s2319_s20 + $0x398] sm:$0xff] }
  0xd5   : > { %1346 = vmatprep.subr.bf16.mxu0 %v1694_v24  ;;  %1428 = vmatprep.subr.bf16.mxu1 %v1696_v54  ;;  %v356_v24 = vld [vmem:[%s2319_s20 + $0x3b8] sm:$0xff]  ;;  %v1749_v54 = vcombine.low %v343_v12, %v347_v13  ;;  %v1758_v26 = vcombine.high %v351_v21, %v355_v22 }
  0xd6   : > { %v1760_v27 = vcombine.high %v352_v23, %v356_v24  ;;  %v1759_v33 = vcombine.low %v352_v23, %v356_v24 }
  0xd8   : > { %1347 = vmatpush1.bf16.msra.mxu0 %v1693_v29  ;;  %1429 = vmatpush1.bf16.msra.mxu1 %v1695_v30  ;;  %v363_v29 = vld [vmem:[%s2319_s20 + $0x3f0] sm:$0xff]  ;;  %v360_v30 = vld [vmem:[%s2319_s20 + $0x3d8] sm:$0xff] }
  0xd9   : > { %1348 = vmatprep.subr.bf16.mxu0 %v1702_v31  ;;  %1430 = vmatprep.subr.bf16.mxu1 %v1704_v32  ;;  %v364_v31 = vld [vmem:[%s2319_s20 + $0x3f8] sm:$0xff]  ;;  %v1757_v32 = vcombine.low %v351_v21, %v355_v22  ;;  %v1766_v34 = vcombine.high %v359_v28, %v363_v29 }
  0xda   : > { %v1768_v35 = vcombine.high %v360_v30, %v364_v31  ;;  %v1767_v42 = vcombine.low %v360_v30, %v364_v31 }
  0xdc   : > { %1349 = vmatpush1.bf16.msra.mxu0 %v1701_v37  ;;  %1431 = vmatpush1.bf16.msra.mxu1 %v1703_v38  ;;  %v371_v37 = vld [vmem:[%s2319_s20 + $0x430] sm:$0xff]  ;;  %v368_v38 = vld [vmem:[%s2319_s20 + $0x418] sm:$0xff] }
  0xdd   : > { %1350 = vmatprep.subr.bf16.mxu0 %v1710_v39  ;;  %1432 = vmatprep.subr.bf16.mxu1 %v1712_v41  ;;  %v372_v39 = vld [vmem:[%s2319_s20 + $0x438] sm:$0xff]  ;;  %v1765_v41 = vcombine.low %v359_v28, %v363_v29  ;;  %v1774_v43 = vcombine.high %v367_v36, %v371_v37 }
  0xde   : > { %v1776_v44 = vcombine.high %v368_v38, %v372_v39  ;;  %v1775_v50 = vcombine.low %v368_v38, %v372_v39 }
  0xe0   : > { %1351 = vmatpush1.bf16.msra.mxu0 %v1709_v46  ;;  %1433 = vmatpush1.bf16.msra.mxu1 %v1711_v47  ;;  %v379_v46 = vld [vmem:[%s2319_s20 + $0x470] sm:$0xff]  ;;  %v376_v47 = vld [vmem:[%s2319_s20 + $0x458] sm:$0xff] }
  0xe1   : > { %1352 = vmatprep.subr.bf16.mxu0 %v1718_v48  ;;  %1434 = vmatprep.subr.bf16.mxu1 %v1720_v49  ;;  %v380_v48 = vld [vmem:[%s2319_s20 + $0x478] sm:$0xff]  ;;  %v1773_v49 = vcombine.low %v367_v36, %v371_v37  ;;  %v1782_v51 = vcombine.high %v375_v45, %v379_v46 }
  0xe2   : > { %v1784_v52 = vcombine.high %v376_v47, %v380_v48 }
  0xe4   : > { %1353 = vmatpush1.bf16.msra.mxu0 %v1717_v55  ;;  %1435 = vmatpush1.bf16.msra.mxu1 %v1719_v56  ;;  %v384_v55 = vld [vmem:[%s2319_s20 + $0x498] sm:$0x77]  ;;  %v1781_v56 = vcombine.low %v375_v45, %v379_v46 }
  0xe5   : > { %1354 = vmatprep.subr.bf16.mxu0 %v1726_v57  ;;  %1436 = vmatprep.subr.bf16.mxu1 %v1728_v59  ;;  %v1783_v57 = vcombine.low %v376_v47, %v380_v48  ;;  %v1790_v59 = vcombine.high %v383_v53, %v383_v53  ;;  %v1792_v61 = vcombine.high %v384_v55, %v384_v55 }
  0xe6   : > { %v1791_v62 = vcombine.low %v384_v55, %v384_v55 }
  0xe8   : > { %1355 = vmatpush1.bf16.msra.mxu0 %v1725_v1  ;;  %1437 = vmatpush1.bf16.msra.mxu1 %v1727_v2  ;;  %v1165_v63 = vsel %vm1145_vm0, %v1791_v62, 0 }
  0xe9   : > { %1356 = vmatprep.subr.bf16.mxu0 %v1734_v3  ;;  %1438 = vmatprep.subr.bf16.mxu1 %v1736_v4 }
  0xec   : > { %1357 = vmatpush1.bf16.msra.mxu0 %v1733_v8  ;;  %1439 = vmatpush1.bf16.msra.mxu1 %v1735_v9 }
  0xed   : > { %1358 = vmatprep.subr.bf16.mxu0 %v1742_v10  ;;  %1440 = vmatprep.subr.bf16.mxu1 %v1744_v11 }
  0xf0   : > { %1359 = vmatpush1.bf16.msra.mxu0 %v1741_v17  ;;  %1441 = vmatpush1.bf16.msra.mxu1 %v1743_v18 }
  0xf1   : > { %1360 = vmatprep.subr.bf16.mxu0 %v1750_v19  ;;  %1442 = vmatprep.subr.bf16.mxu1 %v1752_v20 }
  0xf4   : > { %1361 = vmatpush1.bf16.msra.mxu0 %v1749_v54  ;;  %1443 = vmatpush1.bf16.msra.mxu1 %v1751_v25 }
  0xf5   : > { %1362 = vmatprep.subr.bf16.mxu0 %v1758_v26  ;;  %1444 = vmatprep.subr.bf16.mxu1 %v1760_v27 }
  0xf8   : > { %1363 = vmatpush1.bf16.msra.mxu0 %v1757_v32  ;;  %1445 = vmatpush1.bf16.msra.mxu1 %v1759_v33 }
  0xf9   : > { %1364 = vmatprep.subr.bf16.mxu0 %v1766_v34  ;;  %1446 = vmatprep.subr.bf16.mxu1 %v1768_v35 }
  0xfc   : > { %1365 = vmatpush1.bf16.msra.mxu0 %v1765_v41  ;;  %1447 = vmatpush1.bf16.msra.mxu1 %v1767_v42 }
  0xfd   : > { %1375 = vmatprep.subr.bf16.mxu0 %v1774_v43  ;;  %1457 = vmatprep.subr.bf16.mxu1 %v1776_v44 }
  0xff   : > { %1367 = vmatmul.mubr.bf16.vlgmr.msra.gmra.mrb[4].mxu0 %v2410_v16  ;;  %1449 = vmatmul.mubr.bf16.vlgmr.msra.gmra.mrb[4].mxu1 %v2410_v16  ;;  %v1159_v16 = vsel %vm1145_vm0, %v1789_v60, 0 }
 0x100   : > { %1376 = vmatpush1.bf16.msra.mxu0 %v1773_v49  ;;  %1458 = vmatpush1.bf16.msra.mxu1 %v1775_v50 }
 0x101   : > { %1377 = vmatprep.subr.bf16.mxu0 %v1782_v51  ;;  %1459 = vmatprep.subr.bf16.mxu1 %v1784_v52 }
 0x102   : > { %1407 = vmatprep.mubr.bf16.mxu0 %v2113_v0  ;;  %1489 = vmatprep.mubr.bf16.mxu1 %v2113_v0 }
 0x104   : > { %1378 = vmatpush1.bf16.msra.mxu0 %v1781_v56  ;;  %1460 = vmatpush1.bf16.msra.mxu1 %v1783_v57 }
 0x105   : > { %1797 = vmatprep.subr.msk.bf16.mxu0 %vm1145_vm0, %v1790_v59  ;;  %1799 = vmatprep.subr.msk.bf16.mxu1 %vm1145_vm0, %v1792_v61 }
 0x108   : > { %1380 = vmatpush1.bf16.msra.mxu0 %v1159_v16  ;;  %1462 = vmatpush1.bf16.msra.mxu1 %v1165_v63 }
 0x10b   : > { %1798 = vmatmul.mubr.msk.bf16.vlgmr.msra.gmra.mrb[4].mxu0 %vm1141_vm1, %v2430_v40  ;;  %1800 = vmatmul.mubr.msk.bf16.vlgmr.msra.gmra.mrb[4].mxu1 %vm1141_vm1, %v2430_v40 }
 0x10d   : > { %v389_v0 = vpop.permute.xlu0 %388 }
 0x192   : > { %v1245_v1 = vpop.f32.mrb[0].mxu0  ;;  %v1327_v3 = vpop.f32.mrb[0].mxu1 }
 0x193   : > { %v1808_v2 = vadd.f32 %v1245_v1, %v389_v0  ;;  %v1247_v4 = vpop.f32.mrb[1].mxu0  ;;  %v1810_v5 = vadd.f32 %v1327_v3, %v389_v0  ;;  %v1329_v58 = vpop.f32.mrb[1].mxu1 }
 0x194   : > { %v1809_v6 = vadd.f32 %v1247_v4, %v389_v0  ;;  %v1249_v7 = vpop.f32.mrb[2].mxu0  ;;  %v1811_v8 = vadd.f32 %v1329_v58, %v389_v0  ;;  %v1331_v9 = vpop.f32.mrb[2].mxu1 }
 0x195   : > { %1498 = vst [vmem:[%s231_s23] sm:$0xff] %v1808_v2  ;;  %v1250_v10 = vpop.f32.mrb[3].mxu0  ;;  %1500 = vst [vmem:[%s231_s23 + $0x10] sm:$0xff] %v1810_v5  ;;  %v1332_v11 = vpop.f32.mrb[3].mxu1 }
 0x196   : > { %1499 = vst [vmem:[%s231_s23 + $0x8] sm:$0xff] %v1809_v6  ;;  %1501 = vst [vmem:[%s231_s23 + $0x18] sm:$0xff] %v1811_v8 }
 0x1de   : > { %v1409_v40 = vpop.f32.mrb[4].mxu0  ;;  %v1491_v13 = vpop.f32.mrb[4].mxu1 }
 0x1df   : > { %v1812_v12 = vadd.f32 %v1409_v40, %v389_v0  ;;  %v1411_v14 = vpop.f32.mrb[5].mxu0  ;;  %v1814_v15 = vadd.f32 %v1491_v13, %v389_v0  ;;  %v1493_v18 = vpop.f32.mrb[5].mxu1 }
 0x1e0   : > { %v1813_v17 = vadd.f32 %v1411_v14, %v389_v0  ;;  %v1413_v19 = vpop.f32.mrb[6].mxu0  ;;  %v1815_v20 = vadd.f32 %v1493_v18, %v389_v0  ;;  %v1495_v21 = vpop.f32.mrb[6].mxu1 }
 0x1e1   : > { %1502 = vst [vmem:[%s231_s23 + $0x20] sm:$0xff] %v1812_v12  ;;  %v1414_v22 = vpop.f32.mrb[7].mxu0  ;;  %1504 = vst [vmem:[%s231_s23 + $0x30] sm:$0xff] %v1814_v15  ;;  %v1496_v23 = vpop.f32.mrb[7].mxu1 }
 0x1e2   : > { %1503 = vst [vmem:[%s231_s23 + $0x28] sm:$0xff] %v1813_v17  ;;  %1505 = vst [vmem:[%s231_s23 + $0x38] sm:$0xff] %v1815_v20 }
 0x1e3   : > { %2032 = shalt.err (!%p2029_p9)
}
 0x1e4   : > { %s2033_s19 = scalar_lea.hbm %s2523_s28, 1024  ;;  %s2037_s5 = scalar_lea.hbm %s2574_s3, 6144 }
 0x1e5   : > { %p2034_p8 = scmp.ne.s32.totalorder %s2523_s28, %s2033_s19  ;;  %p2038_p7 = scmp.lt.u32.totalorder %s2523_s28, %s2574_s3 }
 0x1e6   : > { %p2039_p12 = scmp.lt.u32.totalorder %s2037_s5, %s2033_s19  ;;  %p2041_p6 = scmp.lt.u32.totalorder %s2033_s19, %s2523_s28 }
 0x1e7   : > { %p2035_p1 = pnand %p2034_p8, %p2593_p10 }
 0x1e8   : > { %p2040_p3 = por %p2039_p12, %p2038_p7 }
 0x1e9   : > { %p2036_p4 = pneg %p2035_p1 }
 0x1ea   : > { %p2042_p11 = por %p2041_p6, %p2040_p3 }
 0x1ec   : > { %p2043_p13 = pnand %p2042_p11, %p2036_p4 }
 0x1ee   : > { %2046 = shalt.err (!%p2043_p13)
}
 0x1ef   : > { %1844 = dma.vmem_to_hbm [thread:$0]  (%p2593_p10), %s2525_s29, 1024, %s2523_s28, %s1507_s15  }
 0x1f0 PF: > { %p1866_p0 = scmp.ge.s32.totalorder %s2105_s17, 2  ;;  %s1535_s21 = sand.u32 1, %s2085_s12  }
 0x1f1   : > { %p2594_p5 = scmp.ne.s32.totalorder %s2585_s25, 0  ;;  %s1536_s23 = scalar_lea.sflag [#allocation4], %s1535_s21 }
 0x1f3   : > { %p1858_p2 = pnand %p1866_p0, %p2594_p5 }
 0x1f5   : > { %2080 = dma.done.wait (!%p1858_p2), %s1536_s23, 1024  }
 0x1f6   : > { %2082 = vsyncadd (!%p1858_p2), %s1536_s23, 4294966272  ;;  %s20_s17 = sadd.s32 1, %s2105_s17   ;;  %s2595_s12 = smov %s2089_s13 }
 0x1f7   : > { %p17_p9 = scmp.ge.s32.totalorder %s20_s17, 8   ;;  %s2596_s13 = smov %s2093_s14 }
 0x1f8   : > { %s2597_s14 = smov %s2282_s11  ;;  %s2598_s15 = smov %s2101_s16 }
 0x1f9   : > { %s2599_s16 = smov %s2601_s22  ;;  %19 = sbr.rel (!%p17_p9) target bundleno = 7 (0x7), region = 85 }
 0x200   :  { %1541 = vsyncpa [#allocation3], 1 }
 0x201   :  { %1543 = vsyncpa [#allocation3 + $0x1], 1 }
 0x202   :  { %1544 = vsyncpa [#allocation6], 1 }
 0x203   :  { %1545 = vsyncpa [#allocation4], 1 }
 0x204   :  { %1547 = vsyncpa [#allocation4 + $0x1], 1 }

// kernel: deepvo_forward.10
= control target key start
LH: loop header
LB: loop body
LE: loop exit
PB: predicated region body
PF: predicated region fallthrough
CT: control target
= control target key end

     0   :  { %8 = vsyncpa [#allocation3], 0  ;;  %s1557_s0 = inlined_call_operand.hbm [shape: bf16[1,200,1536], index: 0, kind: input, shape index: {}]   ;;  %s1558_s1 = inlined_call_operand.hbm [shape: bf16[16,200], index: 1, kind: input, shape index: {}]   ;;  %s1559_s2 = inlined_call_operand.hbm [shape: f32[16,1], index: 2, kind: input, shape index: {}]   ;;  %s1560_s3 = inlined_call_operand.hbm [shape: f32[1,16,1536], index: 3, kind: output, shape index: {}]  }
   0x1   :  { %10 = vsyncpa [#allocation3 + $0x1], 0 }
   0x2   :  { %11 = vsyncpa [#allocation6], 0 }
   0x3   :  { %12 = vsyncpa [#allocation4], 0 }
   0x4   :  { %14 = vsyncpa [#allocation4 + $0x1], 0  ;;  %s1253_s12 = smov 0   ;;  %s1255_s13 = smov 0  }
   0x5   :  { %s1257_s14 = smov 0   ;;  %s1259_s15 = smov 0  }
   0x6   :  { %s1261_s16 = smov 0   ;;  %s1263_s17 = smov 0  }
   0x7 LB: > { %s795_s18 = sadd.s32 4294967295, %s1218_s17   ;;  %s796_s19 = sadd.s32 4294967294, %s1218_s17   ;;  %s1218_s17 = sphi %s1263_s17, %s20_s17   ;;  %s1214_s16 = sphi %s1261_s16, %s1581_s16   ;;  %s1210_s15 = sphi %s1259_s15, %s1580_s15   ;;  %s1206_s14 = sphi %s1257_s14, %s1579_s14   ;;  %s1202_s13 = sphi %s1255_s13, %s1578_s13   ;;  %s1198_s12 = sphi %s1253_s12, %s1577_s12  }
   0x8   : > { %p48_p0 = scmp.ne.s32.totalorder %s1206_s14, %s1202_s13  ;;  %p49_p1 = scmp.eq.s32.totalorder %s1218_s17, 0 }
   0x9   : > { %p54_p2 = scmp.ne.s32.totalorder %s1202_s13, %s1198_s12  ;;  %p1290_p3 = scmp.eq.s32.totalorder %s795_s18, 0 }
   0xa   : > { %p1294_p4 = por %p49_p1, %p48_p0  ;;  %p122_p5 = scmp.eq.s32.totalorder %s795_s18, 2 }
   0xb   : > { %s1565_s20 = scalar_select %p1290_p3, 1, 0 }
   0xc   : > { %p1300_p6 = por %p1290_p3, %p54_p2  ;;  %p128_p7 = scmp.eq.s32.totalorder %s796_s19, 2 }
   0xd   : > { %p1304_p8 = por %p122_p5, %p48_p0  ;;  %p797_p9 = scmp.ge.s32.totalorder %s1218_s17, 1 }
   0xe   : > { %s1567_s22 = scalar_select %p1300_p6, 1, 0 }
   0xf   : > { %s1568_s23 = scalar_select %p1304_p8, 1, 0 }
  0x10   : > { %p1309_p10 = por %p128_p7, %p54_p2  ;;  %p135_p11 = scmp.lt.s32.totalorder %s1218_s17, 4 }
  0x11   : > { %s1220_s26 = smov [#allocation5]   ;;  %p903_p0 = scmp.lt.s32.totalorder %s1218_s17, 3 }
  0x12   : > { %s1569_s24 = scalar_select %p1309_p10, 1, 0 }
  0x13   : > { %p1314_p12 = pnand %p797_p9, %p135_p11  ;;  %s147_s27 = sshll.u32 %s1220_s26, 4  ;;  %s1318_s27 = int_to_ptr.vmem [resolvable:$true] %s147_s27 }
  0x14   : > { %p1331_p2 = pnand %p903_p0, %p1294_p4  ;;  %s1221_s30 = smov [#allocation7]  }
  0x15   : > { %p886_p13 = pneg %p1314_p12  ;;  %s160_s4 = sshll.u32 %s1221_s30, 4  ;;  %s1335_s4 = int_to_ptr.vmem [resolvable:$true] %s160_s4 }
  0x16   : > { %s1046_s7 = scalar_lea.hbm %s1558_s1, 256 }
  0x17   : > { %p1325_p1 = pnand %p886_p13, %p1290_p3  ;;  %p1047_p5 = scmp.ne.s32.totalorder %s1558_s1, %s1046_s7 }
  0x18   : > { %p1053_p11 = scmp.lt.u32.totalorder %s1046_s7, %s1558_s1 }
  0x19   : > { %p1048_p7 = pneg %p1325_p1 }
  0x1b   : > { %p1049_p4 = pnand %p1048_p7, %p1047_p5 }
  0x1d   : > { %p1050_p9 = pneg %p1049_p4 }
  0x1f   : > { %p1055_p13 = pnand %p1053_p11, %p1050_p9 }
  0x21   : > { %1058 = shalt.err (!%p1055_p13)
}
  0x22   : > { %s1059_s18 = scalar_lea.vmem %s1318_s27, 256  ;;  %p1067_p3 = scmp.lt.s32.totalorder %s1318_s27, %s1318_s27 }
  0x23   : > { %p1060_p0 = scmp.ne.s32.totalorder %s1318_s27, %s1059_s18  ;;  %p1068_p5 = scmp.lt.s32.totalorder %s1059_s18, %s1059_s18 }
  0x25   : > { %p1062_p10 = pnand %p1060_p0, %p1048_p7  ;;  %p1069_p4 = por %p1068_p5, %p1067_p3 }
  0x27   : > { %p1063_p8 = pneg %p1062_p10 }
  0x29   : > { %p1070_p6 = pnand %p1069_p4, %p1063_p8 }
  0x2b   : > { %1073 = shalt.err (!%p1070_p6)
}
  0x2c   : > { %s1222_s19 = smov 128   ;;  %s1223_s21 = smov 8  }
  0x2d   : > { %889 = dma.hbm_to_vmem [thread:$0]  (!%p1325_p1), %s1558_s1, 256, %s1318_s27, [#allocation6], %s1222_s19, %s1222_s19, %s1223_s21  }
  0x2e   : > { %s1074_s7 = scalar_lea.hbm %s1559_s2, 256 }
  0x2f   : > { %p1075_p3 = scmp.ne.s32.totalorder %s1559_s2, %s1074_s7  ;;  %p1081_p10 = scmp.lt.u32.totalorder %s1074_s7, %s1559_s2 }
  0x31   : > { %p1077_p6 = pnand %p1075_p3, %p1048_p7 }
  0x33   : > { %p1078_p8 = pneg %p1077_p6 }
  0x35   : > { %p1083_p9 = pnand %p1081_p10, %p1078_p8 }
  0x37   : > { %1086 = shalt.err (!%p1083_p9)
}
  0x38   : > { %s1087_s27 = scalar_lea.vmem %s1335_s4, 256  ;;  %p1095_p5 = scmp.lt.s32.totalorder %s1335_s4, %s1335_s4 }
  0x39   : > { %p1088_p11 = scmp.ne.s32.totalorder %s1335_s4, %s1087_s27  ;;  %p1096_p4 = scmp.lt.s32.totalorder %s1087_s27, %s1087_s27 }
  0x3b   : > { %p1090_p13 = pnand %p1088_p11, %p1048_p7  ;;  %p1097_p3 = por %p1096_p4, %p1095_p5 }
  0x3d   : > { %p1091_p0 = pneg %p1090_p13 }
  0x3f   : > { %p1098_p6 = pnand %p1097_p3, %p1091_p0 }
  0x41   : > { %1101 = shalt.err (!%p1098_p6)
}
  0x42   : > { %892 = dma.hbm_to_vmem [thread:$0]  (!%p1325_p1), %s1559_s2, 256, %s1335_s4, [#allocation6], %s1222_s19, %s1222_s19, %s1223_s21  }
  0x43   : > { %s41_s30 = sadd.s32 1, %s1206_s14  ;;  %s29_s5 = sadd.s32 1, %s1214_s16 }
  0x44   : > { %s174_s6 = sand.u32 1, %s1206_s14   ;;  %p30_p7 = scmp.ge.s32.totalorder %s29_s5, 3 }
  0x45   : > { %s872_s7 = smul.u32 400, %s174_s6  ;;  %s870_s8 = sshll.u32 %s1214_s16, 8 }
  0x46   : > { %s1583_s5 = smov (%p30_p7, %s29_s5), 0  ;;  %s1398_s10 = scalar_lea.hbm %s1557_s0, %s870_s8 }
  0x47   : > { %s37_s4 = ssub.s32 %s1214_s16, %s1583_s5  ;;  %s178_s19 = scalar_lea.vmem [#allocation2], %s872_s7 }
  0x48   : > { %s187_s21 = sshll.u32 %s178_s19, 4  ;;  %p39_p1 = scmp.eq.s32.totalorder %s37_s4, 0  ;;  %s1402_s21 = int_to_ptr.vmem [resolvable:$true] %s187_s21 }
  0x49   : > { %s1407_s27 = scalar_lea.sflag [#allocation3], %s174_s6  ;;  %s1102_s18 = scalar_lea.hbm %s1398_s10, 6400 }
  0x4a   : > { %s1405_s11 = scalar_select %p39_p1, %s1206_s14, %s41_s30  }
  0x4b   : > { %p1103_p8 = scmp.ne.s32.totalorder %s1398_s10, %s1102_s18  ;;  %p1104_p10 = pneg %p1331_p2 }
  0x4c   : > { %s1107_s7 = scalar_lea.hbm %s1557_s0, 19200  ;;  %p1108_p13 = scmp.lt.u32.totalorder %s1398_s10, %s1557_s0 }
  0x4d   : > { %p1105_p9 = pnand %p1104_p10, %p1103_p8  ;;  %p1109_p0 = scmp.lt.u32.totalorder %s1107_s7, %s1102_s18 }
  0x4e   : > { %p1111_p4 = scmp.lt.u32.totalorder %s1102_s18, %s1398_s10 }
  0x4f   : > { %p1106_p11 = pneg %p1105_p9  ;;  %p1110_p5 = por %p1109_p0, %p1108_p13 }
  0x51   : > { %p1112_p3 = por %p1111_p4, %p1110_p5 }
  0x53   : > { %p1113_p6 = pnand %p1112_p3, %p1106_p11 }
  0x55   : > { %1116 = shalt.err (!%p1113_p6)
}
  0x56   : > { %s1117_s30 = scalar_lea.vmem %s1402_s21, 6400  ;;  %s1224_s6 = smov [#allocation2]  }
  0x57   : > { %p1118_p7 = scmp.ne.s32.totalorder %s1402_s21, %s1117_s30  ;;  %s1122_s4 = sshll.u32 %s1224_s6, 4  ;;  %s1123_s4 = int_to_ptr.vmem [resolvable:$false] %s1122_s4 }
  0x58   : > { %s1124_s19 = scalar_lea.vmem %s1123_s4, 12800  ;;  %p1125_p9 = scmp.lt.s32.totalorder %s1402_s21, %s1123_s4 }
  0x59   : > { %p1120_p1 = pnand %p1118_p7, %p1104_p10  ;;  %p1126_p13 = scmp.lt.s32.totalorder %s1124_s19, %s1117_s30 }
  0x5b   : > { %p1121_p8 = pneg %p1120_p1  ;;  %p1127_p0 = por %p1126_p13, %p1125_p9 }
  0x5d   : > { %p1128_p5 = pnand %p1127_p0, %p1121_p8 }
  0x5f   : > { %1131 = shalt.err (!%p1128_p5)
}
  0x60   : > { %s1225_s18 = smov 768   ;;  %s1226_s26 = smov 256  }
  0x61   : > { %s1227_s8 = smov 16   ;;  %199 = sbr.rel (%p1314_p12) target bundleno = 395 (0x18b), region = 32 }
  0x62   : > { %896 = dma.hbm_to_vmem [thread:$0]  (!%p1331_p2), %s1398_s10, 6400, %s1402_s21, %s1407_s27, %s1225_s18, %s1226_s26, %s1227_s8  }
  0x63   : > { %s1438_s7 = sand.u32 (!%p1314_p12), 1, %s1202_s13   ;;  %p1573_p10 = scmp.ne.s32.totalorder (!%p1314_p12), %s1567_s22, 0 }
  0x64   : > { %s873_s28 = smul.u32 (!%p1314_p12), 400, %s1438_s7  ;;  %s202_s9 = scalar_lea.sflag (!%p1314_p12), [#allocation3], %s1438_s7 }
  0x66   : > { %s1442_s30 = scalar_lea.vmem (!%p1314_p12), [#allocation2], %s873_s28 }
  0x68   : > { %1185 = dma.done.wait (%p1573_p10), %s202_s9, 6400  }
  0x69   : > { %1187 = vsyncadd (%p1573_p10), %s202_s9, 4294960896  ;;  %p1574_p2 = scmp.ne.s32.totalorder %s1565_s20, 0 }
  0x6b   : > { %1189 = dma.done.wait (%p1574_p2), [#allocation6], 512  }
  0x6c   : > { %1191 = vsyncadd (%p1574_p2), [#allocation6], 4294966784  ;;  %v1228_v0 = vmov 0   ;;  %v967_v1 = vld [vmem:[%s1442_s30 + $0x4] ss:$16 sps:$4 sm:$0xff]   ;;  %vm562_vm0 = vcmask 588800  }
  0x6d   : > { %966 = vset.pattern.permute.xlu0 %v1228_v0  ;;  %v969_v2 = vld [vmem:[%s1442_s30 + $0xc] ss:$16 sps:$4 sm:$0xff]   ;;  %579 = vmatprep.subr.bf16.mxu0 %v967_v1  ;;  %v971_v3 = vld [vmem:[%s1442_s30] ss:$16 sps:$4 sm:$0xff]   ;;  %v972_v4 = vld [vmem:[%s1442_s30 + $0x8] ss:$16 sps:$4 sm:$0xff]  }
  0x6e   : > { %622 = vmatprep.subr.bf16.mxu1 %v969_v2  ;;  %v973_v5 = vld [vmem:[%s1442_s30 + $0x24] ss:$16 sps:$4 sm:$0xff]   ;;  %580 = vmatpush1.bf16.msra.mxu0 %v971_v3  ;;  %v975_v6 = vld [vmem:[%s1442_s30 + $0x2c] ss:$16 sps:$4 sm:$0xff]   ;;  %v977_v7 = vld [vmem:[%s1442_s30 + $0x20] ss:$16 sps:$4 sm:$0xff]  }
  0x6f   : > { %623 = vmatpush1.bf16.msra.mxu1 %v972_v4  ;;  %581 = vmatprep.subr.bf16.mxu0 %v973_v5  ;;  %v978_v8 = vld [vmem:[%s1442_s30 + $0x28] ss:$16 sps:$4 sm:$0xff]   ;;  %v979_v9 = vld [vmem:[%s1442_s30 + $0x44] ss:$16 sps:$4 sm:$0xff]   ;;  %v981_v10 = vld [vmem:[%s1442_s30 + $0x4c] ss:$16 sps:$4 sm:$0xff]  }
  0x70   : > { %624 = vmatprep.subr.bf16.mxu1 %v975_v6  ;;  %v983_v11 = vld [vmem:[%s1442_s30 + $0x40] ss:$16 sps:$4 sm:$0xff]   ;;  %v984_v12 = vld [vmem:[%s1442_s30 + $0x48] ss:$16 sps:$4 sm:$0xff]   ;;  %v985_v13 = vld [vmem:[%s1442_s30 + $0x64] ss:$16 sps:$4 sm:$0xff]  }
  0x71   : > { %v987_v14 = vld [vmem:[%s1442_s30 + $0x6c] ss:$16 sps:$4 sm:$0xff]   ;;  %v989_v15 = vld [vmem:[%s1442_s30 + $0x60] ss:$16 sps:$4 sm:$0xff]   ;;  %v990_v16 = vld [vmem:[%s1442_s30 + $0x68] ss:$16 sps:$4 sm:$0xff]  }
  0x72   : > { %582 = vmatpush1.bf16.msra.mxu0 %v977_v7  ;;  %v991_v17 = vld [vmem:[%s1442_s30 + $0x84] ss:$16 sps:$4 sm:$0xff]   ;;  %v993_v18 = vld [vmem:[%s1442_s30 + $0x8c] ss:$16 sps:$4 sm:$0xff]   ;;  %v995_v19 = vld [vmem:[%s1442_s30 + $0x80] ss:$16 sps:$4 sm:$0xff]  }
  0x73   : > { %625 = vmatpush1.bf16.msra.mxu1 %v978_v8  ;;  %583 = vmatprep.subr.bf16.mxu0 %v979_v9  ;;  %v996_v20 = vld [vmem:[%s1442_s30 + $0x88] ss:$16 sps:$4 sm:$0xff]   ;;  %v997_v21 = vld [vmem:[%s1442_s30 + $0xa4] ss:$16 sps:$4 sm:$0xff]   ;;  %v999_v22 = vld [vmem:[%s1442_s30 + $0xac] ss:$16 sps:$4 sm:$0xff]  }
  0x74   : > { %626 = vmatprep.subr.bf16.mxu1 %v981_v10  ;;  %v1001_v23 = vld [vmem:[%s1442_s30 + $0xa0] ss:$16 sps:$4 sm:$0xff]   ;;  %v1002_v24 = vld [vmem:[%s1442_s30 + $0xa8] ss:$16 sps:$4 sm:$0xff]   ;;  %v1003_v25 = vld [vmem:[%s1442_s30 + $0xc4] ss:$16 sps:$4 sm:$0xff]  }
  0x75   : > { %v1005_v26 = vld [vmem:[%s1442_s30 + $0xcc] ss:$16 sps:$4 sm:$0xff]   ;;  %v1007_v27 = vld [vmem:[%s1442_s30 + $0xc0] ss:$16 sps:$4 sm:$0xff]   ;;  %v1008_v28 = vld [vmem:[%s1442_s30 + $0xc8] ss:$16 sps:$4 sm:$0xff]  }
  0x76   : > { %584 = vmatpush1.bf16.msra.mxu0 %v983_v11  ;;  %v1009_v29 = vld [vmem:[%s1442_s30 + $0xe4] ss:$16 sps:$4 sm:$0xff]   ;;  %v1011_v30 = vld [vmem:[%s1442_s30 + $0xec] ss:$16 sps:$4 sm:$0xff]   ;;  %v1013_v31 = vld [vmem:[%s1442_s30 + $0xe0] ss:$16 sps:$4 sm:$0xff]  }
  0x77   : > { %627 = vmatpush1.bf16.msra.mxu1 %v984_v12  ;;  %585 = vmatprep.subr.bf16.mxu0 %v985_v13  ;;  %v1014_v32 = vld [vmem:[%s1442_s30 + $0xe8] ss:$16 sps:$4 sm:$0xff]   ;;  %v1015_v33 = vld [vmem:[%s1442_s30 + $0x104] ss:$16 sps:$4 sm:$0xff]   ;;  %v1017_v34 = vld [vmem:[%s1442_s30 + $0x10c] ss:$16 sps:$4 sm:$0xff]  }
  0x78   : > { %628 = vmatprep.subr.bf16.mxu1 %v987_v14  ;;  %v1019_v35 = vld [vmem:[%s1442_s30 + $0x100] ss:$16 sps:$4 sm:$0xff]   ;;  %v1020_v36 = vld [vmem:[%s1442_s30 + $0x108] ss:$16 sps:$4 sm:$0xff]   ;;  %v1021_v37 = vld [vmem:[%s1442_s30 + $0x124] ss:$16 sps:$4 sm:$0xff]  }
  0x79   : > { %v1023_v38 = vld [vmem:[%s1442_s30 + $0x12c] ss:$16 sps:$4 sm:$0xff]   ;;  %v291_v40 = vld [vmem:[#allocation7] sm:$0xff]  ;;  %v1026_v42 = vld [vmem:[%s1442_s30 + $0x128] ss:$16 sps:$4 sm:$0xff]   ;;  %vm566_vm1 = vcmask 1043456  }
  0x7a   : > { %586 = vmatpush1.bf16.msra.mxu0 %v989_v15  ;;  %v1045_v39 = vld [vmem:[#allocation5 + $0x4] ss:$8 sps:$4 sm:$0xff]   ;;  %v1025_v41 = vld [vmem:[%s1442_s30 + $0x120] ss:$16 sps:$4 sm:$0xff]   ;;  %295 = vperm.xlu0 %966, %v291_v40   ;;  %v292_v45 = vld [vmem:[#allocation7 + $0x8] sm:$0xff]  ;;  %s806_s20 = sshll.u32 %s1438_s7, 6 }
  0x7b   : > { %629 = vmatpush1.bf16.msra.mxu1 %v990_v16  ;;  %587 = vmatprep.subr.bf16.mxu0 %v991_v17  ;;  %v1027_v43 = vld [vmem:[%s1442_s30 + $0x144] ss:$16 sps:$4 sm:$0xff]   ;;  %v1029_v44 = vld [vmem:[%s1442_s30 + $0x14c] ss:$16 sps:$4 sm:$0xff]   ;;  %v1031_v46 = vld [vmem:[%s1442_s30 + $0x140] ss:$16 sps:$4 sm:$0xff]  }
  0x7c   : > { %630 = vmatprep.subr.bf16.mxu1 %v993_v18  ;;  %862 = vmatprep.mubr.msk.bf16.mxu0 %vm562_vm0, %v1045_v39  ;;  %v1032_v47 = vld [vmem:[%s1442_s30 + $0x148] ss:$16 sps:$4 sm:$0xff]   ;;  %v1033_v48 = vld [vmem:[%s1442_s30 + $0x164] ss:$16 sps:$4 sm:$0xff]   ;;  %v1035_v49 = vld [vmem:[%s1442_s30 + $0x16c] ss:$16 sps:$4 sm:$0xff]  }
  0x7d   : > { %864 = vmatprep.mubr.msk.bf16.mxu1 %vm562_vm0, %v1045_v39  ;;  %v289_v50 = vld [vmem:[%s1442_s30 + $0x180] sm:$0xff]  ;;  %v290_v51 = vld [vmem:[%s1442_s30 + $0x188] sm:$0xff]  ;;  %s235_s22 = scalar_lea.vmem [#allocation8], %s806_s20  ;;  %s871_s29 = sshll.u32 %s1210_s15, 9 }
  0x7e   : > { %588 = vmatpush1.bf16.msra.mxu0 %v995_v19  ;;  %300 = vperm.xlu0 %966, %v292_v45   ;;  %v1037_v52 = vld [vmem:[%s1442_s30 + $0x160] ss:$16 sps:$4 sm:$0xff]   ;;  %v1038_v53 = vld [vmem:[%s1442_s30 + $0x168] ss:$16 sps:$4 sm:$0xff]   ;;  %v858_v54 = vcombine.high %v289_v50, %v289_v50  ;;  %v860_v55 = vcombine.high %v290_v51, %v290_v51  ;;  %v857_v56 = vcombine.low %v289_v50, %v289_v50  ;;  %s689_s25 = sshll.u32 %s235_s22, 4  ;;  %s1509_s21 = scalar_lea.hbm %s1560_s3, %s871_s29  ;;  %s1504_s25 = int_to_ptr.vmem [resolvable:$true] %s689_s25 }
  0x7f   : > { %631 = vmatpush1.bf16.msra.mxu1 %v996_v20  ;;  %589 = vmatprep.subr.bf16.mxu0 %v997_v21  ;;  %v859_v57 = vcombine.low %v290_v51, %v290_v51  ;;  %v1043_v60 = vld [vmem:[#allocation5] ss:$8 sps:$4 sm:$0xff]   ;;  %s674_s27 = scalar_lea.sflag [#allocation4], %s1438_s7  ;;  %s1132_s6 = scalar_lea.vmem %s1504_s25, 1024 }
  0x80   : > { %632 = vmatprep.subr.bf16.mxu1 %v999_v22  ;;  %v568_v58 = vsel %vm566_vm1, %v857_v56, 0  ;;  %p1133_p12 = scmp.ne.s32.totalorder %s1504_s25, %s1132_s6  ;;  %p1575_p11 = scmp.ne.s32.totalorder %s1568_s23, 0 }
  0x81   : > { %v574_v59 = vsel %vm566_vm1, %v859_v57, 0  ;;  %s1229_s4 = smov [#allocation8]  }
  0x82   : > { %590 = vmatpush1.bf16.msra.mxu0 %v1001_v23  ;;  %p1134_p4 = pnand %p1133_p12, %p1575_p11  ;;  %s1136_s19 = sshll.u32 %s1229_s4, 4  ;;  %s1137_s19 = int_to_ptr.vmem [resolvable:$false] %s1136_s19 }
  0x83   : > { %633 = vmatpush1.bf16.msra.mxu1 %v1002_v24  ;;  %591 = vmatprep.subr.bf16.mxu0 %v1003_v25  ;;  %s1138_s18 = scalar_lea.vmem %s1137_s19, 2048  ;;  %p1139_p6 = scmp.lt.s32.totalorder %s1504_s25, %s1137_s19 }
  0x84   : > { %634 = vmatprep.subr.bf16.mxu1 %v1005_v26  ;;  %p1135_p3 = pneg %p1134_p4  ;;  %p1140_p7 = scmp.lt.s32.totalorder %s1138_s18, %s1132_s6 }
  0x86   : > { %592 = vmatpush1.bf16.msra.mxu0 %v1007_v27  ;;  %p1141_p1 = por %p1140_p7, %p1139_p6 }
  0x87   : > { %635 = vmatpush1.bf16.msra.mxu1 %v1008_v28  ;;  %593 = vmatprep.subr.bf16.mxu0 %v1009_v29 }
  0x88   : > { %636 = vmatprep.subr.bf16.mxu1 %v1011_v30  ;;  %p1142_p8 = pnand %p1141_p1, %p1135_p3 }
  0x8a   : > { %594 = vmatpush1.bf16.msra.mxu0 %v1013_v31 }
  0x8b   : > { %637 = vmatpush1.bf16.msra.mxu1 %v1014_v32  ;;  %595 = vmatprep.subr.bf16.mxu0 %v1015_v33 }
  0x8c   : > { %638 = vmatprep.subr.bf16.mxu1 %v1017_v34 }
  0x8e   : > { %596 = vmatpush1.bf16.msra.mxu0 %v1019_v35 }
  0x8f   : > { %639 = vmatpush1.bf16.msra.mxu1 %v1020_v36  ;;  %597 = vmatprep.subr.bf16.mxu0 %v1021_v37 }
  0x90   : > { %640 = vmatprep.subr.bf16.mxu1 %v1023_v38 }
  0x92   : > { %598 = vmatpush1.bf16.msra.mxu0 %v1025_v41 }
  0x93   : > { %641 = vmatpush1.bf16.msra.mxu1 %v1026_v42  ;;  %599 = vmatprep.subr.bf16.mxu0 %v1027_v43 }
  0x94   : > { %642 = vmatprep.subr.bf16.mxu1 %v1029_v44 }
  0x96   : > { %600 = vmatpush1.bf16.msra.mxu0 %v1031_v46 }
  0x97   : > { %643 = vmatpush1.bf16.msra.mxu1 %v1032_v47  ;;  %601 = vmatprep.subr.bf16.mxu0 %v1033_v48 }
  0x98   : > { %644 = vmatprep.subr.bf16.mxu1 %v1035_v49 }
  0x9a   : > { %602 = vmatpush1.bf16.msra.mxu0 %v1037_v52 }
  0x9b   : > { %645 = vmatpush1.bf16.msra.mxu1 %v1038_v53  ;;  %861 = vmatprep.subr.msk.bf16.mxu0 %vm566_vm1, %v858_v54 }
  0x9c   : > { %863 = vmatprep.subr.msk.bf16.mxu1 %vm566_vm1, %v860_v55 }
  0x9e   : > { %604 = vmatpush1.bf16.msra.mxu0 %v568_v58 }
  0x9f   : > { %647 = vmatpush1.bf16.msra.mxu1 %v574_v59 }
  0xa1   : > { %612 = vmatmul.mubr.bf16.vlgmr.msra.gmra.mrb[0].mxu0 %v1043_v60 }
  0xa2   : > { %655 = vmatmul.mubr.bf16.vlgmr.msra.gmra.mrb[0].mxu1 %v1043_v60 }
  0xf9   : > { %v296_v61 = vpop.permute.xlu0 %295 }
  0xfd   : > { %v301_v62 = vpop.permute.xlu0 %300 }
 0x174   : > { %v613_v63 = vpop.f32.mrb[0].mxu0 }
 0x175   : > { %v656_v0 = vpop.f32.mrb[0].mxu1  ;;  %v614_v1 = vadd.f32 %v613_v63, %v296_v61  ;;  %v615_v3 = vpop.f32.mrb[1].mxu0 }
 0x176   : > { %v657_v2 = vadd.f32 %v656_v0, %v296_v61  ;;  %v658_v4 = vpop.f32.mrb[1].mxu1  ;;  %v616_v5 = vadd.f32 %v615_v3, %v296_v61  ;;  %v617_v7 = vpop.f32.mrb[2].mxu0 }
 0x177   : > { %v659_v6 = vadd.f32 %v658_v4, %v296_v61  ;;  %v660_v8 = vpop.f32.mrb[2].mxu1  ;;  %665 = vst [vmem:[%s235_s22] sm:$0xff] %v614_v1  ;;  %v618_v9 = vadd.f32 %v617_v7, %v301_v62  ;;  %v619_v11 = vpop.f32.mrb[3].mxu0 }
 0x178   : > { %667 = vst [vmem:[%s235_s22 + $0x10] sm:$0xff] %v657_v2  ;;  %v661_v10 = vadd.f32 %v660_v8, %v301_v62  ;;  %v662_v12 = vpop.f32.mrb[3].mxu1  ;;  %666 = vst [vmem:[%s235_s22 + $0x8] sm:$0xff] %v616_v5  ;;  %v620_v13 = vadd.f32 %v619_v11, %v301_v62 }
 0x179   : > { %668 = vst [vmem:[%s235_s22 + $0x18] sm:$0xff] %v659_v6  ;;  %v663_v14 = vadd.f32 %v662_v12, %v301_v62  ;;  %669 = vst [vmem:[%s235_s22 + $0x20] sm:$0xff] %v618_v9 }
 0x17a   : > { %671 = vst [vmem:[%s235_s22 + $0x30] sm:$0xff] %v661_v10  ;;  %670 = vst [vmem:[%s235_s22 + $0x28] sm:$0xff] %v620_v13 }
 0x17b   : > { %672 = vst [vmem:[%s235_s22 + $0x38] sm:$0xff] %v663_v14 }
 0x17c   : > { %1145 = shalt.err (!%p1142_p8)
}
 0x17d   : > { %s1146_s26 = scalar_lea.hbm %s1509_s21, 1024  ;;  %s1150_s9 = scalar_lea.hbm %s1560_s3, 3072 }
 0x17e   : > { %p1147_p9 = scmp.ne.s32.totalorder %s1509_s21, %s1146_s26  ;;  %p1151_p5 = scmp.lt.u32.totalorder %s1509_s21, %s1560_s3 }
 0x17f   : > { %p1152_p10 = scmp.lt.u32.totalorder %s1150_s9, %s1146_s26  ;;  %p1154_p12 = scmp.lt.u32.totalorder %s1146_s26, %s1509_s21 }
 0x180   : > { %p1148_p13 = pnand %p1147_p9, %p1575_p11 }
 0x181   : > { %p1153_p2 = por %p1152_p10, %p1151_p5 }
 0x182   : > { %p1149_p0 = pneg %p1148_p13 }
 0x183   : > { %p1155_p4 = por %p1154_p12, %p1153_p2 }
 0x185   : > { %p1156_p3 = pnand %p1155_p4, %p1149_p0 }
 0x187   : > { %1159 = shalt.err (!%p1156_p3)
}
 0x188   : > { %s1230_s22 = smov 512   ;;  %s1231_s29 = smov 1536  }
 0x189   : > { %s1232_s15 = smov 32  }
 0x18a   : > { %884 = dma.vmem_to_hbm [thread:$0]  (%p1575_p11), %s1504_s25, 1024, %s1509_s21, %s674_s27, %s1230_s22, %s1231_s29, %s1232_s15  }
 0x18b PF: > { %p906_p6 = scmp.ge.s32.totalorder %s1218_s17, 2  ;;  %s704_s10 = sand.u32 1, %s1198_s12  }
 0x18c   : > { %p1576_p7 = scmp.ne.s32.totalorder %s1569_s24, 0  ;;  %s705_s6 = scalar_lea.sflag [#allocation4], %s704_s10 }
 0x18e   : > { %p898_p1 = pnand %p906_p6, %p1576_p7 }
 0x190   : > { %1193 = dma.done.wait (!%p898_p1), %s705_s6, 1024  }
 0x191   : > { %1195 = vsyncadd (!%p898_p1), %s705_s6, 4294966272  ;;  %s20_s17 = sadd.s32 1, %s1218_s17   ;;  %s1577_s12 = smov %s1202_s13 }
 0x192   : > { %p17_p8 = scmp.ge.s32.totalorder %s20_s17, 5   ;;  %s1578_s13 = smov %s1206_s14 }
 0x193   : > { %s1579_s14 = smov %s1405_s11  ;;  %s1580_s15 = smov %s1214_s16 }
 0x194   : > { %s1581_s16 = smov %s1583_s5  ;;  %19 = sbr.rel (!%p17_p8) target bundleno = 7 (0x7), region = 85 }
 0x19b   :  { %710 = vsyncpa [#allocation3], 1 }
 0x19c   :  { %712 = vsyncpa [#allocation3 + $0x1], 1 }
 0x19d   :  { %713 = vsyncpa [#allocation6], 1 }
 0x19e   :  { %714 = vsyncpa [#allocation4], 1 }
 0x19f   :  { %716 = vsyncpa [#allocation4 + $0x1], 1 }

// kernel: deepvo_forward.11
= control target key start
LH: loop header
LB: loop body
LE: loop exit
PB: predicated region body
PF: predicated region fallthrough
CT: control target
= control target key end

     0   :  { %8 = vsyncpa [#allocation3], 0  ;;  %s1448_s0 = inlined_call_operand.hbm [shape: bf16[1,400,384], index: 0, kind: input, shape index: {}]   ;;  %s1449_s1 = inlined_call_operand.hbm [shape: bf16[32,400], index: 1, kind: input, shape index: {}]   ;;  %s1450_s2 = inlined_call_operand.hbm [shape: f32[32,1], index: 2, kind: input, shape index: {}]   ;;  %s1451_s3 = inlined_call_operand.hbm [shape: f32[1,32,384], index: 3, kind: output, shape index: {}]  }
   0x1   :  { %10 = vsyncpa [#allocation3 + $0x1], 0 }
   0x2   :  { %11 = vsyncpa [#allocation6], 0 }
   0x3   :  { %12 = vsyncpa [#allocation4], 0 }
   0x4   :  { %14 = vsyncpa [#allocation4 + $0x1], 0  ;;  %s1156_s12 = smov 0   ;;  %s1158_s13 = smov 0  }
   0x5   :  { %s1160_s14 = smov 0   ;;  %s1162_s15 = smov 0  }
   0x6   :  { %s1164_s16 = smov 0   ;;  %s1166_s17 = smov 0  }
   0x7 LB: > { %s734_s18 = sadd.s32 4294967295, %s1119_s17   ;;  %s735_s19 = sadd.s32 4294967294, %s1119_s17   ;;  %s1119_s17 = sphi %s1166_s17, %s20_s17   ;;  %s1115_s16 = sphi %s1164_s16, %s1472_s16   ;;  %s1111_s15 = sphi %s1162_s15, %s1471_s15   ;;  %s1107_s14 = sphi %s1160_s14, %s1470_s14   ;;  %s1103_s13 = sphi %s1158_s13, %s1469_s13   ;;  %s1099_s12 = sphi %s1156_s12, %s1468_s12  }
   0x8   : > { %p48_p0 = scmp.ne.s32.totalorder %s1107_s14, %s1103_s13  ;;  %p49_p1 = scmp.eq.s32.totalorder %s1119_s17, 0 }
   0x9   : > { %p54_p2 = scmp.ne.s32.totalorder %s1103_s13, %s1099_s12  ;;  %p1193_p3 = scmp.eq.s32.totalorder %s734_s18, 0 }
   0xa   : > { %p1197_p4 = por %p49_p1, %p48_p0  ;;  %p122_p5 = scmp.eq.s32.totalorder %s734_s18, 2 }
   0xb   : > { %s1456_s20 = scalar_select %p1193_p3, 1, 0 }
   0xc   : > { %p1203_p6 = por %p1193_p3, %p54_p2  ;;  %p128_p7 = scmp.eq.s32.totalorder %s735_s19, 2 }
   0xd   : > { %p1207_p8 = por %p122_p5, %p48_p0  ;;  %p736_p9 = scmp.ge.s32.totalorder %s1119_s17, 1 }
   0xe   : > { %s1458_s22 = scalar_select %p1203_p6, 1, 0 }
   0xf   : > { %s1459_s23 = scalar_select %p1207_p8, 1, 0 }
  0x10   : > { %p1212_p10 = por %p128_p7, %p54_p2  ;;  %p135_p11 = scmp.lt.s32.totalorder %s1119_s17, 4 }
  0x11   : > { %s1121_s26 = smov [#allocation5]   ;;  %p843_p0 = scmp.lt.s32.totalorder %s1119_s17, 3 }
  0x12   : > { %s1460_s24 = scalar_select %p1212_p10, 1, 0 }
  0x13   : > { %p1217_p12 = pnand %p736_p9, %p135_p11  ;;  %s147_s27 = sshll.u32 %s1121_s26, 4  ;;  %s1221_s27 = int_to_ptr.vmem [resolvable:$true] %s147_s27 }
  0x14   : > { %p1234_p2 = pnand %p843_p0, %p1197_p4  ;;  %s1122_s30 = smov [#allocation7]  }
  0x15   : > { %p826_p13 = pneg %p1217_p12  ;;  %s160_s4 = sshll.u32 %s1122_s30, 4  ;;  %s1238_s4 = int_to_ptr.vmem [resolvable:$true] %s160_s4 }
  0x16   : > { %s947_s7 = scalar_lea.hbm %s1449_s1, 1024 }
  0x17   : > { %p1228_p1 = pnand %p826_p13, %p1193_p3  ;;  %p948_p5 = scmp.ne.s32.totalorder %s1449_s1, %s947_s7 }
  0x18   : > { %p954_p11 = scmp.lt.u32.totalorder %s947_s7, %s1449_s1 }
  0x19   : > { %p949_p7 = pneg %p1228_p1 }
  0x1b   : > { %p950_p4 = pnand %p949_p7, %p948_p5 }
  0x1d   : > { %p951_p9 = pneg %p950_p4 }
  0x1f   : > { %p956_p13 = pnand %p954_p11, %p951_p9 }
  0x21   : > { %959 = shalt.err (!%p956_p13)
}
  0x22   : > { %s960_s18 = scalar_lea.vmem %s1221_s27, 1024  ;;  %p968_p3 = scmp.lt.s32.totalorder %s1221_s27, %s1221_s27 }
  0x23   : > { %p961_p0 = scmp.ne.s32.totalorder %s1221_s27, %s960_s18  ;;  %p969_p5 = scmp.lt.s32.totalorder %s960_s18, %s960_s18 }
  0x25   : > { %p963_p10 = pnand %p961_p0, %p949_p7  ;;  %p970_p4 = por %p969_p5, %p968_p3 }
  0x27   : > { %p964_p8 = pneg %p963_p10 }
  0x29   : > { %p971_p6 = pnand %p970_p4, %p964_p8 }
  0x2b   : > { %974 = shalt.err (!%p971_p6)
}
  0x2c   : > { %s1123_s19 = smov 256   ;;  %s1124_s21 = smov 16  }
  0x2d   : > { %829 = dma.hbm_to_vmem [thread:$0]  (!%p1228_p1), %s1449_s1, 1024, %s1221_s27, [#allocation6], %s1123_s19, %s1123_s19, %s1124_s21  }
  0x2e   : > { %s975_s7 = scalar_lea.hbm %s1450_s2, 512 }
  0x2f   : > { %p976_p3 = scmp.ne.s32.totalorder %s1450_s2, %s975_s7  ;;  %p982_p10 = scmp.lt.u32.totalorder %s975_s7, %s1450_s2 }
  0x31   : > { %p978_p6 = pnand %p976_p3, %p949_p7 }
  0x33   : > { %p979_p8 = pneg %p978_p6 }
  0x35   : > { %p984_p9 = pnand %p982_p10, %p979_p8 }
  0x37   : > { %987 = shalt.err (!%p984_p9)
}
  0x38   : > { %s988_s27 = scalar_lea.vmem %s1238_s4, 512  ;;  %p996_p5 = scmp.lt.s32.totalorder %s1238_s4, %s1238_s4 }
  0x39   : > { %p989_p11 = scmp.ne.s32.totalorder %s1238_s4, %s988_s27  ;;  %p997_p4 = scmp.lt.s32.totalorder %s988_s27, %s988_s27 }
  0x3b   : > { %p991_p13 = pnand %p989_p11, %p949_p7  ;;  %p998_p3 = por %p997_p4, %p996_p5 }
  0x3d   : > { %p992_p0 = pneg %p991_p13 }
  0x3f   : > { %p999_p6 = pnand %p998_p3, %p992_p0 }
  0x41   : > { %1002 = shalt.err (!%p999_p6)
}
  0x42   : > { %s1125_s18 = smov 128   ;;  %s1126_s19 = smov 8  }
  0x43   : > { %832 = dma.hbm_to_vmem [thread:$0]  (!%p1228_p1), %s1450_s2, 512, %s1238_s4, [#allocation6], %s1125_s18, %s1125_s18, %s1126_s19  }
  0x44   : > { %s41_s30 = sadd.s32 1, %s1107_s14  ;;  %s29_s5 = sadd.s32 1, %s1115_s16 }
  0x45   : > { %s174_s6 = sand.u32 1, %s1107_s14   ;;  %p30_p7 = scmp.ge.s32.totalorder %s29_s5, 3 }
  0x46   : > { %s812_s7 = smul.u32 200, %s174_s6  ;;  %s740_s8 = sshll.u32 %s1115_s16, 6 }
  0x47   : > { %s1474_s5 = smov (%p30_p7, %s29_s5), 0  ;;  %s1301_s11 = scalar_lea.hbm %s1448_s0, %s740_s8 }
  0x48   : > { %s37_s28 = ssub.s32 %s1115_s16, %s1474_s5  ;;  %s178_s4 = scalar_lea.vmem [#allocation2], %s812_s7 }
  0x49   : > { %s186_s27 = sshll.u32 %s178_s4, 4  ;;  %p39_p1 = scmp.eq.s32.totalorder %s37_s28, 0  ;;  %s1305_s27 = int_to_ptr.vmem [resolvable:$true] %s186_s27 }
  0x4a   : > { %s1310_s19 = scalar_lea.sflag [#allocation3], %s174_s6  ;;  %s1003_s21 = scalar_lea.hbm %s1301_s11, 3200 }
  0x4b   : > { %s1308_s18 = scalar_select %p39_p1, %s1107_s14, %s41_s30  }
  0x4c   : > { %p1004_p8 = scmp.ne.s32.totalorder %s1301_s11, %s1003_s21  ;;  %p1005_p10 = pneg %p1234_p2 }
  0x4d   : > { %s1008_s7 = scalar_lea.hbm %s1448_s0, 9600  ;;  %p1009_p13 = scmp.lt.u32.totalorder %s1301_s11, %s1448_s0 }
  0x4e   : > { %p1006_p9 = pnand %p1005_p10, %p1004_p8  ;;  %p1010_p0 = scmp.lt.u32.totalorder %s1008_s7, %s1003_s21 }
  0x4f   : > { %p1012_p4 = scmp.lt.u32.totalorder %s1003_s21, %s1301_s11 }
  0x50   : > { %p1007_p11 = pneg %p1006_p9  ;;  %p1011_p5 = por %p1010_p0, %p1009_p13 }
  0x52   : > { %p1013_p3 = por %p1012_p4, %p1011_p5 }
  0x54   : > { %p1014_p6 = pnand %p1013_p3, %p1007_p11 }
  0x56   : > { %1017 = shalt.err (!%p1014_p6)
}
  0x57   : > { %s1018_s30 = scalar_lea.vmem %s1305_s27, 3200  ;;  %s1127_s6 = smov [#allocation2]  }
  0x58   : > { %p1019_p7 = scmp.ne.s32.totalorder %s1305_s27, %s1018_s30  ;;  %s1023_s28 = sshll.u32 %s1127_s6, 4  ;;  %s1024_s28 = int_to_ptr.vmem [resolvable:$false] %s1023_s28 }
  0x59   : > { %s1025_s4 = scalar_lea.vmem %s1024_s28, 6400  ;;  %p1026_p9 = scmp.lt.s32.totalorder %s1305_s27, %s1024_s28 }
  0x5a   : > { %p1021_p1 = pnand %p1019_p7, %p1005_p10  ;;  %p1027_p13 = scmp.lt.s32.totalorder %s1025_s4, %s1018_s30 }
  0x5c   : > { %p1022_p8 = pneg %p1021_p1  ;;  %p1028_p0 = por %p1027_p13, %p1026_p9 }
  0x5e   : > { %p1029_p5 = pnand %p1028_p0, %p1022_p8 }
  0x60   : > { %1032 = shalt.err (!%p1029_p5)
}
  0x61   : > { %s1128_s21 = smov 192   ;;  %s1129_s26 = smov 64  }
  0x62   : > { %s1130_s8 = smov 4   ;;  %198 = sbr.rel (%p1217_p12) target bundleno = 388 (0x184), region = 32 }
  0x63   : > { %836 = dma.hbm_to_vmem [thread:$0]  (!%p1234_p2), %s1301_s11, 3200, %s1305_s27, %s1310_s19, %s1128_s21, %s1129_s26, %s1130_s8  }
  0x64   : > { %s1341_s7 = sand.u32 (!%p1217_p12), 1, %s1103_s13   ;;  %p1464_p10 = scmp.ne.s32.totalorder (!%p1217_p12), %s1458_s22, 0 }
  0x65   : > { %s813_s9 = smul.u32 (!%p1217_p12), 200, %s1341_s7  ;;  %s201_s10 = scalar_lea.sflag (!%p1217_p12), [#allocation3], %s1341_s7 }
  0x67   : > { %s1345_s30 = scalar_lea.vmem (!%p1217_p12), [#allocation2], %s813_s9 }
  0x69   : > { %1086 = dma.done.wait (%p1464_p10), %s201_s10, 3200  }
  0x6a   : > { %1088 = vsyncadd (%p1464_p10), %s201_s10, 4294964096  ;;  %p1465_p2 = scmp.ne.s32.totalorder %s1456_s20, 0 }
  0x6c   : > { %1090 = dma.done.wait (%p1465_p2), [#allocation6], 1536  }
  0x6d   : > { %1092 = vsyncadd (%p1465_p2), [#allocation6], 4294965760  ;;  %v1131_v0 = vmov 0   ;;  %v910_v1 = vld [vmem:[%s1345_s30 + $0x40] sm:$0xff]   ;;  %v913_v4 = vld [vmem:[%s1345_s30 + $0x48] sm:$0xff]   ;;  %vm506_vm0 = vcmask 130048  }
  0x6e   : > { %562 = vmatprep.subr.bf16.mxu1 %v1131_v0  ;;  %908 = vset.pattern.permute.xlu0 %v1131_v0  ;;  %v911_v2 = vld [vmem:[%s1345_s30 + $0x80] sm:$0xff]   ;;  %v914_v5 = vld [vmem:[%s1345_s30 + $0x88] sm:$0xff]   ;;  %v916_v7 = vld [vmem:[%s1345_s30 + $0x50] sm:$0xff]   ;;  %s744_s20 = sshll.u32 %s1341_s7, 5  ;;  %s781_s29 = sshll.u32 %s1111_s15, 7 }
  0x6f   : > { %909 = vset.pattern.permute.xlu1 %v1131_v0  ;;  %784 = vmatprep.subr.bf16.mxu0 %v910_v1  ;;  %v912_v3 = vld [vmem:[%s1345_s30] sm:$0xff]   ;;  %v915_v6 = vld [vmem:[%s1345_s30 + $0x8] sm:$0xff]   ;;  %v917_v8 = vld [vmem:[%s1345_s30 + $0x90] sm:$0xff]   ;;  %s234_s22 = scalar_lea.vmem [#allocation8], %s744_s20  ;;  %s1400_s19 = scalar_lea.hbm %s1451_s3, %s781_s29 }
  0x70   : > { %563 = vmatpush1.bf16.msra.mxu1 %v911_v2  ;;  %785 = vmatpush3.bf16.msra.mxu0 %v912_v3  ;;  %v918_v9 = vld [vmem:[%s1345_s30 + $0x10] sm:$0xff]   ;;  %v919_v10 = vld [vmem:[%s1345_s30 + $0x58] sm:$0xff]   ;;  %v922_v13 = vld [vmem:[%s1345_s30 + $0x60] sm:$0xff]   ;;  %s630_s25 = sshll.u32 %s234_s22, 4  ;;  %s616_s6 = scalar_lea.sflag [#allocation4], %s1341_s7  ;;  %s1395_s25 = int_to_ptr.vmem [resolvable:$true] %s630_s25 }
  0x71   : > { %564 = vmatprep.subr.bf16.mxu1 %v1131_v0  ;;  %786 = vmatprep.subr.bf16.mxu0 %v913_v4  ;;  %v920_v11 = vld [vmem:[%s1345_s30 + $0x98] sm:$0xff]   ;;  %v923_v14 = vld [vmem:[%s1345_s30 + $0xa0] sm:$0xff]   ;;  %v925_v16 = vld [vmem:[%s1345_s30 + $0x68] sm:$0xff]   ;;  %s1033_s15 = scalar_lea.vmem %s1395_s25, 512  ;;  %p1466_p11 = scmp.ne.s32.totalorder %s1459_s23, 0 }
  0x72   : > { %v921_v12 = vld [vmem:[%s1345_s30 + $0x18] sm:$0xff]   ;;  %v924_v15 = vld [vmem:[%s1345_s30 + $0x20] sm:$0xff]   ;;  %v926_v17 = vld [vmem:[%s1345_s30 + $0xa8] sm:$0xff]   ;;  %p1034_p12 = scmp.ne.s32.totalorder %s1395_s25, %s1033_s15  ;;  %s1132_s28 = smov [#allocation8]  }
  0x73   : > { %v927_v18 = vld [vmem:[%s1345_s30 + $0x28] sm:$0xff]   ;;  %v928_v19 = vld [vmem:[%s1345_s30 + $0x70] sm:$0xff]   ;;  %v931_v22 = vld [vmem:[%s1345_s30 + $0x78] sm:$0xff]   ;;  %s1037_s4 = sshll.u32 %s1132_s28, 4  ;;  %s1038_s4 = int_to_ptr.vmem [resolvable:$false] %s1037_s4 }
  0x74   : > { %565 = vmatpush1.bf16.msra.mxu1 %v914_v5  ;;  %787 = vmatpush3.bf16.msra.mxu0 %v915_v6  ;;  %v929_v20 = vld [vmem:[%s1345_s30 + $0xb0] sm:$0xff]   ;;  %v932_v24 = vld [vmem:[%s1345_s30 + $0xb8] sm:$0xff]   ;;  %v937_v30 = vld [vmem:[%s1345_s30 + $0xc0] sm:$0xff]   ;;  %p1035_p4 = pnand %p1034_p12, %p1466_p11  ;;  %s1039_s21 = scalar_lea.vmem %s1038_s4, 1024 }
  0x75   : > { %566 = vmatprep.subr.bf16.mxu1 %v1131_v0  ;;  %788 = vmatprep.subr.bf16.mxu0 %v916_v7  ;;  %v930_v21 = vld [vmem:[%s1345_s30 + $0x30] sm:$0xff]   ;;  %v933_v26 = vld [vmem:[%s1345_s30 + $0x38] sm:$0xff]   ;;  %v297_v34 = vld [vmem:[#allocation7 + $0x18] sm:$0xff]  ;;  %p1040_p6 = scmp.lt.s32.totalorder %s1395_s25, %s1038_s4  ;;  %p1041_p7 = scmp.lt.s32.totalorder %s1039_s21, %s1033_s15 }
  0x76   : > { %v936_v23 = vld [vmem:[#allocation5 + $0x4] ss:$16 sps:$4 sm:$0xff]   ;;  %v940_v25 = vld [vmem:[#allocation5 + $0xc] ss:$16 sps:$4 sm:$0xff]   ;;  %v934_v29 = vld [vmem:[#allocation5] ss:$16 sps:$4 sm:$0xff]   ;;  %p1036_p3 = pneg %p1035_p4 }
  0x77   : > { %545 = vmatprep.mubr.bf16.mxu0 %v936_v23  ;;  %778 = vmatprep.mubr.msk.bf16.mxu1 %vm506_vm0, %v940_v25  ;;  %v294_v27 = vld [vmem:[#allocation7] sm:$0xff]  ;;  %v296_v28 = vld [vmem:[#allocation7 + $0x10] sm:$0xff]  ;;  %v295_v32 = vld [vmem:[#allocation7 + $0x8] sm:$0xff]  ;;  %p1042_p1 = por %p1041_p7, %p1040_p6 }
  0x78   : > { %567 = vmatpush1.bf16.msra.mxu1 %v917_v8  ;;  %789 = vmatpush3.bf16.msra.mxu0 %v918_v9  ;;  %v941_v31 = vld [vmem:[#allocation5 + $0x24] ss:$16 sps:$4 sm:$0xff]   ;;  %v938_v33 = vld [vmem:[#allocation5 + $0x8] ss:$16 sps:$4 sm:$0xff]   ;;  %v944_v35 = vld [vmem:[#allocation5 + $0x2c] ss:$16 sps:$4 sm:$0xff]  }
  0x79   : > { %568 = vmatprep.subr.bf16.mxu1 %v1131_v0  ;;  %790 = vmatprep.subr.bf16.mxu0 %v919_v10  ;;  %v943_v36 = vld [vmem:[#allocation5 + $0x20] ss:$16 sps:$4 sm:$0xff]   ;;  %v946_v37 = vld [vmem:[#allocation5 + $0x28] ss:$16 sps:$4 sm:$0xff]   ;;  %p1043_p8 = pnand %p1042_p1, %p1036_p3 }
  0x7a   : > { %300 = vperm.xlu0 %908, %v294_v27   ;;  %310 = vperm.xlu1 %909, %v296_v28  }
  0x7c   : > { %569 = vmatpush1.bf16.msra.mxu1 %v920_v11  ;;  %791 = vmatpush3.bf16.msra.mxu0 %v921_v12 }
  0x7d   : > { %570 = vmatprep.subr.bf16.mxu1 %v1131_v0  ;;  %792 = vmatprep.subr.bf16.mxu0 %v922_v13 }
  0x7e   : > { %305 = vperm.xlu0 %908, %v295_v32   ;;  %315 = vperm.xlu1 %909, %v297_v34  }
  0x80   : > { %571 = vmatpush1.bf16.msra.mxu1 %v923_v14  ;;  %793 = vmatpush3.bf16.msra.mxu0 %v924_v15 }
  0x81   : > { %572 = vmatprep.subr.bf16.mxu1 %v1131_v0  ;;  %794 = vmatprep.subr.bf16.mxu0 %v925_v16 }
  0x84   : > { %573 = vmatpush1.bf16.msra.mxu1 %v926_v17  ;;  %795 = vmatpush3.bf16.msra.mxu0 %v927_v18 }
  0x85   : > { %574 = vmatprep.subr.bf16.mxu1 %v1131_v0  ;;  %796 = vmatprep.subr.bf16.mxu0 %v928_v19 }
  0x88   : > { %575 = vmatpush1.bf16.msra.mxu1 %v929_v20  ;;  %797 = vmatpush3.bf16.msra.mxu0 %v930_v21 }
  0x89   : > { %576 = vmatprep.subr.bf16.mxu1 %v1131_v0  ;;  %798 = vmatprep.subr.bf16.mxu0 %v931_v22 }
  0x8c   : > { %577 = vmatpush1.bf16.msra.mxu1 %v932_v24  ;;  %799 = vmatpush3.bf16.msra.mxu0 %v933_v26 }
  0x8d   : > { %578 = vmatprep.subr.bf16.mxu1 %v1131_v0 }
  0x8f   : > { %546 = vmatmul.mubr.bf16.vlgmr.msra.gmra.mrb[0].mxu0 %v934_v29 }
  0x90   : > { %579 = vmatpush1.bf16.msra.mxu1 %v937_v30  ;;  %553 = vmatprep.mubr.bf16.mxu0 %v941_v31 }
  0x93   : > { %595 = vmatmul.mubr.bf16.vlgmr.msra.gmra.mrb[0].mxu1 %v938_v33 }
  0x94   : > { %779 = vmatprep.mubr.msk.bf16.mxu1 %vm506_vm0, %v944_v35 }
  0x97   : > { %554 = vmatmul.mubr.bf16.gmra.mrb[4].mxu0 %v943_v36 }
  0x9b   : > { %603 = vmatmul.mubr.bf16.gmra.mrb[4].mxu1 %v946_v37 }
  0xf9   : > { %v301_v38 = vpop.permute.xlu0 %300  ;;  %v311_v53 = vpop.permute.xlu1 %310 }
  0xfd   : > { %v306_v43 = vpop.permute.xlu0 %305  ;;  %v316_v0 = vpop.permute.xlu1 %315 }
 0x162   : > { %v800_v39 = vpop.f32.mrb[0].mxu0 }
 0x163   : > { %v801_v40 = vpop.f32.mrb[1].mxu0 }
 0x164   : > { %v802_v41 = vadd.f32 %v801_v40, %v800_v39  ;;  %v803_v42 = vpop.f32.mrb[2].mxu0 }
 0x165   : > { %v804_v44 = vpop.f32.mrb[3].mxu0 }
 0x166   : > { %v596_v45 = vpop.f32.mrb[0].mxu1  ;;  %v805_v46 = vadd.f32 %v804_v44, %v803_v42  ;;  %v548_v47 = vadd.f32 %v802_v41, %v301_v38 }
 0x167   : > { %v598_v48 = vpop.f32.mrb[1].mxu1 }
 0x168   : > { %v599_v49 = vpop.f32.mrb[2].mxu1  ;;  %v597_v50 = vadd.f32 %v596_v45, %v548_v47  ;;  %v551_v51 = vadd.f32 %v805_v46, %v306_v43 }
 0x169   : > { %v601_v52 = vpop.f32.mrb[3].mxu1 }
 0x16a   : > { %611 = vst [vmem:[%s234_s22] sm:$0xff] %v597_v50  ;;  %v600_v54 = vadd.f32 %v599_v49, %v551_v51  ;;  %v806_v55 = vpop.f32.mrb[4].mxu0 }
 0x16b   : > { %v807_v56 = vpop.f32.mrb[5].mxu0 }
 0x16c   : > { %612 = vst [vmem:[%s234_s22 + $0x8] sm:$0xff] %v600_v54  ;;  %v808_v57 = vadd.f32 %v807_v56, %v806_v55  ;;  %v809_v58 = vpop.f32.mrb[6].mxu0 }
 0x16d   : > { %v810_v59 = vpop.f32.mrb[7].mxu0 }
 0x16e   : > { %v604_v60 = vpop.f32.mrb[4].mxu1  ;;  %v811_v61 = vadd.f32 %v810_v59, %v809_v58  ;;  %v556_v62 = vadd.f32 %v808_v57, %v311_v53 }
 0x16f   : > { %v606_v63 = vpop.f32.mrb[5].mxu1 }
 0x170   : > { %v607_v1 = vpop.f32.mrb[6].mxu1  ;;  %v605_v2 = vadd.f32 %v604_v60, %v556_v62  ;;  %v559_v3 = vadd.f32 %v811_v61, %v316_v0 }
 0x171   : > { %v609_v4 = vpop.f32.mrb[7].mxu1 }
 0x172   : > { %613 = vst [vmem:[%s234_s22 + $0x10] sm:$0xff] %v605_v2  ;;  %v608_v5 = vadd.f32 %v607_v1, %v559_v3 }
 0x174   : > { %614 = vst [vmem:[%s234_s22 + $0x18] sm:$0xff] %v608_v5 }
 0x175   : > { %1046 = shalt.err (!%p1043_p8)
}
 0x176   : > { %s1047_s26 = scalar_lea.hbm %s1400_s19, 512  ;;  %s1051_s10 = scalar_lea.hbm %s1451_s3, 1536 }
 0x177   : > { %p1048_p9 = scmp.ne.s32.totalorder %s1400_s19, %s1047_s26  ;;  %p1052_p5 = scmp.lt.u32.totalorder %s1400_s19, %s1451_s3 }
 0x178   : > { %p1053_p10 = scmp.lt.u32.totalorder %s1051_s10, %s1047_s26  ;;  %p1055_p12 = scmp.lt.u32.totalorder %s1047_s26, %s1400_s19 }
 0x179   : > { %p1049_p13 = pnand %p1048_p9, %p1466_p11 }
 0x17a   : > { %p1054_p2 = por %p1053_p10, %p1052_p5 }
 0x17b   : > { %p1050_p0 = pneg %p1049_p13 }
 0x17c   : > { %p1056_p4 = por %p1055_p12, %p1054_p2 }
 0x17e   : > { %p1057_p3 = pnand %p1056_p4, %p1050_p0 }
 0x180   : > { %1060 = shalt.err (!%p1057_p3)
}
 0x181   : > { %s1133_s22 = smov 128   ;;  %s1134_s29 = smov 384  }
 0x182   : > { %s1135_s11 = smov 8  }
 0x183   : > { %824 = dma.vmem_to_hbm [thread:$0]  (%p1466_p11), %s1395_s25, 512, %s1400_s19, %s616_s6, %s1133_s22, %s1134_s29, %s1135_s11  }
 0x184 PF: > { %p846_p6 = scmp.ge.s32.totalorder %s1119_s17, 2  ;;  %s645_s27 = sand.u32 1, %s1099_s12  }
 0x185   : > { %p1467_p7 = scmp.ne.s32.totalorder %s1460_s24, 0  ;;  %s646_s15 = scalar_lea.sflag [#allocation4], %s645_s27 }
 0x187   : > { %p838_p1 = pnand %p846_p6, %p1467_p7 }
 0x189   : > { %1094 = dma.done.wait (!%p838_p1), %s646_s15, 512  }
 0x18a   : > { %1096 = vsyncadd (!%p838_p1), %s646_s15, 4294966784  ;;  %s20_s17 = sadd.s32 1, %s1119_s17   ;;  %s1468_s12 = smov %s1103_s13 }
 0x18b   : > { %p17_p8 = scmp.ge.s32.totalorder %s20_s17, 5   ;;  %s1469_s13 = smov %s1107_s14 }
 0x18c   : > { %s1470_s14 = smov %s1308_s18  ;;  %s1471_s15 = smov %s1115_s16 }
 0x18d   : > { %s1472_s16 = smov %s1474_s5  ;;  %19 = sbr.rel (!%p17_p8) target bundleno = 7 (0x7), region = 85 }
 0x194   :  { %651 = vsyncpa [#allocation3], 1 }
 0x195   :  { %653 = vsyncpa [#allocation3 + $0x1], 1 }
 0x196   :  { %654 = vsyncpa [#allocation6], 1 }
 0x197   :  { %655 = vsyncpa [#allocation4], 1 }
 0x198   :  { %657 = vsyncpa [#allocation4 + $0x1], 1 }

// kernel: deepvo_forward.12
= control target key start
LH: loop header
LB: loop body
LE: loop exit
PB: predicated region body
PF: predicated region fallthrough
CT: control target
= control target key end

     0   :  { %8 = vsyncpa [#allocation3], 0  ;;  %s1359_s0 = inlined_call_operand.hbm [shape: bf16[1,288,384], index: 0, kind: input, shape index: {}]   ;;  %s1360_s1 = inlined_call_operand.hbm [shape: bf16[32,288], index: 1, kind: input, shape index: {}]   ;;  %s1361_s2 = inlined_call_operand.hbm [shape: f32[32,1], index: 2, kind: input, shape index: {}]   ;;  %s1362_s3 = inlined_call_operand.hbm [shape: f32[1,32,384], index: 3, kind: output, shape index: {}]  }
   0x1   :  { %10 = vsyncpa [#allocation3 + $0x1], 0 }
   0x2   :  { %11 = vsyncpa [#allocation6], 0 }
   0x3   :  { %12 = vsyncpa [#allocation4], 0 }
   0x4   :  { %14 = vsyncpa [#allocation4 + $0x1], 0  ;;  %s1082_s12 = smov 0   ;;  %s1084_s13 = smov 0  }
   0x5   :  { %s1086_s14 = smov 0   ;;  %s1088_s15 = smov 0  }
   0x6   :  { %s1090_s16 = smov 0   ;;  %s1092_s17 = smov 0  }
   0x7 LB: > { %s670_s18 = sadd.s32 4294967295, %s1046_s17   ;;  %s671_s19 = sadd.s32 4294967294, %s1046_s17   ;;  %s1046_s17 = sphi %s1092_s17, %s20_s17   ;;  %s1042_s16 = sphi %s1090_s16, %s1383_s16   ;;  %s1038_s15 = sphi %s1088_s15, %s1382_s15   ;;  %s1034_s14 = sphi %s1086_s14, %s1381_s14   ;;  %s1030_s13 = sphi %s1084_s13, %s1380_s13   ;;  %s1026_s12 = sphi %s1082_s12, %s1379_s12  }
   0x8   : > { %p48_p0 = scmp.ne.s32.totalorder %s1034_s14, %s1030_s13  ;;  %p49_p1 = scmp.eq.s32.totalorder %s1046_s17, 0 }
   0x9   : > { %p54_p2 = scmp.ne.s32.totalorder %s1030_s13, %s1026_s12  ;;  %p1119_p3 = scmp.eq.s32.totalorder %s670_s18, 0 }
   0xa   : > { %p1123_p4 = por %p49_p1, %p48_p0  ;;  %p122_p5 = scmp.eq.s32.totalorder %s670_s18, 2 }
   0xb   : > { %s1367_s20 = scalar_select %p1119_p3, 1, 0 }
   0xc   : > { %p1129_p6 = por %p1119_p3, %p54_p2  ;;  %p128_p7 = scmp.eq.s32.totalorder %s671_s19, 2 }
   0xd   : > { %p1133_p8 = por %p122_p5, %p48_p0  ;;  %p672_p9 = scmp.ge.s32.totalorder %s1046_s17, 1 }
   0xe   : > { %s1369_s22 = scalar_select %p1129_p6, 1, 0 }
   0xf   : > { %s1370_s23 = scalar_select %p1133_p8, 1, 0 }
  0x10   : > { %p1138_p10 = por %p128_p7, %p54_p2  ;;  %p135_p11 = scmp.lt.s32.totalorder %s1046_s17, 4 }
  0x11   : > { %s1048_s26 = smov [#allocation5]   ;;  %p782_p0 = scmp.lt.s32.totalorder %s1046_s17, 3 }
  0x12   : > { %s1371_s24 = scalar_select %p1138_p10, 1, 0 }
  0x13   : > { %p1143_p12 = pnand %p672_p9, %p135_p11  ;;  %s147_s27 = sshll.u32 %s1048_s26, 4  ;;  %s1147_s27 = int_to_ptr.vmem [resolvable:$true] %s147_s27 }
  0x14   : > { %p1160_p2 = pnand %p782_p0, %p1123_p4  ;;  %s1049_s30 = smov [#allocation7]  }
  0x15   : > { %p765_p13 = pneg %p1143_p12  ;;  %s160_s4 = sshll.u32 %s1049_s30, 4  ;;  %s1164_s4 = int_to_ptr.vmem [resolvable:$true] %s160_s4 }
  0x16   : > { %s874_s7 = scalar_lea.hbm %s1360_s1, 768 }
  0x17   : > { %p1154_p1 = pnand %p765_p13, %p1119_p3  ;;  %p875_p5 = scmp.ne.s32.totalorder %s1360_s1, %s874_s7 }
  0x18   : > { %p881_p11 = scmp.lt.u32.totalorder %s874_s7, %s1360_s1 }
  0x19   : > { %p876_p7 = pneg %p1154_p1 }
  0x1b   : > { %p877_p4 = pnand %p876_p7, %p875_p5 }
  0x1d   : > { %p878_p9 = pneg %p877_p4 }
  0x1f   : > { %p883_p13 = pnand %p881_p11, %p878_p9 }
  0x21   : > { %886 = shalt.err (!%p883_p13)
}
  0x22   : > { %s887_s18 = scalar_lea.vmem %s1147_s27, 768  ;;  %p895_p3 = scmp.lt.s32.totalorder %s1147_s27, %s1147_s27 }
  0x23   : > { %p888_p0 = scmp.ne.s32.totalorder %s1147_s27, %s887_s18  ;;  %p896_p5 = scmp.lt.s32.totalorder %s887_s18, %s887_s18 }
  0x25   : > { %p890_p10 = pnand %p888_p0, %p876_p7  ;;  %p897_p4 = por %p896_p5, %p895_p3 }
  0x27   : > { %p891_p8 = pneg %p890_p10 }
  0x29   : > { %p898_p6 = pnand %p897_p4, %p891_p8 }
  0x2b   : > { %901 = shalt.err (!%p898_p6)
}
  0x2c   : > { %s1050_s19 = smov 192   ;;  %s1051_s21 = smov 12  }
  0x2d   : > { %768 = dma.hbm_to_vmem [thread:$0]  (!%p1154_p1), %s1360_s1, 768, %s1147_s27, [#allocation6], %s1050_s19, %s1050_s19, %s1051_s21  }
  0x2e   : > { %s902_s7 = scalar_lea.hbm %s1361_s2, 512 }
  0x2f   : > { %p903_p3 = scmp.ne.s32.totalorder %s1361_s2, %s902_s7  ;;  %p909_p10 = scmp.lt.u32.totalorder %s902_s7, %s1361_s2 }
  0x31   : > { %p905_p6 = pnand %p903_p3, %p876_p7 }
  0x33   : > { %p906_p8 = pneg %p905_p6 }
  0x35   : > { %p911_p9 = pnand %p909_p10, %p906_p8 }
  0x37   : > { %914 = shalt.err (!%p911_p9)
}
  0x38   : > { %s915_s27 = scalar_lea.vmem %s1164_s4, 512  ;;  %p923_p5 = scmp.lt.s32.totalorder %s1164_s4, %s1164_s4 }
  0x39   : > { %p916_p11 = scmp.ne.s32.totalorder %s1164_s4, %s915_s27  ;;  %p924_p4 = scmp.lt.s32.totalorder %s915_s27, %s915_s27 }
  0x3b   : > { %p918_p13 = pnand %p916_p11, %p876_p7  ;;  %p925_p3 = por %p924_p4, %p923_p5 }
  0x3d   : > { %p919_p0 = pneg %p918_p13 }
  0x3f   : > { %p926_p6 = pnand %p925_p3, %p919_p0 }
  0x41   : > { %929 = shalt.err (!%p926_p6)
}
  0x42   : > { %s1052_s18 = smov 128   ;;  %s1053_s21 = smov 8  }
  0x43   : > { %771 = dma.hbm_to_vmem [thread:$0]  (!%p1154_p1), %s1361_s2, 512, %s1164_s4, [#allocation6], %s1052_s18, %s1052_s18, %s1053_s21  }
  0x44   : > { %s41_s5 = sadd.s32 1, %s1034_s14  ;;  %s29_s6 = sadd.s32 1, %s1042_s16 }
  0x45   : > { %s174_s7 = sand.u32 1, %s1034_s14   ;;  %p30_p7 = scmp.ge.s32.totalorder %s29_s6, 3 }
  0x46   : > { %s751_s8 = smul.u32 144, %s174_s7  ;;  %s676_s9 = sshll.u32 %s1042_s16, 6 }
  0x47   : > { %s1385_s6 = smov (%p30_p7, %s29_s6), 0  ;;  %s1229_s27 = scalar_lea.hbm %s1359_s0, %s676_s9 }
  0x48   : > { %s37_s28 = ssub.s32 %s1042_s16, %s1385_s6  ;;  %s178_s4 = scalar_lea.vmem [#allocation2], %s751_s8 }
  0x49   : > { %s186_s18 = sshll.u32 %s178_s4, 4  ;;  %p39_p1 = scmp.eq.s32.totalorder %s37_s28, 0  ;;  %s1233_s18 = int_to_ptr.vmem [resolvable:$true] %s186_s18 }
  0x4a   : > { %s1238_s26 = scalar_lea.sflag [#allocation3], %s174_s7  ;;  %s930_s30 = scalar_lea.hbm %s1229_s27, 2304 }
  0x4b   : > { %s1236_s21 = scalar_select %p39_p1, %s1034_s14, %s41_s5  }
  0x4c   : > { %p931_p8 = scmp.ne.s32.totalorder %s1229_s27, %s930_s30  ;;  %p932_p10 = pneg %p1160_p2 }
  0x4d   : > { %s935_s8 = scalar_lea.hbm %s1359_s0, 6912  ;;  %p936_p13 = scmp.lt.u32.totalorder %s1229_s27, %s1359_s0 }
  0x4e   : > { %p933_p9 = pnand %p932_p10, %p931_p8  ;;  %p937_p0 = scmp.lt.u32.totalorder %s935_s8, %s930_s30 }
  0x4f   : > { %p939_p4 = scmp.lt.u32.totalorder %s930_s30, %s1229_s27 }
  0x50   : > { %p934_p11 = pneg %p933_p9  ;;  %p938_p5 = por %p937_p0, %p936_p13 }
  0x52   : > { %p940_p3 = por %p939_p4, %p938_p5 }
  0x54   : > { %p941_p6 = pnand %p940_p3, %p934_p11 }
  0x56   : > { %944 = shalt.err (!%p941_p6)
}
  0x57   : > { %s945_s5 = scalar_lea.vmem %s1233_s18, 2304  ;;  %s1054_s7 = smov [#allocation2]  }
  0x58   : > { %p946_p7 = scmp.ne.s32.totalorder %s1233_s18, %s945_s5  ;;  %s950_s4 = sshll.u32 %s1054_s7, 4  ;;  %s951_s4 = int_to_ptr.vmem [resolvable:$false] %s950_s4 }
  0x59   : > { %s952_s9 = scalar_lea.vmem %s951_s4, 4608  ;;  %p953_p9 = scmp.lt.s32.totalorder %s1233_s18, %s951_s4 }
  0x5a   : > { %p948_p1 = pnand %p946_p7, %p932_p10  ;;  %p954_p13 = scmp.lt.s32.totalorder %s952_s9, %s945_s5 }
  0x5c   : > { %p949_p8 = pneg %p948_p1  ;;  %p955_p0 = por %p954_p13, %p953_p9 }
  0x5e   : > { %p956_p5 = pnand %p955_p0, %p949_p8 }
  0x60   : > { %959 = shalt.err (!%p956_p5)
}
  0x61   : > { %s1055_s30 = smov 64   ;;  %s1056_s10 = smov 4  }
  0x62   : > { %775 = dma.hbm_to_vmem [thread:$0]  (!%p1160_p2), %s1229_s27, 2304, %s1233_s18, %s1238_s26, %s1050_s19, %s1055_s30, %s1056_s10  }
  0x63   : > { %198 = sbr.rel (%p1143_p12) target bundleno = 389 (0x185), region = 32  ;;  %s1270_s8 = sand.u32 (!%p1143_p12), 1, %s1030_s13  }
  0x64   : > { %s752_s11 = smul.u32 (!%p1143_p12), 144, %s1270_s8  ;;  %s201_s28 = scalar_lea.sflag (!%p1143_p12), [#allocation3], %s1270_s8 }
  0x65   : > { %p1375_p10 = scmp.ne.s32.totalorder (!%p1143_p12), %s1369_s22, 0 }
  0x66   : > { %s1274_s5 = scalar_lea.vmem (!%p1143_p12), [#allocation2], %s752_s11 }
  0x6a   : > { %1013 = dma.done.wait (%p1375_p10), %s201_s28, 2304  }
  0x6b   : > { %1015 = vsyncadd (%p1375_p10), %s201_s28, 4294964992  ;;  %p1376_p2 = scmp.ne.s32.totalorder %s1367_s20, 0 }
  0x6d   : > { %1017 = dma.done.wait (%p1376_p2), [#allocation6], 1280  }
  0x6e   : > { %1019 = vsyncadd (%p1376_p2), [#allocation6], 4294966016  ;;  %v1057_v0 = vmov 0   ;;  %v848_v1 = vld [vmem:[%s1274_s5 + $0x40] sm:$0xff]   ;;  %v850_v3 = vld [vmem:[%s1274_s5 + $0x48] sm:$0xff]   ;;  %vm442_vm0 = vcmask 261120  }
  0x6f   : > { %846 = vset.pattern.permute.xlu0 %v1057_v0  ;;  %847 = vset.pattern.permute.xlu1 %v1057_v0  ;;  %v849_v2 = vld [vmem:[%s1274_s5] sm:$0xff]   ;;  %v851_v4 = vld [vmem:[%s1274_s5 + $0x8] sm:$0xff]   ;;  %v852_v5 = vld [vmem:[%s1274_s5 + $0x50] sm:$0xff]   ;;  %s680_s20 = sshll.u32 %s1270_s8, 5  ;;  %s708_s29 = sshll.u32 %s1038_s15, 7 }
  0x70   : > { %711 = vmatprep.subr.bf16.mxu0 %v848_v1  ;;  %v853_v6 = vld [vmem:[%s1274_s5 + $0x10] sm:$0xff]   ;;  %v854_v7 = vld [vmem:[%s1274_s5 + $0x58] sm:$0xff]   ;;  %v856_v9 = vld [vmem:[%s1274_s5 + $0x60] sm:$0xff]   ;;  %s234_s22 = scalar_lea.vmem [#allocation8], %s680_s20  ;;  %s1311_s18 = scalar_lea.hbm %s1362_s3, %s708_s29 }
  0x71   : > { %712 = vmatpush3.bf16.msra.mxu0 %v849_v2  ;;  %v855_v8 = vld [vmem:[%s1274_s5 + $0x18] sm:$0xff]   ;;  %v857_v10 = vld [vmem:[%s1274_s5 + $0x20] sm:$0xff]   ;;  %v858_v12 = vld [vmem:[%s1274_s5 + $0x68] sm:$0xff]   ;;  %s566_s25 = sshll.u32 %s234_s22, 4  ;;  %s552_s26 = scalar_lea.sflag [#allocation4], %s1270_s8  ;;  %s1306_s25 = int_to_ptr.vmem [resolvable:$true] %s566_s25 }
  0x72   : > { %713 = vmatprep.subr.bf16.mxu0 %v850_v3  ;;  %v863_v11 = vld [vmem:[%s1274_s5 + $0x80] sm:$0xff]   ;;  %v859_v13 = vld [vmem:[%s1274_s5 + $0x28] sm:$0xff]   ;;  %v860_v14 = vld [vmem:[%s1274_s5 + $0x70] sm:$0xff]   ;;  %s960_s7 = scalar_lea.vmem %s1306_s25, 512  ;;  %p1377_p11 = scmp.ne.s32.totalorder %s1370_s23, 0 }
  0x73   : > { %743 = vmatprep.subr.bf16.mxu1 %v863_v11  ;;  %v867_v15 = vld [vmem:[#allocation5 + $0x4] ss:$12 sps:$4 sm:$0xff]   ;;  %v868_v16 = vld [vmem:[%s1274_s5 + $0x88] sm:$0xff]   ;;  %v862_v22 = vld [vmem:[%s1274_s5 + $0x78] sm:$0xff]   ;;  %p961_p12 = scmp.ne.s32.totalorder %s1306_s25, %s960_s7  ;;  %s1058_s15 = smov [#allocation8]  }
  0x74   : > { %744 = vmatpush3.bf16.msra.mxu1 %v863_v11  ;;  %481 = vmatprep.mubr.bf16.mxu0 %v867_v15  ;;  %v869_v17 = vld [vmem:[#allocation5 + $0x8] ss:$12 sps:$4 sm:$0xff]   ;;  %v870_v18 = vld [vmem:[#allocation5 + $0x20] ss:$12 sps:$4 sm:$0xff]   ;;  %v281_v23 = vld [vmem:[#allocation7 + $0x8] sm:$0xff]  ;;  %s964_s4 = sshll.u32 %s1058_s15, 4  ;;  %s965_s4 = int_to_ptr.vmem [resolvable:$false] %s964_s4 }
  0x75   : > { %714 = vmatpush3.bf16.msra.mxu0 %v851_v4  ;;  %745 = vmatprep.subr.bf16.mxu1 %v868_v16  ;;  %v280_v19 = vld [vmem:[#allocation7] sm:$0xff]  ;;  %v282_v21 = vld [vmem:[#allocation7 + $0x10] sm:$0xff]  ;;  %v283_v24 = vld [vmem:[#allocation7 + $0x18] sm:$0xff]  ;;  %p962_p4 = pnand %p961_p12, %p1377_p11  ;;  %s966_s9 = scalar_lea.vmem %s965_s4, 1024 }
  0x76   : > { %715 = vmatprep.subr.bf16.mxu0 %v852_v5  ;;  %747 = vmatprep.mubr.msk.bf16.mxu1 %vm442_vm0, %v869_v17  ;;  %v861_v20 = vld [vmem:[%s1274_s5 + $0x30] sm:$0xff]   ;;  %v864_v25 = vld [vmem:[%s1274_s5 + $0x38] sm:$0xff]   ;;  %p967_p6 = scmp.lt.s32.totalorder %s1306_s25, %s965_s4  ;;  %p968_p7 = scmp.lt.s32.totalorder %s966_s9, %s960_s7 }
  0x77   : > { %286 = vperm.xlu0 %846, %v280_v19   ;;  %296 = vperm.xlu1 %847, %v282_v21   ;;  %v865_v26 = vld [vmem:[#allocation5] ss:$12 sps:$4 sm:$0xff]   ;;  %v871_v27 = vld [vmem:[#allocation5 + $0x1c] ss:$12 sps:$4 sm:$0xff]   ;;  %v873_v28 = vld [vmem:[#allocation5 + $0x18] ss:$12 sps:$4 sm:$0xff]   ;;  %p963_p3 = pneg %p962_p4 }
  0x78   : > { %746 = vmatpush3.bf16.msra.mxu1 %v868_v16  ;;  %p969_p1 = por %p968_p7, %p967_p6 }
  0x79   : > { %716 = vmatpush3.bf16.msra.mxu0 %v853_v6 }
  0x7a   : > { %717 = vmatprep.subr.bf16.mxu0 %v854_v7  ;;  %p970_p8 = pnand %p969_p1, %p963_p3 }
  0x7b   : > { %748 = vmatmul.mubr.msk.bf16.vlgmr.msra.gmra.mrb[0].mxu1 %vm442_vm0, %v870_v18  ;;  %291 = vperm.xlu0 %846, %v281_v23  }
  0x7c   : > { %301 = vperm.xlu1 %847, %v283_v24  }
  0x7d   : > { %718 = vmatpush3.bf16.msra.mxu0 %v855_v8 }
  0x7e   : > { %719 = vmatprep.subr.bf16.mxu0 %v856_v9 }
  0x81   : > { %720 = vmatpush3.bf16.msra.mxu0 %v857_v10 }
  0x82   : > { %721 = vmatprep.subr.bf16.mxu0 %v858_v12 }
  0x85   : > { %722 = vmatpush3.bf16.msra.mxu0 %v859_v13 }
  0x86   : > { %723 = vmatprep.subr.bf16.mxu0 %v860_v14 }
  0x89   : > { %724 = vmatpush3.bf16.msra.mxu0 %v861_v20 }
  0x8a   : > { %725 = vmatprep.subr.bf16.mxu0 %v862_v22 }
  0x8d   : > { %726 = vmatpush3.bf16.msra.mxu0 %v864_v25 }
  0x90   : > { %482 = vmatmul.mubr.bf16.vlgmr.msra.gmra.mrb[0].mxu0 %v865_v26 }
  0x91   : > { %489 = vmatprep.mubr.bf16.mxu0 %v871_v27 }
  0x98   : > { %490 = vmatmul.mubr.bf16.gmra.mrb[4].mxu0 %v873_v28 }
  0xf6   : > { %v287_v33 = vpop.permute.xlu0 %286  ;;  %v297_v44 = vpop.permute.xlu1 %296 }
  0xfa   : > { %v292_v39 = vpop.permute.xlu0 %291 }
  0xfb   : > { %v302_v53 = vpop.permute.xlu1 %301 }
 0x14e   : > { %v749_v29 = vpop.f32.mrb[0].mxu1 }
 0x14f   : > { %v532_v30 = vpop.f32.mrb[1].mxu1 }
 0x150   : > { %v750_v31 = vpop.f32.mrb[2].mxu1 }
 0x151   : > { %v535_v32 = vpop.f32.mrb[3].mxu1 }
 0x163   : > { %v727_v34 = vpop.f32.mrb[0].mxu0 }
 0x164   : > { %v728_v35 = vpop.f32.mrb[1].mxu0 }
 0x165   : > { %v729_v36 = vadd.f32 %v728_v35, %v727_v34  ;;  %v730_v37 = vpop.f32.mrb[2].mxu0 }
 0x166   : > { %v731_v38 = vpop.f32.mrb[3].mxu0 }
 0x167   : > { %v732_v40 = vadd.f32 %v731_v38, %v730_v37  ;;  %v484_v41 = vadd.f32 %v729_v36, %v287_v33 }
 0x169   : > { %v487_v42 = vadd.f32 %v732_v40, %v292_v39  ;;  %v533_v43 = vadd.f32 %v532_v30, %v484_v41 }
 0x16b   : > { %547 = vst [vmem:[%s234_s22] sm:$0xff] %v533_v43  ;;  %v536_v45 = vadd.f32 %v535_v32, %v487_v42  ;;  %v733_v46 = vpop.f32.mrb[4].mxu0 }
 0x16c   : > { %v734_v47 = vpop.f32.mrb[5].mxu0 }
 0x16d   : > { %548 = vst [vmem:[%s234_s22 + $0x8] sm:$0xff] %v536_v45  ;;  %v735_v48 = vadd.f32 %v734_v47, %v733_v46  ;;  %v736_v49 = vpop.f32.mrb[6].mxu0 }
 0x16e   : > { %v737_v50 = vpop.f32.mrb[7].mxu0 }
 0x16f   : > { %v492_v51 = vadd.f32 %v735_v48, %v297_v44  ;;  %v738_v52 = vadd.f32 %v737_v50, %v736_v49 }
 0x171   : > { %v541_v54 = vadd.f32 %v749_v29, %v492_v51  ;;  %v495_v55 = vadd.f32 %v738_v52, %v302_v53 }
 0x173   : > { %549 = vst [vmem:[%s234_s22 + $0x10] sm:$0xff] %v541_v54  ;;  %v544_v56 = vadd.f32 %v750_v31, %v495_v55 }
 0x175   : > { %550 = vst [vmem:[%s234_s22 + $0x18] sm:$0xff] %v544_v56 }
 0x176   : > { %973 = shalt.err (!%p970_p8)
}
 0x177   : > { %s974_s30 = scalar_lea.hbm %s1311_s18, 512  ;;  %s978_s28 = scalar_lea.hbm %s1362_s3, 1536 }
 0x178   : > { %p975_p9 = scmp.ne.s32.totalorder %s1311_s18, %s974_s30  ;;  %p979_p5 = scmp.lt.u32.totalorder %s1311_s18, %s1362_s3 }
 0x179   : > { %p980_p10 = scmp.lt.u32.totalorder %s978_s28, %s974_s30  ;;  %p982_p12 = scmp.lt.u32.totalorder %s974_s30, %s1311_s18 }
 0x17a   : > { %p976_p13 = pnand %p975_p9, %p1377_p11 }
 0x17b   : > { %p981_p2 = por %p980_p10, %p979_p5 }
 0x17c   : > { %p977_p0 = pneg %p976_p13 }
 0x17d   : > { %p983_p4 = por %p982_p12, %p981_p2 }
 0x17f   : > { %p984_p3 = pnand %p983_p4, %p977_p0 }
 0x181   : > { %987 = shalt.err (!%p984_p3)
}
 0x182   : > { %s1059_s22 = smov 128   ;;  %s1060_s29 = smov 384  }
 0x183   : > { %s1061_s19 = smov 8  }
 0x184   : > { %763 = dma.vmem_to_hbm [thread:$0]  (%p1377_p11), %s1306_s25, 512, %s1311_s18, %s552_s26, %s1059_s22, %s1060_s29, %s1061_s19  }
 0x185 PF: > { %p785_p6 = scmp.ge.s32.totalorder %s1046_s17, 2  ;;  %s581_s27 = sand.u32 1, %s1026_s12  }
 0x186   : > { %p1378_p7 = scmp.ne.s32.totalorder %s1371_s24, 0  ;;  %s582_s7 = scalar_lea.sflag [#allocation4], %s581_s27 }
 0x188   : > { %p777_p1 = pnand %p785_p6, %p1378_p7 }
 0x18a   : > { %1021 = dma.done.wait (!%p777_p1), %s582_s7, 512  }
 0x18b   : > { %1023 = vsyncadd (!%p777_p1), %s582_s7, 4294966784  ;;  %s20_s17 = sadd.s32 1, %s1046_s17   ;;  %s1379_s12 = smov %s1030_s13 }
 0x18c   : > { %p17_p8 = scmp.ge.s32.totalorder %s20_s17, 5   ;;  %s1380_s13 = smov %s1034_s14 }
 0x18d   : > { %s1381_s14 = smov %s1236_s21  ;;  %s1382_s15 = smov %s1042_s16 }
 0x18e   : > { %s1383_s16 = smov %s1385_s6  ;;  %19 = sbr.rel (!%p17_p8) target bundleno = 7 (0x7), region = 85 }
 0x195   :  { %587 = vsyncpa [#allocation3], 1 }
 0x196   :  { %589 = vsyncpa [#allocation3 + $0x1], 1 }
 0x197   :  { %590 = vsyncpa [#allocation6], 1 }
 0x198   :  { %591 = vsyncpa [#allocation4], 1 }
 0x199   :  { %593 = vsyncpa [#allocation4 + $0x1], 1 }

// kernel: deepvo_forward.13
= control target key start
LH: loop header
LB: loop body
LE: loop exit
PB: predicated region body
PF: predicated region fallthrough
CT: control target
= control target key end

     0   :  { %8 = vsyncpa [#allocation3], 0  ;;  %s841_s0 = inlined_call_operand.hbm [shape: bf16[1,288,96], index: 0, kind: input, shape index: {}]   ;;  %s842_s1 = inlined_call_operand.hbm [shape: bf16[64,288], index: 1, kind: input, shape index: {}]   ;;  %s843_s2 = inlined_call_operand.hbm [shape: f32[64,1], index: 2, kind: input, shape index: {}]   ;;  %s844_s3 = inlined_call_operand.hbm [shape: f32[1,64,96], index: 3, kind: output, shape index: {}]  }
   0x1   :  { %9 = vsyncpa [#allocation6], 0 }
   0x2   :  { %10 = vsyncpa [#allocation4], 0  ;;  %s744_s12 = smov [#allocation5]   ;;  %s650_s16 = scalar_lea.hbm %s842_s1, 1536 }
   0x3   :  { %s28_s13 = sshll.u32 %s744_s12, 4  ;;  %p651_p0 = scmp.ne.s32.totalorder %s842_s1, %s650_s16  ;;  %s29_s13 = int_to_ptr.vmem [resolvable:$true] %s28_s13 }
   0x4   :  { %p654_p1 = scmp.lt.u32.totalorder %s650_s16, %s842_s1 }
   0x6   :  { %p656_p2 = pnand %p654_p1, %p651_p0 }
   0x8   :  { %659 = shalt.err (!%p656_p2)
}
   0x9   :  { %s660_s21 = scalar_lea.vmem %s29_s13, 1536  ;;  %p665_p4 = scmp.lt.s32.totalorder %s29_s13, %s29_s13 }
   0xa   :  { %p661_p3 = scmp.ne.s32.totalorder %s29_s13, %s660_s21  ;;  %p666_p5 = scmp.lt.s32.totalorder %s660_s21, %s660_s21 }
   0xc   :  { %p667_p6 = por %p666_p5, %p665_p4 }
   0xe   :  { %p668_p7 = pnand %p667_p6, %p661_p3 }
  0x10   :  { %671 = shalt.err (!%p668_p7)
}
  0x11   :  { %s745_s22 = smov 192   ;;  %s746_s23 = smov 12  }
  0x12   :  { %34 = dma.hbm_to_vmem [thread:$0]  %s842_s1, 1536, %s29_s13, [#allocation6], %s745_s22, %s745_s22, %s746_s23  }
  0x13   :  { %s747_s26 = smov [#allocation2]   ;;  %s672_s30 = scalar_lea.hbm %s841_s0, 2304 }
  0x14   :  { %s16_s27 = sshll.u32 %s747_s26, 4  ;;  %p673_p8 = scmp.ne.s32.totalorder %s841_s0, %s672_s30  ;;  %s17_s27 = int_to_ptr.vmem [resolvable:$true] %s16_s27 }
  0x15   :  { %p676_p9 = scmp.lt.u32.totalorder %s672_s30, %s841_s0 }
  0x17   :  { %p678_p10 = pnand %p676_p9, %p673_p8 }
  0x19   :  { %681 = shalt.err (!%p678_p10)
}
  0x1a   :  { %s682_s8 = scalar_lea.vmem %s17_s27, 2304  ;;  %p687_p12 = scmp.lt.s32.totalorder %s17_s27, %s17_s27 }
  0x1b   :  { %p683_p11 = scmp.ne.s32.totalorder %s17_s27, %s682_s8  ;;  %p688_p13 = scmp.lt.s32.totalorder %s682_s8, %s682_s8 }
  0x1d   :  { %p689_p0 = por %p688_p13, %p687_p12 }
  0x1f   :  { %p690_p1 = pnand %p689_p0, %p683_p11 }
  0x21   :  { %693 = shalt.err (!%p690_p1)
}
  0x22   :  { %s748_s1 = smov 64   ;;  %s749_s9 = smov 4  }
  0x23   :  { %22 = dma.hbm_to_vmem [thread:$0]  %s841_s0, 2304, %s17_s27, [#allocation3], %s748_s1, %s748_s1, %s749_s9  }
  0x24   :  { %s750_s12 = smov [#allocation7]   ;;  %s694_s16 = scalar_lea.hbm %s843_s2, 1024 }
  0x25   :  { %s40_s13 = sshll.u32 %s750_s12, 4  ;;  %p695_p2 = scmp.ne.s32.totalorder %s843_s2, %s694_s16  ;;  %s41_s13 = int_to_ptr.vmem [resolvable:$true] %s40_s13 }
  0x26   :  { %p698_p3 = scmp.lt.u32.totalorder %s694_s16, %s843_s2 }
  0x28   :  { %p700_p4 = pnand %p698_p3, %p695_p2 }
  0x2a   :  { %703 = shalt.err (!%p700_p4)
}
  0x2b   :  { %s704_s21 = scalar_lea.vmem %s41_s13, 1024  ;;  %p709_p6 = scmp.lt.s32.totalorder %s41_s13, %s41_s13 }
  0x2c   :  { %p705_p5 = scmp.ne.s32.totalorder %s41_s13, %s704_s21  ;;  %p710_p7 = scmp.lt.s32.totalorder %s704_s21, %s704_s21 }
  0x2e   :  { %p711_p8 = por %p710_p7, %p709_p6 }
  0x30   :  { %p712_p9 = pnand %p711_p8, %p705_p5 }
  0x32   :  { %715 = shalt.err (!%p712_p9)
}
  0x33   :  { %s751_s0 = smov 128   ;;  %s752_s22 = smov 8  }
  0x34   :  { %46 = dma.hbm_to_vmem [thread:$0]  %s843_s2, 1024, %s41_s13, [#allocation6], %s751_s0, %s751_s0, %s752_s22  }
  0x35   :  { %738 = dma.done.wait [#allocation3], 2304  }
  0x36   :  { %739 = vsyncadd [#allocation3], 4294964992 }
  0x37   :  { %740 = dma.done.wait [#allocation6], 2560  }
  0x38   :  { %741 = vsyncadd [#allocation6], 4294964736  ;;  %v753_v0 = vmov 0   ;;  %v616_v1 = vld [vmem:[#allocation2 + $0x40] sm:$0xff]   ;;  %v618_v3 = vld [vmem:[#allocation2 + $0x48] sm:$0xff]   ;;  %vm325_vm0 = vcmask 261120  }
  0x39   :  { %615 = vset.pattern.permute.xlu1 %v753_v0  ;;  %614 = vset.pattern.permute.xlu0 %v753_v0  ;;  %v617_v2 = vld [vmem:[#allocation2] sm:$0xff]   ;;  %v619_v4 = vld [vmem:[#allocation2 + $0x8] sm:$0xff]   ;;  %v620_v5 = vld [vmem:[#allocation2 + $0x50] sm:$0xff]   ;;  %vm468_vm1 = vcmask 785408   ;;  %s754_s2 = smov [#allocation8]  }
  0x3a   :  { %529 = vmatprep.subr.bf16.mxu0 %v616_v1  ;;  %587 = vmatprep.subr.bf16.mxu1 %v616_v1  ;;  %v621_v6 = vld [vmem:[#allocation2 + $0x10] sm:$0xff]   ;;  %v622_v7 = vld [vmem:[#allocation2 + $0x58] sm:$0xff]   ;;  %v624_v9 = vld [vmem:[#allocation2 + $0x60] sm:$0xff]   ;;  %s482_s25 = sshll.u32 %s754_s2, 4  ;;  %s483_s25 = int_to_ptr.vmem [resolvable:$true] %s482_s25 }
  0x3b   :  { %530 = vmatpush3.bf16.msra.mxu0 %v617_v2  ;;  %595 = vmatpush3.bf16.msra.mxu1 %v617_v2  ;;  %v623_v8 = vld [vmem:[#allocation2 + $0x18] sm:$0xff]   ;;  %v625_v10 = vld [vmem:[#allocation2 + $0x20] sm:$0xff]   ;;  %v626_v11 = vld [vmem:[#allocation2 + $0x68] sm:$0xff]   ;;  %s716_s26 = scalar_lea.vmem %s483_s25, 1024  ;;  %p721_p11 = scmp.lt.s32.totalorder %s483_s25, %s483_s25 }
  0x3c   :  { %531 = vmatprep.subr.bf16.mxu0 %v618_v3  ;;  %588 = vmatprep.subr.bf16.mxu1 %v618_v3  ;;  %v634_v12 = vld [vmem:[#allocation5 + $0x4] ss:$12 sps:$4 sm:$0xff]   ;;  %v637_v13 = vld [vmem:[#allocation5 + $0x4c] ss:$12 sps:$4 sm:$0xff]   ;;  %v635_v23 = vld [vmem:[#allocation5 + $0x48] ss:$12 sps:$4 sm:$0xff]   ;;  %p717_p10 = scmp.ne.s32.totalorder %s483_s25, %s716_s26  ;;  %p722_p12 = scmp.lt.s32.totalorder %s716_s26, %s716_s26 }
  0x3d   :  { %v627_v14 = vld [vmem:[#allocation2 + $0x28] sm:$0xff]   ;;  %v628_v15 = vld [vmem:[#allocation2 + $0x70] sm:$0xff]   ;;  %370 = vmatprep.mubr.bf16.mxu0 %v634_v12  ;;  %394 = vmatprep.mubr.bf16.mxu1 %v637_v13  ;;  %v630_v17 = vld [vmem:[#allocation2 + $0x78] sm:$0xff]  }
  0x3e   :  { %v629_v16 = vld [vmem:[#allocation2 + $0x30] sm:$0xff]   ;;  %v631_v18 = vld [vmem:[#allocation2 + $0x38] sm:$0xff]   ;;  %v111_v19 = vld [vmem:[#allocation7 + $0x10] sm:$0xff]  ;;  %p723_p13 = por %p722_p12, %p721_p11 }
  0x3f   :  { %532 = vmatpush3.bf16.msra.mxu0 %v619_v4  ;;  %596 = vmatpush3.bf16.msra.mxu1 %v619_v4  ;;  %v109_v20 = vld [vmem:[#allocation7] sm:$0xff]  ;;  %v638_v21 = vld [vmem:[#allocation2 + $0x80] sm:$0xff]   ;;  %v112_v24 = vld [vmem:[#allocation7 + $0x18] sm:$0xff] }
  0x40   :  { %533 = vmatprep.subr.bf16.mxu0 %v620_v5  ;;  %589 = vmatprep.subr.bf16.mxu1 %v620_v5  ;;  %v632_v22 = vld [vmem:[#allocation5] ss:$12 sps:$4 sm:$0xff]   ;;  %v640_v26 = vld [vmem:[#allocation5 + $0x1c] ss:$12 sps:$4 sm:$0xff]   ;;  %v643_v31 = vld [vmem:[#allocation5 + $0x18] ss:$12 sps:$4 sm:$0xff]   ;;  %p724_p0 = pnand %p723_p13, %p717_p10 }
  0x41   :  { %129 = vperm.xlu1 %615, %v111_v19   ;;  %119 = vperm.xlu0 %614, %v109_v20   ;;  %v110_v25 = vld [vmem:[#allocation7 + $0x8] sm:$0xff]  ;;  %v639_v27 = vld [vmem:[#allocation2 + $0x88] sm:$0xff]   ;;  %v113_v30 = vld [vmem:[#allocation7 + $0x20] sm:$0xff] }
  0x42   :  { %v642_v28 = vld [vmem:[#allocation5 + $0x8] ss:$12 sps:$4 sm:$0xff]   ;;  %v644_v32 = vld [vmem:[#allocation5 + $0x20] ss:$12 sps:$4 sm:$0xff]   ;;  %v116_v33 = vld [vmem:[#allocation7 + $0x38] sm:$0xff] }
  0x43   :  { %534 = vmatpush3.bf16.msra.mxu0 %v621_v6  ;;  %597 = vmatpush3.bf16.msra.mxu1 %v621_v6  ;;  %v114_v29 = vld [vmem:[#allocation7 + $0x28] sm:$0xff]  ;;  %v115_v34 = vld [vmem:[#allocation7 + $0x30] sm:$0xff]  ;;  %v647_v36 = vld [vmem:[#allocation5 + $0x38] ss:$12 sps:$4 sm:$0xff]  }
  0x44   :  { %535 = vmatprep.subr.bf16.mxu0 %v622_v7  ;;  %590 = vmatprep.subr.bf16.mxu1 %v622_v7  ;;  %v645_v35 = vld [vmem:[#allocation5 + $0x34] ss:$12 sps:$4 sm:$0xff]   ;;  %v648_v37 = vld [vmem:[#allocation5 + $0x30] ss:$12 sps:$4 sm:$0xff]  }
  0x45   :  { %134 = vperm.xlu1 %615, %v112_v24   ;;  %124 = vperm.xlu0 %614, %v110_v25   ;;  %v649_v38 = vld [vmem:[#allocation5 + $0x50] ss:$12 sps:$4 sm:$0xff]  }
  0x47   :  { %536 = vmatpush3.bf16.msra.mxu0 %v623_v8  ;;  %598 = vmatpush3.bf16.msra.mxu1 %v623_v8 }
  0x48   :  { %537 = vmatprep.subr.bf16.mxu0 %v624_v9  ;;  %591 = vmatprep.subr.bf16.mxu1 %v624_v9 }
  0x49   :  { %144 = vperm.xlu1 %615, %v114_v29   ;;  %139 = vperm.xlu0 %614, %v113_v30  }
  0x4b   :  { %538 = vmatpush3.bf16.msra.mxu0 %v625_v10  ;;  %599 = vmatpush3.bf16.msra.mxu1 %v625_v10 }
  0x4c   :  { %539 = vmatprep.subr.bf16.mxu0 %v626_v11  ;;  %592 = vmatprep.subr.bf16.mxu1 %v626_v11 }
  0x4d   :  { %154 = vperm.xlu1 %615, %v116_v33   ;;  %149 = vperm.xlu0 %614, %v115_v34  }
  0x4f   :  { %540 = vmatpush3.bf16.msra.mxu0 %v627_v14  ;;  %600 = vmatpush3.bf16.msra.mxu1 %v627_v14 }
  0x50   :  { %541 = vmatprep.subr.bf16.mxu0 %v628_v15  ;;  %593 = vmatprep.subr.bf16.mxu1 %v628_v15 }
  0x53   :  { %542 = vmatpush3.bf16.msra.mxu0 %v629_v16  ;;  %601 = vmatpush3.bf16.msra.mxu1 %v629_v16 }
  0x54   :  { %543 = vmatprep.subr.bf16.mxu0 %v630_v17  ;;  %594 = vmatprep.subr.bf16.mxu1 %v630_v17 }
  0x57   :  { %544 = vmatpush3.bf16.msra.mxu0 %v631_v18  ;;  %602 = vmatpush3.bf16.msra.mxu1 %v631_v18 }
  0x58   :  { %575 = vmatprep.subr.bf16.mxu1 %v638_v21 }
  0x5a   :  { %371 = vmatmul.mubr.bf16.vlgmr.msra.gmra.mrb[0].mxu0 %v632_v22  ;;  %395 = vmatmul.mubr.bf16.vlgmr.msra.gmra.mrb[0].mxu1 %v635_v23 }
  0x5b   :  { %576 = vmatpush3.bf16.msra.mxu1 %v638_v21  ;;  %378 = vmatprep.mubr.bf16.mxu0 %v640_v26 }
  0x5c   :  { %577 = vmatprep.subr.bf16.mxu1 %v639_v27  ;;  %579 = vmatprep.mubr.msk.bf16.mxu1 %vm325_vm0, %v642_v28 }
  0x5f   :  { %578 = vmatpush3.bf16.msra.mxu1 %v639_v27 }
  0x62   :  { %379 = vmatmul.mubr.bf16.gmra.mrb[4].mxu0 %v643_v31  ;;  %580 = vmatmul.mubr.msk.bf16.vlgmr.msra.gmra.mrb[4].mxu1 %vm325_vm0, %v644_v32 }
  0x63   :  { %386 = vmatprep.mubr.bf16.mxu0 %v645_v35  ;;  %583 = vmatprep.mubr.msk.bf16.mxu1 %vm325_vm0, %v647_v36 }
  0x6a   :  { %387 = vmatmul.mubr.bf16.gmra.mrb[8].mxu0 %v648_v37  ;;  %584 = vmatmul.mubr.msk.bf16.gmra.mrb[8].mxu1 %vm325_vm0, %v649_v38 }
  0xc0   :  { %v130_v39 = vpop.permute.xlu1 %129  ;;  %v120_v40 = vpop.permute.xlu0 %119 }
  0xc4   :  { %v135_v41 = vpop.permute.xlu1 %134  ;;  %v125_v42 = vpop.permute.xlu0 %124 }
  0xc8   :  { %v140_v55 = vpop.permute.xlu0 %139  ;;  %v145_v56 = vpop.permute.xlu1 %144 }
  0xcc   :  { %v150_v5 = vpop.permute.xlu0 %149  ;;  %v155_v9 = vpop.permute.xlu1 %154 }
 0x12d   :  { %v545_v43 = vpop.f32.mrb[0].mxu0  ;;  %v563_v44 = vpop.f32.mrb[0].mxu1 }
 0x12e   :  { %v546_v45 = vpop.f32.mrb[1].mxu0  ;;  %v564_v46 = vpop.f32.mrb[1].mxu1 }
 0x12f   :  { %v547_v47 = vadd.f32 %v546_v45, %v545_v43  ;;  %v548_v48 = vpop.f32.mrb[2].mxu0  ;;  %v565_v49 = vadd.f32 %v564_v46, %v563_v44  ;;  %v566_v50 = vpop.f32.mrb[2].mxu1 }
 0x130   :  { %v549_v51 = vpop.f32.mrb[3].mxu0  ;;  %v567_v52 = vpop.f32.mrb[3].mxu1 }
 0x131   :  { %v550_v53 = vadd.f32 %v549_v51, %v548_v48  ;;  %v568_v54 = vadd.f32 %v567_v52, %v566_v50  ;;  %v373_v59 = vadd.f32 %v547_v47, %v120_v40  ;;  %v397_v12 = vadd.f32 %v565_v49, %v150_v5 }
 0x133   :  { %v376_v2 = vadd.f32 %v550_v53, %v125_v42  ;;  %v400_v16 = vadd.f32 %v568_v54, %v155_v9 }
 0x135   :  { %v551_v57 = vpop.f32.mrb[4].mxu0  ;;  %v581_v58 = vpop.f32.mrb[4].mxu1 }
 0x136   :  { %v552_v60 = vpop.f32.mrb[5].mxu0  ;;  %v437_v61 = vpop.f32.mrb[5].mxu1 }
 0x137   :  { %v553_v62 = vadd.f32 %v552_v60, %v551_v57  ;;  %v438_v63 = vadd.f32 %v437_v61, %v373_v59  ;;  %v554_v0 = vpop.f32.mrb[6].mxu0  ;;  %v582_v1 = vpop.f32.mrb[6].mxu1 }
 0x138   :  { %v555_v3 = vpop.f32.mrb[7].mxu0  ;;  %v440_v4 = vpop.f32.mrb[7].mxu1 }
 0x139   :  { %v381_v6 = vadd.f32 %v553_v62, %v130_v39  ;;  %469 = vst.msk [vmem:[#allocation8] sm:$0xff] %vm468_vm1, %v438_v63  ;;  %v556_v7 = vadd.f32 %v555_v3, %v554_v0  ;;  %v441_v8 = vadd.f32 %v440_v4, %v376_v2 }
 0x13b   :  { %v446_v10 = vadd.f32 %v581_v58, %v381_v6  ;;  %v384_v11 = vadd.f32 %v556_v7, %v135_v41  ;;  %470 = vst.msk [vmem:[#allocation8 + $0x8] sm:$0xff] %vm468_vm1, %v441_v8 }
 0x13d   :  { %471 = vst.msk [vmem:[#allocation8 + $0x10] sm:$0xff] %vm468_vm1, %v446_v10  ;;  %v449_v13 = vadd.f32 %v582_v1, %v384_v11  ;;  %v557_v14 = vpop.f32.mrb[8].mxu0  ;;  %v585_v15 = vpop.f32.mrb[8].mxu1 }
 0x13e   :  { %v462_v17 = vadd.f32 %v585_v15, %v397_v12  ;;  %v558_v18 = vpop.f32.mrb[9].mxu0  ;;  %v453_v19 = vpop.f32.mrb[9].mxu1 }
 0x13f   :  { %472 = vst.msk [vmem:[#allocation8 + $0x18] sm:$0xff] %vm468_vm1, %v449_v13  ;;  %v559_v20 = vadd.f32 %v558_v18, %v557_v14  ;;  %v560_v21 = vpop.f32.mrb[10].mxu0  ;;  %v586_v22 = vpop.f32.mrb[10].mxu1 }
 0x140   :  { %475 = vst.msk [vmem:[#allocation8 + $0x30] sm:$0xff] %vm468_vm1, %v462_v17  ;;  %v465_v23 = vadd.f32 %v586_v22, %v400_v16  ;;  %v561_v24 = vpop.f32.mrb[11].mxu0  ;;  %v456_v25 = vpop.f32.mrb[11].mxu1 }
 0x141   :  { %v389_v26 = vadd.f32 %v559_v20, %v140_v55  ;;  %v562_v27 = vadd.f32 %v561_v24, %v560_v21 }
 0x142   :  { %476 = vst.msk [vmem:[#allocation8 + $0x38] sm:$0xff] %vm468_vm1, %v465_v23 }
 0x143   :  { %v454_v28 = vadd.f32 %v453_v19, %v389_v26  ;;  %v392_v29 = vadd.f32 %v562_v27, %v145_v56 }
 0x145   :  { %473 = vst.msk [vmem:[#allocation8 + $0x20] sm:$0xff] %vm468_vm1, %v454_v28  ;;  %v457_v30 = vadd.f32 %v456_v25, %v392_v29 }
 0x147   :  { %474 = vst.msk [vmem:[#allocation8 + $0x28] sm:$0xff] %vm468_vm1, %v457_v30 }
 0x148   :  { %727 = shalt.err (!%p724_p0)
}
 0x149   :  { %s728_s29 = scalar_lea.hbm %s844_s3, 1024 }
 0x14a   :  { %p729_p1 = scmp.ne.s32.totalorder %s844_s3, %s728_s29  ;;  %p732_p2 = scmp.lt.u32.totalorder %s728_s29, %s844_s3 }
 0x14c   :  { %p734_p3 = pnand %p732_p2, %p729_p1 }
 0x14e   :  { %737 = shalt.err (!%p734_p3)
}
 0x14f   :  { %488 = dma.vmem_to_hbm [thread:$0]  %s483_s25, 1024, %s844_s3, [#allocation4], %s751_s0, %s751_s0, %s752_s22  }
 0x150   :  { %742 = dma.done.wait [#allocation4], 1024  }
 0x151   :  { %743 = vsyncadd [#allocation4], 4294966272 }
 0x152   :  { %492 = vsyncpa [#allocation3], 1 }
 0x153   :  { %493 = vsyncpa [#allocation6], 1 }
 0x154   :  { %494 = vsyncpa [#allocation4], 1 }

// kernel: deepvo_forward.14
= control target key start
LH: loop header
LB: loop body
LE: loop exit
PB: predicated region body
PF: predicated region fallthrough
CT: control target
= control target key end

     0   :  { %8 = vsyncpa [#allocation3], 0  ;;  %s1195_s0 = inlined_call_operand.hbm [shape: bf16[1,576,96], index: 0, kind: input, shape index: {}]   ;;  %s1196_s1 = inlined_call_operand.hbm [shape: bf16[64,576], index: 1, kind: input, shape index: {}]   ;;  %s1197_s2 = inlined_call_operand.hbm [shape: f32[64,1], index: 2, kind: input, shape index: {}]   ;;  %s1198_s3 = inlined_call_operand.hbm [shape: f32[1,64,96], index: 3, kind: output, shape index: {}]  }
   0x1   :  { %9 = vsyncpa [#allocation6], 0 }
   0x2   :  { %10 = vsyncpa [#allocation4], 0  ;;  %s1095_s12 = smov [#allocation5]   ;;  %s1001_s16 = scalar_lea.hbm %s1196_s1, 2560 }
   0x3   :  { %s28_s13 = sshll.u32 %s1095_s12, 4  ;;  %p1002_p0 = scmp.ne.s32.totalorder %s1196_s1, %s1001_s16  ;;  %s29_s13 = int_to_ptr.vmem [resolvable:$true] %s28_s13 }
   0x4   :  { %p1005_p1 = scmp.lt.u32.totalorder %s1001_s16, %s1196_s1 }
   0x6   :  { %p1007_p2 = pnand %p1005_p1, %p1002_p0 }
   0x8   :  { %1010 = shalt.err (!%p1007_p2)
}
   0x9   :  { %s1011_s21 = scalar_lea.vmem %s29_s13, 2560  ;;  %p1016_p4 = scmp.lt.s32.totalorder %s29_s13, %s29_s13 }
   0xa   :  { %p1012_p3 = scmp.ne.s32.totalorder %s29_s13, %s1011_s21  ;;  %p1017_p5 = scmp.lt.s32.totalorder %s1011_s21, %s1011_s21 }
   0xc   :  { %p1018_p6 = por %p1017_p5, %p1016_p4 }
   0xe   :  { %p1019_p7 = pnand %p1018_p6, %p1012_p3 }
  0x10   :  { %1022 = shalt.err (!%p1019_p7)
}
  0x11   :  { %s1096_s22 = smov 320   ;;  %s1097_s23 = smov 20  }
  0x12   :  { %34 = dma.hbm_to_vmem [thread:$0]  %s1196_s1, 2560, %s29_s13, [#allocation6], %s1096_s22, %s1096_s22, %s1097_s23  }
  0x13   :  { %s1098_s26 = smov [#allocation2]   ;;  %s1023_s30 = scalar_lea.hbm %s1195_s0, 4608 }
  0x14   :  { %s16_s27 = sshll.u32 %s1098_s26, 4  ;;  %p1024_p8 = scmp.ne.s32.totalorder %s1195_s0, %s1023_s30  ;;  %s17_s27 = int_to_ptr.vmem [resolvable:$true] %s16_s27 }
  0x15   :  { %p1027_p9 = scmp.lt.u32.totalorder %s1023_s30, %s1195_s0 }
  0x17   :  { %p1029_p10 = pnand %p1027_p9, %p1024_p8 }
  0x19   :  { %1032 = shalt.err (!%p1029_p10)
}
  0x1a   :  { %s1033_s8 = scalar_lea.vmem %s17_s27, 4608  ;;  %p1038_p12 = scmp.lt.s32.totalorder %s17_s27, %s17_s27 }
  0x1b   :  { %p1034_p11 = scmp.ne.s32.totalorder %s17_s27, %s1033_s8  ;;  %p1039_p13 = scmp.lt.s32.totalorder %s1033_s8, %s1033_s8 }
  0x1d   :  { %p1040_p0 = por %p1039_p13, %p1038_p12 }
  0x1f   :  { %p1041_p1 = pnand %p1040_p0, %p1034_p11 }
  0x21   :  { %1044 = shalt.err (!%p1041_p1)
}
  0x22   :  { %s1099_s1 = smov 64   ;;  %s1100_s9 = smov 4  }
  0x23   :  { %22 = dma.hbm_to_vmem [thread:$0]  %s1195_s0, 4608, %s17_s27, [#allocation3], %s1099_s1, %s1099_s1, %s1100_s9  }
  0x24   :  { %s1101_s12 = smov [#allocation7]   ;;  %s1045_s16 = scalar_lea.hbm %s1197_s2, 1024 }
  0x25   :  { %s40_s13 = sshll.u32 %s1101_s12, 4  ;;  %p1046_p2 = scmp.ne.s32.totalorder %s1197_s2, %s1045_s16  ;;  %s41_s13 = int_to_ptr.vmem [resolvable:$true] %s40_s13 }
  0x26   :  { %p1049_p3 = scmp.lt.u32.totalorder %s1045_s16, %s1197_s2 }
  0x28   :  { %p1051_p4 = pnand %p1049_p3, %p1046_p2 }
  0x2a   :  { %1054 = shalt.err (!%p1051_p4)
}
  0x2b   :  { %s1055_s21 = scalar_lea.vmem %s41_s13, 1024  ;;  %p1060_p6 = scmp.lt.s32.totalorder %s41_s13, %s41_s13 }
  0x2c   :  { %p1056_p5 = scmp.ne.s32.totalorder %s41_s13, %s1055_s21  ;;  %p1061_p7 = scmp.lt.s32.totalorder %s1055_s21, %s1055_s21 }
  0x2e   :  { %p1062_p8 = por %p1061_p7, %p1060_p6 }
  0x30   :  { %p1063_p9 = pnand %p1062_p8, %p1056_p5 }
  0x32   :  { %1066 = shalt.err (!%p1063_p9)
}
  0x33   :  { %s1102_s0 = smov 128   ;;  %s1103_s22 = smov 8  }
  0x34   :  { %46 = dma.hbm_to_vmem [thread:$0]  %s1197_s2, 1024, %s41_s13, [#allocation6], %s1102_s0, %s1102_s0, %s1103_s22  }
  0x35   :  { %1089 = dma.done.wait [#allocation3], 4608  }
  0x36   :  { %1090 = vsyncadd [#allocation3], 4294962688 }
  0x37   :  { %1091 = dma.done.wait [#allocation6], 3584  }
  0x38   :  { %1092 = vsyncadd [#allocation6], 4294963712  ;;  %v1104_v0 = vmov 0   ;;  %v937_v1 = vld [vmem:[#allocation2 + $0x40] sm:$0xff]   ;;  %v941_v5 = vld [vmem:[#allocation2 + $0x48] sm:$0xff]   ;;  %vm517_vm0 = vcmask 523264  }
  0x39   :  { %935 = vset.pattern.permute.xlu0 %v1104_v0  ;;  %936 = vset.pattern.permute.xlu1 %v1104_v0  ;;  %v938_v2 = vld [vmem:[#allocation2 + $0xc0] sm:$0xff]   ;;  %v942_v6 = vld [vmem:[#allocation2 + $0xc8] sm:$0xff]   ;;  %v945_v9 = vld [vmem:[#allocation2 + $0x50] sm:$0xff]   ;;  %vm725_vm1 = vcmask 785408   ;;  %s1105_s2 = smov [#allocation8]  }
  0x3a   :  { %812 = vmatprep.subr.bf16.mxu0 %v937_v1  ;;  %v939_v3 = vld [vmem:[#allocation2] sm:$0xff]   ;;  %852 = vmatprep.subr.bf16.mxu1 %v938_v2  ;;  %v943_v7 = vld [vmem:[#allocation2 + $0x8] sm:$0xff]   ;;  %v946_v10 = vld [vmem:[#allocation2 + $0xd0] sm:$0xff]   ;;  %s739_s25 = sshll.u32 %s1105_s2, 4  ;;  %s740_s25 = int_to_ptr.vmem [resolvable:$true] %s739_s25 }
  0x3b   :  { %v940_v4 = vld [vmem:[#allocation2 + $0x80] sm:$0xff]   ;;  %813 = vmatpush3.bf16.msra.mxu0 %v939_v3  ;;  %v944_v8 = vld [vmem:[#allocation2 + $0x88] sm:$0xff]   ;;  %v947_v11 = vld [vmem:[#allocation2 + $0x10] sm:$0xff]   ;;  %s1067_s26 = scalar_lea.vmem %s740_s25, 1024  ;;  %p1072_p11 = scmp.lt.s32.totalorder %s740_s25, %s740_s25 }
  0x3c   :  { %853 = vmatpush3.bf16.msra.mxu1 %v940_v4  ;;  %814 = vmatprep.subr.bf16.mxu0 %v941_v5  ;;  %v948_v12 = vld [vmem:[#allocation2 + $0x90] sm:$0xff]   ;;  %v949_v13 = vld [vmem:[#allocation2 + $0x58] sm:$0xff]   ;;  %v953_v17 = vld [vmem:[#allocation2 + $0x60] sm:$0xff]   ;;  %p1068_p10 = scmp.ne.s32.totalorder %s740_s25, %s1067_s26  ;;  %p1073_p12 = scmp.lt.s32.totalorder %s1067_s26, %s1067_s26 }
  0x3d   :  { %854 = vmatprep.subr.bf16.mxu1 %v942_v6  ;;  %v950_v14 = vld [vmem:[#allocation2 + $0xd8] sm:$0xff]   ;;  %v954_v18 = vld [vmem:[#allocation2 + $0xe0] sm:$0xff]   ;;  %v957_v21 = vld [vmem:[#allocation2 + $0x68] sm:$0xff]  }
  0x3e   :  { %v951_v15 = vld [vmem:[#allocation2 + $0x18] sm:$0xff]   ;;  %v955_v19 = vld [vmem:[#allocation2 + $0x20] sm:$0xff]   ;;  %v958_v22 = vld [vmem:[#allocation2 + $0xe8] sm:$0xff]   ;;  %p1074_p13 = por %p1073_p12, %p1072_p11 }
  0x3f   :  { %815 = vmatpush3.bf16.msra.mxu0 %v943_v7  ;;  %v952_v16 = vld [vmem:[#allocation2 + $0x98] sm:$0xff]   ;;  %v956_v20 = vld [vmem:[#allocation2 + $0xa0] sm:$0xff]   ;;  %v959_v23 = vld [vmem:[#allocation2 + $0x28] sm:$0xff]  }
  0x40   :  { %855 = vmatpush3.bf16.msra.mxu1 %v944_v8  ;;  %816 = vmatprep.subr.bf16.mxu0 %v945_v9  ;;  %v960_v24 = vld [vmem:[#allocation2 + $0xa8] sm:$0xff]   ;;  %v961_v25 = vld [vmem:[#allocation2 + $0x70] sm:$0xff]   ;;  %v965_v29 = vld [vmem:[#allocation2 + $0x78] sm:$0xff]   ;;  %p1075_p0 = pnand %p1074_p13, %p1068_p10 }
  0x41   :  { %856 = vmatprep.subr.bf16.mxu1 %v946_v10  ;;  %v962_v26 = vld [vmem:[#allocation2 + $0xf0] sm:$0xff]   ;;  %v966_v30 = vld [vmem:[#allocation2 + $0xf8] sm:$0xff]   ;;  %v974_v36 = vld [vmem:[#allocation5 + $0xc] ss:$20 sps:$4 sm:$0xff]  }
  0x42   :  { %v963_v27 = vld [vmem:[#allocation2 + $0x30] sm:$0xff]   ;;  %v967_v31 = vld [vmem:[#allocation2 + $0x38] sm:$0xff]   ;;  %v975_v37 = vld [vmem:[#allocation2 + $0x100] sm:$0xff]   ;;  %627 = vmatprep.mubr.bf16.mxu1 %v974_v36 }
  0x43   :  { %817 = vmatpush3.bf16.msra.mxu0 %v947_v11  ;;  %v964_v28 = vld [vmem:[#allocation2 + $0xb0] sm:$0xff]   ;;  %v968_v32 = vld [vmem:[#allocation2 + $0xb8] sm:$0xff]   ;;  %v976_v38 = vld [vmem:[#allocation5 + $0x2c] ss:$20 sps:$4 sm:$0xff]  }
  0x44   :  { %857 = vmatpush3.bf16.msra.mxu1 %v948_v12  ;;  %818 = vmatprep.subr.bf16.mxu0 %v949_v13  ;;  %v969_v33 = vld [vmem:[#allocation5] ss:$20 sps:$4 sm:$0xff]   ;;  %v971_v34 = vld [vmem:[#allocation5 + $0x4] ss:$20 sps:$4 sm:$0xff]   ;;  %v972_v35 = vld [vmem:[#allocation5 + $0x8] ss:$20 sps:$4 sm:$0xff]  }
  0x45   :  { %858 = vmatprep.subr.bf16.mxu1 %v950_v14  ;;  %562 = vmatprep.mubr.bf16.mxu0 %v971_v34  ;;  %v978_v39 = vld [vmem:[#allocation5 + $0x34] ss:$20 sps:$4 sm:$0xff]   ;;  %v981_v42 = vld [vmem:[#allocation5 + $0x30] ss:$20 sps:$4 sm:$0xff]   ;;  %v996_v46 = vld [vmem:[#allocation2 + $0x118] sm:$0xff]  }
  0x46   :  { %v982_v40 = vld [vmem:[#allocation2 + $0x108] sm:$0xff]   ;;  %v985_v44 = vld [vmem:[#allocation5 + $0x5c] ss:$20 sps:$4 sm:$0xff]   ;;  %v992_v50 = vld [vmem:[#allocation5 + $0x84] ss:$20 sps:$4 sm:$0xff]  }
  0x47   :  { %819 = vmatpush3.bf16.msra.mxu0 %v951_v15  ;;  %v980_v41 = vld [vmem:[#allocation5 + $0x28] ss:$20 sps:$4 sm:$0xff]   ;;  %v989_v45 = vld [vmem:[#allocation2 + $0x110] sm:$0xff]   ;;  %v988_v48 = vld [vmem:[#allocation5 + $0x58] ss:$20 sps:$4 sm:$0xff]  }
  0x48   :  { %859 = vmatpush3.bf16.msra.mxu1 %v952_v16  ;;  %820 = vmatprep.subr.bf16.mxu0 %v953_v17  ;;  %v983_v43 = vld [vmem:[#allocation5 + $0x54] ss:$20 sps:$4 sm:$0xff]   ;;  %v987_v47 = vld [vmem:[#allocation5 + $0x50] ss:$20 sps:$4 sm:$0xff]   ;;  %v156_v54 = vld [vmem:[#allocation7 + $0x18] sm:$0xff] }
  0x49   :  { %860 = vmatprep.subr.bf16.mxu1 %v954_v18  ;;  %v990_v49 = vld [vmem:[#allocation5 + $0x7c] ss:$20 sps:$4 sm:$0xff]   ;;  %v153_v51 = vld [vmem:[#allocation7] sm:$0xff]  ;;  %v154_v53 = vld [vmem:[#allocation7 + $0x8] sm:$0xff] }
  0x4a   :  { %v155_v52 = vld [vmem:[#allocation7 + $0x10] sm:$0xff]  ;;  %163 = vperm.xlu0 %935, %v153_v51   ;;  %v994_v55 = vld [vmem:[#allocation5 + $0x78] ss:$20 sps:$4 sm:$0xff]   ;;  %v157_v58 = vld [vmem:[#allocation7 + $0x20] sm:$0xff] }
  0x4b   :  { %821 = vmatpush3.bf16.msra.mxu0 %v955_v19  ;;  %173 = vperm.xlu1 %936, %v155_v52   ;;  %v995_v56 = vld [vmem:[#allocation5 + $0x80] ss:$20 sps:$4 sm:$0xff]   ;;  %v997_v57 = vld [vmem:[#allocation5 + $0x10] ss:$20 sps:$4 sm:$0xff]   ;;  %v158_v60 = vld [vmem:[#allocation7 + $0x28] sm:$0xff] }
  0x4c   :  { %861 = vmatpush3.bf16.msra.mxu1 %v956_v20  ;;  %822 = vmatprep.subr.bf16.mxu0 %v957_v21  ;;  %v998_v59 = vld [vmem:[#allocation5 + $0x60] ss:$20 sps:$4 sm:$0xff]   ;;  %v160_v62 = vld [vmem:[#allocation7 + $0x38] sm:$0xff] }
  0x4d   :  { %862 = vmatprep.subr.bf16.mxu1 %v958_v22  ;;  %v159_v61 = vld [vmem:[#allocation7 + $0x30] sm:$0xff]  ;;  %v999_v63 = vld [vmem:[#allocation5 + $0x38] ss:$20 sps:$4 sm:$0xff]   ;;  %v1000_v0 = vld [vmem:[#allocation5 + $0x88] ss:$20 sps:$4 sm:$0xff]  }
  0x4e   :  { %168 = vperm.xlu0 %935, %v154_v53  }
  0x4f   :  { %823 = vmatpush3.bf16.msra.mxu0 %v959_v23  ;;  %178 = vperm.xlu1 %936, %v156_v54  }
  0x50   :  { %863 = vmatpush3.bf16.msra.mxu1 %v960_v24  ;;  %824 = vmatprep.subr.bf16.mxu0 %v961_v25 }
  0x51   :  { %864 = vmatprep.subr.bf16.mxu1 %v962_v26 }
  0x52   :  { %183 = vperm.xlu0 %935, %v157_v58  }
  0x53   :  { %825 = vmatpush3.bf16.msra.mxu0 %v963_v27  ;;  %188 = vperm.xlu1 %936, %v158_v60  }
  0x54   :  { %865 = vmatpush3.bf16.msra.mxu1 %v964_v28  ;;  %826 = vmatprep.subr.bf16.mxu0 %v965_v29 }
  0x55   :  { %866 = vmatprep.subr.bf16.mxu1 %v966_v30 }
  0x56   :  { %193 = vperm.xlu0 %935, %v159_v61  }
  0x57   :  { %827 = vmatpush3.bf16.msra.mxu0 %v967_v31  ;;  %198 = vperm.xlu1 %936, %v160_v62  }
  0x58   :  { %867 = vmatpush3.bf16.msra.mxu1 %v968_v32  ;;  %900 = vmatprep.subr.bf16.mxu0 %v975_v37 }
  0x59   :  { %916 = vmatprep.subr.bf16.mxu1 %v975_v37 }
  0x5a   :  { %563 = vmatmul.mubr.bf16.vlgmr.msra.gmra.mrb[0].mxu0 %v969_v33 }
  0x5b   :  { %628 = vmatmul.mubr.bf16.vlgmr.msra.gmra.mrb[0].mxu1 %v972_v35  ;;  %901 = vmatpush3.bf16.msra.mxu0 %v975_v37 }
  0x5c   :  { %920 = vmatpush3.bf16.msra.mxu1 %v975_v37  ;;  %570 = vmatprep.mubr.bf16.mxu0 %v976_v38 }
  0x5d   :  { %635 = vmatprep.mubr.bf16.mxu1 %v978_v39  ;;  %902 = vmatprep.subr.bf16.mxu0 %v982_v40 }
  0x5e   :  { %917 = vmatprep.subr.bf16.mxu1 %v982_v40 }
  0x5f   :  { %903 = vmatpush3.bf16.msra.mxu0 %v982_v40 }
  0x60   :  { %921 = vmatpush3.bf16.msra.mxu1 %v982_v40  ;;  %904 = vmatprep.subr.bf16.mxu0 %v989_v45 }
  0x61   :  { %918 = vmatprep.subr.bf16.mxu1 %v989_v45 }
  0x62   :  { %571 = vmatmul.mubr.bf16.gmra.mrb[4].mxu0 %v980_v41 }
  0x63   :  { %636 = vmatmul.mubr.bf16.gmra.mrb[4].mxu1 %v981_v42  ;;  %578 = vmatprep.mubr.bf16.mxu0 %v983_v43 }
  0x64   :  { %643 = vmatprep.mubr.bf16.mxu1 %v985_v44  ;;  %905 = vmatpush3.bf16.msra.mxu0 %v989_v45 }
  0x65   :  { %922 = vmatpush3.bf16.msra.mxu1 %v989_v45  ;;  %906 = vmatprep.subr.bf16.mxu0 %v996_v46 }
  0x66   :  { %919 = vmatprep.subr.bf16.mxu1 %v996_v46 }
  0x68   :  { %907 = vmatpush3.bf16.msra.mxu0 %v996_v46 }
  0x69   :  { %923 = vmatpush3.bf16.msra.mxu1 %v996_v46 }
  0x6a   :  { %579 = vmatmul.mubr.bf16.gmra.mrb[8].mxu0 %v987_v47 }
  0x6b   :  { %644 = vmatmul.mubr.bf16.gmra.mrb[8].mxu1 %v988_v48  ;;  %586 = vmatprep.mubr.bf16.mxu0 %v990_v49 }
  0x6c   :  { %651 = vmatprep.mubr.bf16.mxu1 %v992_v50 }
  0x72   :  { %587 = vmatmul.mubr.bf16.gmra.mrb[12].mxu0 %v994_v55 }
  0x73   :  { %652 = vmatmul.mubr.bf16.gmra.mrb[12].mxu1 %v995_v56  ;;  %908 = vmatprep.mubr.msk.bf16.mxu0 %vm517_vm0, %v997_v57 }
  0x74   :  { %912 = vmatprep.mubr.msk.bf16.mxu1 %vm517_vm0, %v998_v59 }
  0x7a   :  { %909 = vmatmul.mubr.msk.bf16.vlgmr.msra.gmra.mrb[16].mxu0 %vm517_vm0, %v999_v63 }
  0x7b   :  { %913 = vmatmul.mubr.msk.bf16.vlgmr.msra.gmra.mrb[16].mxu1 %vm517_vm0, %v1000_v0 }
  0xc9   :  { %v164_v1 = vpop.permute.xlu0 %163 }
  0xca   :  { %v174_v18 = vpop.permute.xlu1 %173 }
  0xcd   :  { %v169_v3 = vpop.permute.xlu0 %168 }
  0xce   :  { %v179_v33 = vpop.permute.xlu1 %178 }
  0xd1   :  { %v184_v36 = vpop.permute.xlu0 %183 }
  0xd2   :  { %v189_v50 = vpop.permute.xlu1 %188 }
  0xd5   :  { %v194_v54 = vpop.permute.xlu0 %193 }
 0x12d   :  { %v828_v2 = vpop.f32.mrb[0].mxu0 }
 0x12e   :  { %v868_v4 = vpop.f32.mrb[0].mxu1  ;;  %v829_v5 = vpop.f32.mrb[1].mxu0 }
 0x12f   :  { %v830_v6 = vadd.f32 %v829_v5, %v828_v2  ;;  %v869_v7 = vpop.f32.mrb[1].mxu1  ;;  %v831_v8 = vpop.f32.mrb[2].mxu0 }
 0x130   :  { %v870_v9 = vadd.f32 %v869_v7, %v868_v4  ;;  %v871_v10 = vpop.f32.mrb[2].mxu1  ;;  %v832_v11 = vpop.f32.mrb[3].mxu0 }
 0x131   :  { %v565_v12 = vadd.f32 %v830_v6, %v164_v1  ;;  %v833_v13 = vadd.f32 %v832_v11, %v831_v8  ;;  %v872_v14 = vpop.f32.mrb[3].mxu1  ;;  %v199_v4 = vpop.permute.xlu1 %198 }
 0x132   :  { %v873_v15 = vadd.f32 %v872_v14, %v871_v10 }
 0x133   :  { %v568_v16 = vadd.f32 %v833_v13, %v169_v3  ;;  %v630_v17 = vadd.f32 %v870_v9, %v565_v12 }
 0x135   :  { %v834_v19 = vpop.f32.mrb[4].mxu0  ;;  %v1169_v20 = vadd.f32 %v873_v15, %v568_v16 }
 0x136   :  { %v874_v21 = vpop.f32.mrb[4].mxu1  ;;  %v835_v22 = vpop.f32.mrb[5].mxu0 }
 0x137   :  { %v836_v23 = vadd.f32 %v835_v22, %v834_v19  ;;  %v875_v24 = vpop.f32.mrb[5].mxu1  ;;  %v837_v25 = vpop.f32.mrb[6].mxu0 }
 0x138   :  { %v876_v26 = vadd.f32 %v875_v24, %v874_v21  ;;  %v877_v27 = vpop.f32.mrb[6].mxu1  ;;  %v838_v28 = vpop.f32.mrb[7].mxu0 }
 0x139   :  { %v573_v29 = vadd.f32 %v836_v23, %v174_v18  ;;  %v839_v30 = vadd.f32 %v838_v28, %v837_v25  ;;  %v878_v31 = vpop.f32.mrb[7].mxu1 }
 0x13a   :  { %v879_v32 = vadd.f32 %v878_v31, %v877_v27 }
 0x13b   :  { %v576_v34 = vadd.f32 %v839_v30, %v179_v33  ;;  %v638_v35 = vadd.f32 %v876_v26, %v573_v29 }
 0x13d   :  { %v840_v37 = vpop.f32.mrb[8].mxu0  ;;  %v641_v38 = vadd.f32 %v879_v32, %v576_v34 }
 0x13e   :  { %v880_v39 = vpop.f32.mrb[8].mxu1  ;;  %v841_v40 = vpop.f32.mrb[9].mxu0 }
 0x13f   :  { %v842_v41 = vadd.f32 %v841_v40, %v840_v37  ;;  %v881_v42 = vpop.f32.mrb[9].mxu1  ;;  %v843_v43 = vpop.f32.mrb[10].mxu0 }
 0x140   :  { %v882_v44 = vadd.f32 %v881_v42, %v880_v39  ;;  %v883_v45 = vpop.f32.mrb[10].mxu1  ;;  %v844_v46 = vpop.f32.mrb[11].mxu0 }
 0x141   :  { %v581_v47 = vadd.f32 %v842_v41, %v184_v36  ;;  %v845_v48 = vadd.f32 %v844_v46, %v843_v43  ;;  %v884_v49 = vpop.f32.mrb[11].mxu1 }
 0x142   :  { %v885_v51 = vadd.f32 %v884_v49, %v883_v45 }
 0x143   :  { %v584_v52 = vadd.f32 %v845_v48, %v189_v50  ;;  %v646_v53 = vadd.f32 %v882_v44, %v581_v47 }
 0x145   :  { %v846_v55 = vpop.f32.mrb[12].mxu0  ;;  %v649_v56 = vadd.f32 %v885_v51, %v584_v52 }
 0x146   :  { %v886_v57 = vpop.f32.mrb[12].mxu1  ;;  %v847_v58 = vpop.f32.mrb[13].mxu0 }
 0x147   :  { %v848_v59 = vadd.f32 %v847_v58, %v846_v55  ;;  %v887_v60 = vpop.f32.mrb[13].mxu1  ;;  %v849_v61 = vpop.f32.mrb[14].mxu0 }
 0x148   :  { %v888_v62 = vadd.f32 %v887_v60, %v886_v57  ;;  %v889_v63 = vpop.f32.mrb[14].mxu1  ;;  %v850_v0 = vpop.f32.mrb[15].mxu0 }
 0x149   :  { %v589_v1 = vadd.f32 %v848_v59, %v194_v54  ;;  %v851_v2 = vadd.f32 %v850_v0, %v849_v61  ;;  %v890_v3 = vpop.f32.mrb[15].mxu1 }
 0x14a   :  { %v891_v5 = vadd.f32 %v890_v3, %v889_v63 }
 0x14b   :  { %v592_v6 = vadd.f32 %v851_v2, %v199_v4  ;;  %v654_v7 = vadd.f32 %v888_v62, %v589_v1 }
 0x14d   :  { %v910_v8 = vpop.f32.mrb[16].mxu0  ;;  %v657_v9 = vadd.f32 %v891_v5, %v592_v6 }
 0x14e   :  { %v703_v10 = vadd.f32 %v910_v8, %v638_v35  ;;  %v914_v11 = vpop.f32.mrb[16].mxu1  ;;  %v694_v12 = vpop.f32.mrb[17].mxu0 }
 0x14f   :  { %v719_v13 = vadd.f32 %v914_v11, %v654_v7  ;;  %v695_v14 = vadd.f32 %v694_v12, %v630_v17  ;;  %v710_v15 = vpop.f32.mrb[17].mxu1  ;;  %v911_v16 = vpop.f32.mrb[18].mxu0 }
 0x150   :  { %728 = vst.msk [vmem:[#allocation8 + $0x10] sm:$0xff] %vm725_vm1, %v703_v10  ;;  %v711_v18 = vadd.f32 %v710_v15, %v646_v53  ;;  %v706_v19 = vadd.f32 %v911_v16, %v641_v38  ;;  %v915_v21 = vpop.f32.mrb[18].mxu1  ;;  %v697_v22 = vpop.f32.mrb[19].mxu0 }
 0x151   :  { %732 = vst.msk [vmem:[#allocation8 + $0x30] sm:$0xff] %vm725_vm1, %v719_v13  ;;  %726 = vst.msk [vmem:[#allocation8] sm:$0xff] %vm725_vm1, %v695_v14  ;;  %v722_v23 = vadd.f32 %v915_v21, %v657_v9  ;;  %v698_v24 = vadd.f32 %v697_v22, %v1169_v20  ;;  %v713_v25 = vpop.f32.mrb[19].mxu1 }
 0x152   :  { %730 = vst.msk [vmem:[#allocation8 + $0x20] sm:$0xff] %vm725_vm1, %v711_v18  ;;  %729 = vst.msk [vmem:[#allocation8 + $0x18] sm:$0xff] %vm725_vm1, %v706_v19  ;;  %v714_v17 = vadd.f32 %v713_v25, %v649_v56 }
 0x153   :  { %733 = vst.msk [vmem:[#allocation8 + $0x38] sm:$0xff] %vm725_vm1, %v722_v23  ;;  %727 = vst.msk [vmem:[#allocation8 + $0x8] sm:$0xff] %vm725_vm1, %v698_v24 }
 0x154   :  { %731 = vst.msk [vmem:[#allocation8 + $0x28] sm:$0xff] %vm725_vm1, %v714_v17 }
 0x155   :  { %1078 = shalt.err (!%p1075_p0)
}
 0x156   :  { %s1079_s29 = scalar_lea.hbm %s1198_s3, 1024 }
 0x157   :  { %p1080_p1 = scmp.ne.s32.totalorder %s1198_s3, %s1079_s29  ;;  %p1083_p2 = scmp.lt.u32.totalorder %s1079_s29, %s1198_s3 }
 0x159   :  { %p1085_p3 = pnand %p1083_p2, %p1080_p1 }
 0x15b   :  { %1088 = shalt.err (!%p1085_p3)
}
 0x15c   :  { %745 = dma.vmem_to_hbm [thread:$0]  %s740_s25, 1024, %s1198_s3, [#allocation4], %s1102_s0, %s1102_s0, %s1103_s22  }
 0x15d   :  { %1093 = dma.done.wait [#allocation4], 1024  }
 0x15e   :  { %1094 = vsyncadd [#allocation4], 4294966272 }
 0x15f   :  { %749 = vsyncpa [#allocation3], 1 }
 0x160   :  { %750 = vsyncpa [#allocation6], 1 }
 0x161   :  { %751 = vsyncpa [#allocation4], 1 }

// kernel: deepvo_forward.15
= control target key start
LH: loop header
LB: loop body
LE: loop exit
PB: predicated region body
PF: predicated region fallthrough
CT: control target
= control target key end

     0   :  { %8 = vsyncpa [#allocation3], 0  ;;  %s1195_s0 = inlined_call_operand.hbm [shape: bf16[1,576,24], index: 0, kind: input, shape index: {}]   ;;  %s1196_s1 = inlined_call_operand.hbm [shape: bf16[64,576], index: 1, kind: input, shape index: {}]   ;;  %s1197_s2 = inlined_call_operand.hbm [shape: f32[64,1], index: 2, kind: input, shape index: {}]   ;;  %s1198_s3 = inlined_call_operand.hbm [shape: f32[1,64,24], index: 3, kind: output, shape index: {}]  }
   0x1   :  { %9 = vsyncpa [#allocation6], 0 }
   0x2   :  { %10 = vsyncpa [#allocation4], 0  ;;  %s1095_s12 = smov [#allocation5]   ;;  %s1001_s16 = scalar_lea.hbm %s1196_s1, 2560 }
   0x3   :  { %s28_s13 = sshll.u32 %s1095_s12, 4  ;;  %p1002_p0 = scmp.ne.s32.totalorder %s1196_s1, %s1001_s16  ;;  %s29_s13 = int_to_ptr.vmem [resolvable:$true] %s28_s13 }
   0x4   :  { %p1005_p1 = scmp.lt.u32.totalorder %s1001_s16, %s1196_s1 }
   0x6   :  { %p1007_p2 = pnand %p1005_p1, %p1002_p0 }
   0x8   :  { %1010 = shalt.err (!%p1007_p2)
}
   0x9   :  { %s1011_s21 = scalar_lea.vmem %s29_s13, 2560  ;;  %p1016_p4 = scmp.lt.s32.totalorder %s29_s13, %s29_s13 }
   0xa   :  { %p1012_p3 = scmp.ne.s32.totalorder %s29_s13, %s1011_s21  ;;  %p1017_p5 = scmp.lt.s32.totalorder %s1011_s21, %s1011_s21 }
   0xc   :  { %p1018_p6 = por %p1017_p5, %p1016_p4 }
   0xe   :  { %p1019_p7 = pnand %p1018_p6, %p1012_p3 }
  0x10   :  { %1022 = shalt.err (!%p1019_p7)
}
  0x11   :  { %s1096_s22 = smov 320   ;;  %s1097_s23 = smov 20  }
  0x12   :  { %34 = dma.hbm_to_vmem [thread:$0]  %s1196_s1, 2560, %s29_s13, [#allocation6], %s1096_s22, %s1096_s22, %s1097_s23  }
  0x13   :  { %s1098_s26 = smov [#allocation2]   ;;  %s1023_s30 = scalar_lea.hbm %s1195_s0, 4608 }
  0x14   :  { %s16_s27 = sshll.u32 %s1098_s26, 4  ;;  %p1024_p8 = scmp.ne.s32.totalorder %s1195_s0, %s1023_s30  ;;  %s17_s27 = int_to_ptr.vmem [resolvable:$true] %s16_s27 }
  0x15   :  { %p1027_p9 = scmp.lt.u32.totalorder %s1023_s30, %s1195_s0 }
  0x17   :  { %p1029_p10 = pnand %p1027_p9, %p1024_p8 }
  0x19   :  { %1032 = shalt.err (!%p1029_p10)
}
  0x1a   :  { %s1033_s8 = scalar_lea.vmem %s17_s27, 4608  ;;  %p1038_p12 = scmp.lt.s32.totalorder %s17_s27, %s17_s27 }
  0x1b   :  { %p1034_p11 = scmp.ne.s32.totalorder %s17_s27, %s1033_s8  ;;  %p1039_p13 = scmp.lt.s32.totalorder %s1033_s8, %s1033_s8 }
  0x1d   :  { %p1040_p0 = por %p1039_p13, %p1038_p12 }
  0x1f   :  { %p1041_p1 = pnand %p1040_p0, %p1034_p11 }
  0x21   :  { %1044 = shalt.err (!%p1041_p1)
}
  0x22   :  { %s1099_s1 = smov 64   ;;  %s1100_s9 = smov 4  }
  0x23   :  { %22 = dma.hbm_to_vmem [thread:$0]  %s1195_s0, 4608, %s17_s27, [#allocation3], %s1099_s1, %s1099_s1, %s1100_s9  }
  0x24   :  { %s1101_s12 = smov [#allocation7]   ;;  %s1045_s16 = scalar_lea.hbm %s1197_s2, 1024 }
  0x25   :  { %s40_s13 = sshll.u32 %s1101_s12, 4  ;;  %p1046_p2 = scmp.ne.s32.totalorder %s1197_s2, %s1045_s16  ;;  %s41_s13 = int_to_ptr.vmem [resolvable:$true] %s40_s13 }
  0x26   :  { %p1049_p3 = scmp.lt.u32.totalorder %s1045_s16, %s1197_s2 }
  0x28   :  { %p1051_p4 = pnand %p1049_p3, %p1046_p2 }
  0x2a   :  { %1054 = shalt.err (!%p1051_p4)
}
  0x2b   :  { %s1055_s21 = scalar_lea.vmem %s41_s13, 1024  ;;  %p1060_p6 = scmp.lt.s32.totalorder %s41_s13, %s41_s13 }
  0x2c   :  { %p1056_p5 = scmp.ne.s32.totalorder %s41_s13, %s1055_s21  ;;  %p1061_p7 = scmp.lt.s32.totalorder %s1055_s21, %s1055_s21 }
  0x2e   :  { %p1062_p8 = por %p1061_p7, %p1060_p6 }
  0x30   :  { %p1063_p9 = pnand %p1062_p8, %p1056_p5 }
  0x32   :  { %1066 = shalt.err (!%p1063_p9)
}
  0x33   :  { %s1102_s0 = smov 128   ;;  %s1103_s22 = smov 8  }
  0x34   :  { %46 = dma.hbm_to_vmem [thread:$0]  %s1197_s2, 1024, %s41_s13, [#allocation6], %s1102_s0, %s1102_s0, %s1103_s22  }
  0x35   :  { %1089 = dma.done.wait [#allocation3], 4608  }
  0x36   :  { %1090 = vsyncadd [#allocation3], 4294962688 }
  0x37   :  { %1091 = dma.done.wait [#allocation6], 3584  }
  0x38   :  { %1092 = vsyncadd [#allocation6], 4294963712  ;;  %v1104_v0 = vmov 0   ;;  %v937_v1 = vld [vmem:[#allocation2 + $0x40] sm:$0xff]   ;;  %v941_v5 = vld [vmem:[#allocation2 + $0x48] sm:$0xff]   ;;  %vm517_vm0 = vcmask 523264  }
  0x39   :  { %935 = vset.pattern.permute.xlu0 %v1104_v0  ;;  %936 = vset.pattern.permute.xlu1 %v1104_v0  ;;  %v938_v2 = vld [vmem:[#allocation2 + $0xc0] sm:$0xff]   ;;  %v942_v6 = vld [vmem:[#allocation2 + $0xc8] sm:$0xff]   ;;  %v945_v9 = vld [vmem:[#allocation2 + $0x50] sm:$0xff]   ;;  %vm725_vm1 = vcmask 195584   ;;  %s1105_s2 = smov [#allocation8]  }
  0x3a   :  { %812 = vmatprep.subr.bf16.mxu0 %v937_v1  ;;  %v939_v3 = vld [vmem:[#allocation2] sm:$0xff]   ;;  %852 = vmatprep.subr.bf16.mxu1 %v938_v2  ;;  %v943_v7 = vld [vmem:[#allocation2 + $0x8] sm:$0xff]   ;;  %v946_v10 = vld [vmem:[#allocation2 + $0xd0] sm:$0xff]   ;;  %s739_s25 = sshll.u32 %s1105_s2, 4  ;;  %s740_s25 = int_to_ptr.vmem [resolvable:$true] %s739_s25 }
  0x3b   :  { %v940_v4 = vld [vmem:[#allocation2 + $0x80] sm:$0xff]   ;;  %813 = vmatpush3.bf16.msra.mxu0 %v939_v3  ;;  %v944_v8 = vld [vmem:[#allocation2 + $0x88] sm:$0xff]   ;;  %v947_v11 = vld [vmem:[#allocation2 + $0x10] sm:$0xff]   ;;  %s1067_s26 = scalar_lea.vmem %s740_s25, 1024  ;;  %p1072_p11 = scmp.lt.s32.totalorder %s740_s25, %s740_s25 }
  0x3c   :  { %853 = vmatpush3.bf16.msra.mxu1 %v940_v4  ;;  %814 = vmatprep.subr.bf16.mxu0 %v941_v5  ;;  %v948_v12 = vld [vmem:[#allocation2 + $0x90] sm:$0xff]   ;;  %v949_v13 = vld [vmem:[#allocation2 + $0x58] sm:$0xff]   ;;  %v953_v17 = vld [vmem:[#allocation2 + $0x60] sm:$0xff]   ;;  %p1068_p10 = scmp.ne.s32.totalorder %s740_s25, %s1067_s26  ;;  %p1073_p12 = scmp.lt.s32.totalorder %s1067_s26, %s1067_s26 }
  0x3d   :  { %854 = vmatprep.subr.bf16.mxu1 %v942_v6  ;;  %v950_v14 = vld [vmem:[#allocation2 + $0xd8] sm:$0xff]   ;;  %v954_v18 = vld [vmem:[#allocation2 + $0xe0] sm:$0xff]   ;;  %v957_v21 = vld [vmem:[#allocation2 + $0x68] sm:$0xff]  }
  0x3e   :  { %v951_v15 = vld [vmem:[#allocation2 + $0x18] sm:$0xff]   ;;  %v955_v19 = vld [vmem:[#allocation2 + $0x20] sm:$0xff]   ;;  %v958_v22 = vld [vmem:[#allocation2 + $0xe8] sm:$0xff]   ;;  %p1074_p13 = por %p1073_p12, %p1072_p11 }
  0x3f   :  { %815 = vmatpush3.bf16.msra.mxu0 %v943_v7  ;;  %v952_v16 = vld [vmem:[#allocation2 + $0x98] sm:$0xff]   ;;  %v956_v20 = vld [vmem:[#allocation2 + $0xa0] sm:$0xff]   ;;  %v959_v23 = vld [vmem:[#allocation2 + $0x28] sm:$0xff]  }
  0x40   :  { %855 = vmatpush3.bf16.msra.mxu1 %v944_v8  ;;  %816 = vmatprep.subr.bf16.mxu0 %v945_v9  ;;  %v960_v24 = vld [vmem:[#allocation2 + $0xa8] sm:$0xff]   ;;  %v961_v25 = vld [vmem:[#allocation2 + $0x70] sm:$0xff]   ;;  %v965_v29 = vld [vmem:[#allocation2 + $0x78] sm:$0xff]   ;;  %p1075_p0 = pnand %p1074_p13, %p1068_p10 }
  0x41   :  { %856 = vmatprep.subr.bf16.mxu1 %v946_v10  ;;  %v962_v26 = vld [vmem:[#allocation2 + $0xf0] sm:$0xff]   ;;  %v966_v30 = vld [vmem:[#allocation2 + $0xf8] sm:$0xff]   ;;  %v974_v36 = vld [vmem:[#allocation5 + $0xc] ss:$20 sps:$4 sm:$0xff]  }
  0x42   :  { %v963_v27 = vld [vmem:[#allocation2 + $0x30] sm:$0xff]   ;;  %v967_v31 = vld [vmem:[#allocation2 + $0x38] sm:$0xff]   ;;  %v975_v37 = vld [vmem:[#allocation2 + $0x100] sm:$0xff]   ;;  %627 = vmatprep.mubr.bf16.mxu1 %v974_v36 }
  0x43   :  { %817 = vmatpush3.bf16.msra.mxu0 %v947_v11  ;;  %v964_v28 = vld [vmem:[#allocation2 + $0xb0] sm:$0xff]   ;;  %v968_v32 = vld [vmem:[#allocation2 + $0xb8] sm:$0xff]   ;;  %v976_v38 = vld [vmem:[#allocation5 + $0x2c] ss:$20 sps:$4 sm:$0xff]  }
  0x44   :  { %857 = vmatpush3.bf16.msra.mxu1 %v948_v12  ;;  %818 = vmatprep.subr.bf16.mxu0 %v949_v13  ;;  %v969_v33 = vld [vmem:[#allocation5] ss:$20 sps:$4 sm:$0xff]   ;;  %v971_v34 = vld [vmem:[#allocation5 + $0x4] ss:$20 sps:$4 sm:$0xff]   ;;  %v972_v35 = vld [vmem:[#allocation5 + $0x8] ss:$20 sps:$4 sm:$0xff]  }
  0x45   :  { %858 = vmatprep.subr.bf16.mxu1 %v950_v14  ;;  %562 = vmatprep.mubr.bf16.mxu0 %v971_v34  ;;  %v978_v39 = vld [vmem:[#allocation5 + $0x34] ss:$20 sps:$4 sm:$0xff]   ;;  %v981_v42 = vld [vmem:[#allocation5 + $0x30] ss:$20 sps:$4 sm:$0xff]   ;;  %v996_v46 = vld [vmem:[#allocation2 + $0x118] sm:$0xff]  }
  0x46   :  { %v982_v40 = vld [vmem:[#allocation2 + $0x108] sm:$0xff]   ;;  %v985_v44 = vld [vmem:[#allocation5 + $0x5c] ss:$20 sps:$4 sm:$0xff]   ;;  %v992_v50 = vld [vmem:[#allocation5 + $0x84] ss:$20 sps:$4 sm:$0xff]  }
  0x47   :  { %819 = vmatpush3.bf16.msra.mxu0 %v951_v15  ;;  %v980_v41 = vld [vmem:[#allocation5 + $0x28] ss:$20 sps:$4 sm:$0xff]   ;;  %v989_v45 = vld [vmem:[#allocation2 + $0x110] sm:$0xff]   ;;  %v988_v48 = vld [vmem:[#allocation5 + $0x58] ss:$20 sps:$4 sm:$0xff]  }
  0x48   :  { %859 = vmatpush3.bf16.msra.mxu1 %v952_v16  ;;  %820 = vmatprep.subr.bf16.mxu0 %v953_v17  ;;  %v983_v43 = vld [vmem:[#allocation5 + $0x54] ss:$20 sps:$4 sm:$0xff]   ;;  %v987_v47 = vld [vmem:[#allocation5 + $0x50] ss:$20 sps:$4 sm:$0xff]   ;;  %v156_v54 = vld [vmem:[#allocation7 + $0x18] sm:$0xff] }
  0x49   :  { %860 = vmatprep.subr.bf16.mxu1 %v954_v18  ;;  %v990_v49 = vld [vmem:[#allocation5 + $0x7c] ss:$20 sps:$4 sm:$0xff]   ;;  %v153_v51 = vld [vmem:[#allocation7] sm:$0xff]  ;;  %v154_v53 = vld [vmem:[#allocation7 + $0x8] sm:$0xff] }
  0x4a   :  { %v155_v52 = vld [vmem:[#allocation7 + $0x10] sm:$0xff]  ;;  %163 = vperm.xlu0 %935, %v153_v51   ;;  %v994_v55 = vld [vmem:[#allocation5 + $0x78] ss:$20 sps:$4 sm:$0xff]   ;;  %v157_v58 = vld [vmem:[#allocation7 + $0x20] sm:$0xff] }
  0x4b   :  { %821 = vmatpush3.bf16.msra.mxu0 %v955_v19  ;;  %173 = vperm.xlu1 %936, %v155_v52   ;;  %v995_v56 = vld [vmem:[#allocation5 + $0x80] ss:$20 sps:$4 sm:$0xff]   ;;  %v997_v57 = vld [vmem:[#allocation5 + $0x10] ss:$20 sps:$4 sm:$0xff]   ;;  %v158_v60 = vld [vmem:[#allocation7 + $0x28] sm:$0xff] }
  0x4c   :  { %861 = vmatpush3.bf16.msra.mxu1 %v956_v20  ;;  %822 = vmatprep.subr.bf16.mxu0 %v957_v21  ;;  %v998_v59 = vld [vmem:[#allocation5 + $0x60] ss:$20 sps:$4 sm:$0xff]   ;;  %v160_v62 = vld [vmem:[#allocation7 + $0x38] sm:$0xff] }
  0x4d   :  { %862 = vmatprep.subr.bf16.mxu1 %v958_v22  ;;  %v159_v61 = vld [vmem:[#allocation7 + $0x30] sm:$0xff]  ;;  %v999_v63 = vld [vmem:[#allocation5 + $0x38] ss:$20 sps:$4 sm:$0xff]   ;;  %v1000_v0 = vld [vmem:[#allocation5 + $0x88] ss:$20 sps:$4 sm:$0xff]  }
  0x4e   :  { %168 = vperm.xlu0 %935, %v154_v53  }
  0x4f   :  { %823 = vmatpush3.bf16.msra.mxu0 %v959_v23  ;;  %178 = vperm.xlu1 %936, %v156_v54  }
  0x50   :  { %863 = vmatpush3.bf16.msra.mxu1 %v960_v24  ;;  %824 = vmatprep.subr.bf16.mxu0 %v961_v25 }
  0x51   :  { %864 = vmatprep.subr.bf16.mxu1 %v962_v26 }
  0x52   :  { %183 = vperm.xlu0 %935, %v157_v58  }
  0x53   :  { %825 = vmatpush3.bf16.msra.mxu0 %v963_v27  ;;  %188 = vperm.xlu1 %936, %v158_v60  }
  0x54   :  { %865 = vmatpush3.bf16.msra.mxu1 %v964_v28  ;;  %826 = vmatprep.subr.bf16.mxu0 %v965_v29 }
  0x55   :  { %866 = vmatprep.subr.bf16.mxu1 %v966_v30 }
  0x56   :  { %193 = vperm.xlu0 %935, %v159_v61  }
  0x57   :  { %827 = vmatpush3.bf16.msra.mxu0 %v967_v31  ;;  %198 = vperm.xlu1 %936, %v160_v62  }
  0x58   :  { %867 = vmatpush3.bf16.msra.mxu1 %v968_v32  ;;  %900 = vmatprep.subr.bf16.mxu0 %v975_v37 }
  0x59   :  { %916 = vmatprep.subr.bf16.mxu1 %v975_v37 }
  0x5a   :  { %563 = vmatmul.mubr.bf16.vlgmr.msra.gmra.mrb[0].mxu0 %v969_v33 }
  0x5b   :  { %628 = vmatmul.mubr.bf16.vlgmr.msra.gmra.mrb[0].mxu1 %v972_v35  ;;  %901 = vmatpush3.bf16.msra.mxu0 %v975_v37 }
  0x5c   :  { %920 = vmatpush3.bf16.msra.mxu1 %v975_v37  ;;  %570 = vmatprep.mubr.bf16.mxu0 %v976_v38 }
  0x5d   :  { %635 = vmatprep.mubr.bf16.mxu1 %v978_v39  ;;  %902 = vmatprep.subr.bf16.mxu0 %v982_v40 }
  0x5e   :  { %917 = vmatprep.subr.bf16.mxu1 %v982_v40 }
  0x5f   :  { %903 = vmatpush3.bf16.msra.mxu0 %v982_v40 }
  0x60   :  { %921 = vmatpush3.bf16.msra.mxu1 %v982_v40  ;;  %904 = vmatprep.subr.bf16.mxu0 %v989_v45 }
  0x61   :  { %918 = vmatprep.subr.bf16.mxu1 %v989_v45 }
  0x62   :  { %571 = vmatmul.mubr.bf16.gmra.mrb[4].mxu0 %v980_v41 }
  0x63   :  { %636 = vmatmul.mubr.bf16.gmra.mrb[4].mxu1 %v981_v42  ;;  %578 = vmatprep.mubr.bf16.mxu0 %v983_v43 }
  0x64   :  { %643 = vmatprep.mubr.bf16.mxu1 %v985_v44  ;;  %905 = vmatpush3.bf16.msra.mxu0 %v989_v45 }
  0x65   :  { %922 = vmatpush3.bf16.msra.mxu1 %v989_v45  ;;  %906 = vmatprep.subr.bf16.mxu0 %v996_v46 }
  0x66   :  { %919 = vmatprep.subr.bf16.mxu1 %v996_v46 }
  0x68   :  { %907 = vmatpush3.bf16.msra.mxu0 %v996_v46 }
  0x69   :  { %923 = vmatpush3.bf16.msra.mxu1 %v996_v46 }
  0x6a   :  { %579 = vmatmul.mubr.bf16.gmra.mrb[8].mxu0 %v987_v47 }
  0x6b   :  { %644 = vmatmul.mubr.bf16.gmra.mrb[8].mxu1 %v988_v48  ;;  %586 = vmatprep.mubr.bf16.mxu0 %v990_v49 }
  0x6c   :  { %651 = vmatprep.mubr.bf16.mxu1 %v992_v50 }
  0x72   :  { %587 = vmatmul.mubr.bf16.gmra.mrb[12].mxu0 %v994_v55 }
  0x73   :  { %652 = vmatmul.mubr.bf16.gmra.mrb[12].mxu1 %v995_v56  ;;  %908 = vmatprep.mubr.msk.bf16.mxu0 %vm517_vm0, %v997_v57 }
  0x74   :  { %912 = vmatprep.mubr.msk.bf16.mxu1 %vm517_vm0, %v998_v59 }
  0x7a   :  { %909 = vmatmul.mubr.msk.bf16.vlgmr.msra.gmra.mrb[16].mxu0 %vm517_vm0, %v999_v63 }
  0x7b   :  { %913 = vmatmul.mubr.msk.bf16.vlgmr.msra.gmra.mrb[16].mxu1 %vm517_vm0, %v1000_v0 }
  0xc9   :  { %v164_v1 = vpop.permute.xlu0 %163 }
  0xca   :  { %v174_v18 = vpop.permute.xlu1 %173 }
  0xcd   :  { %v169_v3 = vpop.permute.xlu0 %168 }
  0xce   :  { %v179_v33 = vpop.permute.xlu1 %178 }
  0xd1   :  { %v184_v36 = vpop.permute.xlu0 %183 }
  0xd2   :  { %v189_v50 = vpop.permute.xlu1 %188 }
  0xd5   :  { %v194_v54 = vpop.permute.xlu0 %193 }
 0x12d   :  { %v828_v2 = vpop.f32.mrb[0].mxu0 }
 0x12e   :  { %v868_v4 = vpop.f32.mrb[0].mxu1  ;;  %v829_v5 = vpop.f32.mrb[1].mxu0 }
 0x12f   :  { %v830_v6 = vadd.f32 %v829_v5, %v828_v2  ;;  %v869_v7 = vpop.f32.mrb[1].mxu1  ;;  %v831_v8 = vpop.f32.mrb[2].mxu0 }
 0x130   :  { %v870_v9 = vadd.f32 %v869_v7, %v868_v4  ;;  %v871_v10 = vpop.f32.mrb[2].mxu1  ;;  %v832_v11 = vpop.f32.mrb[3].mxu0 }
 0x131   :  { %v565_v12 = vadd.f32 %v830_v6, %v164_v1  ;;  %v833_v13 = vadd.f32 %v832_v11, %v831_v8  ;;  %v872_v14 = vpop.f32.mrb[3].mxu1  ;;  %v199_v4 = vpop.permute.xlu1 %198 }
 0x132   :  { %v873_v15 = vadd.f32 %v872_v14, %v871_v10 }
 0x133   :  { %v568_v16 = vadd.f32 %v833_v13, %v169_v3  ;;  %v630_v17 = vadd.f32 %v870_v9, %v565_v12 }
 0x135   :  { %v834_v19 = vpop.f32.mrb[4].mxu0  ;;  %v1169_v20 = vadd.f32 %v873_v15, %v568_v16 }
 0x136   :  { %v874_v21 = vpop.f32.mrb[4].mxu1  ;;  %v835_v22 = vpop.f32.mrb[5].mxu0 }
 0x137   :  { %v836_v23 = vadd.f32 %v835_v22, %v834_v19  ;;  %v875_v24 = vpop.f32.mrb[5].mxu1  ;;  %v837_v25 = vpop.f32.mrb[6].mxu0 }
 0x138   :  { %v876_v26 = vadd.f32 %v875_v24, %v874_v21  ;;  %v877_v27 = vpop.f32.mrb[6].mxu1  ;;  %v838_v28 = vpop.f32.mrb[7].mxu0 }
 0x139   :  { %v573_v29 = vadd.f32 %v836_v23, %v174_v18  ;;  %v839_v30 = vadd.f32 %v838_v28, %v837_v25  ;;  %v878_v31 = vpop.f32.mrb[7].mxu1 }
 0x13a   :  { %v879_v32 = vadd.f32 %v878_v31, %v877_v27 }
 0x13b   :  { %v576_v34 = vadd.f32 %v839_v30, %v179_v33  ;;  %v638_v35 = vadd.f32 %v876_v26, %v573_v29 }
 0x13d   :  { %v840_v37 = vpop.f32.mrb[8].mxu0  ;;  %v641_v38 = vadd.f32 %v879_v32, %v576_v34 }
 0x13e   :  { %v880_v39 = vpop.f32.mrb[8].mxu1  ;;  %v841_v40 = vpop.f32.mrb[9].mxu0 }
 0x13f   :  { %v842_v41 = vadd.f32 %v841_v40, %v840_v37  ;;  %v881_v42 = vpop.f32.mrb[9].mxu1  ;;  %v843_v43 = vpop.f32.mrb[10].mxu0 }
 0x140   :  { %v882_v44 = vadd.f32 %v881_v42, %v880_v39  ;;  %v883_v45 = vpop.f32.mrb[10].mxu1  ;;  %v844_v46 = vpop.f32.mrb[11].mxu0 }
 0x141   :  { %v581_v47 = vadd.f32 %v842_v41, %v184_v36  ;;  %v845_v48 = vadd.f32 %v844_v46, %v843_v43  ;;  %v884_v49 = vpop.f32.mrb[11].mxu1 }
 0x142   :  { %v885_v51 = vadd.f32 %v884_v49, %v883_v45 }
 0x143   :  { %v584_v52 = vadd.f32 %v845_v48, %v189_v50  ;;  %v646_v53 = vadd.f32 %v882_v44, %v581_v47 }
 0x145   :  { %v846_v55 = vpop.f32.mrb[12].mxu0  ;;  %v649_v56 = vadd.f32 %v885_v51, %v584_v52 }
 0x146   :  { %v886_v57 = vpop.f32.mrb[12].mxu1  ;;  %v847_v58 = vpop.f32.mrb[13].mxu0 }
 0x147   :  { %v848_v59 = vadd.f32 %v847_v58, %v846_v55  ;;  %v887_v60 = vpop.f32.mrb[13].mxu1  ;;  %v849_v61 = vpop.f32.mrb[14].mxu0 }
 0x148   :  { %v888_v62 = vadd.f32 %v887_v60, %v886_v57  ;;  %v889_v63 = vpop.f32.mrb[14].mxu1  ;;  %v850_v0 = vpop.f32.mrb[15].mxu0 }
 0x149   :  { %v589_v1 = vadd.f32 %v848_v59, %v194_v54  ;;  %v851_v2 = vadd.f32 %v850_v0, %v849_v61  ;;  %v890_v3 = vpop.f32.mrb[15].mxu1 }
 0x14a   :  { %v891_v5 = vadd.f32 %v890_v3, %v889_v63 }
 0x14b   :  { %v592_v6 = vadd.f32 %v851_v2, %v199_v4  ;;  %v654_v7 = vadd.f32 %v888_v62, %v589_v1 }
 0x14d   :  { %v910_v8 = vpop.f32.mrb[16].mxu0  ;;  %v657_v9 = vadd.f32 %v891_v5, %v592_v6 }
 0x14e   :  { %v703_v10 = vadd.f32 %v910_v8, %v638_v35  ;;  %v914_v11 = vpop.f32.mrb[16].mxu1  ;;  %v694_v12 = vpop.f32.mrb[17].mxu0 }
 0x14f   :  { %v719_v13 = vadd.f32 %v914_v11, %v654_v7  ;;  %v695_v14 = vadd.f32 %v694_v12, %v630_v17  ;;  %v710_v15 = vpop.f32.mrb[17].mxu1  ;;  %v911_v16 = vpop.f32.mrb[18].mxu0 }
 0x150   :  { %728 = vst.msk [vmem:[#allocation8 + $0x10] sm:$0xff] %vm725_vm1, %v703_v10  ;;  %v711_v18 = vadd.f32 %v710_v15, %v646_v53  ;;  %v706_v19 = vadd.f32 %v911_v16, %v641_v38  ;;  %v915_v21 = vpop.f32.mrb[18].mxu1  ;;  %v697_v22 = vpop.f32.mrb[19].mxu0 }
 0x151   :  { %732 = vst.msk [vmem:[#allocation8 + $0x30] sm:$0xff] %vm725_vm1, %v719_v13  ;;  %726 = vst.msk [vmem:[#allocation8] sm:$0xff] %vm725_vm1, %v695_v14  ;;  %v722_v23 = vadd.f32 %v915_v21, %v657_v9  ;;  %v698_v24 = vadd.f32 %v697_v22, %v1169_v20  ;;  %v713_v25 = vpop.f32.mrb[19].mxu1 }
 0x152   :  { %730 = vst.msk [vmem:[#allocation8 + $0x20] sm:$0xff] %vm725_vm1, %v711_v18  ;;  %729 = vst.msk [vmem:[#allocation8 + $0x18] sm:$0xff] %vm725_vm1, %v706_v19  ;;  %v714_v17 = vadd.f32 %v713_v25, %v649_v56 }
 0x153   :  { %733 = vst.msk [vmem:[#allocation8 + $0x38] sm:$0xff] %vm725_vm1, %v722_v23  ;;  %727 = vst.msk [vmem:[#allocation8 + $0x8] sm:$0xff] %vm725_vm1, %v698_v24 }
 0x154   :  { %731 = vst.msk [vmem:[#allocation8 + $0x28] sm:$0xff] %vm725_vm1, %v714_v17 }
 0x155   :  { %1078 = shalt.err (!%p1075_p0)
}
 0x156   :  { %s1079_s29 = scalar_lea.hbm %s1198_s3, 1024 }
 0x157   :  { %p1080_p1 = scmp.ne.s32.totalorder %s1198_s3, %s1079_s29  ;;  %p1083_p2 = scmp.lt.u32.totalorder %s1079_s29, %s1198_s3 }
 0x159   :  { %p1085_p3 = pnand %p1083_p2, %p1080_p1 }
 0x15b   :  { %1088 = shalt.err (!%p1085_p3)
}
 0x15c   :  { %745 = dma.vmem_to_hbm [thread:$0]  %s740_s25, 1024, %s1198_s3, [#allocation4], %s1102_s0, %s1102_s0, %s1103_s22  }
 0x15d   :  { %1093 = dma.done.wait [#allocation4], 1024  }
 0x15e   :  { %1094 = vsyncadd [#allocation4], 4294966272 }
 0x15f   :  { %749 = vsyncpa [#allocation3], 1 }
 0x160   :  { %750 = vsyncpa [#allocation6], 1 }
 0x161   :  { %751 = vsyncpa [#allocation4], 1 }

// kernel: deepvo_forward.16
= control target key start
LH: loop header
LB: loop body
LE: loop exit
PB: predicated region body
PF: predicated region fallthrough
CT: control target
= control target key end

     0   :  { %8 = vsyncpa [#allocation3], 0  ;;  %s1637_s0 = inlined_call_operand.hbm [shape: bf16[1,576,6], index: 0, kind: input, shape index: {}]   ;;  %s1638_s1 = inlined_call_operand.hbm [shape: bf16[128,576], index: 1, kind: input, shape index: {}]   ;;  %s1639_s2 = inlined_call_operand.hbm [shape: f32[128,1], index: 2, kind: input, shape index: {}]   ;;  %s1640_s3 = inlined_call_operand.hbm [shape: f32[1,128,6], index: 3, kind: output, shape index: {}]  }
   0x1   :  { %9 = vsyncpa [#allocation6], 0 }
   0x2   :  { %10 = vsyncpa [#allocation4], 0  ;;  %s1495_s12 = smov [#allocation5]   ;;  %s1401_s16 = scalar_lea.hbm %s1638_s1, 5120 }
   0x3   :  { %s28_s13 = sshll.u32 %s1495_s12, 4  ;;  %p1402_p0 = scmp.ne.s32.totalorder %s1638_s1, %s1401_s16  ;;  %s29_s13 = int_to_ptr.vmem [resolvable:$true] %s28_s13 }
   0x4   :  { %p1405_p1 = scmp.lt.u32.totalorder %s1401_s16, %s1638_s1 }
   0x6   :  { %p1407_p2 = pnand %p1405_p1, %p1402_p0 }
   0x8   :  { %1410 = shalt.err (!%p1407_p2)
}
   0x9   :  { %s1411_s21 = scalar_lea.vmem %s29_s13, 5120  ;;  %p1416_p4 = scmp.lt.s32.totalorder %s29_s13, %s29_s13 }
   0xa   :  { %p1412_p3 = scmp.ne.s32.totalorder %s29_s13, %s1411_s21  ;;  %p1417_p5 = scmp.lt.s32.totalorder %s1411_s21, %s1411_s21 }
   0xc   :  { %p1418_p6 = por %p1417_p5, %p1416_p4 }
   0xe   :  { %p1419_p7 = pnand %p1418_p6, %p1412_p3 }
  0x10   :  { %1422 = shalt.err (!%p1419_p7)
}
  0x11   :  { %s1496_s22 = smov 320   ;;  %s1497_s23 = smov 20  }
  0x12   :  { %34 = dma.hbm_to_vmem [thread:$0]  %s1638_s1, 5120, %s29_s13, [#allocation6], %s1496_s22, %s1496_s22, %s1497_s23  }
  0x13   :  { %s1498_s26 = smov [#allocation2]   ;;  %s1423_s30 = scalar_lea.hbm %s1637_s0, 4608 }
  0x14   :  { %s16_s27 = sshll.u32 %s1498_s26, 4  ;;  %p1424_p8 = scmp.ne.s32.totalorder %s1637_s0, %s1423_s30  ;;  %s17_s27 = int_to_ptr.vmem [resolvable:$true] %s16_s27 }
  0x15   :  { %p1427_p9 = scmp.lt.u32.totalorder %s1423_s30, %s1637_s0 }
  0x17   :  { %p1429_p10 = pnand %p1427_p9, %p1424_p8 }
  0x19   :  { %1432 = shalt.err (!%p1429_p10)
}
  0x1a   :  { %s1433_s8 = scalar_lea.vmem %s17_s27, 4608  ;;  %p1438_p12 = scmp.lt.s32.totalorder %s17_s27, %s17_s27 }
  0x1b   :  { %p1434_p11 = scmp.ne.s32.totalorder %s17_s27, %s1433_s8  ;;  %p1439_p13 = scmp.lt.s32.totalorder %s1433_s8, %s1433_s8 }
  0x1d   :  { %p1440_p0 = por %p1439_p13, %p1438_p12 }
  0x1f   :  { %p1441_p1 = pnand %p1440_p0, %p1434_p11 }
  0x21   :  { %1444 = shalt.err (!%p1441_p1)
}
  0x22   :  { %s1499_s1 = smov 64   ;;  %s1500_s9 = smov 4  }
  0x23   :  { %22 = dma.hbm_to_vmem [thread:$0]  %s1637_s0, 4608, %s17_s27, [#allocation3], %s1499_s1, %s1499_s1, %s1500_s9  }
  0x24   :  { %s1501_s12 = smov [#allocation7]   ;;  %s1445_s16 = scalar_lea.hbm %s1639_s2, 2048 }
  0x25   :  { %s40_s13 = sshll.u32 %s1501_s12, 4  ;;  %p1446_p2 = scmp.ne.s32.totalorder %s1639_s2, %s1445_s16  ;;  %s41_s13 = int_to_ptr.vmem [resolvable:$true] %s40_s13 }
  0x26   :  { %p1449_p3 = scmp.lt.u32.totalorder %s1445_s16, %s1639_s2 }
  0x28   :  { %p1451_p4 = pnand %p1449_p3, %p1446_p2 }
  0x2a   :  { %1454 = shalt.err (!%p1451_p4)
}
  0x2b   :  { %s1455_s21 = scalar_lea.vmem %s41_s13, 2048  ;;  %p1460_p6 = scmp.lt.s32.totalorder %s41_s13, %s41_s13 }
  0x2c   :  { %p1456_p5 = scmp.ne.s32.totalorder %s41_s13, %s1455_s21  ;;  %p1461_p7 = scmp.lt.s32.totalorder %s1455_s21, %s1455_s21 }
  0x2e   :  { %p1462_p8 = por %p1461_p7, %p1460_p6 }
  0x30   :  { %p1463_p9 = pnand %p1462_p8, %p1456_p5 }
  0x32   :  { %1466 = shalt.err (!%p1463_p9)
}
  0x33   :  { %s1502_s0 = smov 128   ;;  %s1503_s22 = smov 8  }
  0x34   :  { %46 = dma.hbm_to_vmem [thread:$0]  %s1639_s2, 2048, %s41_s13, [#allocation6], %s1502_s0, %s1502_s0, %s1503_s22  }
  0x35   :  { %1489 = dma.done.wait [#allocation3], 4608  }
  0x36   :  { %1490 = vsyncadd [#allocation3], 4294962688 }
  0x37   :  { %1491 = dma.done.wait [#allocation6], 7168  }
  0x38   :  { %1492 = vsyncadd [#allocation6], 4294960128  ;;  %v1504_v0 = vmov 0   ;;  %v1309_v1 = vld [vmem:[#allocation2 + $0x40] sm:$0xff]   ;;  %v1313_v5 = vld [vmem:[#allocation2 + $0x48] sm:$0xff]   ;;  %vm689_vm0 = vcmask 523264  }
  0x39   :  { %1307 = vset.pattern.permute.xlu0 %v1504_v0  ;;  %1308 = vset.pattern.permute.xlu1 %v1504_v0  ;;  %v1310_v2 = vld [vmem:[#allocation2 + $0xc0] sm:$0xff]   ;;  %v1314_v6 = vld [vmem:[#allocation2 + $0xc8] sm:$0xff]   ;;  %v1317_v9 = vld [vmem:[#allocation2 + $0x50] sm:$0xff]   ;;  %vm1005_vm1 = vcmask 48128   ;;  %s1505_s2 = smov [#allocation8]  }
  0x3a   :  { %1124 = vmatprep.subr.bf16.mxu0 %v1309_v1  ;;  %v1311_v3 = vld [vmem:[#allocation2] sm:$0xff]   ;;  %1188 = vmatprep.subr.bf16.mxu1 %v1310_v2  ;;  %v1315_v7 = vld [vmem:[#allocation2 + $0x8] sm:$0xff]   ;;  %v1318_v10 = vld [vmem:[#allocation2 + $0xd0] sm:$0xff]   ;;  %s1027_s25 = sshll.u32 %s1505_s2, 4  ;;  %s1028_s25 = int_to_ptr.vmem [resolvable:$true] %s1027_s25 }
  0x3b   :  { %v1312_v4 = vld [vmem:[#allocation2 + $0x80] sm:$0xff]   ;;  %1125 = vmatpush3.bf16.msra.mxu0 %v1311_v3  ;;  %v1316_v8 = vld [vmem:[#allocation2 + $0x88] sm:$0xff]   ;;  %v1319_v11 = vld [vmem:[#allocation2 + $0x10] sm:$0xff]   ;;  %s1467_s26 = scalar_lea.vmem %s1028_s25, 2048  ;;  %p1472_p11 = scmp.lt.s32.totalorder %s1028_s25, %s1028_s25 }
  0x3c   :  { %1189 = vmatpush3.bf16.msra.mxu1 %v1312_v4  ;;  %1126 = vmatprep.subr.bf16.mxu0 %v1313_v5  ;;  %v1320_v12 = vld [vmem:[#allocation2 + $0x90] sm:$0xff]   ;;  %v1321_v13 = vld [vmem:[#allocation2 + $0x58] sm:$0xff]   ;;  %v1325_v17 = vld [vmem:[#allocation2 + $0x60] sm:$0xff]   ;;  %p1468_p10 = scmp.ne.s32.totalorder %s1028_s25, %s1467_s26  ;;  %p1473_p12 = scmp.lt.s32.totalorder %s1467_s26, %s1467_s26 }
  0x3d   :  { %1190 = vmatprep.subr.bf16.mxu1 %v1314_v6  ;;  %v1322_v14 = vld [vmem:[#allocation2 + $0xd8] sm:$0xff]   ;;  %v1326_v18 = vld [vmem:[#allocation2 + $0xe0] sm:$0xff]   ;;  %v1329_v21 = vld [vmem:[#allocation2 + $0x68] sm:$0xff]  }
  0x3e   :  { %v1323_v15 = vld [vmem:[#allocation2 + $0x18] sm:$0xff]   ;;  %v1327_v19 = vld [vmem:[#allocation2 + $0x20] sm:$0xff]   ;;  %v1330_v22 = vld [vmem:[#allocation2 + $0xe8] sm:$0xff]   ;;  %p1474_p13 = por %p1473_p12, %p1472_p11 }
  0x3f   :  { %1127 = vmatpush3.bf16.msra.mxu0 %v1315_v7  ;;  %v1324_v16 = vld [vmem:[#allocation2 + $0x98] sm:$0xff]   ;;  %v1328_v20 = vld [vmem:[#allocation2 + $0xa0] sm:$0xff]   ;;  %v1331_v23 = vld [vmem:[#allocation2 + $0x28] sm:$0xff]  }
  0x40   :  { %1191 = vmatpush3.bf16.msra.mxu1 %v1316_v8  ;;  %1128 = vmatprep.subr.bf16.mxu0 %v1317_v9  ;;  %v1332_v24 = vld [vmem:[#allocation2 + $0xa8] sm:$0xff]   ;;  %v1333_v25 = vld [vmem:[#allocation2 + $0x70] sm:$0xff]   ;;  %v1337_v29 = vld [vmem:[#allocation2 + $0x78] sm:$0xff]   ;;  %p1475_p0 = pnand %p1474_p13, %p1468_p10 }
  0x41   :  { %1192 = vmatprep.subr.bf16.mxu1 %v1318_v10  ;;  %v1334_v26 = vld [vmem:[#allocation2 + $0xf0] sm:$0xff]   ;;  %v1338_v30 = vld [vmem:[#allocation2 + $0xf8] sm:$0xff]   ;;  %v1346_v36 = vld [vmem:[#allocation5 + $0xc] ss:$20 sps:$4 sm:$0xff]  }
  0x42   :  { %v1335_v27 = vld [vmem:[#allocation2 + $0x30] sm:$0xff]   ;;  %v1339_v31 = vld [vmem:[#allocation2 + $0x38] sm:$0xff]   ;;  %v1347_v37 = vld [vmem:[#allocation2 + $0x100] sm:$0xff]   ;;  %843 = vmatprep.mubr.bf16.mxu1 %v1346_v36 }
  0x43   :  { %1129 = vmatpush3.bf16.msra.mxu0 %v1319_v11  ;;  %v1336_v28 = vld [vmem:[#allocation2 + $0xb0] sm:$0xff]   ;;  %v1340_v32 = vld [vmem:[#allocation2 + $0xb8] sm:$0xff]   ;;  %v1348_v38 = vld [vmem:[#allocation5 + $0x2c] ss:$20 sps:$4 sm:$0xff]  }
  0x44   :  { %1193 = vmatpush3.bf16.msra.mxu1 %v1320_v12  ;;  %1130 = vmatprep.subr.bf16.mxu0 %v1321_v13  ;;  %v1341_v33 = vld [vmem:[#allocation5] ss:$20 sps:$4 sm:$0xff]   ;;  %v1343_v34 = vld [vmem:[#allocation5 + $0x4] ss:$20 sps:$4 sm:$0xff]   ;;  %v1344_v35 = vld [vmem:[#allocation5 + $0x8] ss:$20 sps:$4 sm:$0xff]  }
  0x45   :  { %1194 = vmatprep.subr.bf16.mxu1 %v1322_v14  ;;  %746 = vmatprep.mubr.bf16.mxu0 %v1343_v34  ;;  %v1350_v39 = vld [vmem:[#allocation5 + $0x34] ss:$20 sps:$4 sm:$0xff]   ;;  %v1353_v41 = vld [vmem:[#allocation5 + $0x30] ss:$20 sps:$4 sm:$0xff]   ;;  %v1359_v46 = vld [vmem:[#allocation5 + $0x58] ss:$20 sps:$4 sm:$0xff]  }
  0x46   :  { %v1352_v40 = vld [vmem:[#allocation5 + $0x28] ss:$20 sps:$4 sm:$0xff]   ;;  %v1358_v45 = vld [vmem:[#allocation5 + $0x50] ss:$20 sps:$4 sm:$0xff]   ;;  %v1365_v51 = vld [vmem:[#allocation5 + $0x78] ss:$20 sps:$4 sm:$0xff]  }
  0x47   :  { %1131 = vmatpush3.bf16.msra.mxu0 %v1323_v15  ;;  %v1354_v42 = vld [vmem:[#allocation5 + $0x54] ss:$20 sps:$4 sm:$0xff]   ;;  %v1356_v44 = vld [vmem:[#allocation5 + $0x5c] ss:$20 sps:$4 sm:$0xff]   ;;  %v1363_v49 = vld [vmem:[#allocation5 + $0x84] ss:$20 sps:$4 sm:$0xff]  }
  0x48   :  { %1195 = vmatpush3.bf16.msra.mxu1 %v1324_v16  ;;  %1132 = vmatprep.subr.bf16.mxu0 %v1325_v17  ;;  %v1360_v43 = vld [vmem:[#allocation2 + $0x108] sm:$0xff]   ;;  %v1373_v47 = vld [vmem:[#allocation2 + $0x110] sm:$0xff]   ;;  %v1386_v50 = vld [vmem:[#allocation2 + $0x118] sm:$0xff]  }
  0x49   :  { %1196 = vmatprep.subr.bf16.mxu1 %v1326_v18  ;;  %v1361_v48 = vld [vmem:[#allocation5 + $0x7c] ss:$20 sps:$4 sm:$0xff]   ;;  %v1366_v52 = vld [vmem:[#allocation5 + $0x80] ss:$20 sps:$4 sm:$0xff]   ;;  %v1367_v53 = vld [vmem:[#allocation5 + $0xa4] ss:$20 sps:$4 sm:$0xff]  }
  0x4a   :  { %v1369_v54 = vld [vmem:[#allocation5 + $0xac] ss:$20 sps:$4 sm:$0xff]   ;;  %v1372_v56 = vld [vmem:[#allocation5 + $0xa8] ss:$20 sps:$4 sm:$0xff]   ;;  %v179_v60 = vld [vmem:[#allocation7 + $0x10] sm:$0xff] }
  0x4b   :  { %1133 = vmatpush3.bf16.msra.mxu0 %v1327_v19  ;;  %v1371_v55 = vld [vmem:[#allocation5 + $0xa0] ss:$20 sps:$4 sm:$0xff]   ;;  %v178_v61 = vld [vmem:[#allocation7 + $0x8] sm:$0xff]  ;;  %205 = vperm.xlu1 %1308, %v179_v60   ;;  %v180_v62 = vld [vmem:[#allocation7 + $0x18] sm:$0xff] }
  0x4c   :  { %1197 = vmatpush3.bf16.msra.mxu1 %v1328_v20  ;;  %1134 = vmatprep.subr.bf16.mxu0 %v1329_v21  ;;  %v1374_v57 = vld [vmem:[#allocation5 + $0xcc] ss:$20 sps:$4 sm:$0xff]   ;;  %v1376_v59 = vld [vmem:[#allocation5 + $0xd4] ss:$20 sps:$4 sm:$0xff]   ;;  %v1379_v2 = vld [vmem:[#allocation5 + $0xd0] ss:$20 sps:$4 sm:$0xff]  }
  0x4d   :  { %1198 = vmatprep.subr.bf16.mxu1 %v1330_v22  ;;  %v177_v58 = vld [vmem:[#allocation7] sm:$0xff]  ;;  %v1378_v0 = vld [vmem:[#allocation5 + $0xc8] ss:$20 sps:$4 sm:$0xff]   ;;  %v183_v5 = vld [vmem:[#allocation7 + $0x30] sm:$0xff] }
  0x4e   :  { %195 = vperm.xlu0 %1307, %v177_v58   ;;  %v181_v63 = vld [vmem:[#allocation7 + $0x20] sm:$0xff]  ;;  %v182_v1 = vld [vmem:[#allocation7 + $0x28] sm:$0xff]  ;;  %v1382_v4 = vld [vmem:[#allocation5 + $0xfc] ss:$20 sps:$4 sm:$0xff]  }
  0x4f   :  { %1135 = vmatpush3.bf16.msra.mxu0 %v1331_v23  ;;  %210 = vperm.xlu1 %1308, %v180_v62   ;;  %v1380_v3 = vld [vmem:[#allocation5 + $0xf4] ss:$20 sps:$4 sm:$0xff]   ;;  %v184_v6 = vld [vmem:[#allocation7 + $0x38] sm:$0xff]  ;;  %v185_v7 = vld [vmem:[#allocation7 + $0x40] sm:$0xff] }
  0x50   :  { %1199 = vmatpush3.bf16.msra.mxu1 %v1332_v24  ;;  %1136 = vmatprep.subr.bf16.mxu0 %v1333_v25  ;;  %v1384_v8 = vld [vmem:[#allocation5 + $0xf0] ss:$20 sps:$4 sm:$0xff]   ;;  %v186_v9 = vld [vmem:[#allocation7 + $0x48] sm:$0xff]  ;;  %v188_v14 = vld [vmem:[#allocation7 + $0x58] sm:$0xff] }
  0x51   :  { %1200 = vmatprep.subr.bf16.mxu1 %v1334_v26  ;;  %v1385_v10 = vld [vmem:[#allocation5 + $0xf8] ss:$20 sps:$4 sm:$0xff]   ;;  %v1387_v11 = vld [vmem:[#allocation5 + $0x11c] ss:$20 sps:$4 sm:$0xff]   ;;  %v189_v15 = vld [vmem:[#allocation7 + $0x60] sm:$0xff] }
  0x52   :  { %200 = vperm.xlu0 %1307, %v178_v61   ;;  %v1389_v12 = vld [vmem:[#allocation5 + $0x124] ss:$20 sps:$4 sm:$0xff]   ;;  %v187_v13 = vld [vmem:[#allocation7 + $0x50] sm:$0xff]  ;;  %v190_v17 = vld [vmem:[#allocation7 + $0x68] sm:$0xff] }
  0x53   :  { %1137 = vmatpush3.bf16.msra.mxu0 %v1335_v27  ;;  %220 = vperm.xlu1 %1308, %v182_v1   ;;  %v1391_v16 = vld [vmem:[#allocation5 + $0x118] ss:$20 sps:$4 sm:$0xff]   ;;  %v1392_v18 = vld [vmem:[#allocation5 + $0x120] ss:$20 sps:$4 sm:$0xff]   ;;  %v1393_v19 = vld [vmem:[#allocation5 + $0x10] ss:$20 sps:$4 sm:$0xff]  }
  0x54   :  { %1201 = vmatpush3.bf16.msra.mxu1 %v1336_v28  ;;  %1138 = vmatprep.subr.bf16.mxu0 %v1337_v29  ;;  %v1394_v20 = vld [vmem:[#allocation5 + $0xb0] ss:$20 sps:$4 sm:$0xff]   ;;  %v192_v22 = vld [vmem:[#allocation7 + $0x78] sm:$0xff]  ;;  %v1397_v25 = vld [vmem:[#allocation5 + $0x60] ss:$20 sps:$4 sm:$0xff]  }
  0x55   :  { %1202 = vmatprep.subr.bf16.mxu1 %v1338_v30  ;;  %v191_v21 = vld [vmem:[#allocation7 + $0x70] sm:$0xff]  ;;  %v1395_v23 = vld [vmem:[#allocation5 + $0x38] ss:$20 sps:$4 sm:$0xff]   ;;  %v1399_v27 = vld [vmem:[#allocation5 + $0x88] ss:$20 sps:$4 sm:$0xff]  }
  0x56   :  { %215 = vperm.xlu0 %1307, %v181_v63   ;;  %v1396_v24 = vld [vmem:[#allocation5 + $0xd8] ss:$20 sps:$4 sm:$0xff]   ;;  %v1398_v26 = vld [vmem:[#allocation5 + $0x100] ss:$20 sps:$4 sm:$0xff]   ;;  %v1400_v28 = vld [vmem:[#allocation5 + $0x128] ss:$20 sps:$4 sm:$0xff]  }
  0x57   :  { %1139 = vmatpush3.bf16.msra.mxu0 %v1339_v31  ;;  %230 = vperm.xlu1 %1308, %v184_v6  }
  0x58   :  { %1203 = vmatpush3.bf16.msra.mxu1 %v1340_v32  ;;  %1264 = vmatprep.subr.bf16.mxu0 %v1347_v37 }
  0x59   :  { %1288 = vmatprep.subr.bf16.mxu1 %v1347_v37 }
  0x5a   :  { %747 = vmatmul.mubr.bf16.vlgmr.msra.gmra.mrb[0].mxu0 %v1341_v33  ;;  %225 = vperm.xlu0 %1307, %v183_v5  }
  0x5b   :  { %844 = vmatmul.mubr.bf16.vlgmr.msra.gmra.mrb[0].mxu1 %v1344_v35  ;;  %1265 = vmatpush3.bf16.msra.mxu0 %v1347_v37 }
  0x5c   :  { %1292 = vmatpush3.bf16.msra.mxu1 %v1347_v37  ;;  %754 = vmatprep.mubr.bf16.mxu0 %v1348_v38 }
  0x5d   :  { %851 = vmatprep.mubr.bf16.mxu1 %v1350_v39  ;;  %1266 = vmatprep.subr.bf16.mxu0 %v1360_v43 }
  0x5e   :  { %1289 = vmatprep.subr.bf16.mxu1 %v1360_v43  ;;  %235 = vperm.xlu0 %1307, %v185_v7  }
  0x5f   :  { %1267 = vmatpush3.bf16.msra.mxu0 %v1360_v43  ;;  %240 = vperm.xlu1 %1308, %v186_v9  }
  0x60   :  { %1293 = vmatpush3.bf16.msra.mxu1 %v1360_v43  ;;  %1268 = vmatprep.subr.bf16.mxu0 %v1373_v47 }
  0x61   :  { %1290 = vmatprep.subr.bf16.mxu1 %v1373_v47 }
  0x62   :  { %755 = vmatmul.mubr.bf16.gmra.mrb[4].mxu0 %v1352_v40  ;;  %245 = vperm.xlu0 %1307, %v187_v13  }
  0x63   :  { %852 = vmatmul.mubr.bf16.gmra.mrb[4].mxu1 %v1353_v41  ;;  %762 = vmatprep.mubr.bf16.mxu0 %v1354_v42 }
  0x64   :  { %859 = vmatprep.mubr.bf16.mxu1 %v1356_v44  ;;  %1269 = vmatpush3.bf16.msra.mxu0 %v1373_v47 }
  0x65   :  { %1294 = vmatpush3.bf16.msra.mxu1 %v1373_v47  ;;  %1270 = vmatprep.subr.bf16.mxu0 %v1386_v50 }
  0x66   :  { %1291 = vmatprep.subr.bf16.mxu1 %v1386_v50  ;;  %250 = vperm.xlu1 %1308, %v188_v14  }
  0x67   :  { %255 = vperm.xlu0 %1307, %v189_v15  }
  0x68   :  { %1271 = vmatpush3.bf16.msra.mxu0 %v1386_v50 }
  0x69   :  { %1295 = vmatpush3.bf16.msra.mxu1 %v1386_v50 }
  0x6a   :  { %763 = vmatmul.mubr.bf16.gmra.mrb[8].mxu0 %v1358_v45  ;;  %260 = vperm.xlu1 %1308, %v190_v17  }
  0x6b   :  { %860 = vmatmul.mubr.bf16.gmra.mrb[8].mxu1 %v1359_v46  ;;  %770 = vmatprep.mubr.bf16.mxu0 %v1361_v48 }
  0x6c   :  { %867 = vmatprep.mubr.bf16.mxu1 %v1363_v49  ;;  %265 = vperm.xlu0 %1307, %v191_v21  }
  0x6e   :  { %270 = vperm.xlu1 %1308, %v192_v22  }
  0x72   :  { %771 = vmatmul.mubr.bf16.gmra.mrb[12].mxu0 %v1365_v51 }
  0x73   :  { %868 = vmatmul.mubr.bf16.gmra.mrb[12].mxu1 %v1366_v52  ;;  %778 = vmatprep.mubr.bf16.mxu0 %v1367_v53 }
  0x74   :  { %875 = vmatprep.mubr.bf16.mxu1 %v1369_v54 }
  0x7a   :  { %779 = vmatmul.mubr.bf16.gmra.mrb[16].mxu0 %v1371_v55 }
  0x7b   :  { %876 = vmatmul.mubr.bf16.gmra.mrb[16].mxu1 %v1372_v56  ;;  %786 = vmatprep.mubr.bf16.mxu0 %v1374_v57 }
  0x7c   :  { %883 = vmatprep.mubr.bf16.mxu1 %v1376_v59 }
  0x82   :  { %787 = vmatmul.mubr.bf16.gmra.mrb[20].mxu0 %v1378_v0 }
  0x83   :  { %884 = vmatmul.mubr.bf16.gmra.mrb[20].mxu1 %v1379_v2  ;;  %794 = vmatprep.mubr.bf16.mxu0 %v1380_v3 }
  0x84   :  { %891 = vmatprep.mubr.bf16.mxu1 %v1382_v4 }
  0x8a   :  { %795 = vmatmul.mubr.bf16.gmra.mrb[24].mxu0 %v1384_v8 }
  0x8b   :  { %892 = vmatmul.mubr.bf16.gmra.mrb[24].mxu1 %v1385_v10  ;;  %802 = vmatprep.mubr.bf16.mxu0 %v1387_v11 }
  0x8c   :  { %899 = vmatprep.mubr.bf16.mxu1 %v1389_v12 }
  0x92   :  { %803 = vmatmul.mubr.bf16.gmra.mrb[28].mxu0 %v1391_v16 }
  0x93   :  { %900 = vmatmul.mubr.bf16.gmra.mrb[28].mxu1 %v1392_v18  ;;  %1272 = vmatprep.mubr.msk.bf16.mxu0 %vm689_vm0, %v1393_v19 }
  0x94   :  { %1280 = vmatprep.mubr.msk.bf16.mxu1 %vm689_vm0, %v1394_v20 }
  0x9a   :  { %1273 = vmatmul.mubr.msk.bf16.vlgmr.msra.gmra.mrb[32].mxu0 %vm689_vm0, %v1395_v23 }
  0x9b   :  { %1281 = vmatmul.mubr.msk.bf16.vlgmr.msra.gmra.mrb[32].mxu1 %vm689_vm0, %v1396_v24  ;;  %1276 = vmatprep.mubr.msk.bf16.mxu0 %vm689_vm0, %v1397_v25 }
  0x9c   :  { %1284 = vmatprep.mubr.msk.bf16.mxu1 %vm689_vm0, %v1398_v26 }
  0xa2   :  { %1277 = vmatmul.mubr.msk.bf16.gmra.mrb[36].mxu0 %vm689_vm0, %v1399_v27 }
  0xa3   :  { %1285 = vmatmul.mubr.msk.bf16.gmra.mrb[36].mxu1 %vm689_vm0, %v1400_v28 }
  0xca   :  { %v206_v30 = vpop.permute.xlu1 %205 }
  0xcd   :  { %v196_v29 = vpop.permute.xlu0 %195 }
  0xce   :  { %v211_v48 = vpop.permute.xlu1 %210 }
  0xd1   :  { %v201_v32 = vpop.permute.xlu0 %200 }
  0xd2   :  { %v221_v2 = vpop.permute.xlu1 %220 }
  0xd5   :  { %v216_v0 = vpop.permute.xlu0 %215 }
  0xd9   :  { %v226_v19 = vpop.permute.xlu0 %225 }
 0x12d   :  { %v1140_v31 = vpop.f32.mrb[0].mxu0 }
 0x12e   :  { %v1204_v33 = vpop.f32.mrb[0].mxu1  ;;  %v1141_v34 = vpop.f32.mrb[1].mxu0 }
 0x12f   :  { %v1142_v35 = vadd.f32 %v1141_v34, %v1140_v31  ;;  %v1205_v36 = vpop.f32.mrb[1].mxu1  ;;  %v1143_v37 = vpop.f32.mrb[2].mxu0 }
 0x130   :  { %v1206_v38 = vadd.f32 %v1205_v36, %v1204_v33  ;;  %v1207_v39 = vpop.f32.mrb[2].mxu1  ;;  %v1144_v40 = vpop.f32.mrb[3].mxu0 }
 0x131   :  { %v749_v41 = vadd.f32 %v1142_v35, %v196_v29  ;;  %v1145_v42 = vadd.f32 %v1144_v40, %v1143_v37  ;;  %v1208_v43 = vpop.f32.mrb[3].mxu1  ;;  %v231_v33 = vpop.permute.xlu1 %230 }
 0x132   :  { %v1209_v44 = vadd.f32 %v1208_v43, %v1207_v39  ;;  %v236_v36 = vpop.permute.xlu0 %235 }
 0x133   :  { %v752_v45 = vadd.f32 %v1145_v42, %v201_v32  ;;  %v1573_v46 = vadd.f32 %v1206_v38, %v749_v41 }
 0x135   :  { %v1146_v47 = vpop.f32.mrb[4].mxu0  ;;  %v1575_v49 = vadd.f32 %v1209_v44, %v752_v45 }
 0x136   :  { %v1210_v50 = vpop.f32.mrb[4].mxu1  ;;  %v1147_v51 = vpop.f32.mrb[5].mxu0 }
 0x137   :  { %v1148_v52 = vadd.f32 %v1147_v51, %v1146_v47  ;;  %v1211_v53 = vpop.f32.mrb[5].mxu1  ;;  %v1149_v54 = vpop.f32.mrb[6].mxu0 }
 0x138   :  { %v1212_v55 = vadd.f32 %v1211_v53, %v1210_v50  ;;  %v1213_v56 = vpop.f32.mrb[6].mxu1  ;;  %v1150_v57 = vpop.f32.mrb[7].mxu0 }
 0x139   :  { %v757_v58 = vadd.f32 %v1148_v52, %v206_v30  ;;  %v1151_v59 = vadd.f32 %v1150_v57, %v1149_v54  ;;  %v1214_v60 = vpop.f32.mrb[7].mxu1  ;;  %v241_v52 = vpop.permute.xlu1 %240 }
 0x13a   :  { %v1215_v61 = vadd.f32 %v1214_v60, %v1213_v56  ;;  %v246_v56 = vpop.permute.xlu0 %245 }
 0x13b   :  { %v760_v62 = vadd.f32 %v1151_v59, %v211_v48  ;;  %v1577_v63 = vadd.f32 %v1212_v55, %v757_v58 }
 0x13d   :  { %v1152_v1 = vpop.f32.mrb[8].mxu0  ;;  %v1579_v3 = vadd.f32 %v1215_v61, %v760_v62 }
 0x13e   :  { %v1216_v4 = vpop.f32.mrb[8].mxu1  ;;  %v1153_v5 = vpop.f32.mrb[9].mxu0 }
 0x13f   :  { %v1154_v6 = vadd.f32 %v1153_v5, %v1152_v1  ;;  %v1217_v7 = vpop.f32.mrb[9].mxu1  ;;  %v1155_v8 = vpop.f32.mrb[10].mxu0 }
 0x140   :  { %v1218_v9 = vadd.f32 %v1217_v7, %v1216_v4  ;;  %v1219_v10 = vpop.f32.mrb[10].mxu1  ;;  %v1156_v11 = vpop.f32.mrb[11].mxu0 }
 0x141   :  { %v765_v12 = vadd.f32 %v1154_v6, %v216_v0  ;;  %v1157_v13 = vadd.f32 %v1156_v11, %v1155_v8  ;;  %v1220_v14 = vpop.f32.mrb[11].mxu1  ;;  %v251_v8 = vpop.permute.xlu1 %250 }
 0x142   :  { %v1221_v15 = vadd.f32 %v1220_v14, %v1219_v10 }
 0x143   :  { %v768_v16 = vadd.f32 %v1157_v13, %v221_v2  ;;  %v1581_v17 = vadd.f32 %v1218_v9, %v765_v12  ;;  %v256_v12 = vpop.permute.xlu0 %255 }
 0x145   :  { %v1158_v18 = vpop.f32.mrb[12].mxu0  ;;  %v1583_v20 = vadd.f32 %v1221_v15, %v768_v16 }
 0x146   :  { %v1222_v21 = vpop.f32.mrb[12].mxu1  ;;  %v1159_v22 = vpop.f32.mrb[13].mxu0 }
 0x147   :  { %v1160_v23 = vadd.f32 %v1159_v22, %v1158_v18  ;;  %v1223_v24 = vpop.f32.mrb[13].mxu1  ;;  %v1161_v25 = vpop.f32.mrb[14].mxu0 }
 0x148   :  { %v1224_v26 = vadd.f32 %v1223_v24, %v1222_v21  ;;  %v1225_v27 = vpop.f32.mrb[14].mxu1  ;;  %v1162_v28 = vpop.f32.mrb[15].mxu0 }
 0x149   :  { %v773_v29 = vadd.f32 %v1160_v23, %v226_v19  ;;  %v1163_v30 = vadd.f32 %v1162_v28, %v1161_v25  ;;  %v1226_v31 = vpop.f32.mrb[15].mxu1  ;;  %v261_v28 = vpop.permute.xlu1 %260 }
 0x14a   :  { %v1227_v32 = vadd.f32 %v1226_v31, %v1225_v27 }
 0x14b   :  { %v776_v34 = vadd.f32 %v1163_v30, %v231_v33  ;;  %v1585_v35 = vadd.f32 %v1224_v26, %v773_v29 }
 0x14d   :  { %v1164_v37 = vpop.f32.mrb[16].mxu0  ;;  %v1587_v38 = vadd.f32 %v1227_v32, %v776_v34  ;;  %v266_v32 = vpop.permute.xlu0 %265 }
 0x14e   :  { %v1228_v39 = vpop.f32.mrb[16].mxu1  ;;  %v1165_v40 = vpop.f32.mrb[17].mxu0 }
 0x14f   :  { %v1166_v41 = vadd.f32 %v1165_v40, %v1164_v37  ;;  %v1229_v42 = vpop.f32.mrb[17].mxu1  ;;  %v1167_v43 = vpop.f32.mrb[18].mxu0 }
 0x150   :  { %v1230_v44 = vadd.f32 %v1229_v42, %v1228_v39  ;;  %v1231_v45 = vpop.f32.mrb[18].mxu1  ;;  %v1168_v47 = vpop.f32.mrb[19].mxu0 }
 0x151   :  { %v781_v48 = vadd.f32 %v1166_v41, %v236_v36  ;;  %v1169_v50 = vadd.f32 %v1168_v47, %v1167_v43  ;;  %v1232_v51 = vpop.f32.mrb[19].mxu1 }
 0x152   :  { %v1233_v53 = vadd.f32 %v1232_v51, %v1231_v45 }
 0x153   :  { %v784_v54 = vadd.f32 %v1169_v50, %v241_v52  ;;  %v1589_v55 = vadd.f32 %v1230_v44, %v781_v48  ;;  %v271_v50 = vpop.permute.xlu1 %270 }
 0x155   :  { %v1170_v57 = vpop.f32.mrb[20].mxu0  ;;  %v1591_v58 = vadd.f32 %v1233_v53, %v784_v54 }
 0x156   :  { %v1234_v59 = vpop.f32.mrb[20].mxu1  ;;  %v1171_v60 = vpop.f32.mrb[21].mxu0 }
 0x157   :  { %v1172_v61 = vadd.f32 %v1171_v60, %v1170_v57  ;;  %v1235_v62 = vpop.f32.mrb[21].mxu1  ;;  %v1173_v0 = vpop.f32.mrb[22].mxu0 }
 0x158   :  { %v1236_v1 = vadd.f32 %v1235_v62, %v1234_v59  ;;  %v1237_v2 = vpop.f32.mrb[22].mxu1  ;;  %v1174_v4 = vpop.f32.mrb[23].mxu0 }
 0x159   :  { %v789_v5 = vadd.f32 %v1172_v61, %v246_v56  ;;  %v1175_v6 = vadd.f32 %v1174_v4, %v1173_v0  ;;  %v1238_v7 = vpop.f32.mrb[23].mxu1 }
 0x15a   :  { %v1239_v9 = vadd.f32 %v1238_v7, %v1237_v2 }
 0x15b   :  { %v792_v10 = vadd.f32 %v1175_v6, %v251_v8  ;;  %v886_v11 = vadd.f32 %v1236_v1, %v789_v5 }
 0x15d   :  { %v1176_v13 = vpop.f32.mrb[24].mxu0  ;;  %v889_v14 = vadd.f32 %v1239_v9, %v792_v10 }
 0x15e   :  { %v1240_v15 = vpop.f32.mrb[24].mxu1  ;;  %v1177_v16 = vpop.f32.mrb[25].mxu0 }
 0x15f   :  { %v1178_v18 = vadd.f32 %v1177_v16, %v1176_v13  ;;  %v1241_v19 = vpop.f32.mrb[25].mxu1  ;;  %v1179_v21 = vpop.f32.mrb[26].mxu0 }
 0x160   :  { %v1242_v22 = vadd.f32 %v1241_v19, %v1240_v15  ;;  %v1243_v23 = vpop.f32.mrb[26].mxu1  ;;  %v1180_v24 = vpop.f32.mrb[27].mxu0 }
 0x161   :  { %v797_v25 = vadd.f32 %v1178_v18, %v256_v12  ;;  %v1181_v26 = vadd.f32 %v1180_v24, %v1179_v21  ;;  %v1244_v27 = vpop.f32.mrb[27].mxu1 }
 0x162   :  { %v1245_v29 = vadd.f32 %v1244_v27, %v1243_v23 }
 0x163   :  { %v800_v30 = vadd.f32 %v1181_v26, %v261_v28  ;;  %v894_v31 = vadd.f32 %v1242_v22, %v797_v25 }
 0x165   :  { %v1182_v33 = vpop.f32.mrb[28].mxu0  ;;  %v1593_v34 = vadd.f32 %v1245_v29, %v800_v30 }
 0x166   :  { %v1246_v36 = vpop.f32.mrb[28].mxu1  ;;  %v1183_v37 = vpop.f32.mrb[29].mxu0 }
 0x167   :  { %v1184_v39 = vadd.f32 %v1183_v37, %v1182_v33  ;;  %v1247_v40 = vpop.f32.mrb[29].mxu1  ;;  %v1185_v41 = vpop.f32.mrb[30].mxu0 }
 0x168   :  { %v1248_v42 = vadd.f32 %v1247_v40, %v1246_v36  ;;  %v1249_v43 = vpop.f32.mrb[30].mxu1  ;;  %v1186_v44 = vpop.f32.mrb[31].mxu0 }
 0x169   :  { %v805_v45 = vadd.f32 %v1184_v39, %v266_v32  ;;  %v1187_v47 = vadd.f32 %v1186_v44, %v1185_v41  ;;  %v1250_v48 = vpop.f32.mrb[31].mxu1 }
 0x16a   :  { %v1251_v51 = vadd.f32 %v1250_v48, %v1249_v43 }
 0x16b   :  { %v808_v52 = vadd.f32 %v1187_v47, %v271_v50  ;;  %v902_v53 = vadd.f32 %v1248_v42, %v805_v45 }
 0x16d   :  { %v1274_v54 = vpop.f32.mrb[32].mxu0  ;;  %v905_v56 = vadd.f32 %v1251_v51, %v808_v52 }
 0x16e   :  { %v951_v57 = vadd.f32 %v1274_v54, %v1577_v63  ;;  %v1282_v59 = vpop.f32.mrb[32].mxu1  ;;  %v942_v60 = vpop.f32.mrb[33].mxu0 }
 0x16f   :  { %v983_v61 = vadd.f32 %v1282_v59, %v886_v11  ;;  %v943_v62 = vadd.f32 %v942_v60, %v1573_v46  ;;  %v974_v0 = vpop.f32.mrb[33].mxu1  ;;  %v1275_v1 = vpop.f32.mrb[34].mxu0 }
 0x170   :  { %1008 = vst.msk [vmem:[#allocation8 + $0x10] sm:$0xff] %vm1005_vm1, %v951_v57  ;;  %v975_v2 = vadd.f32 %v974_v0, %v1589_v55  ;;  %v954_v4 = vadd.f32 %v1275_v1, %v1579_v3  ;;  %v1283_v5 = vpop.f32.mrb[34].mxu1  ;;  %v945_v6 = vpop.f32.mrb[35].mxu0 }
 0x171   :  { %1016 = vst.msk [vmem:[#allocation8 + $0x50] sm:$0xff] %vm1005_vm1, %v983_v61  ;;  %1006 = vst.msk [vmem:[#allocation8] sm:$0xff] %vm1005_vm1, %v943_v62  ;;  %v986_v63 = vadd.f32 %v1283_v5, %v889_v14  ;;  %v946_v7 = vadd.f32 %v945_v6, %v1575_v49  ;;  %v977_v8 = vpop.f32.mrb[35].mxu1 }
 0x172   :  { %1014 = vst.msk [vmem:[#allocation8 + $0x40] sm:$0xff] %vm1005_vm1, %v975_v2  ;;  %1009 = vst.msk [vmem:[#allocation8 + $0x18] sm:$0xff] %vm1005_vm1, %v954_v4  ;;  %v978_v46 = vadd.f32 %v977_v8, %v1591_v58 }
 0x173   :  { %1017 = vst.msk [vmem:[#allocation8 + $0x58] sm:$0xff] %vm1005_vm1, %v986_v63  ;;  %1007 = vst.msk [vmem:[#allocation8 + $0x8] sm:$0xff] %vm1005_vm1, %v946_v7 }
 0x174   :  { %1015 = vst.msk [vmem:[#allocation8 + $0x48] sm:$0xff] %vm1005_vm1, %v978_v46 }
 0x175   :  { %v1278_v3 = vpop.f32.mrb[36].mxu0 }
 0x176   :  { %v967_v55 = vadd.f32 %v1278_v3, %v1585_v35  ;;  %v1286_v9 = vpop.f32.mrb[36].mxu1  ;;  %v958_v10 = vpop.f32.mrb[37].mxu0 }
 0x177   :  { %v999_v11 = vadd.f32 %v1286_v9, %v902_v53  ;;  %v959_v49 = vadd.f32 %v958_v10, %v1581_v17  ;;  %v990_v12 = vpop.f32.mrb[37].mxu1  ;;  %v1279_v13 = vpop.f32.mrb[38].mxu0 }
 0x178   :  { %1012 = vst.msk [vmem:[#allocation8 + $0x30] sm:$0xff] %vm1005_vm1, %v967_v55  ;;  %v991_v58 = vadd.f32 %v990_v12, %v894_v31  ;;  %v970_v14 = vadd.f32 %v1279_v13, %v1587_v38  ;;  %v1287_v15 = vpop.f32.mrb[38].mxu1  ;;  %v961_v16 = vpop.f32.mrb[39].mxu0 }
 0x179   :  { %1020 = vst.msk [vmem:[#allocation8 + $0x70] sm:$0xff] %vm1005_vm1, %v999_v11  ;;  %1010 = vst.msk [vmem:[#allocation8 + $0x20] sm:$0xff] %vm1005_vm1, %v959_v49  ;;  %v1002_v35 = vadd.f32 %v1287_v15, %v905_v56  ;;  %v962_v18 = vadd.f32 %v961_v16, %v1583_v20  ;;  %v993_v19 = vpop.f32.mrb[39].mxu1 }
 0x17a   :  { %1018 = vst.msk [vmem:[#allocation8 + $0x60] sm:$0xff] %vm1005_vm1, %v991_v58  ;;  %1013 = vst.msk [vmem:[#allocation8 + $0x38] sm:$0xff] %vm1005_vm1, %v970_v14  ;;  %v994_v17 = vadd.f32 %v993_v19, %v1593_v34 }
 0x17b   :  { %1021 = vst.msk [vmem:[#allocation8 + $0x78] sm:$0xff] %vm1005_vm1, %v1002_v35  ;;  %1011 = vst.msk [vmem:[#allocation8 + $0x28] sm:$0xff] %vm1005_vm1, %v962_v18 }
 0x17c   :  { %1019 = vst.msk [vmem:[#allocation8 + $0x68] sm:$0xff] %vm1005_vm1, %v994_v17 }
 0x17d   :  { %1478 = shalt.err (!%p1475_p0)
}
 0x17e   :  { %s1479_s29 = scalar_lea.hbm %s1640_s3, 2048 }
 0x17f   :  { %p1480_p1 = scmp.ne.s32.totalorder %s1640_s3, %s1479_s29  ;;  %p1483_p2 = scmp.lt.u32.totalorder %s1479_s29, %s1640_s3 }
 0x181   :  { %p1485_p3 = pnand %p1483_p2, %p1480_p1 }
 0x183   :  { %1488 = shalt.err (!%p1485_p3)
}
 0x184   :  { %1033 = dma.vmem_to_hbm [thread:$0]  %s1028_s25, 2048, %s1640_s3, [#allocation4], %s1502_s0, %s1502_s0, %s1503_s22  }
 0x185   :  { %1493 = dma.done.wait [#allocation4], 2048  }
 0x186   :  { %1494 = vsyncadd [#allocation4], 4294965248 }
 0x187   :  { %1037 = vsyncpa [#allocation3], 1 }
 0x188   :  { %1038 = vsyncpa [#allocation6], 1 }
 0x189   :  { %1039 = vsyncpa [#allocation4], 1 }

// kernel: deepvo_forward.17
= control target key start
LH: loop header
LB: loop body
LE: loop exit
PB: predicated region body
PF: predicated region fallthrough
CT: control target
= control target key end

     0   :  { %s4455_s0 = inlined_call_operand.hbm [shape: bf16[1,768], index: 0, kind: input, shape index: {}]   ;;  %s4456_s1 = inlined_call_operand.hbm [shape: f32[1,128], index: 1, kind: input, shape index: {}]   ;;  %s4457_s2 = inlined_call_operand.hbm [shape: f32[1,128], index: 2, kind: input, shape index: {}]   ;;  %s4458_s3 = inlined_call_operand.hbm [shape: f32[1,128], index: 3, kind: input, shape index: {}]   ;;  %s4459_s4 = inlined_call_operand.hbm [shape: f32[1,128], index: 4, kind: input, shape index: {}]   ;;  %s4460_s5 = inlined_call_operand.hbm [shape: bf16[768,512], index: 5, kind: input, shape index: {}]   ;;  %s4461_s6 = inlined_call_operand.hbm [shape: bf16[128,512], index: 6, kind: input, shape index: {}]   ;;  %s4462_s7 = inlined_call_operand.hbm [shape: f32[1,512], index: 7, kind: input, shape index: {}]   ;;  %s4463_s8 = inlined_call_operand.hbm [shape: bf16[128,512], index: 8, kind: input, shape index: {}]   ;;  %s4464_s9 = inlined_call_operand.hbm [shape: bf16[128,512], index: 9, kind: input, shape index: {}]   ;;  %s4465_s10 = inlined_call_operand.hbm [shape: f32[1,512], index: 10, kind: input, shape index: {}]   ;;  %s4466_s11 = inlined_call_operand.hbm [shape: bf16[128,6], index: 11, kind: input, shape index: {}]   ;;  %s4467_s12 = inlined_call_operand.hbm [shape: f32[1,6], index: 12, kind: input, shape index: {}]   ;;  %s4468_s13 = inlined_call_operand.hbm [shape: f32[1,6], index: 13, kind: output, shape index: {0}]   ;;  %s4469_s14 = inlined_call_operand.hbm [shape: f32[1,128], index: 14, kind: output, shape index: {1}]   ;;  %s4470_s15 = inlined_call_operand.hbm [shape: f32[1,128], index: 15, kind: output, shape index: {2}]   ;;  %s4471_s16 = inlined_call_operand.hbm [shape: f32[1,128], index: 16, kind: output, shape index: {3}]   ;;  %s4472_s17 = inlined_call_operand.hbm [shape: f32[1,128], index: 17, kind: output, shape index: {4}]  }
   0x1   :  { %4475 = sst [smem:[#allocation40_spill]] %s4455_s0 }
   0x2   :  { %4476 = sst [smem:[#allocation41_spill]] %s4456_s1 }
   0x3   :  { %23 = vsyncpa [#allocation3], 0 }
   0x4   :  { %24 = vsyncpa [#allocation6], 0 }
   0x5   :  { %25 = vsyncpa [#allocation9], 0 }
   0x6   :  { %26 = vsyncpa [#allocation12], 0 }
   0x7   :  { %27 = vsyncpa [#allocation15], 0 }
   0x8   :  { %28 = vsyncpa [#allocation18], 0 }
   0x9   :  { %29 = vsyncpa [#allocation21], 0 }
   0xa   :  { %30 = vsyncpa [#allocation4], 0 }
   0xb   :  { %31 = vsyncpa [#allocation25], 0 }
   0xc   :  { %32 = vsyncpa [#allocation28], 0  ;;  %s4016_s24 = smov [#allocation5]   ;;  %s4017_s26 = smov [#allocation8]  }
   0xd   :  { %s49_s25 = sshll.u32 %s4016_s24, 4  ;;  %s69_s27 = sshll.u32 %s4017_s26, 4  ;;  %s50_s25 = int_to_ptr.vmem [resolvable:$true] %s49_s25  ;;  %s70_s27 = int_to_ptr.vmem [resolvable:$true] %s69_s27 }
   0xe   :  { %s4477_s0 = sld [smem:[#allocation41_spill]] }
  0x14   :  { %s3600_s30 = scalar_lea.hbm %s4477_s0, 16 }
  0x15   :  { %p3601_p0 = scmp.ne.s32.totalorder %s4477_s0, %s3600_s30  ;;  %p3604_p1 = scmp.lt.u32.totalorder %s3600_s30, %s4477_s0 }
  0x17   :  { %p3606_p2 = pnand %p3604_p1, %p3601_p0 }
  0x19   :  { %3609 = shalt.err (!%p3606_p2)
}
  0x1a   :  { %s3610_s21 = scalar_lea.vmem %s50_s25, 16  ;;  %s3614_s22 = scalar_lea.vmem %s50_s25, 32 }
  0x1b   :  { %p3611_p3 = scmp.ne.s32.totalorder %s50_s25, %s3610_s21  ;;  %p3615_p4 = scmp.lt.s32.totalorder %s50_s25, %s50_s25 }
  0x1c   :  { %p3616_p5 = scmp.lt.s32.totalorder %s3614_s22, %s3610_s21 }
  0x1e   :  { %p3617_p6 = por %p3616_p5, %p3615_p4 }
  0x20   :  { %p3618_p7 = pnand %p3617_p6, %p3611_p3 }
  0x22   :  { %3621 = shalt.err (!%p3618_p7)
}
  0x23   :  { %52 = dma.hbm_to_vmem [thread:$0]  %s4477_s0, 16, %s50_s25, [#allocation6]  }
  0x24   :  { %s3622_s29 = scalar_lea.hbm %s4458_s3, 16 }
  0x25   :  { %p3623_p8 = scmp.ne.s32.totalorder %s4458_s3, %s3622_s29  ;;  %p3626_p9 = scmp.lt.u32.totalorder %s3622_s29, %s4458_s3 }
  0x27   :  { %p3628_p10 = pnand %p3626_p9, %p3623_p8 }
  0x29   :  { %3631 = shalt.err (!%p3628_p10)
}
  0x2a   :  { %s3632_s20 = scalar_lea.vmem %s70_s27, 16  ;;  %s3636_s21 = scalar_lea.vmem %s70_s27, 32 }
  0x2b   :  { %p3633_p11 = scmp.ne.s32.totalorder %s70_s27, %s3632_s20  ;;  %p3637_p12 = scmp.lt.s32.totalorder %s70_s27, %s70_s27 }
  0x2c   :  { %p3638_p13 = scmp.lt.s32.totalorder %s3636_s21, %s3632_s20 }
  0x2e   :  { %p3639_p0 = por %p3638_p13, %p3637_p12 }
  0x30   :  { %p3640_p1 = pnand %p3639_p0, %p3633_p11 }
  0x32   :  { %3643 = shalt.err (!%p3640_p1)
}
  0x33   :  { %72 = dma.hbm_to_vmem [thread:$0]  %s4458_s3, 16, %s70_s27, [#allocation9]  }
  0x34   :  { %s4018_s22 = smov [#allocation11]   ;;  %s3644_s28 = scalar_lea.hbm %s4460_s5, 24576 }
  0x35   :  { %s88_s23 = sshll.u32 %s4018_s22, 4  ;;  %p3645_p2 = scmp.ne.s32.totalorder %s4460_s5, %s3644_s28  ;;  %s89_s23 = int_to_ptr.vmem [resolvable:$true] %s88_s23 }
  0x36   :  { %p3648_p3 = scmp.lt.u32.totalorder %s3644_s28, %s4460_s5 }
  0x38   :  { %p3650_p4 = pnand %p3648_p3, %p3645_p2 }
  0x3a   :  { %3653 = shalt.err (!%p3650_p4)
}
  0x3b   :  { %s3654_s1 = scalar_lea.vmem %s89_s23, 24576  ;;  %p3659_p6 = scmp.lt.s32.totalorder %s89_s23, %s89_s23 }
  0x3c   :  { %p3655_p5 = scmp.ne.s32.totalorder %s89_s23, %s3654_s1  ;;  %p3660_p7 = scmp.lt.s32.totalorder %s3654_s1, %s3654_s1 }
  0x3e   :  { %p3661_p8 = por %p3660_p7, %p3659_p6 }
  0x40   :  { %p3662_p9 = pnand %p3661_p8, %p3655_p5 }
  0x42   :  { %3665 = shalt.err (!%p3662_p9)
}
  0x43   :  { %s4019_s3 = smov 256   ;;  %s4020_s27 = smov 16  }
  0x44   :  { %94 = dma.hbm_to_vmem [thread:$0]  %s4460_s5, 24576, %s89_s23, [#allocation12], %s4019_s3, %s4019_s3, %s4020_s27  }
  0x45   :  { %s4021_s25 = smov [#allocation14]   ;;  %s4022_s22 = smov [#allocation17]  }
  0x46   :  { %s113_s0 = sshll.u32 %s4021_s25, 4  ;;  %s134_s24 = sshll.u32 %s4022_s22, 4  ;;  %s114_s0 = int_to_ptr.vmem [resolvable:$true] %s113_s0  ;;  %s135_s24 = int_to_ptr.vmem [resolvable:$true] %s134_s24 }
  0x47   :  { %s3666_s29 = scalar_lea.hbm %s4462_s7, 64 }
  0x48   :  { %p3667_p10 = scmp.ne.s32.totalorder %s4462_s7, %s3666_s29  ;;  %p3670_p11 = scmp.lt.u32.totalorder %s3666_s29, %s4462_s7 }
  0x4a   :  { %p3672_p12 = pnand %p3670_p11, %p3667_p10 }
  0x4c   :  { %3675 = shalt.err (!%p3672_p12)
}
  0x4d   :  { %s3676_s5 = scalar_lea.vmem %s114_s0, 64  ;;  %p3681_p0 = scmp.lt.s32.totalorder %s114_s0, %s114_s0 }
  0x4e   :  { %p3677_p13 = scmp.ne.s32.totalorder %s114_s0, %s3676_s5  ;;  %p3682_p1 = scmp.lt.s32.totalorder %s3676_s5, %s3676_s5 }
  0x50   :  { %p3683_p2 = por %p3682_p1, %p3681_p0 }
  0x52   :  { %p3684_p3 = pnand %p3683_p2, %p3677_p13 }
  0x54   :  { %3687 = shalt.err (!%p3684_p3)
}
  0x55   :  { %116 = dma.hbm_to_vmem [thread:$0]  %s4462_s7, 64, %s114_s0, [#allocation15]  }
  0x56   :  { %s3688_s22 = scalar_lea.hbm %s4464_s9, 4096 }
  0x57   :  { %p3689_p4 = scmp.ne.s32.totalorder %s4464_s9, %s3688_s22  ;;  %p3692_p5 = scmp.lt.u32.totalorder %s3688_s22, %s4464_s9 }
  0x59   :  { %p3694_p6 = pnand %p3692_p5, %p3689_p4 }
  0x5b   :  { %3697 = shalt.err (!%p3694_p6)
}
  0x5c   :  { %s3698_s30 = scalar_lea.vmem %s135_s24, 4096  ;;  %p3703_p8 = scmp.lt.s32.totalorder %s135_s24, %s135_s24 }
  0x5d   :  { %p3699_p7 = scmp.ne.s32.totalorder %s135_s24, %s3698_s30  ;;  %p3704_p9 = scmp.lt.s32.totalorder %s3698_s30, %s3698_s30 }
  0x5f   :  { %p3705_p10 = por %p3704_p9, %p3703_p8 }
  0x61   :  { %p3706_p11 = pnand %p3705_p10, %p3699_p7 }
  0x63   :  { %3709 = shalt.err (!%p3706_p11)
}
  0x64   :  { %140 = dma.hbm_to_vmem [thread:$0]  %s4464_s9, 4096, %s135_s24, [#allocation18], %s4019_s3, %s4019_s3, %s4020_s27  }
  0x65   :  { %s4023_s19 = smov [#allocation20]   ;;  %s3710_s20 = scalar_lea.hbm %s4466_s11, 1024 }
  0x66   :  { %s156_s1 = sshll.u32 %s4023_s19, 4  ;;  %p3711_p12 = scmp.ne.s32.totalorder %s4466_s11, %s3710_s20  ;;  %s157_s1 = int_to_ptr.vmem [resolvable:$true] %s156_s1 }
  0x67   :  { %p3714_p13 = scmp.lt.u32.totalorder %s3710_s20, %s4466_s11 }
  0x69   :  { %p3716_p0 = pnand %p3714_p13, %p3711_p12 }
  0x6b   :  { %3719 = shalt.err (!%p3716_p0)
}
  0x6c   :  { %s3720_s28 = scalar_lea.vmem %s157_s1, 1024  ;;  %p3725_p2 = scmp.lt.s32.totalorder %s157_s1, %s157_s1 }
  0x6d   :  { %p3721_p1 = scmp.ne.s32.totalorder %s157_s1, %s3720_s28  ;;  %p3726_p3 = scmp.lt.s32.totalorder %s3720_s28, %s3720_s28 }
  0x6f   :  { %p3727_p4 = por %p3726_p3, %p3725_p2 }
  0x71   :  { %p3728_p5 = pnand %p3727_p4, %p3721_p1 }
  0x73   :  { %3731 = shalt.err (!%p3728_p5)
}
  0x74   :  { %s4024_s9 = smov 64   ;;  %s4025_s24 = smov 4  }
  0x75   :  { %162 = dma.hbm_to_vmem [thread:$0]  %s4466_s11, 1024, %s157_s1, [#allocation21], %s4024_s9, %s4024_s9, %s4025_s24  }
  0x76   :  { %s4026_s30 = smov [#allocation2]   ;;  %s4027_s0 = smov [#allocation7]  }
  0x77   :  { %s39_s7 = sshll.u32 %s4026_s30, 4  ;;  %s59_s19 = sshll.u32 %s4027_s0, 4  ;;  %s40_s7 = int_to_ptr.vmem [resolvable:$true] %s39_s7  ;;  %s60_s19 = int_to_ptr.vmem [resolvable:$true] %s59_s19 }
  0x78   :  { %s4478_s20 = sld [smem:[#allocation40_spill]] }
  0x7e   :  { %s3732_s21 = scalar_lea.hbm %s4478_s20, 96 }
  0x7f   :  { %p3733_p6 = scmp.ne.s32.totalorder %s4478_s20, %s3732_s21  ;;  %p3736_p7 = scmp.lt.u32.totalorder %s3732_s21, %s4478_s20 }
  0x81   :  { %p3738_p8 = pnand %p3736_p7, %p3733_p6 }
  0x83   :  { %3741 = shalt.err (!%p3738_p8)
}
  0x84   :  { %s3742_s11 = scalar_lea.vmem %s40_s7, 96  ;;  %p3747_p10 = scmp.lt.s32.totalorder %s40_s7, %s40_s7 }
  0x85   :  { %p3743_p9 = scmp.ne.s32.totalorder %s40_s7, %s3742_s11  ;;  %p3748_p11 = scmp.lt.s32.totalorder %s3742_s11, %s3742_s11 }
  0x87   :  { %p3749_p12 = por %p3748_p11, %p3747_p10 }
  0x89   :  { %p3750_p13 = pnand %p3749_p12, %p3743_p9 }
  0x8b   :  { %3753 = shalt.err (!%p3750_p13)
}
  0x8c   :  { %42 = dma.hbm_to_vmem [thread:$0]  %s4478_s20, 96, %s40_s7, [#allocation3]  }
  0x8d   :  { %s3754_s18 = scalar_lea.hbm %s4457_s2, 16 }
  0x8e   :  { %p3755_p0 = scmp.ne.s32.totalorder %s4457_s2, %s3754_s18  ;;  %p3758_p1 = scmp.lt.u32.totalorder %s3754_s18, %s4457_s2 }
  0x90   :  { %p3760_p2 = pnand %p3758_p1, %p3755_p0 }
  0x92   :  { %3763 = shalt.err (!%p3760_p2)
}
  0x93   :  { %s3764_s21 = scalar_lea.vmem %s60_s19, 16  ;;  %s3768_s25 = scalar_lea.vmem %s60_s19, 32 }
  0x94   :  { %p3765_p3 = scmp.ne.s32.totalorder %s60_s19, %s3764_s21  ;;  %p3769_p4 = scmp.lt.s32.totalorder %s60_s19, %s60_s19 }
  0x95   :  { %p3770_p5 = scmp.lt.s32.totalorder %s3768_s25, %s3764_s21 }
  0x97   :  { %p3771_p6 = por %p3770_p5, %p3769_p4 }
  0x99   :  { %p3772_p7 = pnand %p3771_p6, %p3765_p3 }
  0x9b   :  { %3775 = shalt.err (!%p3772_p7)
}
  0x9c   :  { %62 = dma.hbm_to_vmem [thread:$0]  %s4457_s2, 16, %s60_s19, [#allocation6]  }
  0x9d   :  { %s4028_s22 = smov [#allocation10]   ;;  %s4029_s28 = smov [#allocation13]  }
  0x9e   :  { %s79_s26 = sshll.u32 %s4028_s22, 4  ;;  %s100_s11 = sshll.u32 %s4029_s28, 4  ;;  %s80_s26 = int_to_ptr.vmem [resolvable:$true] %s79_s26  ;;  %s4234_s11 = int_to_ptr.vmem [resolvable:$true] %s100_s11 }
  0x9f   :  { %s3776_s24 = scalar_lea.hbm %s4459_s4, 16 }
  0xa0   :  { %p3777_p8 = scmp.ne.s32.totalorder %s4459_s4, %s3776_s24  ;;  %p3780_p9 = scmp.lt.u32.totalorder %s3776_s24, %s4459_s4 }
  0xa2   :  { %p3782_p10 = pnand %p3780_p9, %p3777_p8 }
  0xa4   :  { %3785 = shalt.err (!%p3782_p10)
}
  0xa5   :  { %s3786_s2 = scalar_lea.vmem %s80_s26, 16  ;;  %s3790_s19 = scalar_lea.vmem %s80_s26, 32 }
  0xa6   :  { %p3787_p11 = scmp.ne.s32.totalorder %s80_s26, %s3786_s2  ;;  %p3791_p12 = scmp.lt.s32.totalorder %s80_s26, %s80_s26 }
  0xa7   :  { %p3792_p13 = scmp.lt.s32.totalorder %s3790_s19, %s3786_s2 }
  0xa9   :  { %p3793_p0 = por %p3792_p13, %p3791_p12 }
  0xab   :  { %p3794_p1 = pnand %p3793_p0, %p3787_p11 }
  0xad   :  { %3797 = shalt.err (!%p3794_p1)
}
  0xae   :  { %82 = dma.hbm_to_vmem [thread:$0]  %s4459_s4, 16, %s80_s26, [#allocation9]  }
  0xaf   :  { %s3798_s7 = scalar_lea.hbm %s4461_s6, 4096 }
  0xb0   :  { %p3799_p2 = scmp.ne.s32.totalorder %s4461_s6, %s3798_s7  ;;  %p3802_p3 = scmp.lt.u32.totalorder %s3798_s7, %s4461_s6 }
  0xb2   :  { %p3804_p4 = pnand %p3802_p3, %p3799_p2 }
  0xb4   :  { %3807 = shalt.err (!%p3804_p4)
}
  0xb5   :  { %s3808_s9 = scalar_lea.vmem %s4234_s11, 4096  ;;  %p3813_p6 = scmp.lt.s32.totalorder %s4234_s11, %s4234_s11 }
  0xb6   :  { %p3809_p5 = scmp.ne.s32.totalorder %s4234_s11, %s3808_s9  ;;  %p3814_p7 = scmp.lt.s32.totalorder %s3808_s9, %s3808_s9 }
  0xb8   :  { %p3815_p8 = por %p3814_p7, %p3813_p6 }
  0xba   :  { %p3816_p9 = pnand %p3815_p8, %p3809_p5 }
  0xbc   :  { %3819 = shalt.err (!%p3816_p9)
}
  0xbd   :  { %106 = dma.hbm_to_vmem [thread:$0]  %s4461_s6, 4096, %s4234_s11, [#allocation12], %s4019_s3, %s4019_s3, %s4020_s27  }
  0xbe   :  { %s4030_s24 = smov [#allocation16]   ;;  %s4031_s18 = smov [#allocation19]  }
  0xbf   :  { %s122_s29 = sshll.u32 %s4030_s24, 4  ;;  %s147_s30 = sshll.u32 %s4031_s18, 4  ;;  %s123_s29 = int_to_ptr.vmem [resolvable:$true] %s122_s29  ;;  %s148_s30 = int_to_ptr.vmem [resolvable:$true] %s147_s30 }
  0xc0   :  { %s3820_s19 = scalar_lea.hbm %s4463_s8, 4096 }
  0xc1   :  { %p3821_p10 = scmp.ne.s32.totalorder %s4463_s8, %s3820_s19  ;;  %p3824_p11 = scmp.lt.u32.totalorder %s3820_s19, %s4463_s8 }
  0xc3   :  { %p3826_p12 = pnand %p3824_p11, %p3821_p10 }
  0xc5   :  { %3829 = shalt.err (!%p3826_p12)
}
  0xc6   :  { %s3830_s6 = scalar_lea.vmem %s123_s29, 4096  ;;  %p3835_p0 = scmp.lt.s32.totalorder %s123_s29, %s123_s29 }
  0xc7   :  { %p3831_p13 = scmp.ne.s32.totalorder %s123_s29, %s3830_s6  ;;  %p3836_p1 = scmp.lt.s32.totalorder %s3830_s6, %s3830_s6 }
  0xc9   :  { %p3837_p2 = por %p3836_p1, %p3835_p0 }
  0xcb   :  { %p3838_p3 = pnand %p3837_p2, %p3831_p13 }
  0xcd   :  { %3841 = shalt.err (!%p3838_p3)
}
  0xce   :  { %128 = dma.hbm_to_vmem [thread:$0]  %s4463_s8, 4096, %s123_s29, [#allocation15], %s4019_s3, %s4019_s3, %s4020_s27  }
  0xcf   :  { %s3842_s28 = scalar_lea.hbm %s4465_s10, 64 }
  0xd0   :  { %p3843_p4 = scmp.ne.s32.totalorder %s4465_s10, %s3842_s28  ;;  %p3846_p5 = scmp.lt.u32.totalorder %s3842_s28, %s4465_s10 }
  0xd2   :  { %p3848_p6 = pnand %p3846_p5, %p3843_p4 }
  0xd4   :  { %3851 = shalt.err (!%p3848_p6)
}
  0xd5   :  { %s3852_s24 = scalar_lea.vmem %s148_s30, 64  ;;  %p3857_p8 = scmp.lt.s32.totalorder %s148_s30, %s148_s30 }
  0xd6   :  { %p3853_p7 = scmp.ne.s32.totalorder %s148_s30, %s3852_s24  ;;  %p3858_p9 = scmp.lt.s32.totalorder %s3852_s24, %s3852_s24 }
  0xd8   :  { %p3859_p10 = por %p3858_p9, %p3857_p8 }
  0xda   :  { %p3860_p11 = pnand %p3859_p10, %p3853_p7 }
  0xdc   :  { %3863 = shalt.err (!%p3860_p11)
}
  0xdd   :  { %150 = dma.hbm_to_vmem [thread:$0]  %s4465_s10, 64, %s148_s30, [#allocation18]  }
  0xde   :  { %s4032_s27 = smov [#allocation22]   ;;  %s3864_s2 = scalar_lea.hbm %s4467_s12, 16 }
  0xdf   :  { %s169_s29 = sshll.u32 %s4032_s27, 4  ;;  %p3865_p12 = scmp.ne.s32.totalorder %s4467_s12, %s3864_s2  ;;  %s170_s29 = int_to_ptr.vmem [resolvable:$true] %s169_s29 }
  0xe0   :  { %p3868_p13 = scmp.lt.u32.totalorder %s3864_s2, %s4467_s12 }
  0xe2   :  { %p3870_p0 = pnand %p3868_p13, %p3865_p12 }
  0xe4   :  { %3873 = shalt.err (!%p3870_p0)
}
  0xe5   :  { %s3874_s25 = scalar_lea.vmem %s170_s29, 16  ;;  %s3878_s10 = scalar_lea.vmem %s170_s29, 32 }
  0xe6   :  { %p3875_p1 = scmp.ne.s32.totalorder %s170_s29, %s3874_s25  ;;  %p3879_p2 = scmp.lt.s32.totalorder %s170_s29, %s170_s29 }
  0xe7   :  { %p3880_p3 = scmp.lt.s32.totalorder %s3878_s10, %s3874_s25 }
  0xe9   :  { %p3881_p4 = por %p3880_p3, %p3879_p2 }
  0xeb   :  { %p3882_p5 = pnand %p3881_p4, %p3875_p1 }
  0xed   :  { %3885 = shalt.err (!%p3882_p5)
}
  0xee   :  { %172 = dma.hbm_to_vmem [thread:$0]  %s4467_s12, 16, %s170_s29, [#allocation21]  }
  0xef   :  { %3996 = dma.done.wait [#allocation3], 96  }
  0xf0   :  { %3997 = vsyncadd [#allocation3], 4294967200 }
  0xf1   :  { %3998 = dma.done.wait [#allocation6], 32  }
  0xf2   :  { %3999 = vsyncadd [#allocation6], 4294967264 }
  0xf3   :  { %4000 = dma.done.wait [#allocation9], 32  }
  0xf4   :  { %4001 = vsyncadd [#allocation9], 4294967264 }
  0xf5   :  { %4002 = dma.done.wait [#allocation12], 28672  }
  0xf6   :  { %4003 = vsyncadd [#allocation12], 4294938624 }
  0xf7   :  { %4004 = dma.done.wait [#allocation15], 4160  }
  0xf8   :  { %4005 = vsyncadd [#allocation15], 4294963136 }
  0xf9   :  { %4006 = dma.done.wait [#allocation18], 4160  }
  0xfa   :  { %4007 = vsyncadd [#allocation18], 4294963136 }
  0xfb   :  { %4008 = dma.done.wait [#allocation21], 1040  }
  0xfc   :  { %4009 = vsyncadd [#allocation21], 4294966256  ;;  %v4033_v0 = vmov 0   ;;  %v3127_v1 = vld [vmem:[#allocation13 + $0x4] ss:$16 sps:$4 sm:$0xff]   ;;  %v688_v63 = vlaneseq  ;;  %vm4036_vm0 = vmmov 0  }
  0xfd   :  { %633 = vmatprep.mubr.bf16.mxu0 %v4033_v0  ;;  %674 = vmatprep.mubr.bf16.mxu1 %v4033_v0  ;;  %v3129_v2 = vld [vmem:[#allocation13 + $0xc] ss:$16 sps:$4 sm:$0xff]   ;;  %v3131_v3 = vld [vmem:[#allocation13] ss:$16 sps:$4 sm:$0xff]   ;;  %v3132_v4 = vld [vmem:[#allocation13 + $0x8] ss:$16 sps:$4 sm:$0xff]  }
  0xfe   :  { %601 = vmatprep.subr.bf16.mxu0 %v3127_v1  ;;  %642 = vmatprep.subr.bf16.mxu1 %v3129_v2  ;;  %v3133_v5 = vld [vmem:[#allocation13 + $0x24] ss:$16 sps:$4 sm:$0xff]   ;;  %v3135_v6 = vld [vmem:[#allocation13 + $0x2c] ss:$16 sps:$4 sm:$0xff]   ;;  %v3137_v7 = vld [vmem:[#allocation13 + $0x20] ss:$16 sps:$4 sm:$0xff]  }
  0xff   :  { %602 = vmatpush1.bf16.msra.mxu0 %v3131_v3  ;;  %643 = vmatpush1.bf16.msra.mxu1 %v3132_v4  ;;  %v3138_v8 = vld [vmem:[#allocation13 + $0x28] ss:$16 sps:$4 sm:$0xff]   ;;  %v3139_v9 = vld [vmem:[#allocation13 + $0x44] ss:$16 sps:$4 sm:$0xff]   ;;  %v3141_v10 = vld [vmem:[#allocation13 + $0x4c] ss:$16 sps:$4 sm:$0xff]  }
 0x100   :  { %603 = vmatprep.subr.bf16.mxu0 %v3133_v5  ;;  %644 = vmatprep.subr.bf16.mxu1 %v3135_v6  ;;  %v3143_v11 = vld [vmem:[#allocation13 + $0x40] ss:$16 sps:$4 sm:$0xff]   ;;  %v3144_v12 = vld [vmem:[#allocation13 + $0x48] ss:$16 sps:$4 sm:$0xff]   ;;  %v3145_v13 = vld [vmem:[#allocation13 + $0x64] ss:$16 sps:$4 sm:$0xff]  }
 0x101   :  { %v3147_v14 = vld [vmem:[#allocation13 + $0x6c] ss:$16 sps:$4 sm:$0xff]   ;;  %v3149_v15 = vld [vmem:[#allocation13 + $0x60] ss:$16 sps:$4 sm:$0xff]   ;;  %v3150_v16 = vld [vmem:[#allocation13 + $0x68] ss:$16 sps:$4 sm:$0xff]  }
 0x102   :  { %v3151_v17 = vld [vmem:[#allocation13 + $0x84] ss:$16 sps:$4 sm:$0xff]   ;;  %v3153_v18 = vld [vmem:[#allocation13 + $0x8c] ss:$16 sps:$4 sm:$0xff]   ;;  %v3155_v19 = vld [vmem:[#allocation13 + $0x80] ss:$16 sps:$4 sm:$0xff]  }
 0x103   :  { %604 = vmatpush1.bf16.msra.mxu0 %v3137_v7  ;;  %645 = vmatpush1.bf16.msra.mxu1 %v3138_v8  ;;  %v3156_v20 = vld [vmem:[#allocation13 + $0x88] ss:$16 sps:$4 sm:$0xff]   ;;  %v3157_v21 = vld [vmem:[#allocation13 + $0xa4] ss:$16 sps:$4 sm:$0xff]   ;;  %v3159_v22 = vld [vmem:[#allocation13 + $0xac] ss:$16 sps:$4 sm:$0xff]  }
 0x104   :  { %605 = vmatprep.subr.bf16.mxu0 %v3139_v9  ;;  %646 = vmatprep.subr.bf16.mxu1 %v3141_v10  ;;  %v3161_v23 = vld [vmem:[#allocation13 + $0xa0] ss:$16 sps:$4 sm:$0xff]   ;;  %v3162_v24 = vld [vmem:[#allocation13 + $0xa8] ss:$16 sps:$4 sm:$0xff]   ;;  %v3163_v25 = vld [vmem:[#allocation13 + $0xc4] ss:$16 sps:$4 sm:$0xff]  }
 0x105   :  { %v3165_v26 = vld [vmem:[#allocation13 + $0xcc] ss:$16 sps:$4 sm:$0xff]   ;;  %v3167_v27 = vld [vmem:[#allocation13 + $0xc0] ss:$16 sps:$4 sm:$0xff]   ;;  %v3168_v28 = vld [vmem:[#allocation13 + $0xc8] ss:$16 sps:$4 sm:$0xff]  }
 0x106   :  { %v3169_v29 = vld [vmem:[#allocation13 + $0xe4] ss:$16 sps:$4 sm:$0xff]   ;;  %v3171_v30 = vld [vmem:[#allocation13 + $0xec] ss:$16 sps:$4 sm:$0xff]   ;;  %v3173_v31 = vld [vmem:[#allocation13 + $0xe0] ss:$16 sps:$4 sm:$0xff]  }
 0x107   :  { %606 = vmatpush1.bf16.msra.mxu0 %v3143_v11  ;;  %647 = vmatpush1.bf16.msra.mxu1 %v3144_v12  ;;  %v3174_v32 = vld [vmem:[#allocation13 + $0xe8] ss:$16 sps:$4 sm:$0xff]   ;;  %v3177_v34 = vld [vmem:[#allocation11 + $0x4] ss:$16 sps:$4 sm:$0xff]   ;;  %v3175_v37 = vld [vmem:[#allocation11] ss:$16 sps:$4 sm:$0xff]  }
 0x108   :  { %607 = vmatprep.subr.bf16.mxu0 %v3145_v13  ;;  %648 = vmatprep.subr.bf16.mxu1 %v3147_v14  ;;  %v214_v33 = vld [vmem:[#allocation5] sm:$0x1]  ;;  %v3180_v35 = vld [vmem:[#allocation11 + $0x204] ss:$16 sps:$4 sm:$0xff]   ;;  %v3178_v38 = vld [vmem:[#allocation11 + $0x200] ss:$16 sps:$4 sm:$0xff]  }
 0x109   :  { %v408_v36 = vpack.c.bf16 %v214_v33, %v214_v33  ;;  %v3183_v39 = vld [vmem:[#allocation11 + $0x24] ss:$16 sps:$4 sm:$0xff]   ;;  %v3181_v41 = vld [vmem:[#allocation11 + $0x20] ss:$16 sps:$4 sm:$0xff]   ;;  %v4034_v61 = vmov 1966171168  }
 0x10a   :  { %v3186_v40 = vld [vmem:[#allocation11 + $0x224] ss:$16 sps:$4 sm:$0xff]   ;;  %v3184_v42 = vld [vmem:[#allocation11 + $0x220] ss:$16 sps:$4 sm:$0xff]   ;;  %v686_v62 = vunpack.c.l.s4 %v4034_v61  ;;  %v4309_v6 = vshrl.u32 %v688_v63, 7  ;;  %s4037_s12 = smov [#allocation24]  }
 0x10b   :  { %608 = vmatpush1.bf16.msra.mxu0 %v3149_v15  ;;  %649 = vmatpush1.bf16.msra.mxu1 %v3150_v16  ;;  %v3189_v43 = vld [vmem:[#allocation11 + $0x44] ss:$16 sps:$4 sm:$0xff]   ;;  %v3187_v45 = vld [vmem:[#allocation11 + $0x40] ss:$16 sps:$4 sm:$0xff]   ;;  %v3280_v61 = vld [vmem:[#allocation11 + $0x28] ss:$16 sps:$4 sm:$0xff]  }
 0x10c   :  { %609 = vmatprep.subr.bf16.mxu0 %v3151_v17  ;;  %650 = vmatprep.subr.bf16.mxu1 %v3153_v18  ;;  %v3192_v44 = vld [vmem:[#allocation11 + $0x244] ss:$16 sps:$4 sm:$0xff]   ;;  %v3190_v46 = vld [vmem:[#allocation11 + $0x240] ss:$16 sps:$4 sm:$0xff]   ;;  %v687_v5 = vunpack.c.0.s8 %v686_v62  ;;  %v3288_v63 = vld [vmem:[#allocation11 + $0x4c] ss:$16 sps:$4 sm:$0xff]  }
 0x10d   :  { %v3195_v47 = vld [vmem:[#allocation11 + $0x64] ss:$16 sps:$4 sm:$0xff]   ;;  %v3193_v49 = vld [vmem:[#allocation11 + $0x60] ss:$16 sps:$4 sm:$0xff]   ;;  %s2717_s11 = sshll.u32 %s4037_s12, 4  ;;  %s4038_s7 = smov [#allocation27]   ;;  %s2718_s11 = int_to_ptr.vmem [resolvable:$true] %s2717_s11 }
 0x10e   :  { %v3198_v48 = vld [vmem:[#allocation11 + $0x264] ss:$16 sps:$4 sm:$0xff]   ;;  %v3196_v50 = vld [vmem:[#allocation11 + $0x260] ss:$16 sps:$4 sm:$0xff]   ;;  %v4312_v11 = vsub.s32 %v687_v5, %v4309_v6  ;;  %s2737_s20 = sshll.u32 %s4038_s7, 4  ;;  %s3886_s22 = scalar_lea.vmem %s2718_s11, 16  ;;  %s2738_s20 = int_to_ptr.vmem [resolvable:$true] %s2737_s20 }
 0x10f   :  { %610 = vmatpush1.bf16.msra.mxu0 %v3155_v19  ;;  %651 = vmatpush1.bf16.msra.mxu1 %v3156_v20  ;;  %v3201_v51 = vld [vmem:[#allocation11 + $0x84] ss:$16 sps:$4 sm:$0xff]   ;;  %v3199_v53 = vld [vmem:[#allocation11 + $0x80] ss:$16 sps:$4 sm:$0xff]   ;;  %p3887_p6 = scmp.ne.s32.totalorder %s2718_s11, %s3886_s22  ;;  %s3890_s28 = scalar_lea.vmem %s2718_s11, 32 }
 0x110   :  { %611 = vmatprep.subr.bf16.mxu0 %v3157_v21  ;;  %652 = vmatprep.subr.bf16.mxu1 %v3159_v22  ;;  %v3204_v52 = vld [vmem:[#allocation11 + $0x284] ss:$16 sps:$4 sm:$0xff]   ;;  %v3202_v54 = vld [vmem:[#allocation11 + $0x280] ss:$16 sps:$4 sm:$0xff]   ;;  %p3891_p7 = scmp.lt.s32.totalorder %s2718_s11, %s2718_s11  ;;  %p3892_p8 = scmp.lt.s32.totalorder %s3890_s28, %s3886_s22 }
 0x111   :  { %v3207_v55 = vld [vmem:[#allocation11 + $0xa4] ss:$16 sps:$4 sm:$0xff]   ;;  %v3205_v57 = vld [vmem:[#allocation11 + $0xa0] ss:$16 sps:$4 sm:$0xff]  }
 0x112   :  { %v3210_v56 = vld [vmem:[#allocation11 + $0x2a4] ss:$16 sps:$4 sm:$0xff]   ;;  %v3208_v58 = vld [vmem:[#allocation11 + $0x2a0] ss:$16 sps:$4 sm:$0xff]   ;;  %p3893_p9 = por %p3892_p8, %p3891_p7 }
 0x113   :  { %612 = vmatpush1.bf16.msra.mxu0 %v3161_v23  ;;  %653 = vmatpush1.bf16.msra.mxu1 %v3162_v24  ;;  %v3213_v59 = vld [vmem:[#allocation11 + $0xc4] ss:$16 sps:$4 sm:$0xff]   ;;  %v3211_v1 = vld [vmem:[#allocation11 + $0xc0] ss:$16 sps:$4 sm:$0xff]  }
 0x114   :  { %613 = vmatprep.subr.bf16.mxu0 %v3163_v25  ;;  %654 = vmatprep.subr.bf16.mxu1 %v3165_v26  ;;  %v3216_v60 = vld [vmem:[#allocation11 + $0x2c4] ss:$16 sps:$4 sm:$0xff]   ;;  %v3214_v2 = vld [vmem:[#allocation11 + $0x2c0] ss:$16 sps:$4 sm:$0xff]   ;;  %p3894_p10 = pnand %p3893_p9, %p3887_p6 }
 0x115   :  { %v3219_v3 = vld [vmem:[#allocation11 + $0xe4] ss:$16 sps:$4 sm:$0xff]   ;;  %v3217_v7 = vld [vmem:[#allocation11 + $0xe0] ss:$16 sps:$4 sm:$0xff]  }
 0x116   :  { %v3222_v4 = vld [vmem:[#allocation11 + $0x2e4] ss:$16 sps:$4 sm:$0xff]   ;;  %v3220_v8 = vld [vmem:[#allocation11 + $0x2e0] ss:$16 sps:$4 sm:$0xff]  }
 0x117   :  { %614 = vmatpush1.bf16.msra.mxu0 %v3167_v27  ;;  %655 = vmatpush1.bf16.msra.mxu1 %v3168_v28  ;;  %v3225_v9 = vld [vmem:[#allocation11 + $0x104] ss:$16 sps:$4 sm:$0xff]   ;;  %v3223_v12 = vld [vmem:[#allocation11 + $0x100] ss:$16 sps:$4 sm:$0xff]  }
 0x118   :  { %615 = vmatprep.subr.bf16.mxu0 %v3169_v29  ;;  %656 = vmatprep.subr.bf16.mxu1 %v3171_v30  ;;  %v3228_v10 = vld [vmem:[#allocation11 + $0x304] ss:$16 sps:$4 sm:$0xff]   ;;  %v3226_v13 = vld [vmem:[#allocation11 + $0x300] ss:$16 sps:$4 sm:$0xff]  }
 0x119   :  { %v213_v14 = vld [vmem:[#allocation2] sm:$0x3f] }
 0x11a   :  { %v3231_v15 = vld [vmem:[#allocation11 + $0x124] ss:$16 sps:$4 sm:$0xff]   ;;  %v691_v17 = vrot.slane %v213_v14, %v4312_v11  ;;  %v684_v18 = vcombine.high %v213_v14, %v213_v14  ;;  %v3229_v20 = vld [vmem:[#allocation11 + $0x120] ss:$16 sps:$4 sm:$0xff]  }
 0x11b   :  { %616 = vmatpush1.bf16.msra.mxu0 %v3173_v31  ;;  %657 = vmatpush1.bf16.msra.mxu1 %v3174_v32  ;;  %v3234_v16 = vld [vmem:[#allocation11 + $0x324] ss:$16 sps:$4 sm:$0xff]   ;;  %v3232_v21 = vld [vmem:[#allocation11 + $0x320] ss:$16 sps:$4 sm:$0xff]  }
 0x11c   :  { %1697 = vmatprep.subr.bf16.mxu0 %v3177_v34  ;;  %1738 = vmatprep.subr.bf16.mxu1 %v3180_v35  ;;  %v699_v19 = vcombine.high %v691_v17, %v691_v17  ;;  %v4316_v22 = vrot.slane %v684_v18, %v4312_v11  ;;  %v3237_v23 = vld [vmem:[#allocation11 + $0x144] ss:$16 sps:$4 sm:$0xff]   ;;  %v3235_v28 = vld [vmem:[#allocation11 + $0x140] ss:$16 sps:$4 sm:$0xff]  }
 0x11d   :  { %v3240_v24 = vld [vmem:[#allocation11 + $0x344] ss:$16 sps:$4 sm:$0xff]   ;;  %v3238_v29 = vld [vmem:[#allocation11 + $0x340] ss:$16 sps:$4 sm:$0xff]  }
 0x11e   :  { %634 = vmatmul.mubr.bf16.vlgmr.msra.gmra.mrb[0].mxu0 %v408_v36  ;;  %675 = vmatmul.mubr.bf16.vlgmr.msra.gmra.mrb[0].mxu1 %v408_v36  ;;  %v4319_v25 = vrot.slane %v699_v19, %v4312_v11  ;;  %v4323_v26 = vrot.slane %v4316_v22, %v4312_v11  ;;  %v3243_v30 = vld [vmem:[#allocation11 + $0x164] ss:$16 sps:$4 sm:$0xff]   ;;  %v3241_v32 = vld [vmem:[#allocation11 + $0x160] ss:$16 sps:$4 sm:$0xff]   ;;  %v3310_v19 = vld [vmem:[#allocation11 + $0xc8] ss:$16 sps:$4 sm:$0xff]  }
 0x11f   :  { %1698 = vmatpush1.bf16.msra.mxu0 %v3175_v37  ;;  %1739 = vmatpush1.bf16.msra.mxu1 %v3178_v38  ;;  %v3246_v31 = vld [vmem:[#allocation11 + $0x364] ss:$16 sps:$4 sm:$0xff]   ;;  %v3244_v33 = vld [vmem:[#allocation11 + $0x360] ss:$16 sps:$4 sm:$0xff]  }
 0x120   :  { %1699 = vmatprep.subr.bf16.mxu0 %v3183_v39  ;;  %1740 = vmatprep.subr.bf16.mxu1 %v3186_v40  ;;  %v4328_v27 = vcombine.high %v4319_v25, %v4319_v25  ;;  %v3249_v34 = vld [vmem:[#allocation11 + $0x184] ss:$16 sps:$4 sm:$0xff]   ;;  %v3247_v36 = vld [vmem:[#allocation11 + $0x180] ss:$16 sps:$4 sm:$0xff]  }
 0x121   :  { %1729 = vmatprep.mubr.bf16.mxu0 %v4319_v25  ;;  %v3252_v35 = vld [vmem:[#allocation11 + $0x384] ss:$16 sps:$4 sm:$0xff]   ;;  %v3250_v37 = vld [vmem:[#allocation11 + $0x380] ss:$16 sps:$4 sm:$0xff]  }
 0x122   :  { %1770 = vmatprep.mubr.bf16.mxu1 %v4328_v27  ;;  %v3255_v38 = vld [vmem:[#allocation11 + $0x1a4] ss:$16 sps:$4 sm:$0xff]   ;;  %v3253_v40 = vld [vmem:[#allocation11 + $0x1a0] ss:$16 sps:$4 sm:$0xff]  }
 0x123   :  { %1700 = vmatpush1.bf16.msra.mxu0 %v3181_v41  ;;  %1741 = vmatpush1.bf16.msra.mxu1 %v3184_v42  ;;  %v3258_v39 = vld [vmem:[#allocation11 + $0x3a4] ss:$16 sps:$4 sm:$0xff]   ;;  %v3256_v41 = vld [vmem:[#allocation11 + $0x3a0] ss:$16 sps:$4 sm:$0xff]  }
 0x124   :  { %1701 = vmatprep.subr.bf16.mxu0 %v3189_v43  ;;  %1742 = vmatprep.subr.bf16.mxu1 %v3192_v44  ;;  %v3261_v42 = vld [vmem:[#allocation11 + $0x1c4] ss:$16 sps:$4 sm:$0xff]   ;;  %v3259_v44 = vld [vmem:[#allocation11 + $0x1c0] ss:$16 sps:$4 sm:$0xff]  }
 0x125   :  { %v3264_v43 = vld [vmem:[#allocation11 + $0x3c4] ss:$16 sps:$4 sm:$0xff]   ;;  %v3289_v5 = vld [vmem:[#allocation11 + $0x460] ss:$16 sps:$4 sm:$0xff]  }
 0x126   :  { %v3285_v62 = vld [vmem:[#allocation11 + $0x444] ss:$16 sps:$4 sm:$0xff]   ;;  %v3301_v14 = vld [vmem:[#allocation11 + $0x4a0] ss:$16 sps:$4 sm:$0xff]  }
 0x127   :  { %1702 = vmatpush1.bf16.msra.mxu0 %v3187_v45  ;;  %1743 = vmatpush1.bf16.msra.mxu1 %v3190_v46  ;;  %v3262_v45 = vld [vmem:[#allocation11 + $0x3c0] ss:$16 sps:$4 sm:$0xff]   ;;  %v3267_v46 = vld [vmem:[#allocation11 + $0x1e4] ss:$16 sps:$4 sm:$0xff]  }
 0x128   :  { %1703 = vmatprep.subr.bf16.mxu0 %v3195_v47  ;;  %1744 = vmatprep.subr.bf16.mxu1 %v3198_v48  ;;  %v3270_v47 = vld [vmem:[#allocation11 + $0x3e4] ss:$16 sps:$4 sm:$0xff]   ;;  %v4332_v48 = vrot.slane %v691_v17, %v4312_v11  ;;  %v3312_v17 = vld [vmem:[#allocation11 + $0xcc] ss:$16 sps:$4 sm:$0xff]   ;;  %v3307_v18 = vld [vmem:[#allocation11 + $0x4c0] ss:$16 sps:$4 sm:$0xff]  }
 0x12b   :  { %1704 = vmatpush1.bf16.msra.mxu0 %v3193_v49  ;;  %1745 = vmatpush1.bf16.msra.mxu1 %v3196_v50  ;;  %v3265_v49 = vld [vmem:[#allocation11 + $0x1e0] ss:$16 sps:$4 sm:$0xff]  }
 0x12c   :  { %1705 = vmatprep.subr.bf16.mxu0 %v3201_v51  ;;  %1746 = vmatprep.subr.bf16.mxu1 %v3204_v52  ;;  %v3268_v50 = vld [vmem:[#allocation11 + $0x3e0] ss:$16 sps:$4 sm:$0xff]   ;;  %v3273_v51 = vld [vmem:[#allocation11 + $0x404] ss:$16 sps:$4 sm:$0xff]   ;;  %v3276_v52 = vld [vmem:[#allocation11 + $0xc] ss:$16 sps:$4 sm:$0xff]  }
 0x12f   :  { %1706 = vmatpush1.bf16.msra.mxu0 %v3199_v53  ;;  %1747 = vmatpush1.bf16.msra.mxu1 %v3202_v54  ;;  %v700_v53 = vcombine.high %v4316_v22, %v4316_v22  ;;  %v4338_v54 = vcombine.high %v4332_v48, %v4332_v48  ;;  %v3313_v22 = vld [vmem:[#allocation11 + $0x4e0] ss:$16 sps:$4 sm:$0xff]  }
 0x130   :  { %1707 = vmatprep.subr.bf16.mxu0 %v3207_v55  ;;  %1748 = vmatprep.subr.bf16.mxu1 %v3210_v56  ;;  %v3271_v55 = vld [vmem:[#allocation11 + $0x400] ss:$16 sps:$4 sm:$0xff]   ;;  %v3274_v56 = vld [vmem:[#allocation11 + $0x8] ss:$16 sps:$4 sm:$0xff]  }
 0x133   :  { %1708 = vmatpush1.bf16.msra.mxu0 %v3205_v57  ;;  %1749 = vmatpush1.bf16.msra.mxu1 %v3208_v58  ;;  %v3279_v57 = vld [vmem:[#allocation11 + $0x424] ss:$16 sps:$4 sm:$0xff]   ;;  %v3282_v58 = vld [vmem:[#allocation11 + $0x2c] ss:$16 sps:$4 sm:$0xff]  }
 0x134   :  { %1709 = vmatprep.subr.bf16.mxu0 %v3213_v59  ;;  %1750 = vmatprep.subr.bf16.mxu1 %v3216_v60  ;;  %v4341_v59 = vrot.slane %v700_v53, %v4312_v11  ;;  %v3277_v60 = vld [vmem:[#allocation11 + $0x420] ss:$16 sps:$4 sm:$0xff]   ;;  %v3298_v11 = vld [vmem:[#allocation11 + $0x88] ss:$16 sps:$4 sm:$0xff]  }
 0x135   :  { %v3355_v53 = vld [vmem:[#allocation11 + $0x5c0] ss:$16 sps:$4 sm:$0xff]  }
 0x137   :  { %1710 = vmatpush1.bf16.msra.mxu0 %v3211_v1  ;;  %1751 = vmatpush1.bf16.msra.mxu1 %v3214_v2  ;;  %v3283_v1 = vld [vmem:[#allocation11 + $0x440] ss:$16 sps:$4 sm:$0xff]   ;;  %v3286_v2 = vld [vmem:[#allocation11 + $0x48] ss:$16 sps:$4 sm:$0xff]  }
 0x138   :  { %1711 = vmatprep.subr.bf16.mxu0 %v3219_v3  ;;  %1752 = vmatprep.subr.bf16.mxu1 %v3222_v4  ;;  %v3291_v3 = vld [vmem:[#allocation11 + $0x464] ss:$16 sps:$4 sm:$0xff]   ;;  %v3294_v4 = vld [vmem:[#allocation11 + $0x6c] ss:$16 sps:$4 sm:$0xff]  }
 0x13b   :  { %1712 = vmatpush1.bf16.msra.mxu0 %v3217_v7  ;;  %1753 = vmatpush1.bf16.msra.mxu1 %v3220_v8  ;;  %v3292_v7 = vld [vmem:[#allocation11 + $0x68] ss:$16 sps:$4 sm:$0xff]   ;;  %v3297_v8 = vld [vmem:[#allocation11 + $0x484] ss:$16 sps:$4 sm:$0xff]  }
 0x13c   :  { %1713 = vmatprep.subr.bf16.mxu0 %v3225_v9  ;;  %1754 = vmatprep.subr.bf16.mxu1 %v3228_v10  ;;  %v3300_v9 = vld [vmem:[#allocation11 + $0x8c] ss:$16 sps:$4 sm:$0xff]   ;;  %v3295_v10 = vld [vmem:[#allocation11 + $0x480] ss:$16 sps:$4 sm:$0xff]  }
 0x13f   :  { %1714 = vmatpush1.bf16.msra.mxu0 %v3223_v12  ;;  %1755 = vmatpush1.bf16.msra.mxu1 %v3226_v13  ;;  %v3303_v12 = vld [vmem:[#allocation11 + $0x4a4] ss:$16 sps:$4 sm:$0xff]   ;;  %v3306_v13 = vld [vmem:[#allocation11 + $0xac] ss:$16 sps:$4 sm:$0xff]  }
 0x140   :  { %1715 = vmatprep.subr.bf16.mxu0 %v3231_v15  ;;  %1756 = vmatprep.subr.bf16.mxu1 %v3234_v16  ;;  %v3304_v15 = vld [vmem:[#allocation11 + $0xa8] ss:$16 sps:$4 sm:$0xff]   ;;  %v3309_v16 = vld [vmem:[#allocation11 + $0x4c4] ss:$16 sps:$4 sm:$0xff]  }
 0x143   :  { %1716 = vmatpush1.bf16.msra.mxu0 %v3229_v20  ;;  %1757 = vmatpush1.bf16.msra.mxu1 %v3232_v21  ;;  %v3315_v20 = vld [vmem:[#allocation11 + $0x4e4] ss:$16 sps:$4 sm:$0xff]   ;;  %v3318_v21 = vld [vmem:[#allocation11 + $0xec] ss:$16 sps:$4 sm:$0xff]  }
 0x144   :  { %1717 = vmatprep.subr.bf16.mxu0 %v3237_v23  ;;  %1758 = vmatprep.subr.bf16.mxu1 %v3240_v24  ;;  %v3316_v23 = vld [vmem:[#allocation11 + $0xe8] ss:$16 sps:$4 sm:$0xff]   ;;  %v3321_v24 = vld [vmem:[#allocation11 + $0x504] ss:$16 sps:$4 sm:$0xff]  }
 0x147   :  { %1718 = vmatpush1.bf16.msra.mxu0 %v3235_v28  ;;  %1759 = vmatpush1.bf16.msra.mxu1 %v3238_v29  ;;  %v3319_v28 = vld [vmem:[#allocation11 + $0x500] ss:$16 sps:$4 sm:$0xff]   ;;  %v3322_v29 = vld [vmem:[#allocation11 + $0x108] ss:$16 sps:$4 sm:$0xff]  }
 0x148   :  { %1719 = vmatprep.subr.bf16.mxu0 %v3243_v30  ;;  %1760 = vmatprep.subr.bf16.mxu1 %v3246_v31  ;;  %v3327_v30 = vld [vmem:[#allocation11 + $0x524] ss:$16 sps:$4 sm:$0xff]   ;;  %v3330_v31 = vld [vmem:[#allocation11 + $0x12c] ss:$16 sps:$4 sm:$0xff]  }
 0x14b   :  { %1720 = vmatpush1.bf16.msra.mxu0 %v3241_v32  ;;  %1761 = vmatpush1.bf16.msra.mxu1 %v3244_v33  ;;  %v3325_v32 = vld [vmem:[#allocation11 + $0x520] ss:$16 sps:$4 sm:$0xff]   ;;  %v3328_v33 = vld [vmem:[#allocation11 + $0x128] ss:$16 sps:$4 sm:$0xff]  }
 0x14c   :  { %1721 = vmatprep.subr.bf16.mxu0 %v3249_v34  ;;  %1762 = vmatprep.subr.bf16.mxu1 %v3252_v35  ;;  %v3333_v34 = vld [vmem:[#allocation11 + $0x544] ss:$16 sps:$4 sm:$0xff]   ;;  %v3336_v35 = vld [vmem:[#allocation11 + $0x14c] ss:$16 sps:$4 sm:$0xff]  }
 0x14f   :  { %1722 = vmatpush1.bf16.msra.mxu0 %v3247_v36  ;;  %1763 = vmatpush1.bf16.msra.mxu1 %v3250_v37  ;;  %v3331_v36 = vld [vmem:[#allocation11 + $0x540] ss:$16 sps:$4 sm:$0xff]   ;;  %v3334_v37 = vld [vmem:[#allocation11 + $0x148] ss:$16 sps:$4 sm:$0xff]  }
 0x150   :  { %1723 = vmatprep.subr.bf16.mxu0 %v3255_v38  ;;  %1764 = vmatprep.subr.bf16.mxu1 %v3258_v39  ;;  %v3339_v38 = vld [vmem:[#allocation11 + $0x564] ss:$16 sps:$4 sm:$0xff]   ;;  %v3342_v39 = vld [vmem:[#allocation11 + $0x16c] ss:$16 sps:$4 sm:$0xff]  }
 0x153   :  { %1724 = vmatpush1.bf16.msra.mxu0 %v3253_v40  ;;  %1765 = vmatpush1.bf16.msra.mxu1 %v3256_v41  ;;  %v3337_v40 = vld [vmem:[#allocation11 + $0x560] ss:$16 sps:$4 sm:$0xff]   ;;  %v3340_v41 = vld [vmem:[#allocation11 + $0x168] ss:$16 sps:$4 sm:$0xff]  }
 0x154   :  { %1725 = vmatprep.subr.bf16.mxu0 %v3261_v42  ;;  %1766 = vmatprep.subr.bf16.mxu1 %v3264_v43  ;;  %v3345_v42 = vld [vmem:[#allocation11 + $0x584] ss:$16 sps:$4 sm:$0xff]   ;;  %v3348_v43 = vld [vmem:[#allocation11 + $0x18c] ss:$16 sps:$4 sm:$0xff]  }
 0x157   :  { %1726 = vmatpush1.bf16.msra.mxu0 %v3259_v44  ;;  %1767 = vmatpush1.bf16.msra.mxu1 %v3262_v45  ;;  %v3343_v44 = vld [vmem:[#allocation11 + $0x580] ss:$16 sps:$4 sm:$0xff]   ;;  %v3346_v45 = vld [vmem:[#allocation11 + $0x188] ss:$16 sps:$4 sm:$0xff]  }
 0x158   :  { %1727 = vmatprep.subr.bf16.mxu0 %v3267_v46  ;;  %1768 = vmatprep.subr.bf16.mxu1 %v3270_v47  ;;  %v3351_v46 = vld [vmem:[#allocation11 + $0x5a4] ss:$16 sps:$4 sm:$0xff]   ;;  %v3354_v47 = vld [vmem:[#allocation11 + $0x1ac] ss:$16 sps:$4 sm:$0xff]  }
 0x15b   :  { %1728 = vmatpush1.bf16.msra.mxu0 %v3265_v49  ;;  %1769 = vmatpush1.bf16.msra.mxu1 %v3268_v50  ;;  %v3349_v49 = vld [vmem:[#allocation11 + $0x5a0] ss:$16 sps:$4 sm:$0xff]   ;;  %v3352_v50 = vld [vmem:[#allocation11 + $0x1a8] ss:$16 sps:$4 sm:$0xff]  }
 0x15c   :  { %1779 = vmatprep.subr.bf16.mxu0 %v3273_v51  ;;  %1820 = vmatprep.subr.bf16.mxu1 %v3276_v52  ;;  %v3357_v51 = vld [vmem:[#allocation11 + $0x5c4] ss:$16 sps:$4 sm:$0xff]   ;;  %v3360_v52 = vld [vmem:[#allocation11 + $0x1cc] ss:$16 sps:$4 sm:$0xff]  }
 0x15e   :  { %1730 = vmatmul.mubr.bf16.vlgmr.msra.gmra.mrb[4].mxu0 %v4332_v48  ;;  %1771 = vmatmul.mubr.bf16.vlgmr.msra.gmra.mrb[4].mxu1 %v4338_v54 }
 0x15f   :  { %1780 = vmatpush1.bf16.msra.mxu0 %v3271_v55  ;;  %1821 = vmatpush1.bf16.msra.mxu1 %v3274_v56  ;;  %v3358_v55 = vld [vmem:[#allocation11 + $0x1c8] ss:$16 sps:$4 sm:$0xff]   ;;  %v3363_v56 = vld [vmem:[#allocation11 + $0x5e4] ss:$16 sps:$4 sm:$0xff]  }
 0x160   :  { %1781 = vmatprep.subr.bf16.mxu0 %v3279_v57  ;;  %1822 = vmatprep.subr.bf16.mxu1 %v3282_v58  ;;  %v3366_v57 = vld [vmem:[#allocation11 + $0x1ec] ss:$16 sps:$4 sm:$0xff]   ;;  %v3361_v58 = vld [vmem:[#allocation11 + $0x5e0] ss:$16 sps:$4 sm:$0xff]  }
 0x161   :  { %1811 = vmatprep.mubr.bf16.mxu0 %v4341_v59  ;;  %1852 = vmatprep.mubr.bf16.mxu1 %v4319_v25  ;;  %v3324_v25 = vld [vmem:[#allocation11 + $0x10c] ss:$16 sps:$4 sm:$0xff]  }
 0x163   :  { %1782 = vmatpush1.bf16.msra.mxu0 %v3277_v60  ;;  %1823 = vmatpush1.bf16.msra.mxu1 %v3280_v61  ;;  %v3364_v60 = vld [vmem:[#allocation11 + $0x1e8] ss:$16 sps:$4 sm:$0xff]   ;;  %v3370_v61 = vld [vmem:[#allocation11 + $0x20c] ss:$16 sps:$4 sm:$0xff]  }
 0x164   :  { %1783 = vmatprep.subr.bf16.mxu0 %v3285_v62  ;;  %1824 = vmatprep.subr.bf16.mxu1 %v3288_v63  ;;  %v3373_v62 = vld [vmem:[#allocation11 + $0x40c] ss:$16 sps:$4 sm:$0xff]   ;;  %v3368_v63 = vld [vmem:[#allocation11 + $0x208] ss:$16 sps:$4 sm:$0xff]  }
 0x167   :  { %1784 = vmatpush1.bf16.msra.mxu0 %v3283_v1  ;;  %1825 = vmatpush1.bf16.msra.mxu1 %v3286_v2  ;;  %v3371_v1 = vld [vmem:[#allocation11 + $0x408] ss:$16 sps:$4 sm:$0xff]   ;;  %v3376_v2 = vld [vmem:[#allocation11 + $0x22c] ss:$16 sps:$4 sm:$0xff]  }
 0x168   :  { %1785 = vmatprep.subr.bf16.mxu0 %v3291_v3  ;;  %1826 = vmatprep.subr.bf16.mxu1 %v3294_v4  ;;  %v3379_v3 = vld [vmem:[#allocation11 + $0x42c] ss:$16 sps:$4 sm:$0xff]   ;;  %v3374_v4 = vld [vmem:[#allocation11 + $0x228] ss:$16 sps:$4 sm:$0xff]  }
 0x16b   :  { %1786 = vmatpush1.bf16.msra.mxu0 %v3289_v5  ;;  %1827 = vmatpush1.bf16.msra.mxu1 %v3292_v7  ;;  %v3377_v5 = vld [vmem:[#allocation11 + $0x428] ss:$16 sps:$4 sm:$0xff]   ;;  %v3382_v7 = vld [vmem:[#allocation11 + $0x24c] ss:$16 sps:$4 sm:$0xff]  }
 0x16c   :  { %1787 = vmatprep.subr.bf16.mxu0 %v3297_v8  ;;  %1828 = vmatprep.subr.bf16.mxu1 %v3300_v9  ;;  %v3385_v8 = vld [vmem:[#allocation11 + $0x44c] ss:$16 sps:$4 sm:$0xff]   ;;  %v3380_v9 = vld [vmem:[#allocation11 + $0x248] ss:$16 sps:$4 sm:$0xff]  }
 0x16f   :  { %1788 = vmatpush1.bf16.msra.mxu0 %v3295_v10  ;;  %1829 = vmatpush1.bf16.msra.mxu1 %v3298_v11  ;;  %v3383_v10 = vld [vmem:[#allocation11 + $0x448] ss:$16 sps:$4 sm:$0xff]   ;;  %v3388_v11 = vld [vmem:[#allocation11 + $0x26c] ss:$16 sps:$4 sm:$0xff]  }
 0x170   :  { %1789 = vmatprep.subr.bf16.mxu0 %v3303_v12  ;;  %1830 = vmatprep.subr.bf16.mxu1 %v3306_v13  ;;  %v3391_v12 = vld [vmem:[#allocation11 + $0x46c] ss:$16 sps:$4 sm:$0xff]   ;;  %v3386_v13 = vld [vmem:[#allocation11 + $0x268] ss:$16 sps:$4 sm:$0xff]  }
 0x173   :  { %1790 = vmatpush1.bf16.msra.mxu0 %v3301_v14  ;;  %1831 = vmatpush1.bf16.msra.mxu1 %v3304_v15  ;;  %v3394_v14 = vld [vmem:[#allocation11 + $0x28c] ss:$16 sps:$4 sm:$0xff]  }
 0x174   :  { %1791 = vmatprep.subr.bf16.mxu0 %v3309_v16  ;;  %1832 = vmatprep.subr.bf16.mxu1 %v3312_v17  ;;  %v3397_v15 = vld [vmem:[#allocation11 + $0x48c] ss:$16 sps:$4 sm:$0xff]   ;;  %v3392_v16 = vld [vmem:[#allocation11 + $0x288] ss:$16 sps:$4 sm:$0xff]  }
 0x175   :  { %v3403_v17 = vld [vmem:[#allocation11 + $0x4ac] ss:$16 sps:$4 sm:$0xff]  }
 0x177   :  { %1792 = vmatpush1.bf16.msra.mxu0 %v3307_v18  ;;  %1833 = vmatpush1.bf16.msra.mxu1 %v3310_v19  ;;  %v3398_v18 = vld [vmem:[#allocation11 + $0x2a8] ss:$16 sps:$4 sm:$0xff]  }
 0x178   :  { %1793 = vmatprep.subr.bf16.mxu0 %v3315_v20  ;;  %1834 = vmatprep.subr.bf16.mxu1 %v3318_v21  ;;  %v3401_v19 = vld [vmem:[#allocation11 + $0x4a8] ss:$16 sps:$4 sm:$0xff]   ;;  %v3406_v20 = vld [vmem:[#allocation11 + $0x2cc] ss:$16 sps:$4 sm:$0xff]  }
 0x179   :  { %v3409_v21 = vld [vmem:[#allocation11 + $0x4cc] ss:$16 sps:$4 sm:$0xff]  }
 0x17b   :  { %1794 = vmatpush1.bf16.msra.mxu0 %v3313_v22  ;;  %1835 = vmatpush1.bf16.msra.mxu1 %v3316_v23  ;;  %v3404_v22 = vld [vmem:[#allocation11 + $0x2c8] ss:$16 sps:$4 sm:$0xff]  }
 0x17c   :  { %1795 = vmatprep.subr.bf16.mxu0 %v3321_v24  ;;  %1836 = vmatprep.subr.bf16.mxu1 %v3324_v25  ;;  %v3407_v23 = vld [vmem:[#allocation11 + $0x4c8] ss:$16 sps:$4 sm:$0xff]   ;;  %v3412_v24 = vld [vmem:[#allocation11 + $0x2ec] ss:$16 sps:$4 sm:$0xff]  }
 0x17d   :  { %v3415_v25 = vld [vmem:[#allocation11 + $0x4ec] ss:$16 sps:$4 sm:$0xff]  }
 0x17f   :  { %1796 = vmatpush1.bf16.msra.mxu0 %v3319_v28  ;;  %1837 = vmatpush1.bf16.msra.mxu1 %v3322_v29  ;;  %v3410_v28 = vld [vmem:[#allocation11 + $0x2e8] ss:$16 sps:$4 sm:$0xff]  }
 0x180   :  { %1797 = vmatprep.subr.bf16.mxu0 %v3327_v30  ;;  %1838 = vmatprep.subr.bf16.mxu1 %v3330_v31  ;;  %v3413_v29 = vld [vmem:[#allocation11 + $0x4e8] ss:$16 sps:$4 sm:$0xff]   ;;  %v3418_v30 = vld [vmem:[#allocation11 + $0x30c] ss:$16 sps:$4 sm:$0xff]  }
 0x181   :  { %v3421_v31 = vld [vmem:[#allocation11 + $0x50c] ss:$16 sps:$4 sm:$0xff]  }
 0x183   :  { %1798 = vmatpush1.bf16.msra.mxu0 %v3325_v32  ;;  %1839 = vmatpush1.bf16.msra.mxu1 %v3328_v33  ;;  %v3416_v32 = vld [vmem:[#allocation11 + $0x308] ss:$16 sps:$4 sm:$0xff]  }
 0x184   :  { %1799 = vmatprep.subr.bf16.mxu0 %v3333_v34  ;;  %1840 = vmatprep.subr.bf16.mxu1 %v3336_v35  ;;  %v3419_v33 = vld [vmem:[#allocation11 + $0x508] ss:$16 sps:$4 sm:$0xff]   ;;  %v3424_v34 = vld [vmem:[#allocation11 + $0x32c] ss:$16 sps:$4 sm:$0xff]  }
 0x185   :  { %v3427_v35 = vld [vmem:[#allocation11 + $0x52c] ss:$16 sps:$4 sm:$0xff]  }
 0x187   :  { %1800 = vmatpush1.bf16.msra.mxu0 %v3331_v36  ;;  %1841 = vmatpush1.bf16.msra.mxu1 %v3334_v37  ;;  %v3422_v36 = vld [vmem:[#allocation11 + $0x328] ss:$16 sps:$4 sm:$0xff]  }
 0x188   :  { %1801 = vmatprep.subr.bf16.mxu0 %v3339_v38  ;;  %1842 = vmatprep.subr.bf16.mxu1 %v3342_v39  ;;  %v3425_v37 = vld [vmem:[#allocation11 + $0x528] ss:$16 sps:$4 sm:$0xff]   ;;  %v3430_v38 = vld [vmem:[#allocation11 + $0x34c] ss:$16 sps:$4 sm:$0xff]  }
 0x189   :  { %v3433_v39 = vld [vmem:[#allocation11 + $0x54c] ss:$16 sps:$4 sm:$0xff]  }
 0x18b   :  { %1802 = vmatpush1.bf16.msra.mxu0 %v3337_v40  ;;  %1843 = vmatpush1.bf16.msra.mxu1 %v3340_v41  ;;  %v3428_v40 = vld [vmem:[#allocation11 + $0x348] ss:$16 sps:$4 sm:$0xff]  }
 0x18c   :  { %1803 = vmatprep.subr.bf16.mxu0 %v3345_v42  ;;  %1844 = vmatprep.subr.bf16.mxu1 %v3348_v43  ;;  %v3431_v41 = vld [vmem:[#allocation11 + $0x548] ss:$16 sps:$4 sm:$0xff]   ;;  %v3436_v42 = vld [vmem:[#allocation11 + $0x36c] ss:$16 sps:$4 sm:$0xff]  }
 0x18d   :  { %v3439_v43 = vld [vmem:[#allocation11 + $0x56c] ss:$16 sps:$4 sm:$0xff]  }
 0x18f   :  { %1804 = vmatpush1.bf16.msra.mxu0 %v3343_v44  ;;  %1845 = vmatpush1.bf16.msra.mxu1 %v3346_v45  ;;  %v3434_v44 = vld [vmem:[#allocation11 + $0x368] ss:$16 sps:$4 sm:$0xff]  }
 0x190   :  { %1805 = vmatprep.subr.bf16.mxu0 %v3351_v46  ;;  %1846 = vmatprep.subr.bf16.mxu1 %v3354_v47  ;;  %v3437_v45 = vld [vmem:[#allocation11 + $0x568] ss:$16 sps:$4 sm:$0xff]   ;;  %v3442_v46 = vld [vmem:[#allocation11 + $0x38c] ss:$16 sps:$4 sm:$0xff]  }
 0x191   :  { %v3445_v47 = vld [vmem:[#allocation11 + $0x58c] ss:$16 sps:$4 sm:$0xff]  }
 0x193   :  { %1806 = vmatpush1.bf16.msra.mxu0 %v3349_v49  ;;  %1847 = vmatpush1.bf16.msra.mxu1 %v3352_v50  ;;  %v3440_v49 = vld [vmem:[#allocation11 + $0x388] ss:$16 sps:$4 sm:$0xff]  }
 0x194   :  { %1807 = vmatprep.subr.bf16.mxu0 %v3357_v51  ;;  %1848 = vmatprep.subr.bf16.mxu1 %v3360_v52  ;;  %v3443_v50 = vld [vmem:[#allocation11 + $0x588] ss:$16 sps:$4 sm:$0xff]   ;;  %v3448_v51 = vld [vmem:[#allocation11 + $0x3ac] ss:$16 sps:$4 sm:$0xff]  }
 0x195   :  { %v3451_v52 = vld [vmem:[#allocation11 + $0x5ac] ss:$16 sps:$4 sm:$0xff]  }
 0x197   :  { %1808 = vmatpush1.bf16.msra.mxu0 %v3355_v53  ;;  %1849 = vmatpush1.bf16.msra.mxu1 %v3358_v55  ;;  %v3446_v53 = vld [vmem:[#allocation11 + $0x3a8] ss:$16 sps:$4 sm:$0xff]  }
 0x198   :  { %1809 = vmatprep.subr.bf16.mxu0 %v3363_v56  ;;  %1850 = vmatprep.subr.bf16.mxu1 %v3366_v57  ;;  %v3449_v55 = vld [vmem:[#allocation11 + $0x5a8] ss:$16 sps:$4 sm:$0xff]   ;;  %v3454_v56 = vld [vmem:[#allocation11 + $0x3cc] ss:$16 sps:$4 sm:$0xff]  }
 0x199   :  { %v3457_v57 = vld [vmem:[#allocation11 + $0x5cc] ss:$16 sps:$4 sm:$0xff]  }
 0x19b   :  { %1810 = vmatpush1.bf16.msra.mxu0 %v3361_v58  ;;  %1851 = vmatpush1.bf16.msra.mxu1 %v3364_v60  ;;  %v3452_v58 = vld [vmem:[#allocation11 + $0x3c8] ss:$16 sps:$4 sm:$0xff]  }
 0x19c   :  { %1861 = vmatprep.subr.bf16.mxu0 %v3370_v61  ;;  %1902 = vmatprep.subr.bf16.mxu1 %v3373_v62  ;;  %v3455_v60 = vld [vmem:[#allocation11 + $0x5c8] ss:$16 sps:$4 sm:$0xff]   ;;  %v3460_v61 = vld [vmem:[#allocation11 + $0x3ec] ss:$16 sps:$4 sm:$0xff]  }
 0x19d   :  { %v3463_v62 = vld [vmem:[#allocation11 + $0x5ec] ss:$16 sps:$4 sm:$0xff]  }
 0x19e   :  { %1812 = vmatmul.mubr.bf16.vlgmr.msra.gmra.mrb[8].mxu0 %v4323_v26  ;;  %1853 = vmatmul.mubr.bf16.vlgmr.msra.gmra.mrb[8].mxu1 %v4332_v48  ;;  %v3389_v48 = vld [vmem:[#allocation11 + $0x468] ss:$16 sps:$4 sm:$0xff]  }
 0x19f   :  { %1862 = vmatpush1.bf16.msra.mxu0 %v3368_v63  ;;  %1903 = vmatpush1.bf16.msra.mxu1 %v3371_v1  ;;  %v3458_v63 = vld [vmem:[#allocation11 + $0x3e8] ss:$16 sps:$4 sm:$0xff]  }
 0x1a0   :  { %1863 = vmatprep.subr.bf16.mxu0 %v3376_v2  ;;  %1904 = vmatprep.subr.bf16.mxu1 %v3379_v3  ;;  %v3461_v1 = vld [vmem:[#allocation11 + $0x5e8] ss:$16 sps:$4 sm:$0xff]  }
 0x1a1   :  { %1893 = vmatprep.mubr.bf16.mxu0 %v4328_v27  ;;  %1934 = vmatprep.mubr.bf16.mxu1 %v4341_v59  ;;  %v3395_v27 = vld [vmem:[#allocation11 + $0x488] ss:$16 sps:$4 sm:$0xff]   ;;  %v3400_v59 = vld [vmem:[#allocation11 + $0x2ac] ss:$16 sps:$4 sm:$0xff]  }
 0x1a3   :  { %1864 = vmatpush1.bf16.msra.mxu0 %v3374_v4  ;;  %1905 = vmatpush1.bf16.msra.mxu1 %v3377_v5 }
 0x1a4   :  { %1865 = vmatprep.subr.bf16.mxu0 %v3382_v7  ;;  %1906 = vmatprep.subr.bf16.mxu1 %v3385_v8 }
 0x1a7   :  { %1866 = vmatpush1.bf16.msra.mxu0 %v3380_v9  ;;  %1907 = vmatpush1.bf16.msra.mxu1 %v3383_v10 }
 0x1a8   :  { %1867 = vmatprep.subr.bf16.mxu0 %v3388_v11  ;;  %1908 = vmatprep.subr.bf16.mxu1 %v3391_v12  ;;  %v3464_v11 = vld [vmem:[#allocation17] ss:$16 sps:$4 sm:$0xff]   ;;  %v3467_v12 = vld [vmem:[#allocation17 + $0x8] ss:$16 sps:$4 sm:$0xff]  }
 0x1ab   :  { %1868 = vmatpush1.bf16.msra.mxu0 %v3386_v13  ;;  %1909 = vmatpush1.bf16.msra.mxu1 %v3389_v48  ;;  %v3472_v13 = vld [vmem:[#allocation17 + $0x24] ss:$16 sps:$4 sm:$0xff]   ;;  %v3475_v48 = vld [vmem:[#allocation17 + $0x2c] ss:$16 sps:$4 sm:$0xff]  }
 0x1ac   :  { %1869 = vmatprep.subr.bf16.mxu0 %v3394_v14  ;;  %1910 = vmatprep.subr.bf16.mxu1 %v3397_v15  ;;  %v3470_v14 = vld [vmem:[#allocation17 + $0x20] ss:$16 sps:$4 sm:$0xff]   ;;  %v3473_v15 = vld [vmem:[#allocation17 + $0x28] ss:$16 sps:$4 sm:$0xff]  }
 0x1af   :  { %1870 = vmatpush1.bf16.msra.mxu0 %v3392_v16  ;;  %1911 = vmatpush1.bf16.msra.mxu1 %v3395_v27  ;;  %v3478_v16 = vld [vmem:[#allocation17 + $0x44] ss:$16 sps:$4 sm:$0xff]   ;;  %v3481_v27 = vld [vmem:[#allocation17 + $0x4c] ss:$16 sps:$4 sm:$0xff]  }
 0x1b0   :  { %1871 = vmatprep.subr.bf16.mxu0 %v3400_v59  ;;  %1912 = vmatprep.subr.bf16.mxu1 %v3403_v17  ;;  %v3476_v59 = vld [vmem:[#allocation17 + $0x40] ss:$16 sps:$4 sm:$0xff]   ;;  %v3479_v17 = vld [vmem:[#allocation17 + $0x48] ss:$16 sps:$4 sm:$0xff]  }
 0x1b3   :  { %1872 = vmatpush1.bf16.msra.mxu0 %v3398_v18  ;;  %1913 = vmatpush1.bf16.msra.mxu1 %v3401_v19  ;;  %v3484_v18 = vld [vmem:[#allocation17 + $0x64] ss:$16 sps:$4 sm:$0xff]   ;;  %v3487_v19 = vld [vmem:[#allocation17 + $0x6c] ss:$16 sps:$4 sm:$0xff]  }
 0x1b4   :  { %1873 = vmatprep.subr.bf16.mxu0 %v3406_v20  ;;  %1914 = vmatprep.subr.bf16.mxu1 %v3409_v21  ;;  %v3482_v20 = vld [vmem:[#allocation17 + $0x60] ss:$16 sps:$4 sm:$0xff]   ;;  %v3485_v21 = vld [vmem:[#allocation17 + $0x68] ss:$16 sps:$4 sm:$0xff]  }
 0x1b7   :  { %1874 = vmatpush1.bf16.msra.mxu0 %v3404_v22  ;;  %1915 = vmatpush1.bf16.msra.mxu1 %v3407_v23  ;;  %v3490_v22 = vld [vmem:[#allocation17 + $0x84] ss:$16 sps:$4 sm:$0xff]   ;;  %v3493_v23 = vld [vmem:[#allocation17 + $0x8c] ss:$16 sps:$4 sm:$0xff]  }
 0x1b8   :  { %1875 = vmatprep.subr.bf16.mxu0 %v3412_v24  ;;  %1916 = vmatprep.subr.bf16.mxu1 %v3415_v25  ;;  %v3488_v24 = vld [vmem:[#allocation17 + $0x80] ss:$16 sps:$4 sm:$0xff]   ;;  %v3491_v25 = vld [vmem:[#allocation17 + $0x88] ss:$16 sps:$4 sm:$0xff]  }
 0x1bb   :  { %1876 = vmatpush1.bf16.msra.mxu0 %v3410_v28  ;;  %1917 = vmatpush1.bf16.msra.mxu1 %v3413_v29  ;;  %v3496_v28 = vld [vmem:[#allocation17 + $0xa4] ss:$16 sps:$4 sm:$0xff]   ;;  %v3499_v29 = vld [vmem:[#allocation17 + $0xac] ss:$16 sps:$4 sm:$0xff]  }
 0x1bc   :  { %1877 = vmatprep.subr.bf16.mxu0 %v3418_v30  ;;  %1918 = vmatprep.subr.bf16.mxu1 %v3421_v31  ;;  %v3494_v30 = vld [vmem:[#allocation17 + $0xa0] ss:$16 sps:$4 sm:$0xff]   ;;  %v3497_v31 = vld [vmem:[#allocation17 + $0xa8] ss:$16 sps:$4 sm:$0xff]  }
 0x1bf   :  { %1878 = vmatpush1.bf16.msra.mxu0 %v3416_v32  ;;  %1919 = vmatpush1.bf16.msra.mxu1 %v3419_v33  ;;  %v3502_v32 = vld [vmem:[#allocation17 + $0xc4] ss:$16 sps:$4 sm:$0xff]   ;;  %v3500_v33 = vld [vmem:[#allocation17 + $0xc0] ss:$16 sps:$4 sm:$0xff]  }
 0x1c0   :  { %1879 = vmatprep.subr.bf16.mxu0 %v3424_v34  ;;  %1920 = vmatprep.subr.bf16.mxu1 %v3427_v35  ;;  %v3505_v34 = vld [vmem:[#allocation17 + $0xcc] ss:$16 sps:$4 sm:$0xff]   ;;  %v3503_v35 = vld [vmem:[#allocation17 + $0xc8] ss:$16 sps:$4 sm:$0xff]  }
 0x1c3   :  { %1880 = vmatpush1.bf16.msra.mxu0 %v3422_v36  ;;  %1921 = vmatpush1.bf16.msra.mxu1 %v3425_v37 }
 0x1c4   :  { %1881 = vmatprep.subr.bf16.mxu0 %v3430_v38  ;;  %1922 = vmatprep.subr.bf16.mxu1 %v3433_v39  ;;  %v3508_v38 = vld [vmem:[#allocation17 + $0xe4] ss:$16 sps:$4 sm:$0xff]  }
 0x1c7   :  { %1882 = vmatpush1.bf16.msra.mxu0 %v3428_v40  ;;  %1923 = vmatpush1.bf16.msra.mxu1 %v3431_v41 }
 0x1c8   :  { %1883 = vmatprep.subr.bf16.mxu0 %v3436_v42  ;;  %1924 = vmatprep.subr.bf16.mxu1 %v3439_v43  ;;  %v3506_v42 = vld [vmem:[#allocation17 + $0xe0] ss:$16 sps:$4 sm:$0xff]  }
 0x1cb   :  { %1884 = vmatpush1.bf16.msra.mxu0 %v3434_v44  ;;  %1925 = vmatpush1.bf16.msra.mxu1 %v3437_v45 }
 0x1cc   :  { %1885 = vmatprep.subr.bf16.mxu0 %v3442_v46  ;;  %1926 = vmatprep.subr.bf16.mxu1 %v3445_v47  ;;  %v3511_v46 = vld [vmem:[#allocation17 + $0xec] ss:$16 sps:$4 sm:$0xff]  }
 0x1cf   :  { %1886 = vmatpush1.bf16.msra.mxu0 %v3440_v49  ;;  %1927 = vmatpush1.bf16.msra.mxu1 %v3443_v50 }
 0x1d0   :  { %1887 = vmatprep.subr.bf16.mxu0 %v3448_v51  ;;  %1928 = vmatprep.subr.bf16.mxu1 %v3451_v52  ;;  %v3509_v51 = vld [vmem:[#allocation17 + $0xe8] ss:$16 sps:$4 sm:$0xff]  }
 0x1d1   :  { %v1991_v52 = vld [vmem:[#allocation8] sm:$0x1] }
 0x1d3   :  { %1888 = vmatpush1.bf16.msra.mxu0 %v3446_v53  ;;  %1929 = vmatpush1.bf16.msra.mxu1 %v3449_v55  ;;  %v2025_v55 = vpack.c.bf16 %v1991_v52, %v1991_v52 }
 0x1d4   :  { %1889 = vmatprep.subr.bf16.mxu0 %v3454_v56  ;;  %1930 = vmatprep.subr.bf16.mxu1 %v3457_v57  ;;  %v3514_v56 = vld [vmem:[#allocation16 + $0x4] ss:$16 sps:$4 sm:$0xff]   ;;  %v3517_v57 = vld [vmem:[#allocation16 + $0xc] ss:$16 sps:$4 sm:$0xff]  }
 0x1d7   :  { %1890 = vmatpush1.bf16.msra.mxu0 %v3452_v58  ;;  %1931 = vmatpush1.bf16.msra.mxu1 %v3455_v60  ;;  %v3512_v58 = vld [vmem:[#allocation16] ss:$16 sps:$4 sm:$0xff]   ;;  %v3515_v60 = vld [vmem:[#allocation16 + $0x8] ss:$16 sps:$4 sm:$0xff]  }
 0x1d8   :  { %1891 = vmatprep.subr.bf16.mxu0 %v3460_v61  ;;  %1932 = vmatprep.subr.bf16.mxu1 %v3463_v62  ;;  %v3520_v61 = vld [vmem:[#allocation16 + $0x24] ss:$16 sps:$4 sm:$0xff]   ;;  %v3523_v62 = vld [vmem:[#allocation16 + $0x2c] ss:$16 sps:$4 sm:$0xff]  }
 0x1db   :  { %1892 = vmatpush1.bf16.msra.mxu0 %v3458_v63  ;;  %1933 = vmatpush1.bf16.msra.mxu1 %v3461_v1  ;;  %v3518_v63 = vld [vmem:[#allocation16 + $0x20] ss:$16 sps:$4 sm:$0xff]   ;;  %v3521_v1 = vld [vmem:[#allocation16 + $0x28] ss:$16 sps:$4 sm:$0xff]  }
 0x1de   :  { %1894 = vmatmul.mubr.bf16.vlgmr.msra.gmra.mrb[12].mxu0 %v4338_v54  ;;  %1935 = vmatmul.mubr.bf16.vlgmr.msra.gmra.mrb[12].mxu1 %v4323_v26  ;;  %v3466_v54 = vld [vmem:[#allocation17 + $0x4] ss:$16 sps:$4 sm:$0xff]   ;;  %v3469_v26 = vld [vmem:[#allocation17 + $0xc] ss:$16 sps:$4 sm:$0xff]  }
 0x1df   :  { %2250 = vmatprep.mubr.bf16.mxu0 %v4033_v0  ;;  %2291 = vmatprep.mubr.bf16.mxu1 %v4033_v0 }
 0x1e0   :  { %2218 = vmatprep.subr.bf16.mxu0 %v3466_v54  ;;  %2259 = vmatprep.subr.bf16.mxu1 %v3469_v26  ;;  %v3533_v54 = vld [vmem:[#allocation16 + $0x68] ss:$16 sps:$4 sm:$0xff]   ;;  %v3536_v26 = vld [vmem:[#allocation16 + $0x80] ss:$16 sps:$4 sm:$0xff]  }
 0x1e1   :  { %2219 = vmatpush1.bf16.msra.mxu0 %v3464_v11  ;;  %2260 = vmatpush1.bf16.msra.mxu1 %v3467_v12  ;;  %v3530_v11 = vld [vmem:[#allocation16 + $0x60] ss:$16 sps:$4 sm:$0xff]   ;;  %v3541_v12 = vld [vmem:[#allocation16 + $0x8c] ss:$16 sps:$4 sm:$0xff]  }
 0x1e2   :  { %2220 = vmatprep.subr.bf16.mxu0 %v3472_v13  ;;  %2261 = vmatprep.subr.bf16.mxu1 %v3475_v48  ;;  %v3539_v13 = vld [vmem:[#allocation16 + $0x88] ss:$16 sps:$4 sm:$0xff]   ;;  %v3542_v48 = vld [vmem:[#allocation16 + $0xa0] ss:$16 sps:$4 sm:$0xff]  }
 0x1e5   :  { %2221 = vmatpush1.bf16.msra.mxu0 %v3470_v14  ;;  %2262 = vmatpush1.bf16.msra.mxu1 %v3473_v15  ;;  %v3544_v14 = vld [vmem:[#allocation16 + $0xa4] ss:$16 sps:$4 sm:$0xff]   ;;  %v3545_v15 = vld [vmem:[#allocation16 + $0xa8] ss:$16 sps:$4 sm:$0xff]  }
 0x1e6   :  { %2222 = vmatprep.subr.bf16.mxu0 %v3478_v16  ;;  %2263 = vmatprep.subr.bf16.mxu1 %v3481_v27  ;;  %v3547_v16 = vld [vmem:[#allocation16 + $0xac] ss:$16 sps:$4 sm:$0xff]   ;;  %v3550_v27 = vld [vmem:[#allocation16 + $0xc4] ss:$16 sps:$4 sm:$0xff]  }
 0x1e9   :  { %2223 = vmatpush1.bf16.msra.mxu0 %v3476_v59  ;;  %2264 = vmatpush1.bf16.msra.mxu1 %v3479_v17  ;;  %v3553_v59 = vld [vmem:[#allocation16 + $0xcc] ss:$16 sps:$4 sm:$0xff]   ;;  %v3548_v17 = vld [vmem:[#allocation16 + $0xc0] ss:$16 sps:$4 sm:$0xff]  }
 0x1ea   :  { %2224 = vmatprep.subr.bf16.mxu0 %v3484_v18  ;;  %2265 = vmatprep.subr.bf16.mxu1 %v3487_v19  ;;  %v3551_v18 = vld [vmem:[#allocation16 + $0xc8] ss:$16 sps:$4 sm:$0xff]   ;;  %v3556_v19 = vld [vmem:[#allocation16 + $0xe4] ss:$16 sps:$4 sm:$0xff]  }
 0x1ed   :  { %2225 = vmatpush1.bf16.msra.mxu0 %v3482_v20  ;;  %2266 = vmatpush1.bf16.msra.mxu1 %v3485_v21  ;;  %v3559_v20 = vld [vmem:[#allocation16 + $0xec] ss:$16 sps:$4 sm:$0xff]   ;;  %v3554_v21 = vld [vmem:[#allocation16 + $0xe0] ss:$16 sps:$4 sm:$0xff]  }
 0x1ee   :  { %2226 = vmatprep.subr.bf16.mxu0 %v3490_v22  ;;  %2267 = vmatprep.subr.bf16.mxu1 %v3493_v23  ;;  %v3557_v22 = vld [vmem:[#allocation16 + $0xe8] ss:$16 sps:$4 sm:$0xff]  }
 0x1f1   :  { %v4355_v2 = vpop.f32.mrb[0].mxu0  ;;  %v4357_v3 = vpop.f32.mrb[0].mxu1  ;;  %2227 = vmatpush1.bf16.msra.mxu0 %v3488_v24  ;;  %2268 = vmatpush1.bf16.msra.mxu1 %v3491_v25 }
 0x1f2   :  { %v4359_v4 = vpop.f32.mrb[1].mxu0  ;;  %v4361_v5 = vpop.f32.mrb[1].mxu1  ;;  %2228 = vmatprep.subr.bf16.mxu0 %v3496_v28  ;;  %2269 = vmatprep.subr.bf16.mxu1 %v3499_v29 }
 0x1f3   :  { %v639_v7 = vpop.f32.mrb[2].mxu0  ;;  %v680_v8 = vpop.f32.mrb[2].mxu1 }
 0x1f4   :  { %v640_v9 = vpop.f32.mrb[3].mxu0  ;;  %v681_v10 = vpop.f32.mrb[3].mxu1  ;;  %v3524_v7 = vld [vmem:[#allocation16 + $0x40] ss:$16 sps:$4 sm:$0xff]   ;;  %v3527_v8 = vld [vmem:[#allocation16 + $0x48] ss:$16 sps:$4 sm:$0xff]  }
 0x1f5   :  { %2229 = vmatpush1.bf16.msra.mxu0 %v3494_v30  ;;  %2270 = vmatpush1.bf16.msra.mxu1 %v3497_v31  ;;  %v3532_v9 = vld [vmem:[#allocation16 + $0x64] ss:$16 sps:$4 sm:$0xff]   ;;  %v3535_v10 = vld [vmem:[#allocation16 + $0x6c] ss:$16 sps:$4 sm:$0xff]  }
 0x1f6   :  { %2230 = vmatprep.subr.bf16.mxu0 %v3502_v32  ;;  %2271 = vmatprep.subr.bf16.mxu1 %v3505_v34 }
 0x1f9   :  { %2231 = vmatpush1.bf16.msra.mxu0 %v3500_v33  ;;  %2272 = vmatpush1.bf16.msra.mxu1 %v3503_v35 }
 0x1fa   :  { %2232 = vmatprep.subr.bf16.mxu0 %v3508_v38  ;;  %2273 = vmatprep.subr.bf16.mxu1 %v3511_v46  ;;  %v1943_v38 = vld [vmem:[#allocation14] sm:$0xf]  ;;  %v1955_v46 = vsub.s32 2, %v4309_v6 }
 0x1fd   :  { %2233 = vmatpush1.bf16.msra.mxu0 %v3506_v42  ;;  %2274 = vmatpush1.bf16.msra.mxu1 %v3509_v51 }
 0x1fe   :  { %2460 = vmatprep.subr.bf16.mxu0 %v3514_v56  ;;  %2501 = vmatprep.subr.bf16.mxu1 %v3517_v57  ;;  %v1956_v56 = vrot.slane %v1943_v38, %v1955_v46 }
 0x200   :  { %2251 = vmatmul.mubr.bf16.vlgmr.msra.gmra.mrb[16].mxu0 %v2025_v55  ;;  %2292 = vmatmul.mubr.bf16.vlgmr.msra.gmra.mrb[16].mxu1 %v2025_v55 }
 0x201   :  { %2492 = vmatprep.mubr.bf16.mxu0 %v4033_v0  ;;  %2461 = vmatpush1.bf16.msra.mxu0 %v3512_v58 }
 0x202   :  { %2502 = vmatpush1.bf16.msra.mxu1 %v3515_v60  ;;  %2533 = vmatprep.mubr.bf16.mxu1 %v4033_v0  ;;  %v3538_v0 = vld [vmem:[#allocation16 + $0x84] ss:$16 sps:$4 sm:$0xff]  }
 0x203   :  { %2462 = vmatprep.subr.bf16.mxu0 %v3520_v61  ;;  %2503 = vmatprep.subr.bf16.mxu1 %v3523_v62 }
 0x205   :  { %2463 = vmatpush1.bf16.msra.mxu0 %v3518_v63 }
 0x206   :  { %2504 = vmatpush1.bf16.msra.mxu1 %v3521_v1 }
 0x231   :  { %v1731_v36 = vpop.f32.mrb[4].mxu0  ;;  %v1772_v37 = vpop.f32.mrb[4].mxu1 }
 0x232   :  { %v1732_v39 = vadd.f32 %v1731_v36, %v4355_v2  ;;  %v1733_v40 = vpop.f32.mrb[5].mxu0  ;;  %v1774_v41 = vpop.f32.mrb[5].mxu1  ;;  %v3526_v2 = vld [vmem:[#allocation16 + $0x44] ss:$16 sps:$4 sm:$0xff]  }
 0x233   :  { %v1734_v43 = vadd.f32 %v1733_v40, %v4359_v4  ;;  %v1735_v44 = vpop.f32.mrb[6].mxu0  ;;  %v1776_v45 = vpop.f32.mrb[6].mxu1  ;;  %v3529_v4 = vld [vmem:[#allocation16 + $0x4c] ss:$16 sps:$4 sm:$0xff]   ;;  %2464 = vmatprep.subr.bf16.mxu0 %v3526_v2 }
 0x234   :  { %v4365_v47 = vadd.f32 %v1772_v37, %v1732_v39  ;;  %v1736_v49 = vpop.f32.mrb[7].mxu0  ;;  %v1777_v50 = vpop.f32.mrb[7].mxu1  ;;  %2505 = vmatprep.subr.bf16.mxu1 %v3529_v4  ;;  %2465 = vmatpush1.bf16.msra.mxu0 %v3524_v7  ;;  %v1951_v37 = vsub.s32 1, %v4309_v6  ;;  %v1947_v39 = vsub.s32 0, %v4309_v6 }
 0x235   :  { %v4367_v53 = vadd.f32 %v1774_v41, %v1734_v43  ;;  %2506 = vmatpush1.bf16.msra.mxu1 %v3527_v8  ;;  %2466 = vmatprep.subr.bf16.mxu0 %v3532_v9  ;;  %v1959_v49 = vsub.s32 3, %v4309_v6 }
 0x236   :  { %2507 = vmatprep.subr.bf16.mxu1 %v3535_v10  ;;  %v1952_v40 = vrot.slane %v1943_v38, %v1951_v37 }
 0x237   :  { %v1960_v62 = vrot.slane %v1943_v38, %v1959_v49 }
 0x238   :  { %2467 = vmatpush1.bf16.msra.mxu0 %v3530_v11 }
 0x239   :  { %2508 = vmatpush1.bf16.msra.mxu1 %v3533_v54  ;;  %2468 = vmatprep.subr.bf16.mxu0 %v3538_v0 }
 0x23a   :  { %2509 = vmatprep.subr.bf16.mxu1 %v3541_v12  ;;  %v215_v12 = vld [vmem:[#allocation7] sm:$0x1] }
 0x23c   :  { %2469 = vmatpush1.bf16.msra.mxu0 %v3536_v26 }
 0x23d   :  { %2510 = vmatpush1.bf16.msra.mxu1 %v3539_v13  ;;  %2470 = vmatprep.subr.bf16.mxu0 %v3544_v14 }
 0x23e   :  { %2511 = vmatprep.subr.bf16.mxu1 %v3547_v16 }
 0x240   :  { %2471 = vmatpush1.bf16.msra.mxu0 %v3542_v48 }
 0x241   :  { %2512 = vmatpush1.bf16.msra.mxu1 %v3545_v15  ;;  %2472 = vmatprep.subr.bf16.mxu0 %v3550_v27 }
 0x242   :  { %2513 = vmatprep.subr.bf16.mxu1 %v3553_v59 }
 0x244   :  { %2473 = vmatpush1.bf16.msra.mxu0 %v3548_v17 }
 0x245   :  { %2514 = vmatpush1.bf16.msra.mxu1 %v3551_v18  ;;  %2474 = vmatprep.subr.bf16.mxu0 %v3556_v19 }
 0x246   :  { %2515 = vmatprep.subr.bf16.mxu1 %v3559_v20 }
 0x248   :  { %2475 = vmatpush1.bf16.msra.mxu0 %v3554_v21 }
 0x249   :  { %2516 = vmatpush1.bf16.msra.mxu1 %v3557_v22 }
 0x271   :  { %v1813_v23 = vpop.f32.mrb[8].mxu0  ;;  %v1854_v24 = vpop.f32.mrb[8].mxu1 }
 0x272   :  { %v1814_v25 = vadd.f32 %v1813_v23, %v4365_v47  ;;  %v1855_v28 = vadd.f32 %v1854_v24, %v4357_v3  ;;  %v1815_v29 = vpop.f32.mrb[9].mxu0  ;;  %v1856_v30 = vpop.f32.mrb[9].mxu1  ;;  %v1948_v3 = vrot.slane %v1943_v38, %v1947_v39  ;;  %v3566_v38 = vld [vmem:[#allocation20 + $0x30] sm:$0xff]  }
 0x273   :  { %v1816_v31 = vadd.f32 %v1815_v29, %v4367_v53  ;;  %v1857_v32 = vadd.f32 %v1856_v30, %v4361_v5  ;;  %v1817_v33 = vpop.f32.mrb[10].mxu0  ;;  %v1858_v34 = vpop.f32.mrb[10].mxu1  ;;  %v3560_v30 = vld [vmem:[#allocation20] sm:$0xff]  }
 0x274   :  { %v1818_v35 = vpop.f32.mrb[11].mxu0  ;;  %v1859_v36 = vpop.f32.mrb[11].mxu1  ;;  %v1965_v42 = vadd.f32 %v1948_v3, %v1814_v25  ;;  %v3562_v33 = vld [vmem:[#allocation20 + $0x10] sm:$0xff]   ;;  %v3563_v34 = vld [vmem:[#allocation20 + $0x18] sm:$0xff]  }
 0x275   :  { %v1966_v41 = vadd.f32 %v1952_v40, %v1816_v31  ;;  %v4035_v31 = vmov 0.0   ;;  %v3564_v35 = vld [vmem:[#allocation20 + $0x20] sm:$0xff]   ;;  %v3565_v36 = vld [vmem:[#allocation20 + $0x28] sm:$0xff]   ;;  %v3567_v40 = vld [vmem:[#allocation20 + $0x38] sm:$0xff]  }
 0x276   :  { %v1969_v44 = vsub.f32 0.0, %v1965_v42  ;;  %3081 = vmatprep.subr.bf16.mxu0 %v4035_v31  ;;  %v2542_v3 = vld [vmem:[#allocation19] sm:$0xf] }
 0x277   :  { %v1974_v43 = vsub.f32 0.0, %v1966_v41  ;;  %v2547_v41 = vrot.slane %v2542_v3, %v1947_v39  ;;  %v2559_v39 = vrot.slane %v2542_v3, %v1959_v49 }
 0x278   :  { %v1970_v45 = vmul.f32 1.442695, %v1969_v44  ;;  %v2551_v44 = vrot.slane %v2542_v3, %v1951_v37 }
 0x279   :  { %v1975_v5 = vmul.f32 1.442695, %v1974_v43 }
 0x27b   :  { %3568 = vpow2.f32 %v1975_v5 }
 0x27c   :  { %3570 = vpow2.f32 %v1970_v45 }
 0x285   :  { %v3569_v47 = vpop.eup %3568 }
 0x286   :  { %v3571_v50 = vpop.eup %3570  ;;  %v1977_v53 = vadd.f32 1.0, %v3569_v47 }
 0x287   :  { %v1972_v60 = vadd.f32 1.0, %v3571_v50 }
 0x288   :  { %3572 = vrcp.f32 %v1977_v53 }
 0x289   :  { %3574 = vrcp.f32 %v1972_v60 }
 0x292   :  { %v3573_v0 = vpop.eup %3572 }
 0x293   :  { %v3575_v26 = vpop.eup %3574  ;;  %v1985_v48 = vmul.f32 %v3573_v0, %v215_v12  ;;  %v1992_v12 = vld [vmem:[#allocation10] sm:$0x1] }
 0x2b1   :  { %v1895_v51 = vpop.f32.mrb[12].mxu0  ;;  %v1936_v52 = vpop.f32.mrb[12].mxu1 }
 0x2b2   :  { %v1896_v55 = vadd.f32 %v1895_v51, %v1855_v28  ;;  %v1897_v57 = vpop.f32.mrb[13].mxu0  ;;  %v1938_v58 = vpop.f32.mrb[13].mxu1 }
 0x2b3   :  { %v1898_v61 = vadd.f32 %v1897_v57, %v1857_v32  ;;  %v1899_v63 = vpop.f32.mrb[14].mxu0  ;;  %v1940_v1 = vpop.f32.mrb[14].mxu1  ;;  %v3561_v32 = vld [vmem:[#allocation20 + $0x8] sm:$0xff]  }
 0x2b4   :  { %v1937_v2 = vadd.f32 %v1936_v52, %v1896_v55  ;;  %v1900_v4 = vpop.f32.mrb[15].mxu0  ;;  %v1941_v7 = vpop.f32.mrb[15].mxu1 }
 0x2b5   :  { %v1939_v8 = vadd.f32 %v1938_v58, %v1898_v61  ;;  %v2555_v4 = vrot.slane %v2542_v3, %v1955_v46 }
 0x2b6   :  { %v1967_v9 = vadd.f32 %v1956_v56, %v1937_v2 }
 0x2b7   :  { %v1968_v10 = vadd.f32 %v1960_v62, %v1939_v8 }
 0x2b8   :  { %3576 = vtanh.f32 %v1967_v9 }
 0x2b9   :  { %v1980_v11 = vsub.f32 0.0, %v1968_v10 }
 0x2bb   :  { %v1981_v54 = vmul.f32 1.442695, %v1980_v11 }
 0x2bd   :  { %3578 = vpow2.f32 %v1981_v54 }
 0x2c2   :  { %v3577_v13 = vpop.eup %3576 }
 0x2c3   :  { %v1986_v14 = vmul.f32 %v3577_v13, %v3575_v26 }
 0x2c5   :  { %v1987_v15 = vadd.f32 %v1986_v14, %v1985_v48 }
 0x2c7   :  { %v3579_v16 = vpop.eup %3578  ;;  %2698 = vst [vmem:[#allocation26] sm:$0x1] %v1987_v15  ;;  %3580 = vtanh.f32 %v1987_v15 }
 0x2c8   :  { %v1983_v27 = vadd.f32 1.0, %v3579_v16 }
 0x2ca   :  { %3582 = vrcp.f32 %v1983_v27 }
 0x2d1   :  { %v3581_v59 = vpop.eup %3580 }
 0x2d3   :  { %v2252_v20 = vpop.f32.mrb[16].mxu0  ;;  %v2293_v24 = vpop.f32.mrb[16].mxu1 }
 0x2d4   :  { %v3583_v17 = vpop.eup %3582  ;;  %v2254_v21 = vpop.f32.mrb[17].mxu0 }
 0x2d5   :  { %v1989_v18 = vmul.f32 %v3583_v17, %v3581_v59  ;;  %v2256_v22 = vpop.f32.mrb[18].mxu0  ;;  %v2295_v25 = vpop.f32.mrb[17].mxu1 }
 0x2d6   :  { %v2257_v23 = vpop.f32.mrb[19].mxu0  ;;  %v2297_v28 = vpop.f32.mrb[18].mxu1 }
 0x2d7   :  { %v1990_v19 = vpack.c.bf16 %v1989_v18, %v1989_v18  ;;  %2697 = vst [vmem:[#allocation24] sm:$0x1] %v1989_v18  ;;  %v2298_v29 = vpop.f32.mrb[19].mxu1 }
 0x2d9   :  { %2493 = vmatmul.mubr.bf16.vlgmr.msra.gmra.mrb[20].mxu0 %v1990_v19  ;;  %2534 = vmatmul.mubr.bf16.vlgmr.msra.gmra.mrb[20].mxu1 %v1990_v19 }
 0x2da   :  { %3082 = vmatpush3.bf16.msra.mxu0 %v3560_v30  ;;  %3097 = vmatprep.mubr.msk.bf16.mxu0 %vm4036_vm0, %v4035_v31 }
 0x2db   :  { %3083 = vmatprep.subr.bf16.mxu0 %v4035_v31 }
 0x2de   :  { %3084 = vmatpush3.bf16.msra.mxu0 %v3561_v32 }
 0x2df   :  { %3085 = vmatprep.subr.bf16.mxu0 %v4035_v31 }
 0x2e2   :  { %3086 = vmatpush3.bf16.msra.mxu0 %v3562_v33 }
 0x2e3   :  { %3087 = vmatprep.subr.bf16.mxu0 %v4035_v31 }
 0x2e6   :  { %3088 = vmatpush3.bf16.msra.mxu0 %v3563_v34 }
 0x2e7   :  { %3089 = vmatprep.subr.bf16.mxu0 %v4035_v31 }
 0x2ea   :  { %3090 = vmatpush3.bf16.msra.mxu0 %v3564_v35 }
 0x2eb   :  { %3091 = vmatprep.subr.bf16.mxu0 %v4035_v31 }
 0x2ee   :  { %3092 = vmatpush3.bf16.msra.mxu0 %v3565_v36 }
 0x2ef   :  { %3093 = vmatprep.subr.bf16.mxu0 %v4035_v31 }
 0x2f2   :  { %3094 = vmatpush3.bf16.msra.mxu0 %v3566_v38 }
 0x2f3   :  { %3095 = vmatprep.subr.bf16.mxu0 %v4035_v31 }
 0x2f6   :  { %3096 = vmatpush3.bf16.msra.mxu0 %v3567_v40 }
 0x3ac   :  { %v2494_v42 = vpop.f32.mrb[20].mxu0  ;;  %v2535_v43 = vpop.f32.mrb[20].mxu1 }
 0x3ad   :  { %v2495_v5 = vadd.f32 %v2494_v42, %v2252_v20  ;;  %v2536_v45 = vadd.f32 %v2535_v43, %v2293_v24  ;;  %v2496_v47 = vpop.f32.mrb[21].mxu0  ;;  %v2537_v50 = vpop.f32.mrb[21].mxu1 }
 0x3ae   :  { %v2497_v51 = vadd.f32 %v2496_v47, %v2254_v21  ;;  %v2538_v52 = vadd.f32 %v2537_v50, %v2295_v25  ;;  %v2498_v53 = vpop.f32.mrb[22].mxu0  ;;  %v2539_v55 = vpop.f32.mrb[22].mxu1 }
 0x3af   :  { %v2564_v56 = vadd.f32 %v2547_v41, %v2495_v5  ;;  %v2499_v57 = vpop.f32.mrb[23].mxu0  ;;  %v2540_v58 = vpop.f32.mrb[23].mxu1  ;;  %v2566_v8 = vadd.f32 %v2555_v4, %v2536_v45 }
 0x3b0   :  { %v2565_v60 = vadd.f32 %v2551_v44, %v2497_v51  ;;  %v2567_v37 = vadd.f32 %v2559_v39, %v2538_v52 }
 0x3b1   :  { %v2568_v61 = vsub.f32 0.0, %v2564_v56 }
 0x3b2   :  { %v2573_v62 = vsub.f32 0.0, %v2565_v60  ;;  %v2579_v2 = vsub.f32 0.0, %v2567_v37 }
 0x3b3   :  { %v2569_v63 = vmul.f32 1.442695, %v2568_v61 }
 0x3b4   :  { %v2574_v1 = vmul.f32 1.442695, %v2573_v62  ;;  %v2580_v7 = vmul.f32 1.442695, %v2579_v2 }
 0x3b5   :  { %3584 = vpow2.f32 %v2569_v63 }
 0x3b6   :  { %3586 = vpow2.f32 %v2574_v1 }
 0x3b7   :  { %3588 = vpow2.f32 %v2580_v7 }
 0x3b8   :  { %3590 = vtanh.f32 %v2566_v8 }
 0x3bf   :  { %v3585_v9 = vpop.eup %3584 }
 0x3c0   :  { %v3587_v10 = vpop.eup %3586  ;;  %v2571_v11 = vadd.f32 1.0, %v3585_v9 }
 0x3c1   :  { %v2576_v54 = vadd.f32 1.0, %v3587_v10  ;;  %v3589_v49 = vpop.eup %3588 }
 0x3c2   :  { %3592 = vrcp.f32 %v2571_v11  ;;  %v3591_v0 = vpop.eup %3590  ;;  %v2582_v14 = vadd.f32 1.0, %v3589_v49 }
 0x3c3   :  { %3594 = vrcp.f32 %v2576_v54 }
 0x3c4   :  { %3596 = vrcp.f32 %v2582_v14 }
 0x3cc   :  { %v3593_v26 = vpop.eup %3592 }
 0x3cd   :  { %v3595_v13 = vpop.eup %3594  ;;  %v2585_v48 = vmul.f32 %v3593_v26, %v3591_v0 }
 0x3ce   :  { %v2584_v15 = vmul.f32 %v3595_v13, %v1992_v12  ;;  %v3597_v46 = vpop.eup %3596 }
 0x3d0   :  { %v2586_v6 = vadd.f32 %v2585_v48, %v2584_v15 }
 0x3d2   :  { %2700 = vst [vmem:[#allocation29] sm:$0x1] %v2586_v6  ;;  %3598 = vtanh.f32 %v2586_v6 }
 0x3dc   :  { %v3599_v16 = vpop.eup %3598 }
 0x3dd   :  { %v2588_v27 = vmul.f32 %v3599_v16, %v3597_v46 }
 0x3df   :  { %v2589_v59 = vpack.c.bf16 %v2588_v27, %v2588_v27  ;;  %2699 = vst [vmem:[#allocation27] sm:$0x1] %v2588_v27 }
 0x3e1   :  { %3098 = vmatmul.mubr.bf16.vlgmr.msra.gmra.mrb[24].mxu0 %v2589_v59 }
 0x3e2   :  { %3897 = shalt.err (!%p3894_p10)
}
 0x3e3   :  { %s3898_s4 = scalar_lea.hbm %s4469_s14, 16 }
 0x3e4   :  { %p3899_p11 = scmp.ne.s32.totalorder %s4469_s14, %s3898_s4  ;;  %p3902_p12 = scmp.lt.u32.totalorder %s3898_s4, %s4469_s14 }
 0x3e6   :  { %p3904_p13 = pnand %p3902_p12, %p3899_p11 }
 0x3e8   :  { %3907 = shalt.err (!%p3904_p13)
}
 0x3e9   :  { %2720 = dma.vmem_to_hbm [thread:$0]  %s2718_s11, 16, %s4469_s14, [#allocation25]  }
 0x3ea   :  { %s3908_s18 = scalar_lea.vmem %s2738_s20, 16  ;;  %s3912_s0 = scalar_lea.vmem %s2738_s20, 32 }
 0x3eb   :  { %p3909_p0 = scmp.ne.s32.totalorder %s2738_s20, %s3908_s18  ;;  %p3913_p1 = scmp.lt.s32.totalorder %s2738_s20, %s2738_s20 }
 0x3ec   :  { %p3914_p2 = scmp.lt.s32.totalorder %s3912_s0, %s3908_s18 }
 0x3ee   :  { %p3915_p3 = por %p3914_p2, %p3913_p1 }
 0x3f0   :  { %p3916_p4 = pnand %p3915_p3, %p3909_p0 }
 0x3f2   :  { %3919 = shalt.err (!%p3916_p4)
}
 0x3f3   :  { %s3920_s5 = scalar_lea.hbm %s4471_s16, 16 }
 0x3f4   :  { %p3921_p5 = scmp.ne.s32.totalorder %s4471_s16, %s3920_s5  ;;  %p3924_p6 = scmp.lt.u32.totalorder %s3920_s5, %s4471_s16 }
 0x3f6   :  { %p3926_p7 = pnand %p3924_p6, %p3921_p5 }
 0x3f8   :  { %3929 = shalt.err (!%p3926_p7)
}
 0x3f9   :  { %2740 = dma.vmem_to_hbm [thread:$0]  %s2738_s20, 16, %s4471_s16, [#allocation28]  }
 0x3fa   :  { %s4039_s6 = smov [#allocation26]  }
 0x3fb   :  { %s2727_s12 = sshll.u32 %s4039_s6, 4  ;;  %s2728_s12 = int_to_ptr.vmem [resolvable:$true] %s2727_s12 }
 0x3fc   :  { %s3930_s11 = scalar_lea.vmem %s2728_s12, 16  ;;  %s3934_s7 = scalar_lea.vmem %s2728_s12, 32 }
 0x3fd   :  { %p3931_p8 = scmp.ne.s32.totalorder %s2728_s12, %s3930_s11  ;;  %p3935_p9 = scmp.lt.s32.totalorder %s2728_s12, %s2728_s12 }
 0x3fe   :  { %p3936_p10 = scmp.lt.s32.totalorder %s3934_s7, %s3930_s11 }
 0x400   :  { %p3937_p11 = por %p3936_p10, %p3935_p9 }
 0x402   :  { %p3938_p12 = pnand %p3937_p11, %p3931_p8 }
 0x404   :  { %3941 = shalt.err (!%p3938_p12)
}
 0x405   :  { %s3942_s1 = scalar_lea.hbm %s4470_s15, 16 }
 0x406   :  { %p3943_p13 = scmp.ne.s32.totalorder %s4470_s15, %s3942_s1  ;;  %p3946_p0 = scmp.lt.u32.totalorder %s3942_s1, %s4470_s15 }
 0x408   :  { %p3948_p1 = pnand %p3946_p0, %p3943_p13 }
 0x40a   :  { %3951 = shalt.err (!%p3948_p1)
}
 0x40b   :  { %2730 = dma.vmem_to_hbm [thread:$0]  %s2728_s12, 16, %s4470_s15, [#allocation25]  }
 0x40c   :  { %s4040_s8 = smov [#allocation29]  }
 0x40d   :  { %s2747_s3 = sshll.u32 %s4040_s8, 4  ;;  %s2748_s3 = int_to_ptr.vmem [resolvable:$true] %s2747_s3 }
 0x40e   :  { %s3952_s27 = scalar_lea.vmem %s2748_s3, 16  ;;  %s3956_s29 = scalar_lea.vmem %s2748_s3, 32 }
 0x40f   :  { %p3953_p2 = scmp.ne.s32.totalorder %s2748_s3, %s3952_s27  ;;  %p3957_p3 = scmp.lt.s32.totalorder %s2748_s3, %s2748_s3 }
 0x410   :  { %p3958_p4 = scmp.lt.s32.totalorder %s3956_s29, %s3952_s27 }
 0x412   :  { %p3959_p5 = por %p3958_p4, %p3957_p3 }
 0x414   :  { %p3960_p6 = pnand %p3959_p5, %p3953_p2 }
 0x416   :  { %3963 = shalt.err (!%p3960_p6)
}
 0x417   :  { %s3964_s2 = scalar_lea.hbm %s4472_s17, 16 }
 0x418   :  { %p3965_p7 = scmp.ne.s32.totalorder %s4472_s17, %s3964_s2  ;;  %p3968_p8 = scmp.lt.u32.totalorder %s3964_s2, %s4472_s17 }
 0x41a   :  { %p3970_p9 = pnand %p3968_p8, %p3965_p7 }
 0x41c   :  { %3973 = shalt.err (!%p3970_p9)
}
 0x41d   :  { %2750 = dma.vmem_to_hbm [thread:$0]  %s2748_s3, 16, %s4472_s17, [#allocation28]   ;;  %v2606_v17 = vld [vmem:[#allocation22] sm:$0x1]  ;;  %vm2695_vm1 = vcmask 40960  }
 0x41e   :  { %s4041_s10 = smov [#allocation23]  }
 0x41f   :  { %s2707_s14 = sshll.u32 %s4041_s10, 4  ;;  %s2708_s14 = int_to_ptr.vmem [resolvable:$true] %s2707_s14 }
 0x420   :  { %s3974_s30 = scalar_lea.vmem %s2708_s14, 16  ;;  %s3978_s6 = scalar_lea.vmem %s2708_s14, 32 }
 0x421   :  { %p3975_p10 = scmp.ne.s32.totalorder %s2708_s14, %s3974_s30  ;;  %p3979_p11 = scmp.lt.s32.totalorder %s2708_s14, %s2708_s14 }
 0x422   :  { %p3980_p12 = scmp.lt.s32.totalorder %s3978_s6, %s3974_s30 }
 0x424   :  { %p3981_p13 = por %p3980_p12, %p3979_p11 }
 0x426   :  { %p3982_p0 = pnand %p3981_p13, %p3975_p10 }
 0x4b4   :  { %v2689_v18 = vpop.f32.mrb[24].mxu0 }
 0x4b5   :  { %v2690_v19 = vadd.f32 %v2689_v18, %v2606_v17  ;;  %v3099_v20 = vpop.f32.mrb[25].mxu0 }
 0x4b6   :  { %v2692_v21 = vpop.f32.mrb[26].mxu0 }
 0x4b7   :  { %v3100_v22 = vpop.f32.mrb[27].mxu0  ;;  %2696 = vst.msk [vmem:[#allocation23] sm:$0x1] %vm2695_vm1, %v2690_v19 }
 0x4b8   :  { %3985 = shalt.err (!%p3982_p0)
}
 0x4b9   :  { %s3986_s11 = scalar_lea.hbm %s4468_s13, 16 }
 0x4ba   :  { %p3987_p1 = scmp.ne.s32.totalorder %s4468_s13, %s3986_s11  ;;  %p3990_p2 = scmp.lt.u32.totalorder %s3986_s11, %s4468_s13 }
 0x4bc   :  { %p3992_p3 = pnand %p3990_p2, %p3987_p1 }
 0x4be   :  { %3995 = shalt.err (!%p3992_p3)
}
 0x4bf   :  { %2710 = dma.vmem_to_hbm [thread:$0]  %s2708_s14, 16, %s4468_s13, [#allocation4]  }
 0x4c0   :  { %4010 = dma.done.wait [#allocation4], 16  }
 0x4c1   :  { %4011 = vsyncadd [#allocation4], 4294967280 }
 0x4c2   :  { %4012 = dma.done.wait [#allocation25], 32  }
 0x4c3   :  { %4013 = vsyncadd [#allocation25], 4294967264 }
 0x4c4   :  { %4014 = dma.done.wait [#allocation28], 32  }
 0x4c5   :  { %4015 = vsyncadd [#allocation28], 4294967264 }
 0x4c6   :  { %2766 = vsyncpa [#allocation3], 1 }
 0x4c7   :  { %2767 = vsyncpa [#allocation6], 1 }
 0x4c8   :  { %2768 = vsyncpa [#allocation9], 1 }
 0x4c9   :  { %2769 = vsyncpa [#allocation12], 1 }
 0x4ca   :  { %2770 = vsyncpa [#allocation15], 1 }
 0x4cb   :  { %2771 = vsyncpa [#allocation18], 1 }
 0x4cc   :  { %2772 = vsyncpa [#allocation21], 1 }
 0x4cd   :  { %2773 = vsyncpa [#allocation4], 1 }
 0x4ce   :  { %2774 = vsyncpa [#allocation25], 1 }
 0x4cf   :  { %2775 = vsyncpa [#allocation28], 1 }

</bundles_post_ra>
